<compile_context>
chip_gen: v7x
topology: tpu7x:2x2x1
jax: 0.10.0
libtpu: 0.0.40
codegen_flags: <defaults>
</compile_context>

<pallas_src>
import numpy as np
import jax
import jax.numpy as jnp
from jax.experimental import pallas as pl
from jax.experimental.pallas import tpu as pltpu

EPS = 1e-5                                           # nn.BatchNorm2d default eps
TAPS_3x3 = [(dh, dw) for dh in range(3) for dw in range(3)]


def _round_up(v, m):
    return (v + m - 1) // m * m


# ---------------------------------------------------------------------------
# Forward pass
# ---------------------------------------------------------------------------
def mcam_forward(x_nchw, params):
    (w_ori, b_ori, w_sq, w_ver, w_hor, w2, b2) = params
    x = jnp.transpose(x_nchw, (0, 2, 3, 1)).astype(jnp.float32)   # NCHW -> NHWC
    B, H, W, Cin = x.shape
    Y = w_ori.shape[-1]
    HW = H * W
    N = B * HW
    Hp, Wp = H + 2, W + 2

    Yp = _round_up(Y, 32)          # per-branch padded width -> 4*Yp % 128 == 0
    C4 = 4 * Yp                    # fused channel layout: [ori | sq | ver | hor]
    K1 = 9 * Cin                   # stage-1 im2col contraction depth
    K1p = _round_up(K1, 16)        # bf16 sublane-pack friendly
    LF = max(1, 128 // Yp)         # lane-widening factor for the stage-3 pass
    while LF > 1 and HW % LF:
        LF //= 2
    LYp = LF * Yp

    # ---- fused stage-1 weight, im2col layout (9*Cin -> K1p rows, C4 cols) ----
    # ver (3,1)/pad(1,0) lives on taps (dh,1); hor (1,3)/pad(0,1) on taps (1,dw).
    wcat = jnp.zeros((9, Cin, C4), jnp.float32)
    for t, (dh, dw) in enumerate(TAPS_3x3):
        wcat = wcat.at[t, :, 0:Y].set(w_ori[dh, dw])
        wcat = wcat.at[t, :, Yp:Yp + Y].set(w_sq[dh, dw])
        if dw == 1:
            wcat = wcat.at[t, :, 2 * Yp:2 * Yp + Y].set(w_ver[dh, 0])
        if dh == 1:
            wcat = wcat.at[t, :, 3 * Yp:3 * Yp + Y].set(w_hor[0, dw])
    w1cat = jnp.zeros((K1p, C4), jnp.float32).at[0:K1].set(wcat.reshape(K1, C4))
    w1cat = w1cat.astype(jnp.bfloat16)

    # ---- stage-2 weight expanded over the 4-branch layout (kept f32 here; the
    # BN scale is folded in later, before the bf16 cast) ------------------------
    # conv2d(cat(p1, p2)) with p2 = BN(sq)+BN(ver)+BN(hor) is linear in its
    # inputs, so the p2 weights are replicated onto the sq/ver/hor sections.
    w2e = jnp.zeros((9, C4, Yp), jnp.float32)
    for t, (dh, dw) in enumerate(TAPS_3x3):
        w2e = w2e.at[t, 0:Y, 0:Y].set(w2[dh, dw, 0:Y, :])
        for s in (1, 2, 3):
            w2e = w2e.at[t, s * Yp:s * Yp + Y, 0:Y].set(w2[dh, dw, Y:2 * Y, :])

    # spatially zero-padded NHWC input, bf16 for the MXU
    xpad = jnp.pad(x, ((0, 0), (1, 1), (1, 1), (0, 0))).astype(jnp.bfloat16)

    # ---------------- kernel 1: fused stage-1 convs (single im2col matmul) ----
    def stage1_kernel(x_ref, w1_ref, raw_ref, st_ref):
        pieces = [x_ref[0, dh:dh + H, dw:dw + W, :].reshape(HW, Cin)
                  for (dh, dw) in TAPS_3x3]
        if K1p > K1:                                   # zero K-padding lanes
            pieces.append(jnp.zeros((HW, K1p - K1), jnp.bfloat16))
        col = jnp.concatenate(pieces, axis=-1)          # (HW, K1p) bf16 in VMEM
        acc = jnp.dot(col, w1_ref[...], preferred_element_type=jnp.float32)
        # BN partial stats from the f32 accumulator (bias is folded downstream)
        st_ref[0, 0:1, :] = jnp.sum(acc, axis=0, keepdims=True)
        st_ref[0, 1:2, :] = jnp.sum(acc * acc, axis=0, keepdims=True)
        # zero-bordered spatial emit: zero only the 1-px border, store interior
        y = acc.astype(jnp.bfloat16).reshape(H, W, C4)
        zrow = jnp.zeros((1, Wp, C4), jnp.bfloat16)
        zcol = jnp.zeros((H, 1, C4), jnp.bfloat16)
        raw_ref[0, 0:1, :, :] = zrow
        raw_ref[0, H + 1:H + 2, :, :] = zrow
        raw_ref[0, 1:H + 1, 0:1, :] = zcol
        raw_ref[0, 1:H + 1, W + 1:W + 2, :] = zcol
        raw_ref[0, 1:H + 1, 1:W + 1, :] = y

    raw1, st1 = pl.pallas_call(
        stage1_kernel,
        out_shape=(jax.ShapeDtypeStruct((B, Hp, Wp, C4), jnp.bfloat16),
                   jax.ShapeDtypeStruct((B, 2, C4), jnp.float32)),
        grid=(B,),
        in_specs=[pl.BlockSpec((1, Hp, Wp, Cin), lambda b: (b, 0, 0, 0)),
                  pl.BlockSpec((K1p, C4), lambda b: (0, 0))],
        out_specs=(pl.BlockSpec((1, Hp, Wp, C4), lambda b: (b, 0, 0, 0)),
                   pl.BlockSpec((1, 2, C4), lambda b: (b, 0, 0))),
        compiler_params=pltpu.CompilerParams(
            dimension_semantics=("parallel",),
            vmem_limit_bytes=32 << 20),
    )(xpad, w1cat)

    # ---- glue: BN scale/shift of the asy branches, folded into stage-2 -------
    cnt = jnp.float32(N)
    tot1 = jnp.sum(st1, axis=0)                                    # (2, C4)
    mean1 = tot1[0] / cnt
    # NOTE: E[x^2]-E[x]^2 in f32 is fine at these sizes; use centered partials
    # for production-scale N.
    var1 = jnp.maximum(tot1[1] / cnt - mean1 * mean1, 0.0)         # biased var
    inv1 = jax.lax.rsqrt(var1 + EPS)
    b_ori_full = jnp.zeros((C4,), jnp.float32).at[0:Y].set(b_ori.reshape(-1))
    is_bn = jnp.arange(C4) >= Yp                                   # ori not BN'd
    scale1 = jnp.where(is_bn, inv1, 1.0)
    shift1 = jnp.where(is_bn, -mean1 * inv1, b_ori_full)           # + ori bias

    # fold scale1 into the stage-2 weights (multiply in f32, then cast to bf16)
    w2s = (w2e * scale1.reshape(1, C4, 1)).astype(jnp.bfloat16)
    w2cat = w2s.reshape(3, 3 * C4, Yp)                             # per-dh RHS

    # boundary-aware bias map: shift1 / b_ori / b2 only contribute through taps
    # whose input pixel lies inside the image (conv2d zero-pads p).
    tap_shift = jnp.einsum("tcy,c->ty", w2e, shift1).reshape(3, 3, Yp)
    hh = jnp.arange(H)[:, None] + jnp.arange(3)[None, :] - 1
    ww = jnp.arange(W)[:, None] + jnp.arange(3)[None, :] - 1
    rv = ((hh >= 0) & (hh < H)).astype(jnp.float32)                # (H, 3)
    cv = ((ww >= 0) & (ww < W)).astype(jnp.float32)                # (W, 3)
    bias_map = jnp.einsum("hd,we,dey->hwy", rv, cv, tap_shift).reshape(HW, Yp)
    bias_map = bias_map + jnp.zeros((Yp,), jnp.float32).at[0:Y].set(b2.reshape(-1))

    # ---------------- kernel 2: stage-2 conv (3 matmuls, K = 3*C4) ------------
    def stage2_kernel(r_ref, w2_ref, bias_ref, out_ref, st_ref):
        acc = bias_ref[...]                                        # (HW, Yp) f32
        for dh in range(3):
            col = jnp.concatenate(
                [r_ref[0, dh:dh + H, dw:dw + W, :].reshape(HW, C4)
                 for dw in range(3)], axis=-1)                     # (HW, 3*C4)
            acc = acc + jnp.dot(col, w2_ref[dh],
                                preferred_element_type=jnp.float32)
        st_ref[0, 0:1, :] = jnp.sum(acc, axis=0, keepdims=True)
        st_ref[0, 1:2, :] = jnp.sum(acc * acc, axis=0, keepdims=True)
        out_ref[0] = acc.astype(jnp.bfloat16)

    raw2, st2 = pl.pallas_call(
        stage2_kernel,
        out_shape=(jax.ShapeDtypeStruct((B, HW, Yp), jnp.bfloat16),
                   jax.ShapeDtypeStruct((B, 2, Yp), jnp.float32)),
        grid=(B,),
        in_specs=[pl.BlockSpec((1, Hp, Wp, C4), lambda b: (b, 0, 0, 0)),
                  pl.BlockSpec((3, 3 * C4, Yp), lambda b: (0, 0, 0)),
                  pl.BlockSpec((HW, Yp), lambda b: (0, 0))],
        out_specs=(pl.BlockSpec((1, HW, Yp), lambda b: (b, 0, 0)),
                   pl.BlockSpec((1, 2, Yp), lambda b: (b, 0, 0))),
        compiler_params=pltpu.CompilerParams(
            dimension_semantics=("parallel",),
            vmem_limit_bytes=32 << 20),
    )(raw1, w2cat, bias_map)

    # ---- glue: per-channel BN scale/shift for the final bn2d ------------------
    tot2 = jnp.sum(st2, axis=0)                                    # (2, Yp)
    mean2 = tot2[0] / cnt
    var2 = jnp.maximum(tot2[1] / cnt - mean2 * mean2, 0.0)
    inv2 = jax.lax.rsqrt(var2 + EPS)
    scale2 = jnp.tile(inv2.reshape(1, Yp), (1, LF))                # (1, LF*Yp)
    shift2 = jnp.tile((-mean2 * inv2).reshape(1, Yp), (1, LF))

    # ---------------- kernel 3: lane-dense row-tiled BN affine + ReLU ----------
    # Free row-major view: (B, HW, Yp) -> (N/LF, LF*Yp); 128-lane dense rows.
    raw2w = raw2.reshape(N // LF, LYp)
    rows3 = N // LF
    TR = rows3 if rows3 <= 2048 else 2048          # big tiles; ragged tail masked

    def stage3_kernel(r_ref, sc_ref, sh_ref, o_ref):
        v = r_ref[...].astype(jnp.float32)
        o_ref[...] = jnp.maximum(v * sc_ref[...] + sh_ref[...], 0.0)

    out = pl.pallas_call(
        stage3_kernel,
        out_shape=jax.ShapeDtypeStruct((rows3, LYp), jnp.float32),
        grid=(pl.cdiv(rows3, TR),),
        in_specs=[pl.BlockSpec((TR, LYp), lambda i: (i, 0)),
                  pl.BlockSpec((1, LYp), lambda i: (0, 0)),
                  pl.BlockSpec((1, LYp), lambda i: (0, 0))],
        out_specs=pl.BlockSpec((TR, LYp), lambda i: (i, 0)),
        compiler_params=pltpu.CompilerParams(
            dimension_semantics=("parallel",),
            vmem_limit_bytes=32 << 20),
    )(raw2w, scale2, shift2)

    out = out.reshape(B, H, W, Yp)[:, :, :, :Y]                    # drop pad
    return jnp.transpose(out, (0, 3, 1, 2))                        # back to NCHW


# ---------------------------------------------------------------------------
# Parameters and pure-JAX reference
# ---------------------------------------------------------------------------
def init_params(key, cin, y):
    """Deterministic synthetic init mirroring weight_init (kaiming fan_in/relu,
    zero conv biases, BN gamma=1 / beta=0).  Weights stored HWIO."""
    ks = jax.random.split(key, 5)

    def kaiming(k, shape, fan_in):
        return jax.random.normal(k, shape, jnp.float32) * np.sqrt(2.0 / fan_in)

    w_ori = kaiming(ks[0], (3, 3, cin, y), 9 * cin)      # oriConv
    w_sq = kaiming(ks[1], (3, 3, cin, y), 9 * cin)       # asyConv.square_conv
    w_ver = kaiming(ks[2], (3, 1, cin, y), 3 * cin)      # asyConv.ver_conv
    w_hor = kaiming(ks[3], (1, 3, cin, y), 3 * cin)      # asyConv.hor_conv
    w2 = kaiming(ks[4], (3, 3, 2 * y, y), 9 * 2 * y)     # conv2d (on cat)
    b_ori = jnp.zeros((1, y), jnp.float32)               # zeroed by weight_init
    b2 = jnp.zeros((1, y), jnp.float32)                  # zeroed by weight_init
    return (w_ori, b_ori, w_sq, w_ver, w_hor, w2, b2)


def reference_mcam(x_nchw, params):
    """Pure-JAX reference of the PyTorch forward (training-mode BatchNorm)."""
    (w_ori, b_ori, w_sq, w_ver, w_hor, w2, b2) = params
    x = jnp.transpose(x_nchw, (0, 2, 3, 1)).astype(jnp.float32)
    dn = ("NHWC", "HWIO", "NHWC")

    def conv(v, w, pad):
        return jax.lax.conv_general_dilated(
            v, w, (1, 1), pad, dimension_numbers=dn,
            precision=jax.lax.Precision.HIGHEST)

    def bn(v):
        mean = jnp.mean(v, axis=(0, 1, 2), keepdims=True)
        var = jnp.mean(jnp.square(v - mean), axis=(0, 1, 2), keepdims=True)
        return (v - mean) * jax.lax.rsqrt(var + EPS)

    p1 = conv(x, w_ori, [(1, 1), (1, 1)]) + b_ori.reshape(1, 1, 1, -1)
    sq = bn(conv(x, w_sq, [(1, 1), (1, 1)]))
    vr = bn(conv(x, w_ver, [(1, 1), (0, 0)]))
    hr = bn(conv(x, w_hor, [(0, 0), (1, 1)]))
    p = jnp.concatenate([p1, sq + vr + hr], axis=-1)
    out = jax.nn.relu(bn(conv(p, w2, [(1, 1), (1, 1)]) + b2.reshape(1, 1, 1, -1)))
    return jnp.transpose(out, (0, 3, 1, 2))


if __name__ == "__main__":
    key = jax.random.PRNGKey(0)
    kx, kp = jax.random.split(key)

    B, Cin, Y, H, W = 2, 4, 4, 16, 16            # MCAM(x=4, y=4)
    x = jax.random.normal(kx, (B, Cin, H, W), jnp.float32)
    params = init_params(kp, Cin, Y)

    out = jax.block_until_ready(jax.jit(mcam_forward)(x, params))
    ref = jax.block_until_ready(reference_mcam(x, params))

    assert out.shape == (B, Y, H, W), out.shape
    err = float(jnp.max(jnp.abs(out - ref)))
    # MXU operands and the raw1/raw2 intermediates are bf16 (per perf guidance);
    # tolerance vs the all-f32 reference covers bf16 rounding only.
    if err < 1e-1:
        print("KERNEL_OK")
    else:
        print(f"MISMATCH max_abs_err={err}")
</pallas_src>

<mosaic_0001>
module attributes {stable_mosaic.version = 11 : i64} {
  func.func @stage1_kernel(%arg0: i32, %arg1: memref<1x18x18x4xbf16, #tpu.memory_space<vmem>>, %arg2: memref<48x128xbf16, #tpu.memory_space<vmem>>, %arg3: memref<1x18x18x128xbf16, #tpu.memory_space<vmem>>, %arg4: memref<1x2x128xf32, #tpu.memory_space<vmem>>) attributes {dimension_semantics = [#tpu.dimension_semantics<parallel>], iteration_bounds = array<i64: 2>, scalar_prefetch = 0 : i64, scratch_operands = 0 : i64, tpu.core_type = #tpu.core_type<tc>, window_params = [{transform_indices = @transform_0, window_bounds = array<i64: 1, 18, 18, 4>}, {pipeline_mode = #tpu.pipeline_mode<synchronous>, transform_indices = @transform_1, window_bounds = array<i64: 48, 128>}, {transform_indices = @transform_2, window_bounds = array<i64: 1, 18, 18, 128>}, {transform_indices = @transform_3, window_bounds = array<i64: 1, 2, 128>}]} {
    %c0 = arith.constant 0 : index
    %c0_0 = arith.constant 0 : index
    %c0_1 = arith.constant 0 : index
    %c0_2 = arith.constant 0 : index
    %0 = vector.load %arg1[%c0, %c0_0, %c0_1, %c0_2] : memref<1x18x18x4xbf16, #tpu.memory_space<vmem>>, vector<1x16x16x4xbf16>
    %1 = vector.shape_cast %0 : vector<1x16x16x4xbf16> to vector<16x16x4xbf16>
    %2 = vector.shape_cast %1 : vector<16x16x4xbf16> to vector<256x4xbf16>
    %c0_3 = arith.constant 0 : index
    %c0_4 = arith.constant 0 : index
    %c1 = arith.constant 1 : index
    %c0_5 = arith.constant 0 : index
    %3 = vector.load %arg1[%c0_3, %c0_4, %c1, %c0_5] : memref<1x18x18x4xbf16, #tpu.memory_space<vmem>>, vector<1x16x16x4xbf16>
    %4 = vector.shape_cast %3 : vector<1x16x16x4xbf16> to vector<16x16x4xbf16>
    %5 = vector.shape_cast %4 : vector<16x16x4xbf16> to vector<256x4xbf16>
    %c0_6 = arith.constant 0 : index
    %c0_7 = arith.constant 0 : index
    %c2 = arith.constant 2 : index
    %c0_8 = arith.constant 0 : index
    %6 = vector.load %arg1[%c0_6, %c0_7, %c2, %c0_8] : memref<1x18x18x4xbf16, #tpu.memory_space<vmem>>, vector<1x16x16x4xbf16>
    %7 = vector.shape_cast %6 : vector<1x16x16x4xbf16> to vector<16x16x4xbf16>
    %8 = vector.shape_cast %7 : vector<16x16x4xbf16> to vector<256x4xbf16>
    %c0_9 = arith.constant 0 : index
    %c1_10 = arith.constant 1 : index
    %c0_11 = arith.constant 0 : index
    %c0_12 = arith.constant 0 : index
    %9 = vector.load %arg1[%c0_9, %c1_10, %c0_11, %c0_12] : memref<1x18x18x4xbf16, #tpu.memory_space<vmem>>, vector<1x16x16x4xbf16>
    %10 = vector.shape_cast %9 : vector<1x16x16x4xbf16> to vector<16x16x4xbf16>
    %11 = vector.shape_cast %10 : vector<16x16x4xbf16> to vector<256x4xbf16>
    %c0_13 = arith.constant 0 : index
    %c1_14 = arith.constant 1 : index
    %c1_15 = arith.constant 1 : index
    %c0_16 = arith.constant 0 : index
    %12 = vector.load %arg1[%c0_13, %c1_14, %c1_15, %c0_16] : memref<1x18x18x4xbf16, #tpu.memory_space<vmem>>, vector<1x16x16x4xbf16>
    %13 = vector.shape_cast %12 : vector<1x16x16x4xbf16> to vector<16x16x4xbf16>
    %14 = vector.shape_cast %13 : vector<16x16x4xbf16> to vector<256x4xbf16>
    %c0_17 = arith.constant 0 : index
    %c1_18 = arith.constant 1 : index
    %c2_19 = arith.constant 2 : index
    %c0_20 = arith.constant 0 : index
    %15 = vector.load %arg1[%c0_17, %c1_18, %c2_19, %c0_20] : memref<1x18x18x4xbf16, #tpu.memory_space<vmem>>, vector<1x16x16x4xbf16>
    %16 = vector.shape_cast %15 : vector<1x16x16x4xbf16> to vector<16x16x4xbf16>
    %17 = vector.shape_cast %16 : vector<16x16x4xbf16> to vector<256x4xbf16>
    %c0_21 = arith.constant 0 : index
    %c2_22 = arith.constant 2 : index
    %c0_23 = arith.constant 0 : index
    %c0_24 = arith.constant 0 : index
    %18 = vector.load %arg1[%c0_21, %c2_22, %c0_23, %c0_24] : memref<1x18x18x4xbf16, #tpu.memory_space<vmem>>, vector<1x16x16x4xbf16>
    %19 = vector.shape_cast %18 : vector<1x16x16x4xbf16> to vector<16x16x4xbf16>
    %20 = vector.shape_cast %19 : vector<16x16x4xbf16> to vector<256x4xbf16>
    %c0_25 = arith.constant 0 : index
    %c2_26 = arith.constant 2 : index
    %c1_27 = arith.constant 1 : index
    %c0_28 = arith.constant 0 : index
    %21 = vector.load %arg1[%c0_25, %c2_26, %c1_27, %c0_28] : memref<1x18x18x4xbf16, #tpu.memory_space<vmem>>, vector<1x16x16x4xbf16>
    %22 = vector.shape_cast %21 : vector<1x16x16x4xbf16> to vector<16x16x4xbf16>
    %23 = vector.shape_cast %22 : vector<16x16x4xbf16> to vector<256x4xbf16>
    %c0_29 = arith.constant 0 : index
    %c2_30 = arith.constant 2 : index
    %c2_31 = arith.constant 2 : index
    %c0_32 = arith.constant 0 : index
    %24 = vector.load %arg1[%c0_29, %c2_30, %c2_31, %c0_32] : memref<1x18x18x4xbf16, #tpu.memory_space<vmem>>, vector<1x16x16x4xbf16>
    %25 = vector.shape_cast %24 : vector<1x16x16x4xbf16> to vector<16x16x4xbf16>
    %26 = vector.shape_cast %25 : vector<16x16x4xbf16> to vector<256x4xbf16>
    %cst = arith.constant 0.000000e+00 : bf16
    %27 = vector.broadcast %cst : bf16 to vector<256x12xbf16>
    %28 = tpu.concatenate %2, %5, %8, %11, %14, %17, %20, %23, %26, %27 in 1 : vector<256x4xbf16>, vector<256x4xbf16>, vector<256x4xbf16>, vector<256x4xbf16>, vector<256x4xbf16>, vector<256x4xbf16>, vector<256x4xbf16>, vector<256x4xbf16>, vector<256x4xbf16>, vector<256x12xbf16> -> vector<256x48xbf16>
    %c0_33 = arith.constant 0 : index
    %c0_34 = arith.constant 0 : index
    %29 = vector.load %arg2[%c0_33, %c0_34] : memref<48x128xbf16, #tpu.memory_space<vmem>>, vector<48x128xbf16>
    %cst_35 = arith.constant dense<0.000000e+00> : vector<256x128xf32>
    %30 = tpu.matmul %28, %29, %cst_35 {dimension_numbers = #tpu.dot_dimension_numbers<[1], [0], [0], [1], [0, 0, 1, 1], [], []>} : vector<256x48xbf16>, vector<48x128xbf16>, vector<256x128xf32> -> vector<256x128xf32>
    %cst_36 = arith.constant dense<0.000000e+00> : vector<128xf32>
    %31 = vector.multi_reduction <add>, %30, %cst_36 [0] : vector<256x128xf32> to vector<128xf32>
    %32 = vector.shape_cast %31 : vector<128xf32> to vector<1x128xf32>
    %c0_37 = arith.constant 0 : index
    %c0_38 = arith.constant 0 : index
    %c0_39 = arith.constant 0 : index
    %33 = vector.load %arg4[%c0_37, %c0_38, %c0_39] : memref<1x2x128xf32, #tpu.memory_space<vmem>>, vector<1x1x128xf32>
    %34 = vector.shape_cast %33 : vector<1x1x128xf32> to vector<1x128xf32>
    %35 = vector.shape_cast %32 : vector<1x128xf32> to vector<1x1x128xf32>
    tpu.vector_store %arg4[%c0_37, %c0_38, %c0_39], %35 {strides = array<i32>} : memref<1x2x128xf32, #tpu.memory_space<vmem>>, vector<1x1x128xf32>,
    %36 = arith.mulf %30, %30 : vector<256x128xf32>
    %cst_40 = arith.constant dense<0.000000e+00> : vector<128xf32>
    %37 = vector.multi_reduction <add>, %36, %cst_40 [0] : vector<256x128xf32> to vector<128xf32>
    %38 = vector.shape_cast %37 : vector<128xf32> to vector<1x128xf32>
    %c0_41 = arith.constant 0 : index
    %c1_42 = arith.constant 1 : index
    %c0_43 = arith.constant 0 : index
    %39 = vector.load %arg4[%c0_41, %c1_42, %c0_43] : memref<1x2x128xf32, #tpu.memory_space<vmem>>, vector<1x1x128xf32>
    %40 = vector.shape_cast %39 : vector<1x1x128xf32> to vector<1x128xf32>
    %41 = vector.shape_cast %38 : vector<1x128xf32> to vector<1x1x128xf32>
    tpu.vector_store %arg4[%c0_41, %c1_42, %c0_43], %41 {strides = array<i32>} : memref<1x2x128xf32, #tpu.memory_space<vmem>>, vector<1x1x128xf32>,
    %42 = arith.truncf %30 : vector<256x128xf32> to vector<256x128xbf16>
    %43 = vector.shape_cast %42 : vector<256x128xbf16> to vector<16x16x128xbf16>
    %cst_44 = arith.constant 0.000000e+00 : bf16
    %44 = vector.broadcast %cst_44 : bf16 to vector<1x18x128xbf16>
    %cst_45 = arith.constant 0.000000e+00 : bf16
    %45 = vector.broadcast %cst_45 : bf16 to vector<16x1x128xbf16>
    %c0_46 = arith.constant 0 : index
    %c0_47 = arith.constant 0 : index
    %c0_48 = arith.constant 0 : index
    %c0_49 = arith.constant 0 : index
    %46 = vector.load %arg3[%c0_46, %c0_47, %c0_48, %c0_49] : memref<1x18x18x128xbf16, #tpu.memory_space<vmem>>, vector<1x1x18x128xbf16>
    %47 = vector.shape_cast %46 : vector<1x1x18x128xbf16> to vector<1x18x128xbf16>
    %48 = vector.shape_cast %44 : vector<1x18x128xbf16> to vector<1x1x18x128xbf16>
    tpu.vector_store %arg3[%c0_46, %c0_47, %c0_48, %c0_49], %48 {strides = array<i32>} : memref<1x18x18x128xbf16, #tpu.memory_space<vmem>>, vector<1x1x18x128xbf16>,
    %c0_50 = arith.constant 0 : index
    %c17 = arith.constant 17 : index
    %c0_51 = arith.constant 0 : index
    %c0_52 = arith.constant 0 : index
    %49 = vector.load %arg3[%c0_50, %c17, %c0_51, %c0_52] : memref<1x18x18x128xbf16, #tpu.memory_space<vmem>>, vector<1x1x18x128xbf16>
    %50 = vector.shape_cast %49 : vector<1x1x18x128xbf16> to vector<1x18x128xbf16>
    %51 = vector.shape_cast %44 : vector<1x18x128xbf16> to vector<1x1x18x128xbf16>
    tpu.vector_store %arg3[%c0_50, %c17, %c0_51, %c0_52], %51 {strides = array<i32>} : memref<1x18x18x128xbf16, #tpu.memory_space<vmem>>, vector<1x1x18x128xbf16>,
    %c0_53 = arith.constant 0 : index
    %c1_54 = arith.constant 1 : index
    %c0_55 = arith.constant 0 : index
    %c0_56 = arith.constant 0 : index
    %52 = vector.load %arg3[%c0_53, %c1_54, %c0_55, %c0_56] : memref<1x18x18x128xbf16, #tpu.memory_space<vmem>>, vector<1x16x1x128xbf16>
    %53 = vector.shape_cast %52 : vector<1x16x1x128xbf16> to vector<16x1x128xbf16>
    %54 = vector.shape_cast %45 : vector<16x1x128xbf16> to vector<1x16x1x128xbf16>
    tpu.vector_store %arg3[%c0_53, %c1_54, %c0_55, %c0_56], %54 {strides = array<i32>} : memref<1x18x18x128xbf16, #tpu.memory_space<vmem>>, vector<1x16x1x128xbf16>,
    %c0_57 = arith.constant 0 : index
    %c1_58 = arith.constant 1 : index
    %c17_59 = arith.constant 17 : index
    %c0_60 = arith.constant 0 : index
    %55 = vector.load %arg3[%c0_57, %c1_58, %c17_59, %c0_60] : memref<1x18x18x128xbf16, #tpu.memory_space<vmem>>, vector<1x16x1x128xbf16>
    %56 = vector.shape_cast %55 : vector<1x16x1x128xbf16> to vector<16x1x128xbf16>
    %57 = vector.shape_cast %45 : vector<16x1x128xbf16> to vector<1x16x1x128xbf16>
    tpu.vector_store %arg3[%c0_57, %c1_58, %c17_59, %c0_60], %57 {strides = array<i32>} : memref<1x18x18x128xbf16, #tpu.memory_space<vmem>>, vector<1x16x1x128xbf16>,
    %c0_61 = arith.constant 0 : index
    %c1_62 = arith.constant 1 : index
    %c1_63 = arith.constant 1 : index
    %c0_64 = arith.constant 0 : index
    %58 = vector.load %arg3[%c0_61, %c1_62, %c1_63, %c0_64] : memref<1x18x18x128xbf16, #tpu.memory_space<vmem>>, vector<1x16x16x128xbf16>
    %59 = vector.shape_cast %58 : vector<1x16x16x128xbf16> to vector<16x16x128xbf16>
    %60 = vector.shape_cast %43 : vector<16x16x128xbf16> to vector<1x16x16x128xbf16>
    tpu.vector_store %arg3[%c0_61, %c1_62, %c1_63, %c0_64], %60 {strides = array<i32>} : memref<1x18x18x128xbf16, #tpu.memory_space<vmem>>, vector<1x16x16x128xbf16>,
    return
  }
  func.func @transform_0(%arg0: i32) -> (i32, i32, i32, i32) {
    %c0_i32 = arith.constant 0 : i32
    %c0_i32_0 = arith.constant 0 : i32
    %c0_i32_1 = arith.constant 0 : i32
    %c0_i32_2 = arith.constant 0 : i32
    return %arg0, %c0_i32, %c0_i32_0, %c0_i32_1 : i32, i32, i32, i32
  }
  func.func @transform_1(%arg0: i32) -> (i32, i32) {
    %c0_i32 = arith.constant 0 : i32
    %c0_i32_0 = arith.constant 0 : i32
    %c0_i32_1 = arith.constant 0 : i32
    return %c0_i32, %c0_i32_0 : i32, i32
  }
  func.func @transform_2(%arg0: i32) -> (i32, i32, i32, i32) {
    %c0_i32 = arith.constant 0 : i32
    %c0_i32_0 = arith.constant 0 : i32
    %c0_i32_1 = arith.constant 0 : i32
    %c0_i32_2 = arith.constant 0 : i32
    return %arg0, %c0_i32, %c0_i32_0, %c0_i32_1 : i32, i32, i32, i32
  }
  func.func @transform_3(%arg0: i32) -> (i32, i32, i32) {
    %c0_i32 = arith.constant 0 : i32
    %c0_i32_0 = arith.constant 0 : i32
    %c0_i32_1 = arith.constant 0 : i32
    return %arg0, %c0_i32, %c0_i32_0 : i32, i32, i32
  }
}

module attributes {stable_mosaic.version = 11 : i64} {
  func.func @stage2_kernel(%arg0: i32, %arg1: memref<1x18x18x128xbf16, #tpu.memory_space<vmem>>, %arg2: memref<3x384x32xbf16, #tpu.memory_space<vmem>>, %arg3: memref<256x32xf32, #tpu.memory_space<vmem>>, %arg4: memref<1x256x32xbf16, #tpu.memory_space<vmem>>, %arg5: memref<1x2x32xf32, #tpu.memory_space<vmem>>) attributes {dimension_semantics = [#tpu.dimension_semantics<parallel>], iteration_bounds = array<i64: 2>, scalar_prefetch = 0 : i64, scratch_operands = 0 : i64, tpu.core_type = #tpu.core_type<tc>, window_params = [{transform_indices = @transform_0, window_bounds = array<i64: 1, 18, 18, 128>}, {pipeline_mode = #tpu.pipeline_mode<synchronous>, transform_indices = @transform_1, window_bounds = array<i64: 3, 384, 32>}, {pipeline_mode = #tpu.pipeline_mode<synchronous>, transform_indices = @transform_2, window_bounds = array<i64: 256, 32>}, {transform_indices = @transform_3, window_bounds = array<i64: 1, 256, 32>}, {transform_indices = @transform_4, window_bounds = array<i64: 1, 2, 32>}]} {
    %c0 = arith.constant 0 : index
    %c0_0 = arith.constant 0 : index
    %0 = vector.load %arg3[%c0, %c0_0] : memref<256x32xf32, #tpu.memory_space<vmem>>, vector<256x32xf32>
    %c0_1 = arith.constant 0 : index
    %c0_2 = arith.constant 0 : index
    %c0_3 = arith.constant 0 : index
    %c0_4 = arith.constant 0 : index
    %1 = vector.load %arg1[%c0_1, %c0_2, %c0_3, %c0_4] : memref<1x18x18x128xbf16, #tpu.memory_space<vmem>>, vector<1x16x16x128xbf16>
    %2 = vector.shape_cast %1 : vector<1x16x16x128xbf16> to vector<16x16x128xbf16>
    %3 = vector.shape_cast %2 : vector<16x16x128xbf16> to vector<256x128xbf16>
    %c0_5 = arith.constant 0 : index
    %c0_6 = arith.constant 0 : index
    %c1 = arith.constant 1 : index
    %c0_7 = arith.constant 0 : index
    %4 = vector.load %arg1[%c0_5, %c0_6, %c1, %c0_7] : memref<1x18x18x128xbf16, #tpu.memory_space<vmem>>, vector<1x16x16x128xbf16>
    %5 = vector.shape_cast %4 : vector<1x16x16x128xbf16> to vector<16x16x128xbf16>
    %6 = vector.shape_cast %5 : vector<16x16x128xbf16> to vector<256x128xbf16>
    %c0_8 = arith.constant 0 : index
    %c0_9 = arith.constant 0 : index
    %c2 = arith.constant 2 : index
    %c0_10 = arith.constant 0 : index
    %7 = vector.load %arg1[%c0_8, %c0_9, %c2, %c0_10] : memref<1x18x18x128xbf16, #tpu.memory_space<vmem>>, vector<1x16x16x128xbf16>
    %8 = vector.shape_cast %7 : vector<1x16x16x128xbf16> to vector<16x16x128xbf16>
    %9 = vector.shape_cast %8 : vector<16x16x128xbf16> to vector<256x128xbf16>
    %10 = tpu.concatenate %3, %6, %9 in 1 : vector<256x128xbf16>, vector<256x128xbf16>, vector<256x128xbf16> -> vector<256x384xbf16>
    %c0_11 = arith.constant 0 : index
    %c0_12 = arith.constant 0 : index
    %c0_13 = arith.constant 0 : index
    %11 = vector.load %arg2[%c0_11, %c0_12, %c0_13] : memref<3x384x32xbf16, #tpu.memory_space<vmem>>, vector<1x384x32xbf16>
    %12 = vector.shape_cast %11 : vector<1x384x32xbf16> to vector<384x32xbf16>
    %cst = arith.constant dense<0.000000e+00> : vector<256x32xf32>
    %13 = tpu.matmul %10, %12, %cst {dimension_numbers = #tpu.dot_dimension_numbers<[1], [0], [0], [1], [0, 0, 1, 1], [], []>} : vector<256x384xbf16>, vector<384x32xbf16>, vector<256x32xf32> -> vector<256x32xf32>
    %14 = arith.addf %0, %13 : vector<256x32xf32>
    %c0_14 = arith.constant 0 : index
    %c1_15 = arith.constant 1 : index
    %c0_16 = arith.constant 0 : index
    %c0_17 = arith.constant 0 : index
    %15 = vector.load %arg1[%c0_14, %c1_15, %c0_16, %c0_17] : memref<1x18x18x128xbf16, #tpu.memory_space<vmem>>, vector<1x16x16x128xbf16>
    %16 = vector.shape_cast %15 : vector<1x16x16x128xbf16> to vector<16x16x128xbf16>
    %17 = vector.shape_cast %16 : vector<16x16x128xbf16> to vector<256x128xbf16>
    %c0_18 = arith.constant 0 : index
    %c1_19 = arith.constant 1 : index
    %c1_20 = arith.constant 1 : index
    %c0_21 = arith.constant 0 : index
    %18 = vector.load %arg1[%c0_18, %c1_19, %c1_20, %c0_21] : memref<1x18x18x128xbf16, #tpu.memory_space<vmem>>, vector<1x16x16x128xbf16>
    %19 = vector.shape_cast %18 : vector<1x16x16x128xbf16> to vector<16x16x128xbf16>
    %20 = vector.shape_cast %19 : vector<16x16x128xbf16> to vector<256x128xbf16>
    %c0_22 = arith.constant 0 : index
    %c1_23 = arith.constant 1 : index
    %c2_24 = arith.constant 2 : index
    %c0_25 = arith.constant 0 : index
    %21 = vector.load %arg1[%c0_22, %c1_23, %c2_24, %c0_25] : memref<1x18x18x128xbf16, #tpu.memory_space<vmem>>, vector<1x16x16x128xbf16>
    %22 = vector.shape_cast %21 : vector<1x16x16x128xbf16> to vector<16x16x128xbf16>
    %23 = vector.shape_cast %22 : vector<16x16x128xbf16> to vector<256x128xbf16>
    %24 = tpu.concatenate %17, %20, %23 in 1 : vector<256x128xbf16>, vector<256x128xbf16>, vector<256x128xbf16> -> vector<256x384xbf16>
    %c1_26 = arith.constant 1 : index
    %c0_27 = arith.constant 0 : index
    %c0_28 = arith.constant 0 : index
    %25 = vector.load %arg2[%c1_26, %c0_27, %c0_28] : memref<3x384x32xbf16, #tpu.memory_space<vmem>>, vector<1x384x32xbf16>
    %26 = vector.shape_cast %25 : vector<1x384x32xbf16> to vector<384x32xbf16>
    %cst_29 = arith.constant dense<0.000000e+00> : vector<256x32xf32>
    %27 = tpu.matmul %24, %26, %cst_29 {dimension_numbers = #tpu.dot_dimension_numbers<[1], [0], [0], [1], [0, 0, 1, 1], [], []>} : vector<256x384xbf16>, vector<384x32xbf16>, vector<256x32xf32> -> vector<256x32xf32>
    %28 = arith.addf %14, %27 : vector<256x32xf32>
    %c0_30 = arith.constant 0 : index
    %c2_31 = arith.constant 2 : index
    %c0_32 = arith.constant 0 : index
    %c0_33 = arith.constant 0 : index
    %29 = vector.load %arg1[%c0_30, %c2_31, %c0_32, %c0_33] : memref<1x18x18x128xbf16, #tpu.memory_space<vmem>>, vector<1x16x16x128xbf16>
    %30 = vector.shape_cast %29 : vector<1x16x16x128xbf16> to vector<16x16x128xbf16>
    %31 = vector.shape_cast %30 : vector<16x16x128xbf16> to vector<256x128xbf16>
    %c0_34 = arith.constant 0 : index
    %c2_35 = arith.constant 2 : index
    %c1_36 = arith.constant 1 : index
    %c0_37 = arith.constant 0 : index
    %32 = vector.load %arg1[%c0_34, %c2_35, %c1_36, %c0_37] : memref<1x18x18x128xbf16, #tpu.memory_space<vmem>>, vector<1x16x16x128xbf16>
    %33 = vector.shape_cast %32 : vector<1x16x16x128xbf16> to vector<16x16x128xbf16>
    %34 = vector.shape_cast %33 : vector<16x16x128xbf16> to vector<256x128xbf16>
    %c0_38 = arith.constant 0 : index
    %c2_39 = arith.constant 2 : index
    %c2_40 = arith.constant 2 : index
    %c0_41 = arith.constant 0 : index
    %35 = vector.load %arg1[%c0_38, %c2_39, %c2_40, %c0_41] : memref<1x18x18x128xbf16, #tpu.memory_space<vmem>>, vector<1x16x16x128xbf16>
    %36 = vector.shape_cast %35 : vector<1x16x16x128xbf16> to vector<16x16x128xbf16>
    %37 = vector.shape_cast %36 : vector<16x16x128xbf16> to vector<256x128xbf16>
    %38 = tpu.concatenate %31, %34, %37 in 1 : vector<256x128xbf16>, vector<256x128xbf16>, vector<256x128xbf16> -> vector<256x384xbf16>
    %c2_42 = arith.constant 2 : index
    %c0_43 = arith.constant 0 : index
    %c0_44 = arith.constant 0 : index
    %39 = vector.load %arg2[%c2_42, %c0_43, %c0_44] : memref<3x384x32xbf16, #tpu.memory_space<vmem>>, vector<1x384x32xbf16>
    %40 = vector.shape_cast %39 : vector<1x384x32xbf16> to vector<384x32xbf16>
    %cst_45 = arith.constant dense<0.000000e+00> : vector<256x32xf32>
    %41 = tpu.matmul %38, %40, %cst_45 {dimension_numbers = #tpu.dot_dimension_numbers<[1], [0], [0], [1], [0, 0, 1, 1], [], []>} : vector<256x384xbf16>, vector<384x32xbf16>, vector<256x32xf32> -> vector<256x32xf32>
    %42 = arith.addf %28, %41 : vector<256x32xf32>
    %cst_46 = arith.constant dense<0.000000e+00> : vector<32xf32>
    %43 = vector.multi_reduction <add>, %42, %cst_46 [0] : vector<256x32xf32> to vector<32xf32>
    %44 = vector.shape_cast %43 : vector<32xf32> to vector<1x32xf32>
    %c0_47 = arith.constant 0 : index
    %c0_48 = arith.constant 0 : index
    %c0_49 = arith.constant 0 : index
    %45 = vector.load %arg5[%c0_47, %c0_48, %c0_49] : memref<1x2x32xf32, #tpu.memory_space<vmem>>, vector<1x1x32xf32>
    %46 = vector.shape_cast %45 : vector<1x1x32xf32> to vector<1x32xf32>
    %47 = vector.shape_cast %44 : vector<1x32xf32> to vector<1x1x32xf32>
    tpu.vector_store %arg5[%c0_47, %c0_48, %c0_49], %47 {strides = array<i32>} : memref<1x2x32xf32, #tpu.memory_space<vmem>>, vector<1x1x32xf32>,
    %48 = arith.mulf %42, %42 : vector<256x32xf32>
    %cst_50 = arith.constant dense<0.000000e+00> : vector<32xf32>
    %49 = vector.multi_reduction <add>, %48, %cst_50 [0] : vector<256x32xf32> to vector<32xf32>
    %50 = vector.shape_cast %49 : vector<32xf32> to vector<1x32xf32>
    %c0_51 = arith.constant 0 : index
    %c1_52 = arith.constant 1 : index
    %c0_53 = arith.constant 0 : index
    %51 = vector.load %arg5[%c0_51, %c1_52, %c0_53] : memref<1x2x32xf32, #tpu.memory_space<vmem>>, vector<1x1x32xf32>
    %52 = vector.shape_cast %51 : vector<1x1x32xf32> to vector<1x32xf32>
    %53 = vector.shape_cast %50 : vector<1x32xf32> to vector<1x1x32xf32>
    tpu.vector_store %arg5[%c0_51, %c1_52, %c0_53], %53 {strides = array<i32>} : memref<1x2x32xf32, #tpu.memory_space<vmem>>, vector<1x1x32xf32>,
    %54 = arith.truncf %42 : vector<256x32xf32> to vector<256x32xbf16>
    %c0_54 = arith.constant 0 : index
    %c0_55 = arith.constant 0 : index
    %c0_56 = arith.constant 0 : index
    %55 = vector.load %arg4[%c0_54, %c0_55, %c0_56] : memref<1x256x32xbf16, #tpu.memory_space<vmem>>, vector<1x256x32xbf16>
    %56 = vector.shape_cast %55 : vector<1x256x32xbf16> to vector<256x32xbf16>
    %57 = vector.shape_cast %54 : vector<256x32xbf16> to vector<1x256x32xbf16>
    tpu.vector_store %arg4[%c0_54, %c0_55, %c0_56], %57 {strides = array<i32>} : memref<1x256x32xbf16, #tpu.memory_space<vmem>>, vector<1x256x32xbf16>,
    return
  }
  func.func @transform_0(%arg0: i32) -> (i32, i32, i32, i32) {
    %c0_i32 = arith.constant 0 : i32
    %c0_i32_0 = arith.constant 0 : i32
    %c0_i32_1 = arith.constant 0 : i32
    %c0_i32_2 = arith.constant 0 : i32
    return %arg0, %c0_i32, %c0_i32_0, %c0_i32_1 : i32, i32, i32, i32
  }
  func.func @transform_1(%arg0: i32) -> (i32, i32, i32) {
    %c0_i32 = arith.constant 0 : i32
    %c0_i32_0 = arith.constant 0 : i32
    %c0_i32_1 = arith.constant 0 : i32
    %c0_i32_2 = arith.constant 0 : i32
    return %c0_i32, %c0_i32_0, %c0_i32_1 : i32, i32, i32
  }
  func.func @transform_2(%arg0: i32) -> (i32, i32) {
    %c0_i32 = arith.constant 0 : i32
    %c0_i32_0 = arith.constant 0 : i32
    %c0_i32_1 = arith.constant 0 : i32
    return %c0_i32, %c0_i32_0 : i32, i32
  }
  func.func @transform_3(%arg0: i32) -> (i32, i32, i32) {
    %c0_i32 = arith.constant 0 : i32
    %c0_i32_0 = arith.constant 0 : i32
    %c0_i32_1 = arith.constant 0 : i32
    return %arg0, %c0_i32, %c0_i32_0 : i32, i32, i32
  }
  func.func @transform_4(%arg0: i32) -> (i32, i32, i32) {
    %c0_i32 = arith.constant 0 : i32
    %c0_i32_0 = arith.constant 0 : i32
    %c0_i32_1 = arith.constant 0 : i32
    return %arg0, %c0_i32, %c0_i32_0 : i32, i32, i32
  }
}

module attributes {stable_mosaic.version = 11 : i64} {
  func.func @stage3_kernel(%arg0: i32, %arg1: memref<128x128xbf16, #tpu.memory_space<vmem>>, %arg2: memref<1x128xf32, #tpu.memory_space<vmem>>, %arg3: memref<1x128xf32, #tpu.memory_space<vmem>>, %arg4: memref<128x128xf32, #tpu.memory_space<vmem>>) attributes {dimension_semantics = [#tpu.dimension_semantics<parallel>], iteration_bounds = array<i64: 1>, scalar_prefetch = 0 : i64, scratch_operands = 0 : i64, tpu.core_type = #tpu.core_type<tc>, window_params = [{transform_indices = @transform_0, window_bounds = array<i64: 128, 128>}, {pipeline_mode = #tpu.pipeline_mode<synchronous>, transform_indices = @transform_1, window_bounds = array<i64: 1, 128>}, {pipeline_mode = #tpu.pipeline_mode<synchronous>, transform_indices = @transform_2, window_bounds = array<i64: 1, 128>}, {transform_indices = @transform_3, window_bounds = array<i64: 128, 128>}]} {
    %c0 = arith.constant 0 : index
    %c0_0 = arith.constant 0 : index
    %0 = vector.load %arg1[%c0, %c0_0] : memref<128x128xbf16, #tpu.memory_space<vmem>>, vector<128x128xbf16>
    %1 = arith.extf %0 : vector<128x128xbf16> to vector<128x128xf32>
    %c0_1 = arith.constant 0 : index
    %c0_2 = arith.constant 0 : index
    %2 = vector.load %arg2[%c0_1, %c0_2] : memref<1x128xf32, #tpu.memory_space<vmem>>, vector<1x128xf32>
    %3 = vector.broadcast %2 : vector<1x128xf32> to vector<128x128xf32>
    %4 = arith.mulf %1, %3 : vector<128x128xf32>
    %c0_3 = arith.constant 0 : index
    %c0_4 = arith.constant 0 : index
    %5 = vector.load %arg3[%c0_3, %c0_4] : memref<1x128xf32, #tpu.memory_space<vmem>>, vector<1x128xf32>
    %6 = vector.broadcast %5 : vector<1x128xf32> to vector<128x128xf32>
    %7 = arith.addf %4, %6 : vector<128x128xf32>
    %cst = arith.constant 0.000000e+00 : f32
    %8 = vector.broadcast %cst : f32 to vector<128x128xf32>
    %9 = arith.maximumf %7, %8 : vector<128x128xf32>
    %c0_5 = arith.constant 0 : index
    %c0_6 = arith.constant 0 : index
    %10 = vector.load %arg4[%c0_5, %c0_6] : memref<128x128xf32, #tpu.memory_space<vmem>>, vector<128x128xf32>
    tpu.vector_store %arg4[%c0_5, %c0_6], %9 {strides = array<i32>} : memref<128x128xf32, #tpu.memory_space<vmem>>, vector<128x128xf32>,
    return
  }
  func.func @transform_0(%arg0: i32) -> (i32, i32) {
    %c0_i32 = arith.constant 0 : i32
    %c0_i32_0 = arith.constant 0 : i32
    return %arg0, %c0_i32 : i32, i32
  }
  func.func @transform_1(%arg0: i32) -> (i32, i32) {
    %c0_i32 = arith.constant 0 : i32
    %c0_i32_0 = arith.constant 0 : i32
    %c0_i32_1 = arith.constant 0 : i32
    return %c0_i32, %c0_i32_0 : i32, i32
  }
  func.func @transform_2(%arg0: i32) -> (i32, i32) {
    %c0_i32 = arith.constant 0 : i32
    %c0_i32_0 = arith.constant 0 : i32
    %c0_i32_1 = arith.constant 0 : i32
    return %c0_i32, %c0_i32_0 : i32, i32
  }
  func.func @transform_3(%arg0: i32) -> (i32, i32) {
    %c0_i32 = arith.constant 0 : i32
    %c0_i32_0 = arith.constant 0 : i32
    return %arg0, %c0_i32 : i32, i32
  }
}

</mosaic_0001>

<bundles_post_ra>
// kernel: mcam_forward.5
= control target key start
LH: loop header
LB: loop body
LE: loop exit
PB: predicated region body
PF: predicated region fallthrough
CT: control target
= control target key end

     0   :  { %s303_s0 = inlined_call_operand.vmem [shape: bf16[128,128], index: 0, kind: input, shape index: {}]   ;;  %s304_s1 = inlined_call_operand.vmem [shape: f32[1,128], index: 1, kind: input, shape index: {}]   ;;  %s305_s2 = inlined_call_operand.vmem [shape: f32[1,128], index: 2, kind: input, shape index: {}]   ;;  %s306_s3 = inlined_call_operand.vmem [shape: f32[128,128], index: 3, kind: output, shape index: {}]  }
   0x1   :  { %v131_v0 = vld [vmem:[%s303_s0] sm:$0xff]   ;;  %v162_v4 = vld [vmem:[%s303_s0 + $0x8] sm:$0xff]   ;;  %v163_v5 = vld [vmem:[%s303_s0 + $0x10] sm:$0xff]  }
   0x2   :  { %v195_v1 = vld [vmem:[%s304_s1] ss:$0 sm:$0xff]  ;;  %v132_v2 = vunpack.c.l.bf16 %v131_v0  ;;  %v133_v3 = vunpack.c.h.bf16 %v131_v0  ;;  %v164_v6 = vld [vmem:[%s303_s0 + $0x18] sm:$0xff]   ;;  %v136_v8 = vunpack.c.l.bf16 %v162_v4  ;;  %v137_v9 = vunpack.c.h.bf16 %v162_v4  ;;  %v166_v33 = vld [vmem:[%s303_s0 + $0x28] sm:$0xff]  }
   0x3   :  { %v209_v7 = vld [vmem:[%s305_s2] ss:$0 sm:$0xff]  ;;  %v140_v10 = vunpack.c.l.bf16 %v163_v5  ;;  %v141_v11 = vunpack.c.h.bf16 %v163_v5  ;;  %v144_v14 = vunpack.c.l.bf16 %v164_v6  ;;  %v145_v15 = vunpack.c.h.bf16 %v164_v6  ;;  %v167_v34 = vld [vmem:[%s303_s0 + $0x30] sm:$0xff]   ;;  %v168_v39 = vld [vmem:[%s303_s0 + $0x38] sm:$0xff]  }
   0x4   :  { %v53_v12 = vmul.f32 %v132_v2, %v195_v1  ;;  %v54_v13 = vmul.f32 %v133_v3, %v195_v1  ;;  %v55_v16 = vmul.f32 %v136_v8, %v195_v1  ;;  %v56_v17 = vmul.f32 %v137_v9, %v195_v1  ;;  %v165_v28 = vld [vmem:[%s303_s0 + $0x20] sm:$0xff]  }
   0x5   :  { %v57_v18 = vmul.f32 %v140_v10, %v195_v1  ;;  %v58_v19 = vmul.f32 %v141_v11, %v195_v1  ;;  %v59_v22 = vmul.f32 %v144_v14, %v195_v1  ;;  %v60_v23 = vmul.f32 %v145_v15, %v195_v1 }
   0x6   :  { %v76_v20 = vadd.f32 %v209_v7, %v53_v12  ;;  %v77_v21 = vadd.f32 %v209_v7, %v54_v13  ;;  %v78_v24 = vadd.f32 %v209_v7, %v55_v16  ;;  %v79_v25 = vadd.f32 %v209_v7, %v56_v17 }
   0x7   :  { %v80_v26 = vadd.f32 %v209_v7, %v57_v18  ;;  %v81_v27 = vadd.f32 %v209_v7, %v58_v19  ;;  %v82_v31 = vadd.f32 %v209_v7, %v59_v22  ;;  %v83_v32 = vadd.f32 %v209_v7, %v60_v23 }
   0x8   :  { %v92_v29 = vmax.f32 %v76_v20, 0.0  ;;  %v93_v30 = vmax.f32 %v77_v21, 0.0  ;;  %v94_v35 = vmax.f32 %v78_v24, 0.0  ;;  %v95_v36 = vmax.f32 %v79_v25, 0.0 }
   0x9   :  { %v96_v37 = vmax.f32 %v80_v26, 0.0  ;;  %v97_v38 = vmax.f32 %v81_v27, 0.0  ;;  %v98_v40 = vmax.f32 %v82_v31, 0.0  ;;  %v99_v41 = vmax.f32 %v83_v32, 0.0 }
   0xa   :  { %108 = vst [vmem:[%s306_s3] sm:$0xff] %v92_v29  ;;  %109 = vst [vmem:[%s306_s3 + $0x8] sm:$0xff] %v93_v30  ;;  %v148_v42 = vunpack.c.l.bf16 %v165_v28  ;;  %v149_v43 = vunpack.c.h.bf16 %v165_v28  ;;  %v152_v44 = vunpack.c.l.bf16 %v166_v33  ;;  %v153_v45 = vunpack.c.h.bf16 %v166_v33 }
   0xb   :  { %110 = vst [vmem:[%s306_s3 + $0x10] sm:$0xff] %v94_v35  ;;  %111 = vst [vmem:[%s306_s3 + $0x18] sm:$0xff] %v95_v36  ;;  %v156_v46 = vunpack.c.l.bf16 %v167_v34  ;;  %v157_v47 = vunpack.c.h.bf16 %v167_v34  ;;  %v160_v50 = vunpack.c.l.bf16 %v168_v39  ;;  %v161_v51 = vunpack.c.h.bf16 %v168_v39 }
   0xc   :  { %112 = vst [vmem:[%s306_s3 + $0x20] sm:$0xff] %v96_v37  ;;  %113 = vst [vmem:[%s306_s3 + $0x28] sm:$0xff] %v97_v38  ;;  %v61_v48 = vmul.f32 %v148_v42, %v195_v1  ;;  %v62_v49 = vmul.f32 %v149_v43, %v195_v1  ;;  %v63_v52 = vmul.f32 %v152_v44, %v195_v1 }
   0xd   :  { %114 = vst [vmem:[%s306_s3 + $0x30] sm:$0xff] %v98_v40  ;;  %115 = vst [vmem:[%s306_s3 + $0x38] sm:$0xff] %v99_v41  ;;  %v64_v53 = vmul.f32 %v153_v45, %v195_v1  ;;  %v65_v54 = vmul.f32 %v156_v46, %v195_v1  ;;  %v66_v55 = vmul.f32 %v157_v47, %v195_v1 }
   0xe   :  { %v84_v56 = vadd.f32 %v209_v7, %v61_v48  ;;  %v85_v57 = vadd.f32 %v209_v7, %v62_v49  ;;  %v67_v58 = vmul.f32 %v160_v50, %v195_v1  ;;  %v68_v59 = vmul.f32 %v161_v51, %v195_v1 }
   0xf   :  { %v86_v60 = vadd.f32 %v209_v7, %v63_v52  ;;  %v87_v61 = vadd.f32 %v209_v7, %v64_v53  ;;  %v88_v62 = vadd.f32 %v209_v7, %v65_v54  ;;  %v89_v63 = vadd.f32 %v209_v7, %v66_v55 }
  0x10   :  { %v100_v0 = vmax.f32 %v84_v56, 0.0  ;;  %v101_v2 = vmax.f32 %v85_v57, 0.0  ;;  %v90_v3 = vadd.f32 %v209_v7, %v67_v58  ;;  %v91_v4 = vadd.f32 %v209_v7, %v68_v59 }
  0x11   :  { %v102_v5 = vmax.f32 %v86_v60, 0.0  ;;  %v103_v6 = vmax.f32 %v87_v61, 0.0  ;;  %v104_v8 = vmax.f32 %v88_v62, 0.0  ;;  %v105_v9 = vmax.f32 %v89_v63, 0.0 }
  0x12   :  { %116 = vst [vmem:[%s306_s3 + $0x40] sm:$0xff] %v100_v0  ;;  %117 = vst [vmem:[%s306_s3 + $0x48] sm:$0xff] %v101_v2  ;;  %v106_v1 = vmax.f32 %v90_v3, 0.0  ;;  %v107_v10 = vmax.f32 %v91_v4, 0.0 }
  0x13   :  { %118 = vst [vmem:[%s306_s3 + $0x50] sm:$0xff] %v102_v5  ;;  %119 = vst [vmem:[%s306_s3 + $0x58] sm:$0xff] %v103_v6 }
  0x14   :  { %120 = vst [vmem:[%s306_s3 + $0x60] sm:$0xff] %v104_v8  ;;  %121 = vst [vmem:[%s306_s3 + $0x68] sm:$0xff] %v105_v9 }
  0x15   :  { %122 = vst [vmem:[%s306_s3 + $0x70] sm:$0xff] %v106_v1  ;;  %123 = vst [vmem:[%s306_s3 + $0x78] sm:$0xff] %v107_v10 }

// kernel: mcam_forward.4
= control target key start
LH: loop header
LB: loop body
LE: loop exit
PB: predicated region body
PF: predicated region fallthrough
CT: control target
= control target key end

     0   :  { %s6292_s15 = smov 0   ;;  %s8391_s0 = inlined_call_operand.vmem [shape: bf16[2,18,18,128], index: 0, kind: input, shape index: {}]   ;;  %s8392_s1 = inlined_call_operand.vmem [shape: bf16[3,384,32], index: 1, kind: input, shape index: {}]   ;;  %s8393_s2 = inlined_call_operand.vmem [shape: f32[256,32], index: 2, kind: input, shape index: {}]   ;;  %s8394_s3 = inlined_call_operand.vmem [shape: bf16[2,256,32], index: 3, kind: output, shape index: {0}]   ;;  %s8395_s4 = inlined_call_operand.vmem [shape: f32[2,2,32], index: 4, kind: output, shape index: {1}]  }
   0x1 LB: > { %s4759_s16 = sadd.s32 4294967295, %s6265_s15   ;;  %p4763_p0 = scmp.ge.s32.totalorder %s6265_s15, 1  ;;  %s6265_s15 = sphi %s6292_s15, %s15_s15  }
   0x2   : > { %p165_p1 = scmp.lt.s32.totalorder %s6265_s15, 3 }
   0x4   : > { %p166_p2 = pnand %p4763_p0, %p165_p1 }
   0x6   : > { %169 = sbr.rel (%p166_p2) target bundleno = 582 (0x246), region = 32 }
   0xd   : > { %v6092_v0 = vld [vmem:[%s8392_s1 + $0x40] sm:$0xff]   ;;  %v6095_v3 = vld [vmem:[%s8392_s1 + $0x48] sm:$0xff]   ;;  %v6098_v6 = vld [vmem:[%s8392_s1 + $0x50] sm:$0xff]   ;;  %p195_p3 = scmp.lt.s32.totalorder %s4759_s16, 1  ;;  %vm741_vm0 = vcmask 1042432   ;;  %vm742_vm1 = vcmask 1046532  }
   0xe   : > { %v6306_v1 = vld [vmem:[%s8392_s1 + $0x80] sm:$0xff]   ;;  %5323 = vmatprep.subr.bf16.mxu0 %v6092_v0  ;;  %v6319_v4 = vld [vmem:[%s8392_s1 + $0x88] sm:$0xff]   ;;  %v6331_v7 = vld [vmem:[%s8392_s1 + $0x90] sm:$0xff]   ;;  %vm290_vm2 = vsmask.f32 3328  ;;  %vm4640_vm6 = vcmask 257024  }
   0xf   : > { %v6094_v2 = vld [vmem:[%s8392_s1] sm:$0xff]   ;;  %5875 = vmatprep.subr.bf16.mxu1 %v6306_v1  ;;  %v6097_v5 = vld [vmem:[%s8392_s1 + $0x8] sm:$0xff]   ;;  %v6100_v8 = vld [vmem:[%s8392_s1 + $0x10] sm:$0xff]   ;;  %s8405_s16 = smov (!%p195_p3, %s4759_s16), 1  ;;  %vm291_vm3 = vsmask.f32 7440 }
  0x10   : > { %5324 = vmatpush3.bf16.msra.mxu0 %v6094_v2  ;;  %5883 = vmatpush3.bf16.msra.mxu1 %v6306_v1  ;;  %v6101_v9 = vld [vmem:[%s8392_s1 + $0x58] sm:$0xff]   ;;  %v6104_v12 = vld [vmem:[%s8392_s1 + $0x60] sm:$0xff]   ;;  %v6107_v15 = vld [vmem:[%s8392_s1 + $0x68] sm:$0xff]   ;;  %s6083_s27 = smul.u32 216, %s8405_s16  ;;  %s5290_s19 = sshll.u32 %s8405_s16, 7  ;;  %vm4338_vm7 = vcmask 261120  }
  0x11   : > { %5325 = vmatprep.subr.bf16.mxu0 %v6095_v3  ;;  %5876 = vmatprep.subr.bf16.mxu1 %v6319_v4  ;;  %v6346_v10 = vld [vmem:[%s8392_s1 + $0x98] sm:$0xff]   ;;  %v6359_v13 = vld [vmem:[%s8392_s1 + $0xa0] sm:$0xff]   ;;  %v6376_v16 = vld [vmem:[%s8392_s1 + $0xa8] sm:$0xff]   ;;  %s8199_s22 = scalar_lea.vmem %s8394_s3, %s5290_s19  ;;  %s4767_s23 = sshll.u32 %s8405_s16, 1  ;;  %vm4408_vm8 = vcmask 253952  }
  0x12   : > { %v6103_v11 = vld [vmem:[%s8392_s1 + $0x18] sm:$0xff]   ;;  %v6106_v14 = vld [vmem:[%s8392_s1 + $0x20] sm:$0xff]   ;;  %v6109_v17 = vld [vmem:[%s8392_s1 + $0x28] sm:$0xff]   ;;  %s6395_s10 = scalar_lea.vmem %s8391_s0, %s6083_s27  ;;  %s208_s26 = scalar_lea.vmem %s8395_s4, %s4767_s23 }
  0x13   : > { %v6110_v18 = vld [vmem:[%s8392_s1 + $0x70] sm:$0xff]   ;;  %v6113_v21 = vld [vmem:[%s8392_s1 + $0x78] sm:$0xff]   ;;  %v6410_v23 = vld [vmem:[%s6395_s10] sm:$0xf] }
  0x14   : > { %5326 = vmatpush3.bf16.msra.mxu0 %v6097_v5  ;;  %5884 = vmatpush3.bf16.msra.mxu1 %v6319_v4  ;;  %v6390_v19 = vld [vmem:[%s8392_s1 + $0xb0] sm:$0xff]   ;;  %v6406_v22 = vld [vmem:[%s8392_s1 + $0xb8] sm:$0xff]   ;;  %v6413_v24 = vld [vmem:[%s6395_s10 + $0x4] sm:$0xf]  ;;  %v294_v26 = vshrl.u32 %v6410_v23, 16  ;;  %v297_v27 = vshll.u32 %v6410_v23, 16 }
  0x15   : > { %5327 = vmatprep.subr.bf16.mxu0 %v6098_v6  ;;  %5877 = vmatprep.subr.bf16.mxu1 %v6331_v7  ;;  %v6112_v20 = vld [vmem:[%s8392_s1 + $0x30] sm:$0xff]   ;;  %v6416_v25 = vld [vmem:[%s6395_s10 + $0x8] sm:$0x1]  ;;  %v6115_v28 = vld [vmem:[%s8392_s1 + $0x38] sm:$0xff]   ;;  %v303_v29 = vshll.u32 %v6413_v24, 16  ;;  %v307_v30 = vshrl.u32 %v6413_v24, 16  ;;  %v4784_v61 = vcombine.low %v6410_v23, %v6413_v24 }
  0x16   : > { %v313_v31 = vshll.u32 %v6416_v25, 16  ;;  %v749_v32 = vrot.slane %v6416_v25, 5  ;;  %v6429_v33 = vld [vmem:[%s6395_s10 + $0x64] sm:$0xf]  ;;  %v296_v34 = vrot.slane %v294_v26, 4  ;;  %v299_v35 = vrot.slane %v297_v27, 5  ;;  %vm6436_vm4 = vmor %vm741_vm0, %vm742_vm1 }
  0x17   : > { %v282_v36 = vld [vmem:[%s6395_s10 + $0x68] sm:$0x1]  ;;  %v685_v37 = vld [vmem:[%s6395_s10 + $0x60] sm:$0xe]  ;;  %v305_v38 = vrot.slane %v303_v29, 5  ;;  %v309_v39 = vrot.slane %v307_v30, 4  ;;  %vm6453_vm5 = vmor %vm290_vm2, %vm291_vm3 }
  0x18   : > { %5328 = vmatpush3.bf16.msra.mxu0 %v6100_v8  ;;  %5885 = vmatpush3.bf16.msra.mxu1 %v6331_v7  ;;  %v315_v40 = vrot.slane %v313_v31, 5  ;;  %v505_v41 = vshll.u32 %v282_v36, 16  ;;  %v6441_v43 = vld [vmem:[%s6395_s10 + $0x70] sm:$0xf]  ;;  %v300_v44 = vor.u32 %v299_v35, %v296_v34  ;;  %v4776_v45 = vrot.slane %v685_v37, 9  ;;  %v6117_v49 = vld [vmem:[%s8392_s1 + $0x100] sm:$0xff]  }
  0x19   : > { %5329 = vmatprep.subr.bf16.mxu0 %v6101_v9  ;;  %5878 = vmatprep.subr.bf16.mxu1 %v6346_v10  ;;  %v802_v46 = vrot.slane %v6429_v33, 5  ;;  %v805_v47 = vrot.slane %v282_v36, 5  ;;  %v6446_v48 = vld [vmem:[%s6395_s10 + $0x74] sm:$0x1]  ;;  %v310_v51 = vor.u32 %v309_v39, %v305_v38  ;;  %v686_v53 = vld [vmem:[%s6395_s10 + $0x6c] sm:$0xe] }
  0x1a   : > { %v6457_v52 = vrot.slane %v505_v41, 5  ;;  %v809_v54 = vrot.slane %v6441_v43, 5  ;;  %v812_v55 = vrot.slane %v6446_v48, 5  ;;  %v301_v56 = vrot.slane %v300_v44, 4  ;;  %v6118_v63 = vld [vmem:[%s8392_s1 + $0xc0] sm:$0xff]   ;;  %v6119_v9 = vld [vmem:[%s8392_s1 + $0x108] sm:$0xff]  }
  0x1b   : > { %v803_v57 = vsel %vm6436_vm4, %v4776_v45, %v802_v46  ;;  %v804_v58 = vrot.slane %v802_v46, 4  ;;  %v4777_v59 = vrot.slane %v686_v53, 9  ;;  %v311_v60 = vrot.slane %v310_v51, 4  ;;  %v6502_v27 = vld [vmem:[%s6395_s10 + $0x7c] sm:$0xf] }
  0x1c   : > { %5330 = vmatpush3.bf16.msra.mxu0 %v6103_v11  ;;  %5886 = vmatpush3.bf16.msra.mxu1 %v6346_v10  ;;  %v811_v62 = vrot.slane %v809_v54, 4  ;;  %v306_v0 = vsel %vm6453_vm5, %v301_v56, %v305_v38  ;;  %v495_v11 = vshll.u32 %v6429_v33, 16  ;;  %v6507_v30 = vld [vmem:[%s6395_s10 + $0x80] sm:$0x1]  ;;  %v687_v31 = vld [vmem:[%s6395_s10 + $0x78] sm:$0xe] }
  0x1d   : > { %5331 = vmatprep.subr.bf16.mxu0 %v6104_v12  ;;  %5879 = vmatprep.subr.bf16.mxu1 %v6359_v13  ;;  %v806_v2 = vsel %vm6436_vm4, %v804_v58, %v805_v47  ;;  %v810_v3 = vsel %vm6436_vm4, %v4777_v59, %v809_v54  ;;  %v316_v5 = vsel %vm6453_vm5, %v311_v60, %v315_v40  ;;  %v265_v38 = vld [vmem:[%s6395_s10 + $0x88] sm:$0xf]  ;;  %v4778_v40 = vrot.slane %v687_v31, 9  ;;  %v285_v45 = vld [vmem:[%s6395_s10 + $0x8c] sm:$0x1]  ;;  %v6122_v56 = vld [vmem:[%s8392_s1 + $0x110] sm:$0xff]  }
  0x1e   : > { %v4824_v6 = vcombine.low %v803_v57, %v806_v2  ;;  %v813_v8 = vsel %vm6436_vm4, %v811_v62, %v812_v55  ;;  %v4800_v12 = vcombine.low %v306_v0, %v316_v5  ;;  %v816_v41 = vrot.slane %v6502_v27, 5  ;;  %v6123_v57 = vld [vmem:[%s8392_s1 + $0xd0] sm:$0xff]  }
  0x1f   : > { %v819_v44 = vrot.slane %v6507_v30, 5  ;;  %v823_v51 = vrot.slane %v265_v38, 5  ;;  %v826_v53 = vrot.slane %v285_v45, 5  ;;  %v689_v31 = vld [vmem:[%s6395_s10 + $0x90] sm:$0xe] }
  0x20   : > { %5332 = vmatpush3.bf16.msra.mxu0 %v6106_v14  ;;  %5887 = vmatpush3.bf16.msra.mxu1 %v6359_v13  ;;  %v4825_v14 = vcombine.low %v810_v3, %v813_v8  ;;  %v817_v54 = vsel %vm6436_vm4, %v4778_v40, %v816_v41  ;;  %v818_v55 = vrot.slane %v816_v41, 4  ;;  %v6125_v8 = vld [vmem:[%s8392_s1 + $0xd8] sm:$0xff]   ;;  %v4780_v41 = vrot.slane %v689_v31, 9 }
  0x21   : > { %5333 = vmatprep.subr.bf16.mxu0 %v6107_v15  ;;  %5880 = vmatprep.subr.bf16.mxu1 %v6376_v16  ;;  %v6486_v15 = vld [vmem:[%s6395_s10 + $0xc] sm:$0xf]  ;;  %v825_v60 = vrot.slane %v823_v51, 4 }
  0x22   : > { %5763 = vmatprep.mubr.bf16.mxu1 %v4824_v6  ;;  %v321_v23 = vshll.u32 %v6486_v15, 16  ;;  %1288 = vmatprep.mubr.bf16.mxu0 %v4800_v12  ;;  %v820_v62 = vsel %vm6436_vm4, %v818_v55, %v819_v44  ;;  %v6546_v12 = vld [vmem:[%s6395_s10 + $0x18] sm:$0xf] }
  0x23   : > { %v4826_v5 = vcombine.low %v817_v54, %v820_v62  ;;  %v827_v6 = vsel %vm6436_vm4, %v825_v60, %v826_v53 }
  0x24   : > { %5334 = vmatpush3.bf16.msra.mxu0 %v6109_v17  ;;  %5888 = vmatpush3.bf16.msra.mxu1 %v6376_v16  ;;  %v6489_v17 = vld [vmem:[%s6395_s10 + $0x10] sm:$0xf]  ;;  %v323_v35 = vrot.slane %v321_v23, 5 }
  0x25   : > { %5335 = vmatprep.subr.bf16.mxu0 %v6110_v18  ;;  %5881 = vmatprep.subr.bf16.mxu1 %v6390_v19  ;;  %v6492_v18 = vld [vmem:[%s6395_s10 + $0x14] sm:$0x1]  ;;  %v327_v24 = vshll.u32 %v6489_v17, 16  ;;  %v331_v26 = vshrl.u32 %v6489_v17, 16 }
  0x26   : > { %v756_v29 = vrot.slane %v6492_v18, 5 }
  0x27   : > { %v329_v36 = vrot.slane %v327_v24, 5  ;;  %v333_v37 = vrot.slane %v331_v26, 4  ;;  %v267_v24 = vld [vmem:[%s6395_s10 + $0x94] sm:$0xf] }
  0x28   : > { %5336 = vmatpush3.bf16.msra.mxu0 %v6112_v20  ;;  %5889 = vmatpush3.bf16.msra.mxu1 %v6390_v19  ;;  %v6120_v20 = vld [vmem:[%s8392_s1 + $0xc8] sm:$0xff]  }
  0x29   : > { %5337 = vmatprep.subr.bf16.mxu0 %v6113_v21  ;;  %5882 = vmatprep.subr.bf16.mxu1 %v6406_v22  ;;  %v318_v21 = vshrl.u32 %v6486_v15, 16  ;;  %v334_v47 = vor.u32 %v333_v37, %v329_v36 }
  0x2b   : > { %v320_v34 = vrot.slane %v318_v21, 4  ;;  %v335_v59 = vrot.slane %v334_v47, 4 }
  0x2c   : > { %5338 = vmatpush3.bf16.msra.mxu0 %v6115_v28  ;;  %5890 = vmatpush3.bf16.msra.mxu1 %v6406_v22  ;;  %v337_v28 = vshll.u32 %v6492_v18, 16  ;;  %v6170_v18 = vld [vmem:[%s8392_s1 + $0x1c8] sm:$0xff]  }
  0x2d   : > { %5731 = vmatprep.subr.bf16.mxu0 %v6306_v1  ;;  %5459 = vmatprep.subr.bf16.mxu1 %v6117_v49  ;;  %v324_v46 = vor.u32 %v323_v35, %v320_v34  ;;  %v688_v49 = vld [vmem:[%s6395_s10 + $0x84] sm:$0xe]  ;;  %v830_v34 = vrot.slane %v267_v24, 5 }
  0x2e   : > { %v339_v39 = vrot.slane %v337_v28, 5  ;;  %v286_v28 = vld [vmem:[%s6395_s10 + $0x98] sm:$0x1] }
  0x2f   : > { %5764 = vmatmul.mubr.bf16.vlgmr.msra.gmra.mrb[0].mxu1 %v4825_v14  ;;  %1289 = vmatmul.mubr.bf16.vlgmr.msra.gmra.mrb[0].mxu0 %v4784_v61  ;;  %v325_v58 = vrot.slane %v324_v46, 4  ;;  %v6124_v61 = vld [vmem:[%s8392_s1 + $0x118] sm:$0xff]   ;;  %v832_v44 = vrot.slane %v830_v34, 4  ;;  %v833_v45 = vrot.slane %v286_v28, 5  ;;  %v287_v46 = vld [vmem:[%s6395_s10 + $0xa4] sm:$0x1]  ;;  %v831_v55 = vsel %vm6436_vm4, %v4780_v41, %v830_v34 }
  0x30   : > { %5460 = vmatpush3.bf16.msra.mxu1 %v6118_v63  ;;  %5732 = vmatpush3.bf16.msra.mxu0 %v6306_v1  ;;  %v4779_v1 = vrot.slane %v688_v49, 9  ;;  %v4785_v63 = vcombine.low %v6486_v15, %v6489_v17  ;;  %v340_v3 = vsel %vm6453_vm5, %v335_v59, %v339_v39  ;;  %v6549_v14 = vld [vmem:[%s6395_s10 + $0x1c] sm:$0xf]  ;;  %v276_v15 = vld [vmem:[%s6395_s10 + $0x20] sm:$0x1]  ;;  %v342_v17 = vshrl.u32 %v6546_v12, 16 }
  0x31   : > { %5461 = vmatprep.subr.bf16.mxu1 %v6119_v9  ;;  %5733 = vmatprep.subr.bf16.mxu0 %v6319_v4  ;;  %v330_v2 = vsel %vm6453_vm5, %v325_v58, %v329_v36  ;;  %v351_v21 = vshll.u32 %v6549_v14, 16  ;;  %v355_v23 = vshrl.u32 %v6549_v14, 16  ;;  %v361_v26 = vshll.u32 %v276_v15, 16  ;;  %v269_v39 = vld [vmem:[%s6395_s10 + $0xa0] sm:$0xf] }
  0x32   : > { %v824_v0 = vsel %vm6436_vm4, %v4779_v1, %v823_v51  ;;  %v4801_v9 = vcombine.low %v330_v2, %v340_v3  ;;  %5767 = vmatprep.mubr.bf16.mxu1 %v4826_v5  ;;  %v344_v35 = vrot.slane %v342_v17, 4  ;;  %v690_v51 = vld [vmem:[%s6395_s10 + $0x9c] sm:$0xe]  ;;  %v837_v53 = vrot.slane %v269_v39, 5  ;;  %v691_v28 = vld [vmem:[%s6395_s10 + $0xa8] sm:$0xe] }
  0x33   : > { %v353_v37 = vrot.slane %v351_v21, 5  ;;  %v357_v38 = vrot.slane %v355_v23, 4  ;;  %v363_v40 = vrot.slane %v361_v26, 5  ;;  %v840_v54 = vrot.slane %v287_v46, 5  ;;  %v271_v23 = vld [vmem:[%s6395_s10 + $0xac] sm:$0xf] }
  0x34   : > { %5462 = vmatpush3.bf16.msra.mxu1 %v6120_v20  ;;  %5734 = vmatpush3.bf16.msra.mxu0 %v6319_v4  ;;  %v4827_v4 = vcombine.low %v824_v0, %v827_v6  ;;  %v345_v20 = vshll.u32 %v6546_v12, 16  ;;  %v834_v1 = vsel %vm6436_vm4, %v832_v44, %v833_v45  ;;  %v839_v60 = vrot.slane %v837_v53, 4  ;;  %v6129_v0 = vld [vmem:[%s8392_s1 + $0x128] sm:$0xff]   ;;  %v288_v26 = vld [vmem:[%s6395_s10 + $0xb0] sm:$0x1] }
  0x35   : > { %5463 = vmatprep.subr.bf16.mxu1 %v6122_v56  ;;  %5735 = vmatprep.subr.bf16.mxu0 %v6331_v7  ;;  %v358_v49 = vor.u32 %v357_v38, %v353_v37  ;;  %v4781_v56 = vrot.slane %v690_v51, 9  ;;  %v4828_v59 = vcombine.low %v831_v55, %v834_v1  ;;  %v4786_v62 = vcombine.low %v6546_v12, %v6549_v14  ;;  %v6600_v12 = vld [vmem:[%s6395_s10 + $0x28] sm:$0xf]  ;;  %v277_v14 = vld [vmem:[%s6395_s10 + $0x2c] sm:$0x1] }
  0x36   : > { %1296 = vmatprep.mubr.bf16.mxu0 %v4801_v9  ;;  %v347_v36 = vrot.slane %v345_v20, 5  ;;  %v6584_v2 = vrot.slane %v495_v11, 5  ;;  %v841_v6 = vsel %vm6436_vm4, %v839_v60, %v840_v54  ;;  %v375_v20 = vshll.u32 %v6600_v12, 16  ;;  %v273_v38 = vld [vmem:[%s6395_s10 + $0xb8] sm:$0xf] }
  0x37   : > { %5768 = vmatmul.mubr.bf16.gmra.mrb[4].mxu1 %v4827_v4  ;;  %1297 = vmatmul.mubr.bf16.gmra.mrb[4].mxu0 %v4785_v63  ;;  %v359_v58 = vrot.slane %v358_v49, 4  ;;  %v838_v63 = vsel %vm6436_vm4, %v4781_v56, %v837_v53  ;;  %v6597_v4 = vld [vmem:[%s6395_s10 + $0x24] sm:$0xf]  ;;  %v379_v21 = vshrl.u32 %v6600_v12, 16  ;;  %v385_v24 = vshll.u32 %v277_v14, 16  ;;  %v6132_v56 = vld [vmem:[%s8392_s1 + $0x130] sm:$0xff]  }
  0x38   : > { %5464 = vmatpush3.bf16.msra.mxu1 %v6123_v57  ;;  %5736 = vmatpush3.bf16.msra.mxu0 %v6331_v7  ;;  %v348_v47 = vor.u32 %v347_v36, %v344_v35  ;;  %v6127_v57 = vld [vmem:[%s8392_s1 + $0x120] sm:$0xff]   ;;  %v4829_v9 = vcombine.low %v838_v63, %v841_v6  ;;  %v366_v15 = vshrl.u32 %v6597_v4, 16  ;;  %v369_v17 = vshll.u32 %v6597_v4, 16  ;;  %v289_v45 = vld [vmem:[%s6395_s10 + $0xbc] sm:$0x1] }
  0x39   : > { %5465 = vmatprep.subr.bf16.mxu1 %v6124_v61  ;;  %5737 = vmatprep.subr.bf16.mxu0 %v6346_v10  ;;  %v6128_v61 = vld [vmem:[%s8392_s1 + $0xe0] sm:$0xff]   ;;  %v364_v5 = vsel %vm6453_vm5, %v359_v58, %v363_v40  ;;  %v844_v31 = vrot.slane %v271_v23, 5  ;;  %v377_v36 = vrot.slane %v375_v20, 5  ;;  %v387_v39 = vrot.slane %v385_v24, 5  ;;  %v692_v49 = vld [vmem:[%s6395_s10 + $0xb4] sm:$0xe] }
  0x3a   : > { %v349_v7 = vrot.slane %v348_v47, 4  ;;  %5771 = vmatprep.mubr.bf16.mxu1 %v4828_v59  ;;  %v368_v34 = vrot.slane %v366_v15, 4  ;;  %v371_v35 = vrot.slane %v369_v17, 5  ;;  %v4782_v40 = vrot.slane %v691_v28, 9  ;;  %v6133_v59 = vld [vmem:[%s8392_s1 + $0xf0] sm:$0xff]   ;;  %v6135_v6 = vld [vmem:[%s8392_s1 + $0xf8] sm:$0xff]  }
  0x3b   : > { %v846_v41 = vrot.slane %v844_v31, 4  ;;  %v847_v44 = vrot.slane %v288_v26, 5  ;;  %v851_v51 = vrot.slane %v273_v38, 5  ;;  %v854_v53 = vrot.slane %v289_v45, 5  ;;  %v6659_v20 = vld [vmem:[%s6395_s10 + $0xc] sm:$0xf] }
  0x3c   : > { %5466 = vmatpush3.bf16.msra.mxu1 %v6125_v8  ;;  %5738 = vmatpush3.bf16.msra.mxu0 %v6346_v10  ;;  %v354_v3 = vsel %vm6453_vm5, %v349_v7, %v353_v37  ;;  %v6130_v10 = vld [vmem:[%s8392_s1 + $0xe8] sm:$0xff]   ;;  %v499_v8 = vshrl.u32 %v6429_v33, 16  ;;  %v381_v37 = vrot.slane %v379_v21, 4  ;;  %v372_v46 = vor.u32 %v371_v35, %v368_v34  ;;  %v6662_v23 = vld [vmem:[%s6395_s10 + $0x10] sm:$0xf] }
  0x3d   : > { %5467 = vmatprep.subr.bf16.mxu1 %v6127_v57  ;;  %v4802_v11 = vcombine.low %v354_v3, %v364_v5  ;;  %5739 = vmatprep.subr.bf16.mxu0 %v6359_v13  ;;  %v845_v54 = vsel %vm6436_vm4, %v4782_v40, %v844_v31  ;;  %v848_v55 = vsel %vm6436_vm4, %v846_v41, %v847_v44  ;;  %v4783_v1 = vrot.slane %v692_v49, 9  ;;  %v4888_v24 = vld [vmem:[%s6395_s10 + $0x14] sm:$0x1]  ;;  %v6678_v49 = vld [vmem:[%s6395_s10 + $0x3c] sm:$0xf] }
  0x3e   : > { %v382_v47 = vor.u32 %v381_v37, %v377_v36  ;;  %v373_v57 = vrot.slane %v372_v46, 4  ;;  %v4830_v7 = vcombine.low %v845_v54, %v848_v55  ;;  %v853_v58 = vrot.slane %v851_v51, 4  ;;  %v6686_v55 = vld [vmem:[%s6395_s10 + $0x40] sm:$0xf] }
  0x3f   : > { %1304 = vmatprep.mubr.bf16.mxu0 %v4802_v11  ;;  %5772 = vmatmul.mubr.bf16.gmra.mrb[8].mxu1 %v4829_v9  ;;  %v4787_v60 = vcombine.low %v6597_v4, %v6600_v12  ;;  %v6633_v63 = vrot.slane %v499_v8, 4  ;;  %v6647_v11 = vld [vmem:[%s6395_s10 + $0x30] sm:$0xf]  ;;  %v6650_v9 = vld [vmem:[%s6395_s10 + $0x34] sm:$0xf]  ;;  %v1660_v26 = vshrl.u32 %v6659_v20, 16  ;;  %v4936_v54 = vcombine.low %v6659_v20, %v6662_v23 }
  0x40   : > { %5468 = vmatpush3.bf16.msra.mxu1 %v6128_v61  ;;  %1305 = vmatmul.mubr.bf16.gmra.mrb[8].mxu0 %v4786_v62  ;;  %v852_v61 = vsel %vm6436_vm4, %v4783_v1, %v851_v51  ;;  %v6134_v62 = vld [vmem:[%s8392_s1 + $0x138] sm:$0xff]   ;;  %v855_v5 = vsel %vm6436_vm4, %v853_v58, %v854_v53  ;;  %v390_v12 = vshrl.u32 %v6647_v11, 16  ;;  %v393_v14 = vshll.u32 %v6647_v11, 16  ;;  %v279_v58 = vld [vmem:[%s6395_s10 + $0x44] sm:$0x1] }
  0x41   : > { %5469 = vmatprep.subr.bf16.mxu1 %v6129_v0  ;;  %5740 = vmatpush3.bf16.msra.mxu0 %v6359_v13  ;;  %v383_v13 = vrot.slane %v382_v47, 4  ;;  %v378_v0 = vsel %vm6453_vm5, %v373_v57, %v377_v36  ;;  %v4831_v8 = vcombine.low %v852_v61, %v855_v5  ;;  %v278_v4 = vld [vmem:[%s6395_s10 + $0x38] sm:$0x1]  ;;  %v399_v15 = vshll.u32 %v6650_v9, 16  ;;  %v6675_v47 = vld [vmem:[%s8392_s1 + $0x140] sm:$0xff]  }
  0x42   : > { %5741 = vmatprep.subr.bf16.mxu0 %v6376_v16  ;;  %5775 = vmatprep.mubr.bf16.mxu1 %v4830_v7  ;;  %v403_v17 = vshrl.u32 %v6650_v9, 16  ;;  %v409_v21 = vshll.u32 %v278_v4, 16  ;;  %v502_v28 = vor.u32 %v6633_v63, %v6584_v2  ;;  %v392_v31 = vrot.slane %v390_v12, 4  ;;  %v6703_v4 = vld [vmem:[%s6395_s10 + $0x1c] sm:$0xf] }
  0x43   : > { %v388_v3 = vsel %vm6453_vm5, %v383_v13, %v387_v39  ;;  %v395_v34 = vrot.slane %v393_v14, 5  ;;  %v401_v35 = vrot.slane %v399_v15, 5  ;;  %v1662_v38 = vrot.slane %v1660_v26, 4 }
  0x44   : > { %5470 = vmatpush3.bf16.msra.mxu1 %v6130_v10  ;;  %v519_v10 = vshll.u32 %v6441_v43, 16  ;;  %v405_v36 = vrot.slane %v403_v17, 4  ;;  %v411_v37 = vrot.slane %v409_v21, 5  ;;  %v1663_v39 = vshll.u32 %v6659_v20, 16  ;;  %v6708_v21 = vld [vmem:[%s6395_s10 + $0x20] sm:$0x1] }
  0x45   : > { %5471 = vmatprep.subr.bf16.mxu1 %v6132_v56  ;;  %5742 = vmatpush3.bf16.msra.mxu0 %v6376_v16  ;;  %v4803_v16 = vcombine.low %v378_v0, %v388_v3  ;;  %v1669_v40 = vshll.u32 %v6662_v23, 16  ;;  %v396_v41 = vor.u32 %v395_v34, %v392_v31  ;;  %v1673_v45 = vshrl.u32 %v6662_v23, 16 }
  0x46   : > { %5743 = vmatprep.subr.bf16.mxu0 %v6390_v19  ;;  %v406_v44 = vor.u32 %v405_v36, %v401_v35  ;;  %v1679_v46 = vshll.u32 %v4888_v24, 16  ;;  %v1665_v51 = vrot.slane %v1663_v39, 5  ;;  %v423_v61 = vshll.u32 %v6686_v55, 16 }
  0x47   : > { %1312 = vmatprep.mubr.bf16.mxu0 %v4803_v16  ;;  %5776 = vmatmul.mubr.bf16.gmra.mrb[12].mxu1 %v4831_v8  ;;  %v1671_v53 = vrot.slane %v1669_v40, 5  ;;  %v397_v1 = vrot.slane %v396_v41, 4  ;;  %v1675_v57 = vrot.slane %v1673_v45, 4  ;;  %v427_v5 = vshrl.u32 %v6686_v55, 16  ;;  %v6143_v40 = vld [vmem:[%s8392_s1 + $0x148] sm:$0xff]  }
  0x48   : > { %5472 = vmatpush3.bf16.msra.mxu1 %v6133_v59  ;;  %1313 = vmatmul.mubr.bf16.gmra.mrb[12].mxu0 %v4787_v60  ;;  %v407_v56 = vrot.slane %v406_v44, 4  ;;  %v1681_v13 = vrot.slane %v1679_v46, 5  ;;  %v1666_v7 = vor.u32 %v1665_v51, %v1662_v38  ;;  %v414_v59 = vshrl.u32 %v6678_v49, 16  ;;  %v6721_v51 = vld [vmem:[%s6395_s10 + $0x48] sm:$0xf] }
  0x49   : > { %5473 = vmatprep.subr.bf16.mxu1 %v6134_v62  ;;  %5744 = vmatpush3.bf16.msra.mxu0 %v6390_v19  ;;  %v4788_v19 = vcombine.low %v6647_v11, %v6650_v9  ;;  %v417_v60 = vshll.u32 %v6678_v49, 16  ;;  %v402_v62 = vsel %vm6453_vm5, %v397_v1, %v401_v35  ;;  %v1676_v3 = vor.u32 %v1675_v57, %v1671_v53  ;;  %v6729_v57 = vld [vmem:[%s6395_s10 + $0x4c] sm:$0xf] }
  0x4a   : > { %5745 = vmatprep.subr.bf16.mxu0 %v6406_v22  ;;  %v412_v0 = vsel %vm6453_vm5, %v407_v56, %v411_v37  ;;  %v1667_v8 = vrot.slane %v1666_v7, 4  ;;  %v416_v11 = vrot.slane %v414_v59, 4  ;;  %v429_v14 = vrot.slane %v427_v5, 4 }
  0x4b   : > { %v4804_v16 = vcombine.low %v402_v62, %v412_v0  ;;  %v419_v9 = vrot.slane %v417_v60, 5  ;;  %v1677_v12 = vrot.slane %v1676_v3, 4  ;;  %v433_v15 = vshll.u32 %v279_v58, 16  ;;  %v6168_v0 = vld [vmem:[%s8392_s1 + $0x1c0] sm:$0xff]  }
  0x4c   : > { %5474 = vmatpush3.bf16.msra.mxu1 %v6135_v6  ;;  %v6700_v6 = vld [vmem:[%s6395_s10 + $0x18] sm:$0xf]  ;;  %v1672_v17 = vsel %vm6453_vm5, %v1667_v8, %v1671_v53  ;;  %v1693_v35 = vshll.u32 %v6703_v4, 16  ;;  %v1697_v45 = vshrl.u32 %v6703_v4, 16  ;;  %v1703_v46 = vshll.u32 %v6708_v21, 16 }
  0x4d   : > { %5779 = vmatprep.subr.bf16.mxu1 %v6675_v47  ;;  %5746 = vmatpush3.bf16.msra.mxu0 %v6406_v22  ;;  %v425_v22 = vrot.slane %v423_v61, 5  ;;  %v420_v20 = vor.u32 %v419_v9, %v416_v11  ;;  %v1684_v23 = vshrl.u32 %v6700_v6, 16  ;;  %v1687_v24 = vshll.u32 %v6700_v6, 16  ;;  %v6737_v61 = vld [vmem:[%s6395_s10 + $0x24] sm:$0xf] }
  0x4e   : > { %1320 = vmatprep.mubr.bf16.mxu0 %v4804_v16  ;;  %v1682_v26 = vsel %vm6453_vm5, %v1677_v12, %v1681_v13  ;;  %v435_v34 = vrot.slane %v433_v15, 5  ;;  %v1695_v44 = vrot.slane %v1693_v35, 5  ;;  %v2119_v1 = vrot.slane %v6708_v21, 5  ;;  %v280_v13 = vld [vmem:[%s6395_s10 + $0x50] sm:$0x1]  ;;  %5595 = vmatprep.subr.bf16.mxu0 %v6168_v0  ;;  %v6153_v35 = vld [vmem:[%s8392_s1 + $0x158] sm:$0xff]  }
  0x4f   : > { %v430_v31 = vor.u32 %v429_v14, %v425_v22  ;;  %v4952_v36 = vcombine.low %v1672_v17, %v1682_v26  ;;  %v421_v37 = vrot.slane %v420_v20, 4  ;;  %v1686_v38 = vrot.slane %v1684_v23, 4  ;;  %v6748_v8 = vld [vmem:[%s6395_s10 + $0x28] sm:$0xf]  ;;  %v4890_v12 = vld [vmem:[%s6395_s10 + $0x2c] sm:$0x1] }
  0x50   : > { %1321 = vmatmul.mubr.bf16.gmra.mrb[16].mxu0 %v4788_v19  ;;  %v1689_v39 = vrot.slane %v1687_v24, 5  ;;  %v4789_v56 = vcombine.low %v6678_v49, %v6686_v55  ;;  %v1699_v58 = vrot.slane %v1697_v45, 4  ;;  %v1705_v59 = vrot.slane %v1703_v46, 5  ;;  %v6784_v0 = vld [vmem:[%s6395_s10 + $0x30] sm:$0xf] }
  0x51   : > { %v431_v41 = vrot.slane %v430_v31, 4  ;;  %2652 = vmatprep.mubr.bf16.mxu1 %v4952_v36  ;;  %v426_v53 = vsel %vm6453_vm5, %v421_v37, %v425_v22  ;;  %v4937_v60 = vcombine.low %v6700_v6, %v6703_v4  ;;  %v438_v55 = vshrl.u32 %v6721_v51, 16 }
  0x52   : > { %v1690_v19 = vor.u32 %v1689_v39, %v1686_v38  ;;  %2653 = vmatmul.mubr.bf16.vlgmr.msra.gmra.mrb[16].mxu1 %v4936_v54  ;;  %v441_v54 = vshll.u32 %v6721_v51, 16  ;;  %v1700_v3 = vor.u32 %v1699_v58, %v1695_v44  ;;  %v447_v5 = vshll.u32 %v6729_v57, 16 }
  0x53   : > { %v436_v7 = vsel %vm6453_vm5, %v431_v41, %v435_v34  ;;  %5780 = vmatpush3.bf16.msra.mxu1 %v6675_v47  ;;  %v451_v6 = vshrl.u32 %v6729_v57, 16  ;;  %v457_v16 = vshll.u32 %v280_v13, 16  ;;  %v6148_v47 = vld [vmem:[%s8392_s1 + $0x150] sm:$0xff]   ;;  %v440_v9 = vrot.slane %v438_v55, 4 }
  0x54   : > { %v4805_v62 = vcombine.low %v426_v53, %v436_v7  ;;  %v1691_v49 = vrot.slane %v1690_v19, 4  ;;  %5781 = vmatprep.subr.bf16.mxu1 %v6143_v40  ;;  %v443_v4 = vrot.slane %v441_v54, 5  ;;  %v1708_v22 = vshrl.u32 %v6737_v61, 16  ;;  %v6760_v34 = vld [vmem:[%s6395_s10 + $0x54] sm:$0xf] }
  0x55   : > { %v1701_v14 = vrot.slane %v1700_v3, 4  ;;  %v449_v15 = vrot.slane %v447_v5, 5  ;;  %v453_v17 = vrot.slane %v451_v6, 4  ;;  %v459_v20 = vrot.slane %v457_v16, 5  ;;  %v6791_v16 = vld [vmem:[%s6395_s10 + $0x34] sm:$0xf] }
  0x56   : > { %1328 = vmatprep.mubr.bf16.mxu0 %v4805_v62  ;;  %v1696_v11 = vsel %vm6453_vm5, %v1691_v49, %v1695_v44  ;;  %v444_v23 = vor.u32 %v443_v4, %v440_v9  ;;  %v1710_v24 = vrot.slane %v1708_v22, 4  ;;  %v1711_v26 = vshll.u32 %v6737_v61, 16  ;;  %v281_v62 = vld [vmem:[%s6395_s10 + $0x5c] sm:$0x1]  ;;  %v4891_v4 = vld [vmem:[%s6395_s10 + $0x38] sm:$0x1] }
  0x57   : > { %v1717_v31 = vshll.u32 %v6748_v8, 16  ;;  %5782 = vmatpush3.bf16.msra.mxu1 %v6143_v40  ;;  %v1706_v36 = vsel %vm6453_vm5, %v1701_v14, %v1705_v59  ;;  %v454_v37 = vor.u32 %v453_v17, %v449_v15  ;;  %v1721_v38 = vshrl.u32 %v6748_v8, 16  ;;  %v6769_v40 = vld [vmem:[%s6395_s10 + $0x58] sm:$0xf] }
  0x58   : > { %1329 = vmatmul.mubr.bf16.gmra.mrb[20].mxu0 %v4789_v56  ;;  %v1727_v39 = vshll.u32 %v4890_v12, 16  ;;  %5783 = vmatprep.subr.bf16.mxu1 %v6148_v47  ;;  %v4953_v41 = vcombine.low %v1696_v11, %v1706_v36  ;;  %v445_v44 = vrot.slane %v444_v23, 4  ;;  %v1713_v45 = vrot.slane %v1711_v26, 5  ;;  %v6163_v26 = vld [vmem:[%s8392_s1 + $0x168] sm:$0xff]  }
  0x59   : > { %v1719_v46 = vrot.slane %v1717_v31, 5  ;;  %v455_v53 = vrot.slane %v454_v37, 4  ;;  %v1723_v19 = vrot.slane %v1721_v38, 4  ;;  %v4790_v13 = vcombine.low %v6721_v51, %v6729_v57 }
  0x5a   : > { %v1729_v56 = vrot.slane %v1727_v39, 5  ;;  %2660 = vmatprep.mubr.bf16.mxu1 %v4953_v41  ;;  %v450_v7 = vsel %vm6453_vm5, %v445_v44, %v449_v15  ;;  %v1714_v58 = vor.u32 %v1713_v45, %v1710_v24  ;;  %v4938_v59 = vcombine.low %v6737_v61, %v6748_v8  ;;  %v6158_v61 = vld [vmem:[%s8392_s1 + $0x160] sm:$0xff]  }
  0x5b   : > { %v462_v49 = vshrl.u32 %v6760_v34, 16  ;;  %5784 = vmatpush3.bf16.msra.mxu1 %v6148_v47  ;;  %v460_v55 = vsel %vm6453_vm5, %v455_v53, %v459_v20  ;;  %v1724_v54 = vor.u32 %v1723_v19, %v1719_v46  ;;  %v465_v51 = vshll.u32 %v6760_v34, 16  ;;  %v6805_v39 = vld [vmem:[%s6395_s10 + $0x60] sm:$0xf] }
  0x5c   : > { %2661 = vmatmul.mubr.bf16.gmra.mrb[20].mxu1 %v4937_v60  ;;  %v471_v57 = vshll.u32 %v6769_v40, 16  ;;  %5785 = vmatprep.subr.bf16.mxu1 %v6153_v35  ;;  %v4806_v3 = vcombine.low %v450_v7, %v460_v55  ;;  %v1715_v5 = vrot.slane %v1714_v58, 4  ;;  %v475_v60 = vshrl.u32 %v6769_v40, 16  ;;  %v6819_v55 = vld [vmem:[%s6395_s10 + $0x40] sm:$0xf] }
  0x5d   : > { %v464_v6 = vrot.slane %v462_v49, 4  ;;  %v1725_v8 = vrot.slane %v1724_v54, 4  ;;  %v467_v47 = vrot.slane %v465_v51, 5  ;;  %v481_v9 = vshll.u32 %v281_v62, 16 }
  0x5e   : > { %v473_v11 = vrot.slane %v471_v57, 5  ;;  %1336 = vmatprep.mubr.bf16.mxu0 %v4806_v3  ;;  %v1720_v12 = vsel %vm6453_vm5, %v1715_v5, %v1719_v46  ;;  %v477_v22 = vrot.slane %v475_v60, 4  ;;  %v1732_v14 = vshrl.u32 %v6784_v0, 16  ;;  %v4892_v57 = vld [vmem:[%s6395_s10 + $0x44] sm:$0x1] }
  0x5f   : > { %v1735_v15 = vshll.u32 %v6784_v0, 16  ;;  %5786 = vmatpush3.bf16.msra.mxu1 %v6153_v35  ;;  %v1730_v17 = vsel %vm6453_vm5, %v1725_v8, %v1729_v56  ;;  %v468_v20 = vor.u32 %v467_v47, %v464_v6  ;;  %v483_v23 = vrot.slane %v481_v9, 5  ;;  %v6178_v9 = vld [vmem:[%s8392_s1 + $0x178] sm:$0xff]  }
  0x60   : > { %1337 = vmatmul.mubr.bf16.gmra.mrb[24].mxu0 %v4790_v13  ;;  %v1741_v24 = vshll.u32 %v6791_v16, 16  ;;  %5787 = vmatprep.subr.bf16.mxu1 %v6158_v61  ;;  %v4954_v31 = vcombine.low %v1720_v12, %v1730_v17  ;;  %v478_v36 = vor.u32 %v477_v22, %v473_v11  ;;  %v1734_v37 = vrot.slane %v1732_v14, 4  ;;  %v6813_v13 = vld [vmem:[%s6395_s10 + $0x3c] sm:$0xf]  ;;  %v6846_v14 = vld [vmem:[%s6395_s10 + $0x6c] sm:$0xf] }
  0x61   : > { %v1737_v38 = vrot.slane %v1735_v15, 5  ;;  %v469_v35 = vrot.slane %v468_v20, 4  ;;  %v1745_v44 = vshrl.u32 %v6791_v16, 16  ;;  %v1751_v45 = vshll.u32 %v4891_v4, 16 }
  0x62   : > { %v1743_v41 = vrot.slane %v1741_v24, 5  ;;  %2668 = vmatprep.mubr.bf16.mxu1 %v4954_v31  ;;  %v479_v46 = vrot.slane %v478_v36, 4  ;;  %v4791_v19 = vcombine.low %v6760_v34, %v6769_v40  ;;  %v4939_v56 = vcombine.low %v6784_v0, %v6791_v16  ;;  %v6167_v34 = vld [vmem:[%s8392_s1 + $0x170] sm:$0xff]  }
  0x63   : > { %v1738_v53 = vor.u32 %v1737_v38, %v1734_v37  ;;  %5788 = vmatpush3.bf16.msra.mxu1 %v6158_v61  ;;  %v474_v7 = vsel %vm6453_vm5, %v469_v35, %v473_v11  ;;  %v1747_v58 = vrot.slane %v1745_v44, 4  ;;  %v1753_v62 = vrot.slane %v1751_v45, 5  ;;  %v6853_v37 = vld [vmem:[%s6395_s10 + $0x48] sm:$0xf] }
  0x64   : > { %2669 = vmatmul.mubr.bf16.gmra.mrb[24].mxu1 %v4938_v59  ;;  %v486_v49 = vshrl.u32 %v6805_v39, 16  ;;  %5789 = vmatprep.subr.bf16.mxu1 %v6163_v26  ;;  %v484_v40 = vsel %vm6453_vm5, %v479_v46, %v483_v23  ;;  %v489_v59 = vshll.u32 %v6805_v39, 16  ;;  %v503_v51 = vrot.slane %v502_v28, 4 }
  0x65   : > { %v1739_v54 = vrot.slane %v1738_v53, 4  ;;  %v4807_v0 = vcombine.low %v474_v7, %v484_v40  ;;  %v1748_v61 = vor.u32 %v1747_v58, %v1743_v41  ;;  %v1756_v5 = vshrl.u32 %v6813_v13, 16  ;;  %v6865_v53 = vld [vmem:[%s6395_s10 + $0x4c] sm:$0xf] }
  0x66   : > { %v488_v3 = vrot.slane %v486_v49, 4  ;;  %v491_v60 = vrot.slane %v489_v59, 5  ;;  %v508_v16 = vsel %vm6453_vm5, %v503_v51, %v6457_v52  ;;  %v1759_v8 = vshll.u32 %v6813_v13, 16 }
  0x67   : > { %v1744_v6 = vsel %vm6453_vm5, %v1739_v54, %v1743_v41  ;;  %5790 = vmatpush3.bf16.msra.mxu1 %v6163_v26  ;;  %1344 = vmatprep.mubr.bf16.mxu0 %v4807_v0  ;;  %v1749_v63 = vrot.slane %v1748_v61, 4  ;;  %v1758_v28 = vrot.slane %v1756_v5, 4  ;;  %v1765_v47 = vshll.u32 %v6819_v55, 16 }
  0x68   : > { %v1769_v11 = vshrl.u32 %v6819_v55, 16  ;;  %5791 = vmatprep.subr.bf16.mxu1 %v6167_v34  ;;  %1345 = vmatmul.mubr.bf16.gmra.mrb[28].mxu0 %v4791_v19  ;;  %v492_v4 = vor.u32 %v491_v60, %v488_v3  ;;  %v1761_v12 = vrot.slane %v1759_v8, 5  ;;  %v1775_v52 = vshll.u32 %v4892_v57, 16  ;;  %v6877_v57 = vld [vmem:[%s6395_s10 + $0x78] sm:$0xf] }
  0x69   : > { %v4792_v22 = vcombine.low %v6805_v39, %v6429_v33  ;;  %v1754_v15 = vsel %vm6453_vm5, %v1749_v63, %v1753_v62  ;;  %v1767_v17 = vrot.slane %v1765_v47, 5  ;;  %v4940_v23 = vcombine.low %v6813_v13, %v6819_v55  ;;  %v4893_v55 = vld [vmem:[%s6395_s10 + $0x50] sm:$0x1] }
  0x6a   : > { %v1771_v20 = vrot.slane %v1769_v11, 4  ;;  %v4955_v24 = vcombine.low %v1744_v6, %v1754_v15  ;;  %v493_v26 = vrot.slane %v492_v4, 4  ;;  %v1762_v31 = vor.u32 %v1761_v12, %v1758_v28  ;;  %v6884_v28 = vld [vmem:[%s6395_s10 + $0x54] sm:$0xf]  ;;  %v6890_v12 = vld [vmem:[%s6395_s10 + $0x58] sm:$0xf] }
  0x6b   : > { %v1777_v36 = vrot.slane %v1775_v52, 5  ;;  %5792 = vmatpush3.bf16.msra.mxu1 %v6167_v34  ;;  %v510_v33 = vshrl.u32 %v6846_v14, 16  ;;  %v513_v39 = vshll.u32 %v6846_v14, 16  ;;  %v521_v35 = vrot.slane %v519_v10, 5 }
  0x6c   : > { %v1772_v38 = vor.u32 %v1771_v20, %v1767_v17  ;;  %5793 = vmatprep.subr.bf16.mxu1 %v6178_v9  ;;  %2676 = vmatprep.mubr.bf16.mxu1 %v4955_v24  ;;  %v498_v41 = vsel %vm6453_vm5, %v493_v26, %v6584_v2  ;;  %v1763_v44 = vrot.slane %v1762_v31, 4  ;;  %v523_v45 = vshrl.u32 %v6441_v43, 16  ;;  %v4894_v31 = vld [vmem:[%s6395_s10 + $0x5c] sm:$0x1] }
  0x6d   : > { %v529_v46 = vshll.u32 %v6446_v48, 16  ;;  %2677 = vmatmul.mubr.bf16.gmra.mrb[28].mxu1 %v4939_v56  ;;  %v4808_v19 = vcombine.low %v498_v41, %v508_v16  ;;  %v512_v7 = vrot.slane %v510_v33, 4  ;;  %v515_v58 = vrot.slane %v513_v39, 5  ;;  %v6212_v16 = vld [vmem:[%s6395_s10 + $0x70] sm:$0xf] }
  0x6e   : > { %v1773_v13 = vrot.slane %v1772_v38, 4  ;;  %v1768_v10 = vsel %vm6453_vm5, %v1763_v44, %v1767_v17  ;;  %v525_v62 = vrot.slane %v523_v45, 4  ;;  %v1780_v2 = vshrl.u32 %v6853_v37, 16 }
  0x6f   : > { %v531_v49 = vrot.slane %v529_v46, 5  ;;  %5794 = vmatpush3.bf16.msra.mxu1 %v6178_v9  ;;  %1352 = vmatprep.mubr.bf16.mxu0 %v4808_v19  ;;  %v516_v48 = vor.u32 %v515_v58, %v512_v7  ;;  %v1783_v56 = vshll.u32 %v6853_v37, 16  ;;  %v1789_v34 = vshll.u32 %v6865_v53, 16  ;;  %v6910_v58 = vld [vmem:[%s6395_s10 + $0x84] sm:$0xf] }
  0x70   : > { %v1778_v43 = vsel %vm6453_vm5, %v1773_v13, %v1777_v36  ;;  %1353 = vmatmul.mubr.bf16.gmra.mrb[32].mxu0 %v4792_v22  ;;  %v526_v54 = vor.u32 %v525_v62, %v521_v35  ;;  %v1782_v59 = vrot.slane %v1780_v2, 4  ;;  %v1793_v51 = vshrl.u32 %v6865_v53, 16 }
  0x71   : > { %v4956_v40 = vcombine.low %v1768_v10, %v1778_v43  ;;  %v517_v0 = vrot.slane %v516_v48, 4  ;;  %v1785_v61 = vrot.slane %v1783_v56, 5  ;;  %v1791_v3 = vrot.slane %v1789_v34, 5  ;;  %v6213_v48 = vld [vmem:[%s6395_s10 + $0x7c] sm:$0xf] }
  0x72   : > { %v1799_v5 = vshll.u32 %v4893_v55, 16  ;;  %v527_v6 = vrot.slane %v526_v54, 4  ;;  %v1795_v60 = vrot.slane %v1793_v51, 4  ;;  %v4793_v8 = vcombine.low %v6846_v14, %v6212_v16 }
  0x73   : > { %2684 = vmatprep.mubr.bf16.mxu1 %v4956_v40  ;;  %v4941_v63 = vcombine.low %v6853_v37, %v6865_v53  ;;  %v522_v47 = vsel %vm6453_vm5, %v517_v0, %v521_v35  ;;  %v1786_v11 = vor.u32 %v1785_v61, %v1782_v59  ;;  %v534_v4 = vshrl.u32 %v6877_v57, 16  ;;  %v6918_v40 = vld [vmem:[%s6395_s10 + $0x60] sm:$0xf]  ;;  %v6924_v61 = vld [vmem:[%s6395_s10 + $0x64] sm:$0xf] }
  0x74   : > { %v1801_v9 = vrot.slane %v1799_v5, 5  ;;  %v532_v52 = vsel %vm6453_vm5, %v527_v6, %v531_v49  ;;  %v1796_v22 = vor.u32 %v1795_v60, %v1791_v3  ;;  %v537_v14 = vshll.u32 %v6877_v57, 16  ;;  %v6930_v6 = vld [vmem:[%s6395_s10 + $0x88] sm:$0xf] }
  0x75   : > { %v543_v15 = vshll.u32 %v6502_v27, 16  ;;  %2685 = vmatmul.mubr.bf16.gmra.mrb[32].mxu1 %v4940_v23  ;;  %v4809_v17 = vcombine.low %v522_v47, %v532_v52  ;;  %v1787_v20 = vrot.slane %v1786_v11, 4  ;;  %v536_v24 = vrot.slane %v534_v4, 4  ;;  %v6215_v4 = vld [vmem:[%s6395_s10 + $0x8c] sm:$0x1] }
  0x76   : > { %v547_v26 = vshrl.u32 %v6502_v27, 16  ;;  %v1797_v36 = vrot.slane %v1796_v22, 4  ;;  %v539_v37 = vrot.slane %v537_v14, 5  ;;  %v553_v33 = vshll.u32 %v6507_v30, 16  ;;  %v6189_v27 = vld [vmem:[%s8392_s1 + $0x200] sm:$0xff]  }
  0x77   : > { %v545_v38 = vrot.slane %v543_v15, 5  ;;  %1360 = vmatprep.mubr.bf16.mxu0 %v4809_v17  ;;  %v1792_v39 = vsel %vm6453_vm5, %v1787_v20, %v1791_v3  ;;  %v1804_v41 = vshrl.u32 %v6884_v28, 16  ;;  %v1807_v23 = vshll.u32 %v6884_v28, 16  ;;  %5827 = vmatprep.subr.bf16.mxu1 %v6189_v27  ;;  %v4895_v52 = vld [vmem:[%s6395_s10 + $0x68] sm:$0x1] }
  0x78   : > { %v549_v35 = vrot.slane %v547_v26, 4  ;;  %v1802_v44 = vsel %vm6453_vm5, %v1797_v36, %v1801_v9  ;;  %1361 = vmatmul.mubr.bf16.gmra.mrb[36].mxu0 %v4793_v8  ;;  %v540_v45 = vor.u32 %v539_v37, %v536_v24  ;;  %v555_v30 = vrot.slane %v553_v33, 5 }
  0x79   : > { %v1813_v46 = vshll.u32 %v6890_v12, 16  ;;  %v4957_v53 = vcombine.low %v1792_v39, %v1802_v44  ;;  %v1806_v13 = vrot.slane %v1804_v41, 4  ;;  %v1809_v7 = vrot.slane %v1807_v23, 5  ;;  %v6945_v39 = vld [vmem:[%s6395_s10 + $0x90] sm:$0xf] }
  0x7a   : > { %v550_v19 = vor.u32 %v549_v35, %v545_v38  ;;  %v541_v10 = vrot.slane %v540_v45, 4  ;;  %v1817_v49 = vshrl.u32 %v6890_v12, 16  ;;  %v1823_v55 = vshll.u32 %v4894_v31, 16 }
  0x7b   : > { %v1815_v62 = vrot.slane %v1813_v46, 5  ;;  %2692 = vmatprep.mubr.bf16.mxu1 %v4957_v53  ;;  %v1810_v43 = vor.u32 %v1809_v7, %v1806_v13  ;;  %v4794_v56 = vcombine.low %v6877_v57, %v6213_v48  ;;  %v4942_v34 = vcombine.low %v6884_v28, %v6890_v12 }
  0x7c   : > { %v551_v2 = vrot.slane %v550_v19, 4  ;;  %v546_v54 = vsel %vm6453_vm5, %v541_v10, %v545_v38  ;;  %v1819_v59 = vrot.slane %v1817_v49, 4  ;;  %v1825_v51 = vrot.slane %v1823_v55, 5  ;;  %v6955_v10 = vld [vmem:[%s6395_s10 + $0x6c] sm:$0xf] }
  0x7d   : > { %v558_v0 = vshrl.u32 %v6910_v58, 16  ;;  %2693 = vmatmul.mubr.bf16.gmra.mrb[36].mxu1 %v4941_v63  ;;  %v1811_v3 = vrot.slane %v1810_v43, 4  ;;  %v561_v5 = vshll.u32 %v6910_v58, 16  ;;  %v567_v60 = vshll.u32 %v6930_v6, 16 }
  0x7e   : > { %v556_v57 = vsel %vm6453_vm5, %v551_v2, %v555_v30  ;;  %v1820_v8 = vor.u32 %v1819_v59, %v1815_v62  ;;  %v571_v47 = vshrl.u32 %v6930_v6, 16  ;;  %v577_v12 = vshll.u32 %v6215_v4, 16  ;;  %v6961_v2 = vld [vmem:[%s6395_s10 + $0x70] sm:$0xf]  ;;  %v4896_v59 = vld [vmem:[%s6395_s10 + $0x74] sm:$0x1] }
  0x7f   : > { %v4810_v16 = vcombine.low %v546_v54, %v556_v57  ;;  %v560_v28 = vrot.slane %v558_v0, 4  ;;  %v1816_v11 = vsel %vm6453_vm5, %v1811_v3, %v1815_v62  ;;  %v563_v9 = vrot.slane %v561_v5, 5 }
  0x80   : > { %v569_v63 = vrot.slane %v567_v60, 5  ;;  %v1821_v22 = vrot.slane %v1820_v8, 4  ;;  %v573_v14 = vrot.slane %v571_v47, 4  ;;  %v1828_v15 = vshrl.u32 %v6918_v40, 16 }
  0x81   : > { %1368 = vmatprep.mubr.bf16.mxu0 %v4810_v16  ;;  %v1831_v17 = vshll.u32 %v6918_v40, 16  ;;  %v564_v20 = vor.u32 %v563_v9, %v560_v28  ;;  %v579_v24 = vrot.slane %v577_v12, 5  ;;  %v1837_v26 = vshll.u32 %v6924_v61, 16  ;;  %v6977_v16 = vld [vmem:[%s6395_s10 + $0x9c] sm:$0xf] }
  0x82   : > { %1369 = vmatmul.mubr.bf16.gmra.mrb[40].mxu0 %v4794_v56  ;;  %v1841_v31 = vshrl.u32 %v6924_v61, 16  ;;  %v1826_v36 = vsel %vm6453_vm5, %v1821_v22, %v1825_v51  ;;  %v574_v37 = vor.u32 %v573_v14, %v569_v63  ;;  %v1830_v38 = vrot.slane %v1828_v15, 4 }
  0x83   : > { %v1833_v33 = vrot.slane %v1831_v17, 5  ;;  %v4958_v35 = vcombine.low %v1816_v11, %v1826_v36  ;;  %v565_v41 = vrot.slane %v564_v20, 4  ;;  %v1839_v23 = vrot.slane %v1837_v26, 5 }
  0x84   : > { %v1843_v27 = vrot.slane %v1841_v31, 4  ;;  %v575_v44 = vrot.slane %v574_v37, 4  ;;  %v1847_v30 = vshll.u32 %v4895_v52, 16  ;;  %v4795_v46 = vcombine.low %v6910_v58, %v6930_v6 }
  0x85   : > { %v1834_v45 = vor.u32 %v1833_v33, %v1830_v38  ;;  %2700 = vmatprep.mubr.bf16.mxu1 %v4958_v35  ;;  %v570_v53 = vsel %vm6453_vm5, %v565_v41, %v569_v63  ;;  %v4943_v13 = vcombine.low %v6918_v40, %v6924_v61  ;;  %v582_v7 = vshrl.u32 %v6945_v39, 16  ;;  %v6964_v40 = vld [vmem:[%s6395_s10 + $0x94] sm:$0xf]  ;;  %v6217_v61 = vld [vmem:[%s6395_s10 + $0x98] sm:$0x1] }
  0x86   : > { %v1844_v19 = vor.u32 %v1843_v27, %v1839_v23  ;;  %2701 = vmatmul.mubr.bf16.gmra.mrb[40].mxu1 %v4942_v34  ;;  %v580_v62 = vsel %vm6453_vm5, %v575_v44, %v579_v24  ;;  %v1849_v49 = vrot.slane %v1847_v30, 5  ;;  %v585_v55 = vshll.u32 %v6945_v39, 16  ;;  %v6989_v33 = vld [vmem:[%s6395_s10 + $0x78] sm:$0xf]  ;;  %v6997_v44 = vld [vmem:[%s6395_s10 + $0x7c] sm:$0xf] }
  0x87   : > { %v1835_v58 = vrot.slane %v1834_v45, 4  ;;  %v4811_v43 = vcombine.low %v570_v53, %v580_v62  ;;  %v584_v56 = vrot.slane %v582_v7, 4  ;;  %v591_v54 = vshll.u32 %v6964_v40, 16  ;;  %v6219_v53 = vld [vmem:[%s6395_s10 + $0xa4] sm:$0x1] }
  0x88   : > { %v1845_v48 = vrot.slane %v1844_v19, 4  ;;  %v587_v51 = vrot.slane %v585_v55, 5  ;;  %v595_v0 = vshrl.u32 %v6964_v40, 16  ;;  %v601_v57 = vshll.u32 %v6217_v61, 16 }
  0x89   : > { %v1840_v34 = vsel %vm6453_vm5, %v1835_v58, %v1839_v23  ;;  %1376 = vmatprep.mubr.bf16.mxu0 %v4811_v43  ;;  %v593_v5 = vrot.slane %v591_v54, 5  ;;  %v1852_v6 = vshrl.u32 %v6955_v10, 16  ;;  %v1855_v60 = vshll.u32 %v6955_v10, 16  ;;  %v6993_v23 = vld [vmem:[%s6395_s10 + $0xa0] sm:$0xf] }
  0x8a   : > { %v1850_v3 = vsel %vm6453_vm5, %v1845_v48, %v1849_v49  ;;  %1377 = vmatmul.mubr.bf16.gmra.mrb[44].mxu0 %v4795_v46  ;;  %v588_v28 = vor.u32 %v587_v51, %v584_v56  ;;  %v597_v47 = vrot.slane %v595_v0, 4  ;;  %v603_v11 = vrot.slane %v601_v57, 5  ;;  %v7008_v48 = vld [vmem:[%s6395_s10 + $0xa8] sm:$0xf] }
  0x8b   : > { %v4959_v8 = vcombine.low %v1840_v34, %v1850_v3  ;;  %v1854_v9 = vrot.slane %v1852_v6, 4  ;;  %v1857_v63 = vrot.slane %v1855_v60, 5  ;;  %v1861_v4 = vshll.u32 %v6961_v2, 16 }
  0x8c   : > { %v1865_v12 = vshrl.u32 %v6961_v2, 16  ;;  %v589_v52 = vrot.slane %v588_v28, 4  ;;  %v598_v22 = vor.u32 %v597_v47, %v593_v5  ;;  %v1871_v14 = vshll.u32 %v4896_v59, 16 }
  0x8d   : > { %2708 = vmatprep.mubr.bf16.mxu1 %v4959_v8  ;;  %v4796_v15 = vcombine.low %v6945_v39, %v6964_v40  ;;  %v1858_v17 = vor.u32 %v1857_v63, %v1854_v9  ;;  %v1863_v20 = vrot.slane %v1861_v4, 5  ;;  %v4944_v26 = vcombine.low %v6955_v10, %v6961_v2 }
  0x8e   : > { %v1867_v24 = vrot.slane %v1865_v12, 4  ;;  %2709 = vmatmul.mubr.bf16.gmra.mrb[44].mxu1 %v4943_v13  ;;  %v594_v31 = vsel %vm6453_vm5, %v589_v52, %v593_v5  ;;  %v599_v36 = vrot.slane %v598_v22, 4  ;;  %v1873_v37 = vrot.slane %v1871_v14, 5  ;;  %v4897_v13 = vld [vmem:[%s6395_s10 + $0x80] sm:$0x1] }
  0x8f   : > { %v606_v38 = vshrl.u32 %v6977_v16, 16  ;;  %v1859_v39 = vrot.slane %v1858_v17, 4  ;;  %v609_v41 = vshll.u32 %v6977_v16, 16  ;;  %v615_v27 = vshll.u32 %v6993_v23, 16  ;;  %v7023_v12 = vld [vmem:[%s6395_s10 + $0x84] sm:$0xf] }
  0x90   : > { %v1868_v35 = vor.u32 %v1867_v24, %v1863_v20  ;;  %v604_v45 = vsel %vm6453_vm5, %v599_v36, %v603_v11  ;;  %v619_v46 = vshrl.u32 %v6993_v23, 16  ;;  %v625_v19 = vshll.u32 %v6219_v53, 16  ;;  %v7029_v14 = vld [vmem:[%s6395_s10 + $0xac] sm:$0xf]  ;;  %v7033_v17 = vld [vmem:[%s6395_s10 + $0x88] sm:$0xf] }
  0x91   : > { %v608_v30 = vrot.slane %v606_v38, 4  ;;  %v4812_v7 = vcombine.low %v594_v31, %v604_v45  ;;  %v1864_v10 = vsel %vm6453_vm5, %v1859_v39, %v1863_v20  ;;  %v611_v58 = vrot.slane %v609_v41, 5 }
  0x92   : > { %v1869_v62 = vrot.slane %v1868_v35, 4  ;;  %v617_v49 = vrot.slane %v615_v27, 5  ;;  %v621_v55 = vrot.slane %v619_v46, 4  ;;  %v627_v2 = vrot.slane %v625_v19, 5 }
  0x93   : > { %v1876_v43 = vshrl.u32 %v6989_v33, 16  ;;  %1384 = vmatprep.mubr.bf16.mxu0 %v4812_v7  ;;  %v612_v40 = vor.u32 %v611_v58, %v608_v30  ;;  %v1879_v54 = vshll.u32 %v6989_v33, 16  ;;  %v1885_v59 = vshll.u32 %v6997_v44, 16 }
  0x94   : > { %v1874_v56 = vsel %vm6453_vm5, %v1869_v62, %v1873_v37  ;;  %1385 = vmatmul.mubr.bf16.gmra.mrb[48].mxu0 %v4796_v15  ;;  %v622_v51 = vor.u32 %v621_v55, %v617_v49  ;;  %v1889_v61 = vshrl.u32 %v6997_v44, 16  ;;  %v1895_v6 = vshll.u32 %v4897_v13, 16  ;;  %v7048_v62 = vld [vmem:[%s6395_s10 + $0xb4] sm:$0xf] }
  0x95   : > { %v4960_v34 = vcombine.low %v1864_v10, %v1874_v56  ;;  %v1878_v0 = vrot.slane %v1876_v43, 4  ;;  %v613_v57 = vrot.slane %v612_v40, 4  ;;  %v1881_v3 = vrot.slane %v1879_v54, 5 }
  0x96   : > { %v1887_v5 = vrot.slane %v1885_v59, 5  ;;  %v623_v60 = vrot.slane %v622_v51, 4  ;;  %v1891_v8 = vrot.slane %v1889_v61, 4  ;;  %v4797_v28 = vcombine.low %v6977_v16, %v6993_v23  ;;  %v7040_v23 = vld [vmem:[%s6395_s10 + $0x8c] sm:$0x1] }
  0x97   : > { %2716 = vmatprep.mubr.bf16.mxu1 %v4960_v34  ;;  %v4945_v47 = vcombine.low %v6989_v33, %v6997_v44  ;;  %v618_v11 = vsel %vm6453_vm5, %v613_v57, %v617_v49  ;;  %v1882_v9 = vor.u32 %v1881_v3, %v1878_v0  ;;  %v1897_v63 = vrot.slane %v1895_v6, 5  ;;  %v6221_v33 = vld [vmem:[%s6395_s10 + $0xb0] sm:$0x1] }
  0x98   : > { %2717 = vmatmul.mubr.bf16.gmra.mrb[48].mxu1 %v4944_v26  ;;  %v630_v4 = vshrl.u32 %v7008_v48, 16  ;;  %v628_v52 = vsel %vm6453_vm5, %v623_v60, %v627_v2  ;;  %v1892_v22 = vor.u32 %v1891_v8, %v1887_v5  ;;  %v633_v16 = vshll.u32 %v7008_v48, 16  ;;  %v7067_v6 = vld [vmem:[%s6395_s10 + $0x90] sm:$0xf] }
  0x99   : > { %v639_v15 = vshll.u32 %v7029_v14, 16  ;;  %v4813_v20 = vcombine.low %v618_v11, %v628_v52  ;;  %v1883_v24 = vrot.slane %v1882_v9, 4  ;;  %v643_v31 = vshrl.u32 %v7029_v14, 16  ;;  %v7071_v11 = vld [vmem:[%s6395_s10 + $0x94] sm:$0xf] }
  0x9a   : > { %v632_v26 = vrot.slane %v630_v4, 4  ;;  %v1893_v36 = vrot.slane %v1892_v22, 4  ;;  %v635_v37 = vrot.slane %v633_v16, 5  ;;  %v649_v39 = vshll.u32 %v6221_v33, 16 }
  0x9b   : > { %v641_v38 = vrot.slane %v639_v15, 5  ;;  %1392 = vmatprep.mubr.bf16.mxu0 %v4813_v20  ;;  %v1888_v35 = vsel %vm6453_vm5, %v1883_v24, %v1887_v5  ;;  %v645_v41 = vrot.slane %v643_v31, 4  ;;  %v1900_v27 = vshrl.u32 %v7023_v12, 16  ;;  %v7079_v24 = vld [vmem:[%s6395_s10 + $0x98] sm:$0x1] }
  0x9c   : > { %v1903_v44 = vshll.u32 %v7023_v12, 16  ;;  %v1898_v45 = vsel %vm6453_vm5, %v1893_v36, %v1897_v63  ;;  %1393 = vmatmul.mubr.bf16.gmra.mrb[52].mxu0 %v4797_v28  ;;  %v636_v30 = vor.u32 %v635_v37, %v632_v26  ;;  %v651_v46 = vrot.slane %v649_v39, 5  ;;  %v677_v39 = vld [vmem:[%s6395_s10] sm:$0xe] }
  0x9d   : > { %v1909_v53 = vshll.u32 %v7033_v17, 16  ;;  %v4961_v19 = vcombine.low %v1888_v35, %v1898_v45  ;;  %v646_v13 = vor.u32 %v645_v41, %v641_v38  ;;  %v1902_v7 = vrot.slane %v1900_v27, 4  ;;  %v7087_v45 = vld [vmem:[%s6395_s10 + $0x9c] sm:$0xf] }
  0x9e   : > { %v1905_v10 = vrot.slane %v1903_v44, 5  ;;  %v637_v58 = vrot.slane %v636_v30, 4  ;;  %v1913_v55 = vshrl.u32 %v7033_v17, 16  ;;  %v1919_v2 = vshll.u32 %v7040_v23, 16 }
  0x9f   : > { %v1911_v49 = vrot.slane %v1909_v53, 5  ;;  %2724 = vmatprep.mubr.bf16.mxu1 %v4961_v19  ;;  %v647_v43 = vrot.slane %v646_v13, 4  ;;  %v4798_v40 = vcombine.low %v7008_v48, %v7029_v14  ;;  %v4946_v54 = vcombine.low %v7023_v12, %v7033_v17  ;;  %v7063_v48 = vld [vmem:[%s6395_s10 + $0xb8] sm:$0xf]  ;;  %v6223_v12 = vld [vmem:[%s6395_s10 + $0xbc] sm:$0x1] }
  0xa0   : > { %v1906_v56 = vor.u32 %v1905_v10, %v1902_v7  ;;  %2725 = vmatmul.mubr.bf16.gmra.mrb[52].mxu1 %v4945_v47  ;;  %v642_v59 = vsel %vm6453_vm5, %v637_v58, %v641_v38  ;;  %v1915_v34 = vrot.slane %v1913_v55, 4  ;;  %v1921_v51 = vrot.slane %v1919_v2, 5 }
  0xa1   : > { %v654_v0 = vshrl.u32 %v7048_v62, 16  ;;  %v652_v61 = vsel %vm6453_vm5, %v647_v43, %v651_v46  ;;  %v657_v3 = vshll.u32 %v7048_v62, 16  ;;  %v663_v5 = vshll.u32 %v7063_v48, 16 }
  0xa2   : > { %v1907_v57 = vrot.slane %v1906_v56, 4  ;;  %v4814_v60 = vcombine.low %v642_v59, %v652_v61  ;;  %v1916_v8 = vor.u32 %v1915_v34, %v1911_v49  ;;  %v667_v47 = vshrl.u32 %v7063_v48, 16  ;;  %v678_v61 = vld [vmem:[%s6395_s10 + $0xc] sm:$0xe] }
  0xa3   : > { %v656_v28 = vrot.slane %v654_v0, 4  ;;  %v659_v63 = vrot.slane %v657_v3, 5  ;;  %v665_v4 = vrot.slane %v663_v5, 5  ;;  %v673_v52 = vshll.u32 %v6223_v12, 16  ;;  %v679_v5 = vld [vmem:[%s6395_s10 + $0x18] sm:$0xe] }
  0xa4   : > { %v1912_v9 = vsel %vm6453_vm5, %v1907_v57, %v1911_v49  ;;  %1400 = vmatprep.mubr.bf16.mxu0 %v4814_v60  ;;  %v1917_v22 = vrot.slane %v1916_v8, 4  ;;  %v669_v16 = vrot.slane %v667_v47, 4  ;;  %v1924_v14 = vshrl.u32 %v7067_v6, 16  ;;  %v7097_v49 = vld [vmem:[%s6395_s10 + $0xa0] sm:$0xf] }
  0xa5   : > { %v1927_v15 = vshll.u32 %v7067_v6, 16  ;;  %1401 = vmatmul.mubr.bf16.gmra.mrb[56].mxu0 %v4798_v40  ;;  %v660_v17 = vor.u32 %v659_v63, %v656_v28  ;;  %v675_v20 = vrot.slane %v673_v52, 5  ;;  %v1933_v26 = vshll.u32 %v7071_v11, 16  ;;  %v7103_v40 = vld [vmem:[%s6395_s10 + $0xa4] sm:$0x1] }
  0xa6   : > { %v1937_v31 = vshrl.u32 %v7071_v11, 16  ;;  %v1922_v36 = vsel %vm6453_vm5, %v1917_v22, %v1921_v51  ;;  %v670_v37 = vor.u32 %v669_v16, %v665_v4  ;;  %v1926_v38 = vrot.slane %v1924_v14, 4  ;;  %v7123_v14 = vld [vmem:[%s6395_s10 + $0xa8] sm:$0xf] }
  0xa7   : > { %v1929_v33 = vrot.slane %v1927_v15, 5  ;;  %v4962_v35 = vcombine.low %v1912_v9, %v1922_v36  ;;  %v661_v41 = vrot.slane %v660_v17, 4  ;;  %v1935_v27 = vrot.slane %v1933_v26, 5  ;;  %v6225_v17 = vld [vmem:[%s6395_s10 + $0x10] sm:$0xf] }
  0xa8   : > { %v1939_v44 = vrot.slane %v1937_v31, 4  ;;  %v671_v30 = vrot.slane %v670_v37, 4  ;;  %v1943_v53 = vshll.u32 %v7079_v24, 16  ;;  %v4799_v19 = vcombine.low %v7048_v62, %v7063_v48  ;;  %v6224_v62 = vld [vmem:[%s6395_s10 + $0x4] sm:$0xf] }
  0xa9   : > { %v1930_v46 = vor.u32 %v1929_v33, %v1926_v38  ;;  %2732 = vmatprep.mubr.bf16.mxu1 %v4962_v35  ;;  %v666_v13 = vsel %vm6453_vm5, %v661_v41, %v665_v4  ;;  %v4947_v10 = vcombine.low %v7067_v6, %v7071_v11  ;;  %v4768_v58 = vrot.slane %v677_v39, 9  ;;  %v6226_v37 = vld [vmem:[%s6395_s10 + $0x1c] sm:$0xf]  ;;  %v6227_v33 = vld [vmem:[%s6395_s10 + $0x20] sm:$0x1] }
  0xaa   : > { %v1940_v7 = vor.u32 %v1939_v44, %v1935_v27  ;;  %2733 = vmatmul.mubr.bf16.gmra.mrb[56].mxu1 %v4946_v54  ;;  %v676_v55 = vsel %vm6453_vm5, %v671_v30, %v675_v20  ;;  %v1945_v43 = vrot.slane %v1943_v53, 5  ;;  %v746_v56 = vrot.slane %v6224_v62, 5 }
  0xab   : > { %v1931_v2 = vrot.slane %v1930_v46, 4  ;;  %v4815_v59 = vcombine.low %v666_v13, %v676_v55  ;;  %v1948_v51 = vshrl.u32 %v7087_v45, 16  ;;  %v1951_v0 = vshll.u32 %v7087_v45, 16 }
  0xac   : > { %v1941_v34 = vrot.slane %v1940_v7, 4  ;;  %v747_v57 = vsel %vm6436_vm4, %v4768_v58, %v746_v56  ;;  %v748_v3 = vrot.slane %v746_v56, 4  ;;  %v1957_v48 = vshll.u32 %v7097_v49, 16  ;;  %v6169_v7 = vld [vmem:[%s8392_s1 + $0x180] sm:$0xff]  }
  0xad   : > { %v1936_v54 = vsel %vm6453_vm5, %v1931_v2, %v1935_v27  ;;  %1408 = vmatprep.mubr.bf16.mxu0 %v4815_v59  ;;  %v1950_v60 = vrot.slane %v1948_v51, 4  ;;  %v1953_v8 = vrot.slane %v1951_v0, 5  ;;  %v1961_v28 = vshrl.u32 %v7097_v49, 16  ;;  %v680_v2 = vld [vmem:[%s6395_s10 + $0x24] sm:$0xe] }
  0xae   : > { %v1946_v6 = vsel %vm6453_vm5, %v1941_v34, %v1945_v43  ;;  %1409 = vmatmul.mubr.bf16.gmra.mrb[60].mxu0 %v4799_v19  ;;  %v750_v9 = vsel %vm6436_vm4, %v748_v3, %v749_v32  ;;  %v1959_v63 = vrot.slane %v1957_v48, 5  ;;  %v1967_v4 = vshll.u32 %v7103_v40, 16  ;;  %v7129_v32 = vld [vmem:[%s6395_s10 + $0xac] sm:$0xf]  ;;  %v7142_v19 = vld [vmem:[%s6395_s10 + $0xb0] sm:$0x1] }
  0xaf   : > { %v4963_v47 = vcombine.low %v1936_v54, %v1946_v6  ;;  %v4816_v12 = vcombine.low %v747_v57, %v750_v9  ;;  %v1954_v52 = vor.u32 %v1953_v8, %v1950_v60  ;;  %v1963_v22 = vrot.slane %v1961_v28, 4  ;;  %v681_v59 = vld [vmem:[%s6395_s10 + $0x30] sm:$0xe]  ;;  %v6228_v48 = vld [vmem:[%s6395_s10 + $0x28] sm:$0xf] }
  0xb0   : > { %v4769_v16 = vrot.slane %v678_v61, 9  ;;  %v1969_v15 = vrot.slane %v1967_v4, 5  ;;  %v753_v20 = vrot.slane %v6225_v17, 5  ;;  %v4948_v25 = vcombine.low %v7087_v45, %v7097_v49  ;;  %v7165_v6 = vld [vmem:[%s6395_s10 + $0xb4] sm:$0xf]  ;;  %v6171_v60 = vld [vmem:[%s8392_s1 + $0x188] sm:$0xff]  }
  0xb1   : > { %2740 = vmatprep.mubr.bf16.mxu1 %v4963_v47  ;;  %v4770_v26 = vrot.slane %v679_v5, 9  ;;  %5747 = vmatprep.mubr.bf16.mxu0 %v4816_v12  ;;  %v1955_v31 = vrot.slane %v1954_v52, 4  ;;  %v1964_v36 = vor.u32 %v1963_v22, %v1959_v63  ;;  %v760_v38 = vrot.slane %v6226_v37, 5  ;;  %v6229_v28 = vld [vmem:[%s6395_s10 + $0x2c] sm:$0x1] }
  0xb2   : > { %v763_v39 = vrot.slane %v6227_v33, 5  ;;  %2741 = vmatmul.mubr.bf16.gmra.mrb[60].mxu1 %v4947_v10  ;;  %v754_v35 = vsel %vm6436_vm4, %v4769_v16, %v753_v20  ;;  %v755_v41 = vrot.slane %v753_v20, 4  ;;  %v1972_v27 = vshrl.u32 %v7123_v14, 16  ;;  %v7174_v4 = vld [vmem:[%s6395_s10 + $0xb8] sm:$0xf] }
  0xb3   : > { %v1975_v44 = vshll.u32 %v7123_v14, 16  ;;  %v1960_v45 = vsel %vm6453_vm5, %v1955_v31, %v1959_v63  ;;  %v1965_v30 = vrot.slane %v1964_v36, 4  ;;  %v761_v46 = vsel %vm6436_vm4, %v4770_v26, %v760_v38  ;;  %v7182_v17 = vld [vmem:[%s6395_s10 + $0xbc] sm:$0x1]  ;;  %v6230_v20 = vld [vmem:[%s6395_s10 + $0x34] sm:$0xf] }
  0xb4   : > { %v762_v53 = vrot.slane %v760_v38, 4  ;;  %v757_v13 = vsel %vm6436_vm4, %v755_v41, %v756_v29  ;;  %v1974_v10 = vrot.slane %v1972_v27, 4  ;;  %v1981_v55 = vshll.u32 %v7129_v32, 16  ;;  %v6231_v31 = vld [vmem:[%s6395_s10 + $0x38] sm:$0x1]  ;;  %v6174_v27 = vld [vmem:[%s8392_s1 + $0x190] sm:$0xff]  }
  0xb5   : > { %v1977_v58 = vrot.slane %v1975_v44, 5  ;;  %v1970_v43 = vsel %vm6453_vm5, %v1965_v30, %v1969_v15  ;;  %v4817_v62 = vcombine.low %v754_v35, %v757_v13  ;;  %v1985_v56 = vshrl.u32 %v7129_v32, 16  ;;  %v6173_v15 = vld [vmem:[%s8392_s1 + $0x1d0] sm:$0xff]   ;;  %v682_v38 = vld [vmem:[%s6395_s10 + $0x3c] sm:$0xe] }
  0xb6   : > { %v764_v29 = vsel %vm6436_vm4, %v762_v53, %v763_v39  ;;  %v4964_v34 = vcombine.low %v1960_v45, %v1970_v43  ;;  %v1983_v61 = vrot.slane %v1981_v55, 5  ;;  %v1991_v57 = vshll.u32 %v7142_v19, 16  ;;  %v6175_v53 = vld [vmem:[%s8392_s1 + $0x1d8] sm:$0xff]  }
  0xb7   : > { %v4818_v51 = vcombine.low %v761_v46, %v764_v29  ;;  %v1978_v0 = vor.u32 %v1977_v58, %v1974_v10  ;;  %5748 = vmatmul.mubr.bf16.vlgmr.msra.gmra.mrb[64].mxu0 %v4817_v62  ;;  %v1987_v54 = vrot.slane %v1985_v56, 4  ;;  %v4771_v3 = vrot.slane %v680_v2, 9  ;;  %v683_v58 = vld [vmem:[%s6395_s10 + $0x48] sm:$0xe] }
  0xb8   : > { %v767_v5 = vrot.slane %v6228_v48, 5  ;;  %2748 = vmatprep.mubr.bf16.mxu1 %v4964_v34  ;;  %5596 = vmatpush3.bf16.msra.mxu0 %v6169_v7  ;;  %v770_v47 = vrot.slane %v6229_v28, 5  ;;  %v4949_v9 = vcombine.low %v7123_v14, %v7129_v32  ;;  %v4772_v63 = vrot.slane %v681_v59, 9  ;;  %v6232_v59 = vld [vmem:[%s6395_s10 + $0x40] sm:$0xf] }
  0xb9   : > { %v1979_v8 = vrot.slane %v1978_v0, 4  ;;  %5597 = vmatprep.subr.bf16.mxu0 %v6170_v18  ;;  %5751 = vmatprep.mubr.bf16.mxu0 %v4818_v51  ;;  %v1988_v12 = vor.u32 %v1987_v54, %v1983_v61  ;;  %v1993_v52 = vrot.slane %v1991_v57, 5  ;;  %v774_v26 = vrot.slane %v6230_v20, 5  ;;  %v7211_v51 = vld [vmem:[%s6395_s10 + $0xc0] sm:$0xf]  ;;  %v6176_v0 = vld [vmem:[%s8392_s1 + $0x198] sm:$0xff]  }
  0xba   : > { %v768_v22 = vsel %vm6436_vm4, %v4771_v3, %v767_v5  ;;  %v769_v16 = vrot.slane %v767_v5, 4  ;;  %2749 = vmatmul.mubr.bf16.gmra.mrb[64].mxu1 %v4948_v25  ;;  %v777_v36 = vrot.slane %v6231_v31, 5  ;;  %v1996_v37 = vshrl.u32 %v7165_v6, 16  ;;  %v6233_v54 = vld [vmem:[%s6395_s10 + $0x44] sm:$0x1] }
  0xbb   : > { %v1984_v14 = vsel %vm6453_vm5, %v1979_v8, %v1983_v61  ;;  %v1989_v33 = vrot.slane %v1988_v12, 4  ;;  %v1999_v35 = vshll.u32 %v7165_v6, 16  ;;  %v2005_v41 = vshll.u32 %v7174_v4, 16  ;;  %v7220_v5 = vld [vmem:[%s6395_s10 + $0xc4] sm:$0xf] }
  0xbc   : > { %v771_v39 = vsel %vm6436_vm4, %v769_v16, %v770_v47  ;;  %5598 = vmatpush3.bf16.msra.mxu0 %v6171_v60  ;;  %v775_v44 = vsel %vm6436_vm4, %v4772_v63, %v774_v26  ;;  %v776_v45 = vrot.slane %v774_v26, 4  ;;  %v1998_v30 = vrot.slane %v1996_v37, 4  ;;  %v6179_v63 = vld [vmem:[%s8392_s1 + $0x1e0] sm:$0xff]   ;;  %v6234_v12 = vld [vmem:[%s6395_s10 + $0x4c] sm:$0xf] }
  0xbd   : > { %v4819_v25 = vcombine.low %v768_v22, %v771_v39  ;;  %v1994_v46 = vsel %vm6453_vm5, %v1989_v33, %v1993_v52  ;;  %5599 = vmatprep.subr.bf16.mxu0 %v6173_v15  ;;  %v2001_v13 = vrot.slane %v1999_v35, 5  ;;  %v2007_v7 = vrot.slane %v2005_v41, 5  ;;  %v6235_v52 = vld [vmem:[%s6395_s10 + $0x50] sm:$0x1]  ;;  %v7236_v31 = vld [vmem:[%s6395_s10 + $0xc8] sm:$0x1] }
  0xbe   : > { %v2009_v10 = vshrl.u32 %v7174_v4, 16  ;;  %v4965_v55 = vcombine.low %v1984_v14, %v1994_v46  ;;  %v778_v2 = vsel %vm6436_vm4, %v776_v45, %v777_v36  ;;  %v2015_v43 = vshll.u32 %v7182_v17, 16  ;;  %v684_v36 = vld [vmem:[%s6395_s10 + $0x54] sm:$0xe] }
  0xbf   : > { %v4773_v62 = vrot.slane %v682_v38, 9  ;;  %5752 = vmatmul.mubr.bf16.gmra.mrb[68].mxu0 %v4819_v25  ;;  %v4820_v18 = vcombine.low %v775_v44, %v778_v2  ;;  %v2002_v29 = vor.u32 %v2001_v13, %v1998_v30  ;;  %v781_v34 = vrot.slane %v6232_v59, 5  ;;  %v6180_v38 = vld [vmem:[%s8392_s1 + $0x1a0] sm:$0xff]   ;;  %v6181_v25 = vld [vmem:[%s8392_s1 + $0x1e8] sm:$0xff]   ;;  %v6236_v2 = vld [vmem:[%s6395_s10 + $0x58] sm:$0xf] }
  0xc0   : > { %v2011_v56 = vrot.slane %v2009_v10, 4  ;;  %2756 = vmatprep.mubr.bf16.mxu1 %v4965_v55  ;;  %5600 = vmatpush3.bf16.msra.mxu0 %v6174_v27  ;;  %v2017_v61 = vrot.slane %v2015_v43, 5  ;;  %v784_v57 = vrot.slane %v6233_v54, 5  ;;  %v4950_v3 = vcombine.low %v7165_v6, %v7174_v4  ;;  %v4904_v30 = vld [vmem:[%s6395_s10 + $0xc] sm:$0xe] }
  0xc1   : > { %v4774_v48 = vrot.slane %v683_v58, 9  ;;  %5601 = vmatprep.subr.bf16.mxu0 %v6175_v53  ;;  %5755 = vmatprep.mubr.bf16.mxu0 %v4820_v18  ;;  %v2003_v60 = vrot.slane %v2002_v29, 4  ;;  %v782_v28 = vsel %vm6436_vm4, %v4773_v62, %v781_v34  ;;  %v783_v47 = vrot.slane %v781_v34, 4  ;;  %v7257_v62 = vld [vmem:[%s6395_s10 + $0x18] sm:$0xf]  ;;  %v6182_v18 = vld [vmem:[%s8392_s1 + $0x1a8] sm:$0xff]  }
  0xc2   : > { %v2012_v8 = vor.u32 %v2011_v56, %v2007_v7  ;;  %2757 = vmatmul.mubr.bf16.gmra.mrb[68].mxu1 %v4949_v9  ;;  %v788_v6 = vrot.slane %v6234_v12, 5  ;;  %v791_v22 = vrot.slane %v6235_v52, 5  ;;  %v2020_v16 = vshrl.u32 %v7211_v51, 16  ;;  %v6237_v56 = vld [vmem:[%s6395_s10 + $0x5c] sm:$0x1] }
  0xc3   : > { %v2023_v15 = vshll.u32 %v7211_v51, 16  ;;  %v2008_v14 = vsel %vm6453_vm5, %v2003_v60, %v2007_v7  ;;  %v785_v26 = vsel %vm6436_vm4, %v783_v47, %v784_v57  ;;  %v2029_v9 = vshll.u32 %v7220_v5, 16  ;;  %v6239_v47 = vld [vmem:[%s6395_s10 + $0x14] sm:$0x1] }
  0xc4   : > { %v2013_v20 = vrot.slane %v2012_v8, 4  ;;  %5602 = vmatpush3.bf16.msra.mxu0 %v6176_v0  ;;  %v4821_v37 = vcombine.low %v782_v28, %v785_v26  ;;  %v789_v33 = vsel %vm6436_vm4, %v4774_v48, %v788_v6  ;;  %v790_v39 = vrot.slane %v788_v6, 4  ;;  %v6184_v8 = vld [vmem:[%s8392_s1 + $0x1f0] sm:$0xff]  }
  0xc5   : > { %v2022_v35 = vrot.slane %v2020_v16, 4  ;;  %5603 = vmatprep.subr.bf16.mxu0 %v6179_v63  ;;  %v2025_v27 = vrot.slane %v2023_v15, 5  ;;  %v2031_v44 = vrot.slane %v2029_v9, 5  ;;  %v2033_v45 = vshrl.u32 %v7220_v5, 16  ;;  %v6238_v28 = vld [vmem:[%s6395_s10 + $0x10] sm:$0xf] }
  0xc6   : > { %v2018_v41 = vsel %vm6453_vm5, %v2013_v20, %v2017_v61  ;;  %v792_v53 = vsel %vm6436_vm4, %v790_v39, %v791_v22  ;;  %v2039_v13 = vshll.u32 %v7236_v31, 16  ;;  %v4775_v7 = vrot.slane %v684_v36, 9  ;;  %v7266_v61 = vld [vmem:[%s6395_s10 + $0x1c] sm:$0xf]  ;;  %v7282_v15 = vld [vmem:[%s6395_s10 + $0x20] sm:$0x1] }
  0xc7   : > { %v4966_v46 = vcombine.low %v2008_v14, %v2018_v41  ;;  %5756 = vmatmul.mubr.bf16.gmra.mrb[72].mxu0 %v4821_v37  ;;  %v4822_v10 = vcombine.low %v789_v33, %v792_v53  ;;  %v2026_v58 = vor.u32 %v2025_v27, %v2022_v35  ;;  %v2035_v55 = vrot.slane %v2033_v45, 4  ;;  %v4905_v14 = vld [vmem:[%s6395_s10 + $0x18] sm:$0xe]  ;;  %v6185_v26 = vld [vmem:[%s8392_s1 + $0x1b0] sm:$0xff]  }
  0xc8   : > { %v795_v43 = vrot.slane %v6236_v2, 5  ;;  %5604 = vmatpush3.bf16.msra.mxu0 %v6180_v38  ;;  %v2041_v29 = vrot.slane %v2039_v13, 5  ;;  %v798_v59 = vrot.slane %v6237_v56, 5  ;;  %v4951_v34 = vcombine.low %v7211_v51, %v7220_v5  ;;  %v6186_v33 = vld [vmem:[%s8392_s1 + $0x1f8] sm:$0xff]  }
  0xc9   : > { %2764 = vmatprep.mubr.bf16.mxu1 %v4966_v46  ;;  %v4920_v0 = vrot.slane %v4904_v30, 9  ;;  %5605 = vmatprep.subr.bf16.mxu0 %v6181_v25  ;;  %v2027_v54 = vrot.slane %v2026_v58, 4  ;;  %v2036_v57 = vor.u32 %v2035_v55, %v2031_v44  ;;  %v2109_v51 = vrot.slane %v6238_v28, 5  ;;  %v4906_v25 = vld [vmem:[%s6395_s10 + $0x24] sm:$0xe]  ;;  %v6187_v55 = vld [vmem:[%s8392_s1 + $0x1b8] sm:$0xff]  }
  0xca   : > { %5759 = vmatprep.mubr.bf16.mxu0 %v4822_v10  ;;  %v796_v48 = vsel %vm6436_vm4, %v4775_v7, %v795_v43  ;;  %v797_v60 = vrot.slane %v795_v43, 4  ;;  %2765 = vmatmul.mubr.bf16.gmra.mrb[72].mxu1 %v4950_v3  ;;  %v2112_v63 = vrot.slane %v6239_v47, 5  ;;  %v3024_v12 = vshrl.u32 %v7257_v62, 16  ;;  %v6240_v7 = vld [vmem:[%s6395_s10 + $0x1c] sm:$0xf] }
  0xcb   : > { %v3027_v6 = vshll.u32 %v7257_v62, 16  ;;  %v2032_v52 = vsel %vm6453_vm5, %v2027_v54, %v2031_v44  ;;  %v2037_v22 = vrot.slane %v2036_v57, 4  ;;  %v3033_v3 = vshll.u32 %v7266_v61, 16  ;;  %v7303_v58 = vld [vmem:[%s6395_s10 + $0x24] sm:$0xf] }
  0xcc   : > { %v799_v16 = vsel %vm6436_vm4, %v797_v60, %v798_v59  ;;  %5606 = vmatpush3.bf16.msra.mxu0 %v6182_v18  ;;  %v2110_v9 = vsel %vm6436_vm4, %v4920_v0, %v2109_v51  ;;  %v2111_v36 = vrot.slane %v2109_v51, 4  ;;  %v3026_v37 = vrot.slane %v3024_v12, 4  ;;  %v7327_v12 = vld [vmem:[%s6395_s10 + $0x2c] sm:$0x1] }
  0xcd   : > { %v4823_v20 = vcombine.low %v796_v48, %v799_v16  ;;  %v2042_v38 = vsel %vm6453_vm5, %v2037_v22, %v2041_v29  ;;  %5607 = vmatprep.subr.bf16.mxu0 %v6184_v8  ;;  %v3029_v39 = vrot.slane %v3027_v6, 5  ;;  %v3035_v35 = vrot.slane %v3033_v3, 5  ;;  %v6241_v29 = vld [vmem:[%s6395_s10 + $0x28] sm:$0xf] }
  0xce   : > { %v3037_v41 = vshrl.u32 %v7266_v61, 16  ;;  %v4967_v27 = vcombine.low %v2032_v52, %v2042_v38  ;;  %v2113_v44 = vsel %vm6436_vm4, %v2111_v36, %v2112_v63  ;;  %v3043_v45 = vshll.u32 %v7282_v15, 16  ;;  %v7314_v48 = vld [vmem:[%s6395_s10 + $0x28] sm:$0xf] }
  0xcf   : > { %v4921_v30 = vrot.slane %v4905_v14, 9  ;;  %5760 = vmatmul.mubr.bf16.gmra.mrb[76].mxu0 %v4823_v20  ;;  %v4968_v46 = vcombine.low %v2110_v9, %v2113_v44  ;;  %v3030_v53 = vor.u32 %v3029_v39, %v3026_v37  ;;  %v2116_v10 = vrot.slane %v6240_v7, 5  ;;  %v4907_v14 = vld [vmem:[%s6395_s10 + $0x30] sm:$0xe]  ;;  %v4908_v9 = vld [vmem:[%s6395_s10 + $0x3c] sm:$0xe] }
  0xd0   : > { %v3039_v13 = vrot.slane %v3037_v41, 4  ;;  %2772 = vmatprep.mubr.bf16.mxu1 %v4967_v27  ;;  %5608 = vmatpush3.bf16.msra.mxu0 %v6185_v26  ;;  %v3045_v2 = vrot.slane %v3043_v45, 5  ;;  %v5136_v43 = vcombine.low %v7257_v62, %v7266_v61  ;;  %v4922_v18 = vrot.slane %v4906_v25, 9  ;;  %v6242_v62 = vld [vmem:[%s6395_s10 + $0x2c] sm:$0x1] }
  0xd1   : > { %v2123_v56 = vrot.slane %v6241_v29, 5  ;;  %5609 = vmatprep.subr.bf16.mxu0 %v6186_v33  ;;  %v3031_v59 = vrot.slane %v3030_v53, 4  ;;  %v2117_v54 = vsel %vm6436_vm4, %v4921_v30, %v2116_v10  ;;  %v2118_v57 = vrot.slane %v2116_v10, 4  ;;  %v6243_v25 = vld [vmem:[%s6395_s10 + $0x34] sm:$0xf] }
  0xd2   : > { %v3040_v0 = vor.u32 %v3039_v13, %v3035_v35  ;;  %2773 = vmatmul.mubr.bf16.gmra.mrb[76].mxu1 %v4951_v34  ;;  %v2126_v28 = vrot.slane %v6242_v62, 5  ;;  %v3048_v51 = vshrl.u32 %v7303_v58, 16  ;;  %v3051_v6 = vshll.u32 %v7303_v58, 16  ;;  %v7342_v44 = vld [vmem:[%s6395_s10 + $0x30] sm:$0xf]  ;;  %v6191_v13 = vld [vmem:[%s8392_s1 + $0x208] sm:$0xff]  }
  0xd3   : > { %v2124_v60 = vsel %vm6436_vm4, %v4922_v18, %v2123_v56  ;;  %v2125_v8 = vrot.slane %v2123_v56, 4  ;;  %5795 = vmatprep.mubr.bf16.mxu1 %v4968_v46  ;;  %v3036_v47 = vsel %vm6453_vm5, %v3031_v59, %v3035_v35  ;;  %v2120_v34 = vsel %vm6436_vm4, %v2118_v57, %v2119_v1  ;;  %v6244_v30 = vld [vmem:[%s6395_s10 + $0x38] sm:$0x1]  ;;  %v7351_v10 = vld [vmem:[%s6395_s10 + $0x34] sm:$0xf] }
  0xd4   : > { %v3041_v63 = vrot.slane %v3040_v0, 4  ;;  %5610 = vmatpush3.bf16.msra.mxu0 %v6187_v55  ;;  %v4969_v52 = vcombine.low %v2117_v54, %v2120_v34  ;;  %v3050_v16 = vrot.slane %v3048_v51, 4  ;;  %v3057_v3 = vshll.u32 %v7314_v48, 16  ;;  %v6245_v56 = vld [vmem:[%s6395_s10 + $0x40] sm:$0xf] }
  0xd5   : > { %v2127_v22 = vsel %vm6436_vm4, %v2125_v8, %v2126_v28  ;;  %v3053_v1 = vrot.slane %v3051_v6, 5  ;;  %v3061_v26 = vshrl.u32 %v7314_v48, 16  ;;  %v3067_v38 = vshll.u32 %v7327_v12, 16  ;;  %v7367_v28 = vld [vmem:[%s6395_s10 + $0x38] sm:$0x1] }
  0xd6   : > { %v3046_v21 = vsel %vm6453_vm5, %v3041_v63, %v3045_v2  ;;  %v4970_v20 = vcombine.low %v2124_v60, %v2127_v22  ;;  %v3059_v37 = vrot.slane %v3057_v3, 5  ;;  %v3483_v33 = vrot.slane %v7327_v12, 5  ;;  %v6193_v22 = vld [vmem:[%s8392_s1 + $0x210] sm:$0xff]  }
  0xd7   : > { %v5152_v36 = vcombine.low %v3036_v47, %v3046_v21  ;;  %v3054_v39 = vor.u32 %v3053_v1, %v3050_v16  ;;  %v3063_v35 = vrot.slane %v3061_v26, 4  ;;  %v4923_v41 = vrot.slane %v4907_v14, 9  ;;  %v4909_v47 = vld [vmem:[%s6395_s10 + $0x48] sm:$0xe] }
  0xd8   : > { %v2130_v27 = vrot.slane %v6243_v25, 5  ;;  %v3069_v45 = vrot.slane %v3067_v38, 5  ;;  %v2133_v46 = vrot.slane %v6244_v30, 5  ;;  %v5137_v53 = vcombine.low %v7303_v58, %v7314_v48  ;;  %v6246_v58 = vld [vmem:[%s6395_s10 + $0x44] sm:$0x1] }
  0xd9   : > { %4016 = vmatprep.mubr.bf16.mxu0 %v5152_v36  ;;  %v4924_v7 = vrot.slane %v4908_v9, 9  ;;  %v3055_v55 = vrot.slane %v3054_v39, 4  ;;  %v3064_v2 = vor.u32 %v3063_v35, %v3059_v37  ;;  %v2137_v59 = vrot.slane %v6245_v56, 5  ;;  %v6248_v35 = vld [vmem:[%s6395_s10 + $0x4c] sm:$0xf] }
  0xda   : > { %4017 = vmatmul.mubr.bf16.vlgmr.msra.gmra.mrb[80].mxu0 %v5136_v43  ;;  %v2131_v18 = vsel %vm6436_vm4, %v4923_v41, %v2130_v27  ;;  %v2132_v29 = vrot.slane %v2130_v27, 4  ;;  %5796 = vmatmul.mubr.bf16.vlgmr.msra.gmra.mrb[80].mxu1 %v4969_v52  ;;  %v2140_v0 = vrot.slane %v6246_v58, 5  ;;  %v3072_v54 = vshrl.u32 %v7342_v44, 16  ;;  %v6247_v43 = vld [vmem:[%s8392_s1 + $0x200] sm:$0xff]   ;;  %v7385_v25 = vld [vmem:[%s6395_s10 + $0x3c] sm:$0xf] }
  0xdb   : > { %v3075_v57 = vshll.u32 %v7342_v44, 16  ;;  %5828 = vmatpush3.bf16.msra.mxu1 %v6247_v43  ;;  %5799 = vmatprep.mubr.bf16.mxu1 %v4970_v20  ;;  %v3060_v60 = vsel %vm6453_vm5, %v3055_v55, %v3059_v37  ;;  %v3065_v8 = vrot.slane %v3064_v2, 4  ;;  %v3081_v51 = vshll.u32 %v7351_v10, 16  ;;  %v4910_v20 = vld [vmem:[%s6395_s10 + $0x54] sm:$0xe] }
  0xdc   : > { %v2134_v62 = vsel %vm6436_vm4, %v2132_v29, %v2133_v46  ;;  %5829 = vmatprep.subr.bf16.mxu1 %v6191_v13  ;;  %v2138_v34 = vsel %vm6436_vm4, %v4924_v7, %v2137_v59  ;;  %v2139_v6 = vrot.slane %v2137_v59, 4  ;;  %v3074_v52 = vrot.slane %v3072_v54, 4  ;;  %v7391_v55 = vld [vmem:[%s6395_s10 + $0x40] sm:$0xf]  ;;  %v6250_v59 = vld [vmem:[%s6395_s10 + $0x58] sm:$0xf] }
  0xdd   : > { %v4971_v63 = vcombine.low %v2131_v18, %v2134_v62  ;;  %v3070_v16 = vsel %vm6453_vm5, %v3065_v8, %v3069_v45  ;;  %v3077_v3 = vrot.slane %v3075_v57, 5  ;;  %v3083_v14 = vrot.slane %v3081_v51, 5  ;;  %v6249_v45 = vld [vmem:[%s6395_s10 + $0x50] sm:$0x1]  ;;  %v6251_v58 = vld [vmem:[%s6395_s10 + $0x5c] sm:$0x1] }
  0xde   : > { %v3085_v21 = vshrl.u32 %v7351_v10, 16  ;;  %v5153_v1 = vcombine.low %v3060_v60, %v3070_v16  ;;  %v2141_v26 = vsel %vm6436_vm4, %v2139_v6, %v2140_v0  ;;  %v3091_v9 = vshll.u32 %v7367_v28, 16  ;;  %v7407_v8 = vld [vmem:[%s6395_s10 + $0x44] sm:$0x1]  ;;  %v4911_v51 = vld [vmem:[%s6395_s10 + $0x60] sm:$0xe] }
  0xdf   : > { %v4925_v36 = vrot.slane %v4909_v47, 9  ;;  %5830 = vmatpush3.bf16.msra.mxu1 %v6191_v13  ;;  %v4972_v37 = vcombine.low %v2138_v34, %v2141_v26  ;;  %v3078_v38 = vor.u32 %v3077_v3, %v3074_v52  ;;  %v2144_v41 = vrot.slane %v6248_v35, 5  ;;  %v6195_v13 = vld [vmem:[%s8392_s1 + $0x218] sm:$0xff]   ;;  %v6197_v52 = vld [vmem:[%s8392_s1 + $0x220] sm:$0xff]  }
  0xe0   : > { %v3087_v39 = vrot.slane %v3085_v21, 4  ;;  %4024 = vmatprep.mubr.bf16.mxu0 %v5153_v1  ;;  %v3093_v27 = vrot.slane %v3091_v9, 5  ;;  %v2147_v30 = vrot.slane %v6249_v45, 5  ;;  %v5138_v46 = vcombine.low %v7342_v44, %v7351_v10  ;;  %5831 = vmatprep.subr.bf16.mxu1 %v6193_v22  ;;  %v4912_v21 = vld [vmem:[%s6395_s10 + $0x6c] sm:$0xe] }
  0xe1   : > { %v4926_v7 = vrot.slane %v4910_v20, 9  ;;  %v3079_v2 = vrot.slane %v3078_v38, 4  ;;  %v2145_v29 = vsel %vm6436_vm4, %v4925_v36, %v2144_v41  ;;  %v2146_v56 = vrot.slane %v2144_v41, 4  ;;  %v7425_v41 = vld [vmem:[%s6395_s10 + $0x48] sm:$0xf] }
  0xe2   : > { %4025 = vmatmul.mubr.bf16.gmra.mrb[84].mxu0 %v5137_v53  ;;  %v3088_v18 = vor.u32 %v3087_v39, %v3083_v14  ;;  %5800 = vmatmul.mubr.bf16.gmra.mrb[84].mxu1 %v4971_v63  ;;  %v2151_v44 = vrot.slane %v6250_v59, 5  ;;  %v2154_v0 = vrot.slane %v6251_v58, 5  ;;  %v3096_v54 = vshrl.u32 %v7385_v25, 16  ;;  %v6252_v39 = vld [vmem:[%s6395_s10 + $0x64] sm:$0xf] }
  0xe3   : > { %v3099_v57 = vshll.u32 %v7385_v25, 16  ;;  %5803 = vmatprep.mubr.bf16.mxu1 %v4972_v37  ;;  %v3084_v53 = vsel %vm6453_vm5, %v3079_v2, %v3083_v14  ;;  %v2148_v60 = vsel %vm6436_vm4, %v2146_v56, %v2147_v30  ;;  %5832 = vmatpush3.bf16.msra.mxu1 %v6193_v22  ;;  %v3105_v62 = vshll.u32 %v7391_v55, 16  ;;  %v6253_v45 = vld [vmem:[%s6395_s10 + $0x68] sm:$0x1]  ;;  %v6254_v58 = vld [vmem:[%s6395_s10 + $0x70] sm:$0xf] }
  0xe4   : > { %v3089_v43 = vrot.slane %v3088_v18, 4  ;;  %v4973_v47 = vcombine.low %v2145_v29, %v2148_v60  ;;  %v2152_v63 = vsel %vm6436_vm4, %v4926_v7, %v2151_v44  ;;  %v2153_v34 = vrot.slane %v2151_v44, 4  ;;  %5833 = vmatprep.subr.bf16.mxu1 %v6195_v13  ;;  %v7431_v18 = vld [vmem:[%s6395_s10 + $0x4c] sm:$0xf] }
  0xe5   : > { %v3098_v6 = vrot.slane %v3096_v54, 4  ;;  %v3101_v16 = vrot.slane %v3099_v57, 5  ;;  %v3107_v3 = vrot.slane %v3105_v62, 5  ;;  %v3109_v14 = vshrl.u32 %v7391_v55, 16  ;;  %v6199_v29 = vld [vmem:[%s8392_s1 + $0x228] sm:$0xff]  }
  0xe6   : > { %v3094_v22 = vsel %vm6453_vm5, %v3089_v43, %v3093_v27  ;;  %v2155_v1 = vsel %vm6436_vm4, %v2153_v34, %v2154_v0  ;;  %v3115_v26 = vshll.u32 %v7407_v8, 16  ;;  %v4927_v9 = vrot.slane %v4911_v51, 9  ;;  %v6255_v0 = vld [vmem:[%s6395_s10 + $0x74] sm:$0x1]  ;;  %v7447_v62 = vld [vmem:[%s6395_s10 + $0x50] sm:$0x1] }
  0xe7   : > { %v5154_v20 = vcombine.low %v3084_v53, %v3094_v22  ;;  %v4974_v36 = vcombine.low %v2152_v63, %v2155_v1  ;;  %v3102_v37 = vor.u32 %v3101_v16, %v3098_v6  ;;  %v3111_v38 = vrot.slane %v3109_v14, 4  ;;  %5834 = vmatpush3.bf16.msra.mxu1 %v6195_v13  ;;  %v6201_v16 = vld [vmem:[%s8392_s1 + $0x230] sm:$0xff]  }
  0xe8   : > { %v2158_v35 = vrot.slane %v6252_v39, 5  ;;  %v3117_v27 = vrot.slane %v3115_v26, 5  ;;  %v2161_v30 = vrot.slane %v6253_v45, 5  ;;  %v5139_v7 = vcombine.low %v7385_v25, %v7391_v55  ;;  %5835 = vmatprep.subr.bf16.mxu1 %v6197_v52 }
  0xe9   : > { %4032 = vmatprep.mubr.bf16.mxu0 %v5154_v20  ;;  %v4928_v2 = vrot.slane %v4912_v21, 9  ;;  %v3103_v13 = vrot.slane %v3102_v37, 4  ;;  %v3112_v56 = vor.u32 %v3111_v38, %v3107_v3  ;;  %v2165_v25 = vrot.slane %v6254_v58, 5  ;;  %v4914_v20 = vld [vmem:[%s6395_s10 + $0x84] sm:$0xe]  ;;  %v6203_v58 = vld [vmem:[%s8392_s1 + $0x238] sm:$0xff]  }
  0xea   : > { %4033 = vmatmul.mubr.bf16.gmra.mrb[88].mxu0 %v5138_v46  ;;  %v2159_v59 = vsel %vm6436_vm4, %v4927_v9, %v2158_v35  ;;  %v2160_v44 = vrot.slane %v2158_v35, 4  ;;  %5804 = vmatmul.mubr.bf16.gmra.mrb[88].mxu1 %v4973_v47  ;;  %v2168_v54 = vrot.slane %v6255_v0, 5  ;;  %v3120_v57 = vshrl.u32 %v7425_v41, 16  ;;  %v4913_v47 = vld [vmem:[%s6395_s10 + $0x78] sm:$0xe] }
  0xeb   : > { %v3123_v53 = vshll.u32 %v7425_v41, 16  ;;  %5807 = vmatprep.mubr.bf16.mxu1 %v4974_v36  ;;  %v3108_v46 = vsel %vm6453_vm5, %v3103_v13, %v3107_v3  ;;  %v3113_v43 = vrot.slane %v3112_v56, 4  ;;  %v3129_v51 = vshll.u32 %v7431_v18, 16  ;;  %5836 = vmatpush3.bf16.msra.mxu1 %v6197_v52  ;;  %v6256_v35 = vld [vmem:[%s6395_s10 + $0x7c] sm:$0xf] }
  0xec   : > { %v2162_v60 = vsel %vm6436_vm4, %v2160_v44, %v2161_v30  ;;  %v2166_v34 = vsel %vm6436_vm4, %v4928_v2, %v2165_v25  ;;  %v2167_v6 = vrot.slane %v2165_v25, 4  ;;  %v3122_v22 = vrot.slane %v3120_v57, 4  ;;  %5837 = vmatprep.subr.bf16.mxu1 %v6199_v29  ;;  %v6257_v2 = vld [vmem:[%s6395_s10 + $0x80] sm:$0x1]  ;;  %v7471_v44 = vld [vmem:[%s6395_s10 + $0x58] sm:$0xf] }
  0xed   : > { %v4975_v63 = vcombine.low %v2159_v59, %v2162_v60  ;;  %v3118_v3 = vsel %vm6453_vm5, %v3113_v43, %v3117_v27  ;;  %v3125_v14 = vrot.slane %v3123_v53, 5  ;;  %v3131_v21 = vrot.slane %v3129_v51, 5  ;;  %v7465_v27 = vld [vmem:[%s6395_s10 + $0x54] sm:$0xf]  ;;  %v6258_v57 = vld [vmem:[%s6395_s10 + $0x88] sm:$0xf] }
  0xee   : > { %v3133_v52 = vshrl.u32 %v7431_v18, 16  ;;  %v5155_v1 = vcombine.low %v3108_v46, %v3118_v3  ;;  %v2169_v26 = vsel %vm6436_vm4, %v2167_v6, %v2168_v54  ;;  %v3139_v9 = vshll.u32 %v7447_v62, 16 }
  0xef   : > { %v4929_v36 = vrot.slane %v4913_v47, 9  ;;  %v4976_v37 = vcombine.low %v2166_v34, %v2169_v26  ;;  %v3126_v38 = vor.u32 %v3125_v14, %v3122_v22  ;;  %v2172_v45 = vrot.slane %v6256_v35, 5  ;;  %5838 = vmatpush3.bf16.msra.mxu1 %v6199_v29  ;;  %v7487_v47 = vld [vmem:[%s6395_s10 + $0x5c] sm:$0x1]  ;;  %v4915_v34 = vld [vmem:[%s6395_s10 + $0x90] sm:$0xe] }
  0xf0   : > { %v3135_v39 = vrot.slane %v3133_v52, 4  ;;  %4040 = vmatprep.mubr.bf16.mxu0 %v5155_v1  ;;  %v3141_v30 = vrot.slane %v3139_v9, 5  ;;  %v2175_v13 = vrot.slane %v6257_v2, 5  ;;  %v5140_v56 = vcombine.low %v7425_v41, %v7431_v18  ;;  %5839 = vmatprep.subr.bf16.mxu1 %v6201_v16  ;;  %v4916_v1 = vld [vmem:[%s6395_s10 + $0x9c] sm:$0xe] }
  0xf1   : > { %v4930_v59 = vrot.slane %v4914_v20, 9  ;;  %v3127_v25 = vrot.slane %v3126_v38, 4  ;;  %v2173_v0 = vsel %vm6436_vm4, %v4929_v36, %v2172_v45  ;;  %v2174_v54 = vrot.slane %v2172_v45, 4  ;;  %v7502_v45 = vld [vmem:[%s6395_s10 + $0x60] sm:$0xf] }
  0xf2   : > { %4041 = vmatmul.mubr.bf16.gmra.mrb[92].mxu0 %v5139_v7  ;;  %v3136_v29 = vor.u32 %v3135_v39, %v3131_v21  ;;  %5808 = vmatmul.mubr.bf16.gmra.mrb[92].mxu1 %v4975_v63  ;;  %v2179_v41 = vrot.slane %v6258_v57, 5  ;;  %v2182_v53 = vrot.slane %v7040_v23, 5  ;;  %v3144_v46 = vshrl.u32 %v7465_v27, 16 }
  0xf3   : > { %v3147_v43 = vshll.u32 %v7465_v27, 16  ;;  %5811 = vmatprep.mubr.bf16.mxu1 %v4976_v37  ;;  %v3132_v7 = vsel %vm6453_vm5, %v3127_v25, %v3131_v21  ;;  %v2176_v51 = vsel %vm6436_vm4, %v2174_v54, %v2175_v13  ;;  %v3153_v63 = vshll.u32 %v7471_v44, 16  ;;  %5840 = vmatpush3.bf16.msra.mxu1 %v6201_v16  ;;  %v7508_v25 = vld [vmem:[%s6395_s10 + $0x64] sm:$0xf] }
  0xf4   : > { %v3137_v60 = vrot.slane %v3136_v29, 4  ;;  %v4977_v23 = vcombine.low %v2173_v0, %v2176_v51  ;;  %v2180_v6 = vsel %vm6436_vm4, %v4930_v59, %v2179_v41  ;;  %v2181_v22 = vrot.slane %v2179_v41, 4  ;;  %5841 = vmatprep.subr.bf16.mxu1 %v6203_v58 }
  0xf5   : > { %v3146_v3 = vrot.slane %v3144_v46, 4  ;;  %v3149_v21 = vrot.slane %v3147_v43, 5  ;;  %v3155_v52 = vrot.slane %v3153_v63, 5  ;;  %v3157_v20 = vshrl.u32 %v7471_v44, 16  ;;  %v4917_v63 = vld [vmem:[%s6395_s10 + $0xa8] sm:$0xe] }
  0xf6   : > { %v3142_v14 = vsel %vm6453_vm5, %v3137_v60, %v3141_v30  ;;  %v2183_v16 = vsel %vm6436_vm4, %v2181_v22, %v2182_v53  ;;  %v3163_v9 = vshll.u32 %v7487_v47, 16  ;;  %v4931_v36 = vrot.slane %v4915_v34, 9 }
  0xf7   : > { %v5156_v26 = vcombine.low %v3132_v7, %v3142_v14  ;;  %v4978_v37 = vcombine.low %v2180_v6, %v2183_v16  ;;  %v3150_v38 = vor.u32 %v3149_v21, %v3146_v3  ;;  %v3159_v39 = vrot.slane %v3157_v20, 4  ;;  %5842 = vmatpush3.bf16.msra.mxu1 %v6203_v58  ;;  %v7513_v58 = vld [vmem:[%s6395_s10 + $0x68] sm:$0x1] }
  0xf8   : > { %v2186_v35 = vrot.slane %v7071_v11, 5  ;;  %v3165_v30 = vrot.slane %v3163_v9, 5  ;;  %v2189_v2 = vrot.slane %v7079_v24, 5  ;;  %v5141_v13 = vcombine.low %v7465_v27, %v7471_v44 }
  0xf9   : > { %4048 = vmatprep.mubr.bf16.mxu0 %v5156_v26  ;;  %v4932_v59 = vrot.slane %v4916_v1, 9  ;;  %v3151_v0 = vrot.slane %v3150_v38, 4  ;;  %v3160_v54 = vor.u32 %v3159_v39, %v3155_v52  ;;  %v2193_v24 = vrot.slane %v7097_v49, 5  ;;  %v4918_v38 = vld [vmem:[%s6395_s10 + $0xb4] sm:$0xe] }
  0xfa   : > { %4049 = vmatmul.mubr.bf16.gmra.mrb[96].mxu0 %v5140_v56  ;;  %v2187_v11 = vsel %vm6436_vm4, %v4931_v36, %v2186_v35  ;;  %v2188_v57 = vrot.slane %v2186_v35, 4  ;;  %5812 = vmatmul.mubr.bf16.gmra.mrb[0].mxu1 %v4977_v23  ;;  %v2196_v27 = vrot.slane %v7103_v40, 5  ;;  %v3168_v53 = vshrl.u32 %v7502_v45, 16 }
  0xfb   : > { %v3171_v46 = vshll.u32 %v7502_v45, 16  ;;  %5815 = vmatprep.mubr.bf16.mxu1 %v4978_v37  ;;  %v3156_v43 = vsel %vm6453_vm5, %v3151_v0, %v3155_v52  ;;  %v3161_v7 = vrot.slane %v3160_v54, 4  ;;  %v3177_v51 = vshll.u32 %v7508_v25, 16 }
  0xfc   : > { %v2190_v60 = vsel %vm6436_vm4, %v2188_v57, %v2189_v2  ;;  %v2194_v40 = vsel %vm6436_vm4, %v4932_v59, %v2193_v24  ;;  %v2195_v23 = vrot.slane %v2193_v24, 4  ;;  %v3170_v6 = vrot.slane %v3168_v53, 4  ;;  %v7541_v59 = vld [vmem:[%s6395_s10 + $0x6c] sm:$0xf] }
  0xfd   : > { %v4979_v49 = vcombine.low %v2187_v11, %v2190_v60  ;;  %v3166_v22 = vsel %vm6453_vm5, %v3161_v7, %v3165_v30  ;;  %v3173_v3 = vrot.slane %v3171_v46, 5  ;;  %v3179_v14 = vrot.slane %v3177_v51, 5  ;;  %v7557_v46 = vld [vmem:[%s6395_s10 + $0x74] sm:$0x1]  ;;  %v4919_v51 = vld [vmem:[%s6395_s10 + $0xc0] sm:$0xe] }
  0xfe   : > { %v3181_v21 = vshrl.u32 %v7508_v25, 16  ;;  %v5157_v52 = vcombine.low %v3156_v43, %v3166_v22  ;;  %v2197_v20 = vsel %vm6436_vm4, %v2195_v23, %v2196_v27  ;;  %v3187_v1 = vshll.u32 %v7513_v58, 16 }
  0xff   : > { %v4933_v26 = vrot.slane %v4917_v63, 9  ;;  %v4980_v16 = vcombine.low %v2194_v40, %v2197_v20  ;;  %v3174_v9 = vor.u32 %v3173_v3, %v3170_v6  ;;  %v2200_v37 = vrot.slane %v7129_v32, 5 }
 0x100   : > { %v3183_v36 = vrot.slane %v3181_v21, 4  ;;  %4056 = vmatprep.mubr.bf16.mxu0 %v5157_v52  ;;  %v3189_v39 = vrot.slane %v3187_v1, 5  ;;  %v2203_v35 = vrot.slane %v7142_v19, 5  ;;  %v5142_v30 = vcombine.low %v7502_v45, %v7508_v25 }
 0x101   : > { %v3175_v0 = vrot.slane %v3174_v9, 4  ;;  %v2201_v32 = vsel %vm6436_vm4, %v4933_v26, %v2200_v37  ;;  %v2202_v11 = vrot.slane %v2200_v37, 4  ;;  %v4934_v24 = vrot.slane %v4918_v38, 9 }
 0x102   : > { %v5339_v29 = vpop.f32.mrb[0].mxu0  ;;  %4057 = vmatmul.mubr.bf16.gmra.mrb[100].mxu0 %v5141_v13  ;;  %v3184_v54 = vor.u32 %v3183_v36, %v3179_v14  ;;  %5816 = vmatmul.mubr.bf16.gmra.mrb[4].mxu1 %v4979_v49  ;;  %v2207_v19 = vrot.slane %v7174_v4, 5  ;;  %v2210_v45 = vrot.slane %v7182_v17, 5  ;;  %v3195_v60 = vshll.u32 %v7541_v59, 16 }
 0x103   : > { %v5340_v41 = vpop.f32.mrb[1].mxu0  ;;  %5819 = vmatprep.mubr.bf16.mxu1 %v4980_v16  ;;  %v3180_v13 = vsel %vm6453_vm5, %v3175_v0, %v3179_v14  ;;  %v2204_v53 = vsel %vm6436_vm4, %v2202_v11, %v2203_v35  ;;  %v3211_v21 = vshll.u32 %v7557_v46, 16  ;;  %v4935_v26 = vrot.slane %v4919_v51, 9  ;;  %v7572_v16 = vld [vmem:[%s6395_s10 + $0x78] sm:$0xf] }
 0x104   : > { %v5342_v56 = vpop.f32.mrb[2].mxu0  ;;  %v7538_v2 = vadd.f32 %v5340_v41, %v5339_v29  ;;  %v7550_v29 = vld [vmem:[%s6395_s10 + $0x70] sm:$0xf]  ;;  %v3185_v27 = vrot.slane %v3184_v54, 4  ;;  %v4981_v7 = vcombine.low %v2201_v32, %v2204_v53  ;;  %v2208_v4 = vsel %vm6436_vm4, %v4934_v24, %v2207_v19  ;;  %v7586_v11 = vld [vmem:[%s6395_s10 + $0x80] sm:$0x1] }
 0x105   : > { %v5343_v34 = vpop.f32.mrb[3].mxu0  ;;  %v2209_v17 = vrot.slane %v2207_v19, 4  ;;  %v3201_v40 = vshll.u32 %v7550_v29, 16  ;;  %v3205_v23 = vshrl.u32 %v7550_v29, 16  ;;  %v3197_v14 = vrot.slane %v3195_v60, 5 }
 0x106   : > { %v7545_v57 = vadd.f32 %v5343_v34, %v5342_v56  ;;  %v3192_v56 = vshrl.u32 %v7541_v59, 16  ;;  %v3190_v34 = vsel %vm6453_vm5, %v3185_v27, %v3189_v39  ;;  %v3213_v36 = vrot.slane %v3211_v21, 5  ;;  %v7577_v39 = vld [vmem:[%s6395_s10 + $0x7c] sm:$0xf] }
 0x107   : > { %v5158_v22 = vcombine.low %v3180_v13, %v3190_v34  ;;  %v2211_v3 = vsel %vm6436_vm4, %v2209_v17, %v2210_v45  ;;  %v3203_v20 = vrot.slane %v3201_v40, 5  ;;  %v3207_v1 = vrot.slane %v3205_v23, 4  ;;  %v5104_v13 = vld [vmem:[%s6395_s10 + $0x18] sm:$0xe] }
 0x108   : > { %v3194_v49 = vrot.slane %v3192_v56, 4  ;;  %v4982_v52 = vcombine.low %v2208_v4, %v2211_v3  ;;  %v2214_v37 = vrot.slane %v7220_v5, 5  ;;  %v2217_v38 = vrot.slane %v7236_v31, 5 }
 0x109   : > { %4064 = vmatprep.mubr.bf16.mxu0 %v5158_v22  ;;  %v3208_v35 = vor.u32 %v3207_v1, %v3203_v20  ;;  %v5143_v0 = vcombine.low %v7541_v59, %v7550_v29  ;;  %v3216_v19 = vshrl.u32 %v7572_v16, 16  ;;  %v3219_v45 = vshll.u32 %v7572_v16, 16  ;;  %v7608_v1 = vld [vmem:[%s6395_s10 + $0x84] sm:$0xf] }
 0x10a   : > { %v5345_v41 = vpop.f32.mrb[4].mxu0  ;;  %v3198_v9 = vor.u32 %v3197_v14, %v3194_v49  ;;  %4065 = vmatmul.mubr.bf16.gmra.mrb[104].mxu0 %v5142_v30  ;;  %5820 = vmatmul.mubr.bf16.gmra.mrb[8].mxu1 %v4981_v7  ;;  %v2215_v5 = vsel %vm6436_vm4, %v4935_v26, %v2214_v37  ;;  %v2216_v31 = vrot.slane %v2214_v37, 4  ;;  %v3225_v59 = vshll.u32 %v7577_v39, 16 }
 0x10b   : > { %v5346_v43 = vpop.f32.mrb[5].mxu0  ;;  %5823 = vmatprep.mubr.bf16.mxu1 %v4982_v52  ;;  %v3209_v30 = vrot.slane %v3208_v35, 4  ;;  %v3218_v56 = vrot.slane %v3216_v19, 4  ;;  %v3221_v60 = vrot.slane %v3219_v45, 5  ;;  %v3473_v14 = vrot.slane %v7266_v61, 5 }
 0x10c   : > { %v5348_v63 = vpop.f32.mrb[6].mxu0  ;;  %v7581_v54 = vadd.f32 %v5346_v43, %v5345_v41  ;;  %v3199_v24 = vrot.slane %v3198_v9, 4  ;;  %v3229_v41 = vshrl.u32 %v7577_v39, 16  ;;  %v2218_v53 = vsel %vm6436_vm4, %v2216_v31, %v2217_v38  ;;  %v7614_v38 = vld [vmem:[%s6395_s10 + $0x88] sm:$0xf] }
 0x10d   : > { %v5349_v6 = vpop.f32.mrb[7].mxu0  ;;  %v3235_v43 = vshll.u32 %v7586_v11, 16  ;;  %v3214_v4 = vsel %vm6453_vm5, %v3209_v30, %v3213_v36  ;;  %v4983_v17 = vcombine.low %v2215_v5, %v2218_v53  ;;  %v3227_v51 = vrot.slane %v3225_v59, 5  ;;  %v7628_v30 = vld [vmem:[%s6395_s10 + $0x8c] sm:$0x1] }
 0x10e   : > { %v7583_v32 = vadd.f32 %v5349_v6, %v5348_v63  ;;  %v3204_v27 = vsel %vm6453_vm5, %v3199_v24, %v3203_v20  ;;  %v5105_v63 = vld [vmem:[%s6395_s10 + $0x24] sm:$0xe]  ;;  %v3231_v40 = vrot.slane %v3229_v41, 4  ;;  %v5120_v6 = vrot.slane %v5104_v13, 9  ;;  %v5106_v41 = vld [vmem:[%s6395_s10 + $0x30] sm:$0xe] }
 0x10f   : > { %v5159_v49 = vcombine.low %v3204_v27, %v3214_v4  ;;  %v3237_v23 = vrot.slane %v3235_v43, 5  ;;  %v3222_v3 = vor.u32 %v3221_v60, %v3218_v56  ;;  %v3476_v21 = vrot.slane %v7282_v15, 5  ;;  %v5107_v43 = vld [vmem:[%s6395_s10 + $0x3c] sm:$0xe] }
 0x110   : > { %v5144_v52 = vcombine.low %v7572_v16, %v7577_v39  ;;  %v3232_v26 = vor.u32 %v3231_v40, %v3227_v51  ;;  %v5121_v9 = vrot.slane %v5105_v63, 9  ;;  %v3480_v36 = vrot.slane %v7314_v48, 5 }
 0x111   : > { %4072 = vmatprep.mubr.bf16.mxu0 %v5159_v49  ;;  %v3223_v61 = vrot.slane %v3222_v3, 4  ;;  %v3474_v15 = vsel %vm6436_vm4, %v5120_v6, %v3473_v14  ;;  %v3475_v16 = vrot.slane %v3473_v14, 4  ;;  %v3240_v31 = vshrl.u32 %v7608_v1, 16  ;;  %v7647_v3 = vld [vmem:[%s6395_s10 + $0x90] sm:$0xf] }
 0x112   : > { %4073 = vmatmul.mubr.bf16.gmra.mrb[108].mxu0 %v5143_v0  ;;  %5824 = vmatmul.mubr.bf16.gmra.mrb[12].mxu1 %v4983_v17  ;;  %v3233_v24 = vrot.slane %v3232_v26, 4  ;;  %v3481_v5 = vsel %vm6436_vm4, %v5121_v9, %v3480_v36  ;;  %v3482_v48 = vrot.slane %v3480_v36, 4  ;;  %v3243_v45 = vshll.u32 %v7608_v1, 16 }
 0x113   : > { %v5351_v7 = vpop.f32.mrb[8].mxu0  ;;  %v3228_v19 = vsel %vm6453_vm5, %v3223_v61, %v3227_v51  ;;  %v3477_v0 = vsel %vm6436_vm4, %v3475_v16, %v3476_v21  ;;  %v3249_v59 = vshll.u32 %v7614_v38, 16  ;;  %v3242_v56 = vrot.slane %v3240_v31, 4 }
 0x114   : > { %v5352_v34 = vpop.f32.mrb[9].mxu0  ;;  %v3238_v13 = vsel %vm6453_vm5, %v3233_v24, %v3237_v23  ;;  %v5168_v27 = vcombine.low %v3474_v15, %v3477_v0  ;;  %v3484_v53 = vsel %vm6436_vm4, %v3482_v48, %v3483_v33  ;;  %v3245_v17 = vrot.slane %v3243_v45, 5  ;;  %v7656_v15 = vld [vmem:[%s6395_s10 + $0x94] sm:$0xf]  ;;  %v7663_v48 = vld [vmem:[%s6395_s10 + $0x98] sm:$0x1] }
 0x115   : > { %v5354_v22 = vpop.f32.mrb[10].mxu0  ;;  %v7611_v37 = vadd.f32 %v5352_v34, %v5351_v7  ;;  %v5160_v7 = vcombine.low %v3228_v19, %v3238_v13  ;;  %v5169_v4 = vcombine.low %v3481_v5, %v3484_v53  ;;  %v3251_v60 = vrot.slane %v3249_v59, 5 }
 0x116   : > { %v5355_v20 = vpop.f32.mrb[11].mxu0  ;;  %5843 = vmatprep.mubr.bf16.mxu1 %v5168_v27  ;;  %v3253_v51 = vshrl.u32 %v7614_v38, 16  ;;  %v3259_v63 = vshll.u32 %v7628_v30, 16  ;;  %v5122_v34 = vrot.slane %v5106_v41, 9  ;;  %v3487_v49 = vrot.slane %v7351_v10, 5 }
 0x117   : > { %v7618_v35 = vadd.f32 %v5355_v20, %v5354_v22  ;;  %4080 = vmatprep.mubr.bf16.mxu0 %v5160_v7  ;;  %v3246_v12 = vor.u32 %v3245_v17, %v3242_v56  ;;  %v3490_v33 = vrot.slane %v7367_v28, 5  ;;  %v5145_v23 = vcombine.low %v7608_v1, %v7614_v38  ;;  %v5109_v7 = vld [vmem:[%s6395_s10 + $0x54] sm:$0xe] }
 0x118   : > { %v5123_v6 = vrot.slane %v5107_v43, 9  ;;  %v3255_v14 = vrot.slane %v3253_v51, 4  ;;  %v3261_v21 = vrot.slane %v3259_v63, 5  ;;  %v3488_v20 = vsel %vm6436_vm4, %v5122_v34, %v3487_v49 }
 0x119   : > { %v3489_v10 = vrot.slane %v3487_v49, 4  ;;  %v3247_v9 = vrot.slane %v3246_v12, 4  ;;  %v3494_v28 = vrot.slane %v7391_v55, 5  ;;  %v3497_v36 = vrot.slane %v7407_v8, 5  ;;  %v5108_v55 = vld [vmem:[%s6395_s10 + $0x48] sm:$0xe] }
 0x11a   : > { %4081 = vmatmul.mubr.bf16.gmra.mrb[112].mxu0 %v5144_v52  ;;  %5844 = vmatmul.mubr.bf16.vlgmr.msra.gmra.mrb[80].mxu1 %v5169_v4  ;;  %v3256_v16 = vor.u32 %v3255_v14, %v3251_v60  ;;  %v3264_v52 = vshrl.u32 %v7647_v3, 16  ;;  %v3267_v41 = vshll.u32 %v7647_v3, 16  ;;  %v3273_v13 = vshll.u32 %v7656_v15, 16  ;;  %v7682_v12 = vld [vmem:[%s6395_s10 + $0x9c] sm:$0xf] }
 0x11b   : > { %v5357_v40 = vpop.f32.mrb[12].mxu0  ;;  %v3491_v24 = vsel %vm6436_vm4, %v3489_v10, %v3490_v33  ;;  %v3252_v8 = vsel %vm6453_vm5, %v3247_v9, %v3251_v60  ;;  %v3495_v19 = vsel %vm6436_vm4, %v5123_v6, %v3494_v28  ;;  %v3496_v0 = vrot.slane %v3494_v28, 4 }
 0x11c   : > { %v5358_v22 = vpop.f32.mrb[13].mxu0  ;;  %v5170_v31 = vcombine.low %v3488_v20, %v3491_v24  ;;  %v3257_v45 = vrot.slane %v3256_v16, 4  ;;  %v3266_v59 = vrot.slane %v3264_v52, 4  ;;  %v3277_v53 = vshrl.u32 %v7656_v15, 16 }
 0x11d   : > { %v5360_v26 = vpop.f32.mrb[14].mxu0  ;;  %v7653_v1 = vadd.f32 %v5358_v22, %v5357_v40  ;;  %v3498_v27 = vsel %vm6436_vm4, %v3496_v0, %v3497_v36  ;;  %v3283_v56 = vshll.u32 %v7663_v48, 16  ;;  %v5124_v43 = vrot.slane %v5108_v55, 9  ;;  %v7706_v0 = vld [vmem:[%s6395_s10 + $0xa4] sm:$0x1] }
 0x11e   : > { %v5361_v61 = vpop.f32.mrb[15].mxu0  ;;  %5847 = vmatprep.mubr.bf16.mxu1 %v5170_v31  ;;  %v3262_v4 = vsel %vm6453_vm5, %v3257_v45, %v3261_v21  ;;  %v5171_v17 = vcombine.low %v3495_v19, %v3498_v27  ;;  %v3269_v60 = vrot.slane %v3267_v41, 5  ;;  %v3275_v51 = vrot.slane %v3273_v13, 5 }
 0x11f   : > { %v7660_v5 = vadd.f32 %v5361_v61, %v5360_v26  ;;  %v5161_v63 = vcombine.low %v3252_v8, %v3262_v4  ;;  %v3279_v34 = vrot.slane %v3277_v53, 4  ;;  %v3285_v49 = vrot.slane %v3283_v56, 5  ;;  %v7694_v61 = vld [vmem:[%s6395_s10 + $0xa0] sm:$0xf] }
 0x120   : > { %v3501_v40 = vrot.slane %v7431_v18, 5  ;;  %v3270_v33 = vor.u32 %v3269_v60, %v3266_v59  ;;  %v3504_v6 = vrot.slane %v7447_v62, 5  ;;  %v5146_v22 = vcombine.low %v7647_v3, %v7656_v15  ;;  %v5110_v59 = vld [vmem:[%s6395_s10 + $0x60] sm:$0xe] }
 0x121   : > { %v5125_v14 = vrot.slane %v5109_v7, 9  ;;  %4088 = vmatprep.mubr.bf16.mxu0 %v5161_v63  ;;  %v3280_v21 = vor.u32 %v3279_v34, %v3275_v51  ;;  %v3508_v9 = vrot.slane %v7471_v44, 5  ;;  %v3511_v62 = vrot.slane %v7487_v47, 5 }
 0x122   : > { %v3502_v10 = vsel %vm6436_vm4, %v5124_v43, %v3501_v40  ;;  %v3503_v26 = vrot.slane %v3501_v40, 4  ;;  %4089 = vmatmul.mubr.bf16.gmra.mrb[116].mxu0 %v5145_v23  ;;  %5848 = vmatmul.mubr.bf16.gmra.mrb[84].mxu1 %v5171_v17  ;;  %v3271_v28 = vrot.slane %v3270_v33, 4  ;;  %v3288_v16 = vshrl.u32 %v7682_v12, 16 }
 0x123   : > { %v5363_v20 = vpop.f32.mrb[16].mxu0  ;;  %v3281_v24 = vrot.slane %v3280_v21, 4  ;;  %v3509_v44 = vsel %vm6436_vm4, %v5125_v14, %v3508_v9  ;;  %v3510_v23 = vrot.slane %v3508_v9, 4  ;;  %v3291_v53 = vshll.u32 %v7682_v12, 16 }
 0x124   : > { %v5364_v18 = vpop.f32.mrb[17].mxu0  ;;  %v3505_v52 = vsel %vm6436_vm4, %v3503_v26, %v3504_v6  ;;  %v3276_v47 = vsel %vm6453_vm5, %v3271_v28, %v3275_v51  ;;  %v3290_v45 = vrot.slane %v3288_v16, 4  ;;  %v3297_v56 = vshll.u32 %v7694_v61, 16  ;;  %v5111_v51 = vld [vmem:[%s6395_s10 + $0x6c] sm:$0xe] }
 0x125   : > { %v7691_v36 = vadd.f32 %v5364_v18, %v5363_v20  ;;  %v5366_v3 = vpop.f32.mrb[18].mxu0  ;;  %v5172_v8 = vcombine.low %v3502_v10, %v3505_v52  ;;  %v5475_v31 = vpop.f32.mrb[16].mxu1  ;;  %v3286_v41 = vsel %vm6453_vm5, %v3281_v24, %v3285_v49  ;;  %v3512_v13 = vsel %vm6436_vm4, %v3510_v23, %v3511_v62  ;;  %v7725_v26 = vld [vmem:[%s6395_s10 + $0xa8] sm:$0xf] }
 0x126   : > { %v5367_v55 = vpop.f32.mrb[19].mxu0  ;;  %v5476_v27 = vpop.f32.mrb[17].mxu1  ;;  %v5162_v43 = vcombine.low %v3276_v47, %v3286_v41  ;;  %v5173_v7 = vcombine.low %v3509_v44, %v3512_v13  ;;  %v3301_v60 = vshrl.u32 %v7694_v61, 16  ;;  %v3293_v34 = vrot.slane %v3291_v53, 5  ;;  %v7736_v47 = vld [vmem:[%s6395_s10 + $0xac] sm:$0xf] }
 0x127   : > { %v7703_v19 = vadd.f32 %v5367_v55, %v5366_v3  ;;  %5851 = vmatprep.mubr.bf16.mxu1 %v5172_v8  ;;  %v7715_v4 = vadd.f32 %v5476_v27, %v5475_v31  ;;  %v5478_v17 = vpop.f32.mrb[18].mxu1  ;;  %v3299_v49 = vrot.slane %v3297_v56, 5  ;;  %v3307_v40 = vshll.u32 %v7706_v0, 16  ;;  %v5112_v53 = vld [vmem:[%s6395_s10 + $0x78] sm:$0xe] }
 0x128   : > { %v5479_v63 = vpop.f32.mrb[19].mxu1  ;;  %v5126_v33 = vrot.slane %v5110_v59, 9  ;;  %4096 = vmatprep.mubr.bf16.mxu0 %v5162_v43  ;;  %v3303_v14 = vrot.slane %v3301_v60, 4  ;;  %v3515_v20 = vrot.slane %v7508_v25, 5  ;;  %v3518_v21 = vrot.slane %v7513_v58, 5 }
 0x129   : > { %v7720_v6 = vadd.f32 %v5479_v63, %v5478_v17  ;;  %v3294_v9 = vor.u32 %v3293_v34, %v3290_v45  ;;  %v3309_v18 = vrot.slane %v3307_v40, 5  ;;  %v5147_v28 = vcombine.low %v7682_v12, %v7694_v61  ;;  %v7744_v59 = vld [vmem:[%s6395_s10 + $0xb0] sm:$0x1] }
 0x12a   : > { %v5127_v62 = vrot.slane %v5111_v51, 9  ;;  %4097 = vmatmul.mubr.bf16.gmra.mrb[120].mxu0 %v5146_v22  ;;  %5852 = vmatmul.mubr.bf16.gmra.mrb[88].mxu1 %v5173_v7  ;;  %v3304_v16 = vor.u32 %v3303_v14, %v3299_v49  ;;  %v3516_v25 = vsel %vm6436_vm4, %v5126_v33, %v3515_v20  ;;  %v3517_v24 = vrot.slane %v3515_v20, 4  ;;  %v5113_v33 = vld [vmem:[%s6395_s10 + $0x84] sm:$0xe] }
 0x12b   : > { %v5369_v10 = vpop.f32.mrb[20].mxu0  ;;  %v3522_v58 = vrot.slane %v7550_v29, 5  ;;  %v3295_v44 = vrot.slane %v3294_v9, 4  ;;  %v3525_v23 = vrot.slane %v7557_v46, 5  ;;  %v3312_v22 = vshrl.u32 %v7725_v26, 16 }
 0x12c   : > { %v5370_v3 = vpop.f32.mrb[21].mxu0  ;;  %v3305_v8 = vrot.slane %v3304_v16, 4  ;;  %v3519_v31 = vsel %vm6436_vm4, %v3517_v24, %v3518_v21  ;;  %v3315_v17 = vshll.u32 %v7725_v26, 16  ;;  %v3321_v60 = vshll.u32 %v7736_v47, 16 }
 0x12d   : > { %v5372_v52 = vpop.f32.mrb[22].mxu0  ;;  %v7733_v55 = vadd.f32 %v5370_v3, %v5369_v10  ;;  %v3523_v45 = vsel %vm6436_vm4, %v5127_v62, %v3522_v58  ;;  %v3524_v29 = vrot.slane %v3522_v58, 4  ;;  %v3300_v46 = vsel %vm6453_vm5, %v3295_v44, %v3299_v49 }
 0x12e   : > { %v5373_v12 = vpop.f32.mrb[23].mxu0  ;;  %v5174_v41 = vcombine.low %v3516_v25, %v3519_v31  ;;  %v3314_v27 = vrot.slane %v3312_v22, 4  ;;  %v3310_v56 = vsel %vm6453_vm5, %v3305_v8, %v3309_v18  ;;  %v3325_v49 = vshrl.u32 %v7736_v47, 16  ;;  %v7763_v18 = vld [vmem:[%s6395_s10 + $0xb4] sm:$0xf] }
 0x12f   : > { %v7748_v13 = vadd.f32 %v5373_v12, %v5372_v52  ;;  %v3526_v43 = vsel %vm6436_vm4, %v3524_v29, %v3525_v23  ;;  %v5481_v7 = vpop.f32.mrb[20].mxu1  ;;  %v5163_v51 = vcombine.low %v3300_v46, %v3310_v56  ;;  %v3331_v40 = vshll.u32 %v7744_v59, 16 }
 0x130   : > { %5855 = vmatprep.mubr.bf16.mxu1 %v5174_v41  ;;  %v5175_v63 = vcombine.low %v3523_v45, %v3526_v43  ;;  %v5482_v34 = vpop.f32.mrb[21].mxu1  ;;  %v3317_v21 = vrot.slane %v3315_v17, 5  ;;  %v3323_v10 = vrot.slane %v3321_v60, 5  ;;  %v5128_v9 = vrot.slane %v5112_v53, 9  ;;  %v7778_v41 = vld [vmem:[%s6395_s10 + $0xb8] sm:$0xf] }
 0x131   : > { %v7760_v14 = vadd.f32 %v5482_v34, %v5481_v7  ;;  %v5484_v20 = vpop.f32.mrb[22].mxu1  ;;  %4104 = vmatprep.mubr.bf16.mxu0 %v5163_v51  ;;  %v3327_v3 = vrot.slane %v3325_v49, 4  ;;  %v3333_v16 = vrot.slane %v3331_v40, 5  ;;  %v3529_v25 = vrot.slane %v7577_v39, 5  ;;  %v7790_v51 = vld [vmem:[%s6395_s10 + $0xbc] sm:$0x1] }
 0x132   : > { %v5485_v62 = vpop.f32.mrb[23].mxu1  ;;  %v3532_v24 = vrot.slane %v7586_v11, 5  ;;  %4105 = vmatmul.mubr.bf16.gmra.mrb[124].mxu0 %v5147_v28  ;;  %5856 = vmatmul.mubr.bf16.gmra.mrb[92].mxu1 %v5175_v63  ;;  %v3318_v52 = vor.u32 %v3317_v21, %v3314_v27  ;;  %v5148_v44 = vcombine.low %v7725_v26, %v7736_v47  ;;  %v5129_v23 = vrot.slane %v5113_v33, 9  ;;  %v5114_v34 = vld [vmem:[%s6395_s10 + $0x90] sm:$0xe] }
 0x133   : > { %v7767_v58 = vadd.f32 %v5485_v62, %v5484_v20  ;;  %v5375_v12 = vpop.f32.mrb[24].mxu0  ;;  %v3328_v22 = vor.u32 %v3327_v3, %v3323_v10  ;;  %v3530_v8 = vsel %vm6436_vm4, %v5128_v9, %v3529_v25  ;;  %v3531_v31 = vrot.slane %v3529_v25, 4 }
 0x134   : > { %v3536_v39 = vrot.slane %v7614_v38, 5  ;;  %v5376_v45 = vpop.f32.mrb[25].mxu0  ;;  %v3319_v11 = vrot.slane %v3318_v52, 4  ;;  %v3539_v28 = vrot.slane %v7628_v30, 5  ;;  %v3336_v26 = vshrl.u32 %v7763_v18, 16 }
 0x135   : > { %v7775_v29 = vadd.f32 %v5376_v45, %v5375_v12  ;;  %v5378_v46 = vpop.f32.mrb[26].mxu0  ;;  %v3329_v27 = vrot.slane %v3328_v22, 4  ;;  %v3533_v53 = vsel %vm6436_vm4, %v3531_v31, %v3532_v24  ;;  %v3339_v20 = vshll.u32 %v7763_v18, 16  ;;  %v5115_v24 = vld [vmem:[%s6395_s10 + $0x9c] sm:$0xe] }
 0x136   : > { %v3537_v38 = vsel %vm6436_vm4, %v5129_v23, %v3536_v39  ;;  %v3538_v56 = vrot.slane %v3536_v39, 4  ;;  %v5379_v43 = vpop.f32.mrb[27].mxu0  ;;  %v3324_v30 = vsel %vm6453_vm5, %v3319_v11, %v3323_v10  ;;  %v5176_v7 = vcombine.low %v3530_v8, %v3533_v53  ;;  %v7809_v11 = vld [vmem:[%s6395_s10 + $0xc0] sm:$0xf] }
 0x137   : > { %v5487_v17 = vpop.f32.mrb[24].mxu1  ;;  %v7787_v60 = vadd.f32 %v5379_v43, %v5378_v46  ;;  %v3338_v63 = vrot.slane %v3336_v26, 4  ;;  %v3334_v49 = vsel %vm6453_vm5, %v3329_v27, %v3333_v16  ;;  %v3345_v21 = vshll.u32 %v7778_v41, 16 }
 0x138   : > { %v3540_v40 = vsel %vm6436_vm4, %v3538_v56, %v3539_v28  ;;  %v5488_v33 = vpop.f32.mrb[25].mxu1  ;;  %v5164_v10 = vcombine.low %v3324_v30, %v3334_v49  ;;  %5859 = vmatprep.mubr.bf16.mxu1 %v5176_v7  ;;  %v3349_v25 = vshrl.u32 %v7778_v41, 16  ;;  %v3341_v16 = vrot.slane %v3339_v20, 5  ;;  %v7828_v20 = vld [vmem:[%s6395_s10 + $0xc8] sm:$0x1] }
 0x139   : > { %v5177_v9 = vcombine.low %v3537_v38, %v3540_v40  ;;  %v7799_v62 = vadd.f32 %v5488_v33, %v5487_v17  ;;  %v5490_v3 = vpop.f32.mrb[26].mxu1  ;;  %v3347_v23 = vrot.slane %v3345_v21, 5  ;;  %v3355_v12 = vshll.u32 %v7790_v51, 16 }
 0x13a   : > { %v5491_v52 = vpop.f32.mrb[27].mxu1  ;;  %v5130_v22 = vrot.slane %v5114_v34, 9  ;;  %4112 = vmatprep.mubr.bf16.mxu0 %v5164_v10  ;;  %v3351_v31 = vrot.slane %v3349_v25, 4  ;;  %v3543_v39 = vrot.slane %v7656_v15, 5  ;;  %v3546_v45 = vrot.slane %v7663_v48, 5 }
 0x13b   : > { %5860 = vmatmul.mubr.bf16.gmra.mrb[0].mxu1 %v5177_v9  ;;  %v7804_v8 = vadd.f32 %v5491_v52, %v5490_v3  ;;  %4113 = vmatmul.mubr.bf16.gmra.mrb[128].mxu0 %v5148_v44  ;;  %v3342_v28 = vor.u32 %v3341_v16, %v3338_v63  ;;  %v3357_v46 = vrot.slane %v3355_v12, 5  ;;  %v5149_v26 = vcombine.low %v7763_v18, %v7778_v41  ;;  %v5381_v53 = vpop.f32.mrb[28].mxu0  ;;  %v7820_v63 = vld [vmem:[%s6395_s10 + $0xc4] sm:$0xf]  ;;  %v5116_v3 = vld [vmem:[%s6395_s10 + $0xa8] sm:$0xe] }
 0x13c   : > { %v5131_v27 = vrot.slane %v5115_v24, 9  ;;  %v3352_v38 = vor.u32 %v3351_v31, %v3347_v23  ;;  %v3544_v56 = vsel %vm6436_vm4, %v5130_v22, %v3543_v39  ;;  %v3545_v43 = vrot.slane %v3543_v39, 4  ;;  %v5382_v48 = vpop.f32.mrb[29].mxu0 }
 0x13d   : > { %v3550_v15 = vrot.slane %v7694_v61, 5  ;;  %v3343_v30 = vrot.slane %v3342_v28, 4  ;;  %v3553_v44 = vrot.slane %v7706_v0, 5  ;;  %v7817_v7 = vadd.f32 %v5382_v48, %v5381_v53  ;;  %v5384_v17 = vpop.f32.mrb[30].mxu0  ;;  %v5117_v28 = vld [vmem:[%s6395_s10 + $0xb4] sm:$0xe] }
 0x13e   : > { %v3360_v18 = vshrl.u32 %v7809_v11, 16  ;;  %v3353_v34 = vrot.slane %v3352_v38, 4  ;;  %v3547_v49 = vsel %vm6436_vm4, %v3545_v43, %v3546_v45  ;;  %v5385_v33 = vpop.f32.mrb[31].mxu0  ;;  %v3363_v16 = vshll.u32 %v7809_v11, 16  ;;  %v7847_v43 = vld [vmem:[%s6395_s10 + $0xcc] sm:$0xf] }
 0x13f   : > { %v3551_v40 = vsel %vm6436_vm4, %v5131_v27, %v3550_v15  ;;  %v3552_v61 = vrot.slane %v3550_v15, 4  ;;  %v3348_v0 = vsel %vm6453_vm5, %v3343_v30, %v3347_v23  ;;  %v5178_v21 = vcombine.low %v3544_v56, %v3547_v49 }
 0x140   : > { %v7832_v10 = vadd.f32 %v5385_v33, %v5384_v17  ;;  %v3362_v9 = vrot.slane %v3360_v18, 4  ;;  %v3358_v25 = vsel %vm6453_vm5, %v3353_v34, %v3357_v46  ;;  %v5493_v52 = vpop.f32.mrb[28].mxu1  ;;  %v3369_v12 = vshll.u32 %v7820_v63, 16 }
 0x141   : > { %v3554_v24 = vsel %vm6436_vm4, %v3552_v61, %v3553_v44  ;;  %v5165_v22 = vcombine.low %v3348_v0, %v3358_v25  ;;  %5863 = vmatprep.mubr.bf16.mxu1 %v5178_v21  ;;  %v5494_v31 = vpop.f32.mrb[29].mxu1  ;;  %v3373_v39 = vshrl.u32 %v7820_v63, 16  ;;  %v3379_v45 = vshll.u32 %v7828_v20, 16 }
 0x142   : > { %v5179_v23 = vcombine.low %v3551_v40, %v3554_v24  ;;  %v7844_v27 = vadd.f32 %v5494_v31, %v5493_v52  ;;  %v5496_v46 = vpop.f32.mrb[30].mxu1  ;;  %v3365_v53 = vrot.slane %v3363_v16, 5  ;;  %v3371_v38 = vrot.slane %v3369_v12, 5 }
 0x143   : > { %v5132_v56 = vrot.slane %v5116_v3, 9  ;;  %4120 = vmatprep.mubr.bf16.mxu0 %v5165_v22  ;;  %v5497_v15 = vpop.f32.mrb[31].mxu1  ;;  %v3375_v48 = vrot.slane %v3373_v39, 4  ;;  %v3557_v30 = vrot.slane %v7736_v47, 5  ;;  %v3560_v44 = vrot.slane %v7744_v59, 5  ;;  %v5387_v17 = vpop.f32.mrb[32].mxu0 }
 0x144   : > { %5864 = vmatmul.mubr.bf16.gmra.mrb[4].mxu1 %v5179_v23  ;;  %4121 = vmatmul.mubr.bf16.gmra.mrb[132].mxu0 %v5149_v26  ;;  %v7851_v18 = vadd.f32 %v5497_v15, %v5496_v46  ;;  %v3366_v34 = vor.u32 %v3365_v53, %v3362_v9  ;;  %v3381_v49 = vrot.slane %v3379_v45, 5  ;;  %v5133_v40 = vrot.slane %v5117_v28, 9  ;;  %v5388_v61 = vpop.f32.mrb[33].mxu0  ;;  %v7871_v45 = vld [vmem:[%s6395_s10 + $0xd0] sm:$0xf] }
 0x145   : > { %v3376_v33 = vor.u32 %v3375_v48, %v3371_v38  ;;  %v3558_v0 = vsel %vm6436_vm4, %v5132_v56, %v3557_v30  ;;  %v3559_v21 = vrot.slane %v3557_v30, 4  ;;  %v3564_v3 = vrot.slane %v7778_v41, 5  ;;  %v5390_v25 = vpop.f32.mrb[34].mxu0  ;;  %v5103_v28 = vld [vmem:[%s6395_s10 + $0xd4] sm:$0x1] }
 0x146   : > { %v3367_v47 = vrot.slane %v3366_v34, 4  ;;  %v3567_v59 = vrot.slane %v7790_v51, 5  ;;  %v7857_v26 = vadd.f32 %v5388_v61, %v5387_v17  ;;  %v5391_v24 = vpop.f32.mrb[35].mxu0  ;;  %v3384_v9 = vshrl.u32 %v7847_v43, 16  ;;  %v5118_v48 = vld [vmem:[%s6395_s10 + $0xc0] sm:$0xe] }
 0x147   : > { %v3377_v52 = vrot.slane %v3376_v33, 4  ;;  %v3561_v16 = vsel %vm6436_vm4, %v3559_v21, %v3560_v44  ;;  %v3565_v12 = vsel %vm6436_vm4, %v5133_v40, %v3564_v3  ;;  %v3566_v41 = vrot.slane %v3564_v3, 4  ;;  %v5119_v34 = vld [vmem:[%s6395_s10 + $0xcc] sm:$0xe] }
 0x148   : > { %v3372_v22 = vsel %vm6453_vm5, %v3367_v47, %v3371_v38  ;;  %v5180_v23 = vcombine.low %v3558_v0, %v3561_v16  ;;  %v5150_v51 = vcombine.low %v7809_v11, %v7820_v63  ;;  %v5499_v31 = vpop.f32.mrb[32].mxu1  ;;  %v7868_v39 = vadd.f32 %v5391_v24, %v5390_v25 }
 0x149   : > { %v3382_v46 = vsel %vm6453_vm5, %v3377_v52, %v3381_v49  ;;  %v3568_v53 = vsel %vm6436_vm4, %v3566_v41, %v3567_v59  ;;  %v5500_v56 = vpop.f32.mrb[33].mxu1  ;;  %v3386_v15 = vrot.slane %v3384_v9, 4  ;;  %v3387_v38 = vshll.u32 %v7847_v43, 16 }
 0x14a   : > { %v5166_v30 = vcombine.low %v3372_v22, %v3382_v46  ;;  %5867 = vmatprep.mubr.bf16.mxu1 %v5180_v23  ;;  %v5181_v11 = vcombine.low %v3565_v12, %v3568_v53  ;;  %v7880_v44 = vadd.f32 %v5500_v56, %v5499_v31  ;;  %v5502_v17 = vpop.f32.mrb[34].mxu1  ;;  %v3393_v33 = vshll.u32 %v7871_v45, 16 }
 0x14b   : > { %v5503_v40 = vpop.f32.mrb[35].mxu1  ;;  %v3389_v61 = vrot.slane %v3387_v38, 5  ;;  %v3397_v49 = vshrl.u32 %v7871_v45, 16  ;;  %v3403_v0 = vshll.u32 %v5103_v28, 16  ;;  %v5393_v21 = vpop.f32.mrb[36].mxu0  ;;  %v5134_v25 = vrot.slane %v5118_v48, 9 }
 0x14c   : > { %4128 = vmatprep.mubr.bf16.mxu0 %v5166_v30  ;;  %5868 = vmatmul.mubr.bf16.gmra.mrb[8].mxu1 %v5181_v11  ;;  %v7885_v3 = vadd.f32 %v5503_v40, %v5502_v17  ;;  %v3571_v47 = vrot.slane %v7820_v63, 5  ;;  %v3574_v59 = vrot.slane %v7828_v20, 5  ;;  %v5394_v24 = vpop.f32.mrb[37].mxu0  ;;  %v3395_v52 = vrot.slane %v3393_v33, 5 }
 0x14d   : > { %4129 = vmatmul.mubr.bf16.gmra.mrb[136].mxu0 %v5150_v51  ;;  %v3390_v9 = vor.u32 %v3389_v61, %v3386_v15  ;;  %v3399_v16 = vrot.slane %v3397_v49, 4  ;;  %v5396_v12 = vpop.f32.mrb[38].mxu0  ;;  %v5135_v23 = vrot.slane %v5119_v34, 9  ;;  %v3405_v56 = vrot.slane %v3403_v0, 5 }
 0x14e   : > { %v3572_v41 = vsel %vm6436_vm4, %v5134_v25, %v3571_v47  ;;  %v3573_v22 = vrot.slane %v3571_v47, 4  ;;  %v5397_v31 = vpop.f32.mrb[39].mxu0  ;;  %v3578_v38 = vrot.slane %v7871_v45, 5  ;;  %v3581_v20 = vrot.slane %v5103_v28, 5 }
 0x14f   : > { %v3391_v46 = vrot.slane %v3390_v9, 4  ;;  %v3400_v53 = vor.u32 %v3399_v16, %v3395_v52  ;;  %v7894_v15 = vadd.f32 %v5394_v24, %v5393_v21  ;;  %v7896_v48 = vadd.f32 %v5397_v31, %v5396_v12 }
 0x150   : > { %v3575_v63 = vsel %vm6436_vm4, %v3573_v22, %v3574_v59  ;;  %v5505_v51 = vpop.f32.mrb[36].mxu1  ;;  %v3579_v40 = vsel %vm6436_vm4, %v5135_v23, %v3578_v38  ;;  %v3580_v61 = vrot.slane %v3578_v38, 4  ;;  %v5151_v0 = vcombine.low %v7847_v43, %v7871_v45 }
 0x151   : > { %v3396_v30 = vsel %vm6453_vm5, %v3391_v46, %v3395_v52  ;;  %v3401_v11 = vrot.slane %v3400_v53, 4  ;;  %v5182_v17 = vcombine.low %v3572_v41, %v3575_v63  ;;  %v5506_v34 = vpop.f32.mrb[37].mxu1 }
 0x152   : > { %v7902_v33 = vadd.f32 %v5506_v34, %v5505_v51  ;;  %v5508_v49 = vpop.f32.mrb[38].mxu1  ;;  %v3582_v47 = vsel %vm6436_vm4, %v3580_v61, %v3581_v20 }
 0x153   : > { %v3406_v28 = vsel %vm6453_vm5, %v3401_v11, %v3405_v56  ;;  %5871 = vmatprep.mubr.bf16.mxu1 %v5182_v17  ;;  %v5509_v21 = vpop.f32.mrb[39].mxu1  ;;  %v5183_v9 = vcombine.low %v3579_v40, %v3582_v47 }
 0x154   : > { %v5167_v25 = vcombine.low %v3396_v30, %v3406_v28  ;;  %v7910_v59 = vadd.f32 %v5509_v21, %v5508_v49  ;;  %v226_v28 = vld [vmem:[%s8393_s2 + $0x80] sm:$0xff] }
 0x155   : > { %v5399_v24 = vpop.f32.mrb[40].mxu0  ;;  %5872 = vmatmul.mubr.bf16.gmra.mrb[12].mxu1 %v5183_v9 }
 0x156   : > { %v5400_v52 = vpop.f32.mrb[41].mxu0  ;;  %4136 = vmatprep.mubr.bf16.mxu0 %v5167_v25 }
 0x157   : > { %v7912_v16 = vadd.f32 %v5400_v52, %v5399_v24  ;;  %v5402_v12 = vpop.f32.mrb[42].mxu0  ;;  %4137 = vmatmul.mubr.bf16.gmra.mrb[140].mxu0 %v5151_v0  ;;  %v227_v24 = vld [vmem:[%s8393_s2 + $0x88] sm:$0xff] }
 0x158   : > { %v5403_v50 = vpop.f32.mrb[43].mxu0 }
 0x159   : > { %v7914_v41 = vadd.f32 %v5403_v50, %v5402_v12  ;;  %v5511_v43 = vpop.f32.mrb[40].mxu1  ;;  %v5975_v12 = vadd.f32 %v7857_v26, %v226_v28 }
 0x15a   : > { %v5512_v45 = vpop.f32.mrb[41].mxu1 }
 0x15b   : > { %v7916_v22 = vadd.f32 %v5512_v45, %v5511_v43  ;;  %v5514_v42 = vpop.f32.mrb[42].mxu1 }
 0x15c   : > { %v5515_v23 = vpop.f32.mrb[43].mxu1 }
 0x15d   : > { %v7918_v31 = vadd.f32 %v5515_v23, %v5514_v42  ;;  %v5405_v46 = vpop.f32.mrb[44].mxu0  ;;  %v5983_v42 = vadd.f32 %v7868_v39, %v227_v24  ;;  %v229_v39 = vld [vmem:[%s8393_s2 + $0x98] sm:$0xff] }
 0x15e   : > { %v5406_v53 = vpop.f32.mrb[45].mxu0  ;;  %v5979_v24 = vadd.f32 %v7896_v48, %v229_v39  ;;  %v231_v48 = vld [vmem:[%s8393_s2 + $0xa8] sm:$0xff] }
 0x15f   : > { %v7920_v56 = vadd.f32 %v5406_v53, %v5405_v46  ;;  %v5408_v38 = vpop.f32.mrb[46].mxu0 }
 0x160   : > { %v5409_v63 = vpop.f32.mrb[47].mxu0 }
 0x161   : > { %v5517_v20 = vpop.f32.mrb[44].mxu1  ;;  %v7922_v51 = vadd.f32 %v5409_v63, %v5408_v38 }
 0x162   : > { %v5518_v30 = vpop.f32.mrb[45].mxu1 }
 0x163   : > { %v7924_v11 = vadd.f32 %v5518_v30, %v5517_v20  ;;  %v5520_v17 = vpop.f32.mrb[46].mxu1 }
 0x164   : > { %v5521_v34 = vpop.f32.mrb[47].mxu1 }
 0x165   : > { %v7926_v40 = vadd.f32 %v5521_v34, %v5520_v17  ;;  %v228_v17 = vld [vmem:[%s8393_s2 + $0x90] sm:$0xff] }
 0x166   : > { %v5971_v28 = vadd.f32 %v7894_v15, %v228_v17  ;;  %v230_v15 = vld [vmem:[%s8393_s2 + $0xa0] sm:$0xff] }
 0x167   : > { %v5411_v61 = vpop.f32.mrb[48].mxu0 }
 0x168   : > { %v5412_v49 = vpop.f32.mrb[49].mxu0 }
 0x169   : > { %v7931_v0 = vadd.f32 %v5412_v49, %v5411_v61  ;;  %v5414_v21 = vpop.f32.mrb[50].mxu0 }
 0x16a   : > { %v5415_v47 = vpop.f32.mrb[51].mxu0 }
 0x16b   : > { %v5523_v25 = vpop.f32.mrb[48].mxu1  ;;  %v7936_v52 = vadd.f32 %v5415_v47, %v5414_v21 }
 0x16c   : > { %v5524_v9 = vpop.f32.mrb[49].mxu1 }
 0x16d   : > { %v5525_v50 = vadd.f32 %v5524_v9, %v5523_v25  ;;  %v5526_v43 = vpop.f32.mrb[50].mxu1 }
 0x16e   : > { %v5527_v45 = vpop.f32.mrb[51].mxu1 }
 0x16f   : > { %v7940_v23 = vadd.f32 %v5975_v12, %v5525_v50  ;;  %v5528_v46 = vadd.f32 %v5527_v45, %v5526_v43  ;;  %v5417_v53 = vpop.f32.mrb[52].mxu0 }
 0x170   : > { %v5418_v63 = vpop.f32.mrb[53].mxu0 }
 0x171   : > { %v7942_v38 = vadd.f32 %v5983_v42, %v5528_v46  ;;  %v7944_v20 = vadd.f32 %v5418_v63, %v5417_v53  ;;  %v5420_v30 = vpop.f32.mrb[54].mxu0 }
 0x172   : > { %v5421_v26 = vpop.f32.mrb[55].mxu0 }
 0x173   : > { %v5529_v34 = vpop.f32.mrb[52].mxu1  ;;  %v7949_v61 = vadd.f32 %v5421_v26, %v5420_v30  ;;  %v5991_v26 = vadd.f32 %v7912_v16, %v230_v15 }
 0x174   : > { %v5530_v49 = vpop.f32.mrb[53].mxu1 }
 0x175   : > { %v5531_v21 = vadd.f32 %v5530_v49, %v5529_v34  ;;  %v5532_v25 = vpop.f32.mrb[54].mxu1 }
 0x176   : > { %v5533_v47 = vpop.f32.mrb[55].mxu1 }
 0x177   : > { %v7956_v9 = vadd.f32 %v5971_v28, %v5531_v21  ;;  %v5534_v12 = vadd.f32 %v5533_v47, %v5532_v25  ;;  %v5999_v28 = vadd.f32 %v7914_v41, %v231_v48  ;;  %v233_v41 = vld [vmem:[%s8393_s2 + $0xb8] sm:$0xff]  ;;  %v212_v48 = vld [vmem:[%s8393_s2 + $0x10] sm:$0xff] }
 0x178   : > { %v5423_v50 = vpop.f32.mrb[56].mxu0 }
 0x179   : > { %v7958_v43 = vadd.f32 %v5979_v24, %v5534_v12  ;;  %v5424_v45 = vpop.f32.mrb[57].mxu0 }
 0x17a   : > { %v7960_v42 = vadd.f32 %v5424_v45, %v5423_v50  ;;  %v5426_v46 = vpop.f32.mrb[58].mxu0 }
 0x17b   : > { %v5427_v53 = vpop.f32.mrb[59].mxu0 }
 0x17c   : > { %v7965_v63 = vadd.f32 %v5427_v53, %v5426_v46  ;;  %v232_v46 = vld [vmem:[%s8393_s2 + $0xb0] sm:$0xff] }
 0x17d   : > { %v5535_v30 = vpop.f32.mrb[56].mxu1 }
 0x17e   : > { %v5536_v17 = vpop.f32.mrb[57].mxu1 }
 0x17f   : > { %v5537_v34 = vadd.f32 %v5536_v17, %v5535_v30  ;;  %v5538_v39 = vpop.f32.mrb[58].mxu1  ;;  %v5987_v17 = vadd.f32 %v7920_v56, %v232_v46  ;;  %v211_v56 = vld [vmem:[%s8393_s2 + $0x8] sm:$0xff] }
 0x180   : > { %v5539_v49 = vpop.f32.mrb[59].mxu1 }
 0x181   : > { %v7972_v21 = vadd.f32 %v5991_v26, %v5537_v34  ;;  %v5540_v25 = vadd.f32 %v5539_v49, %v5538_v39  ;;  %v5429_v47 = vpop.f32.mrb[60].mxu0  ;;  %v210_v39 = vld [vmem:[%s8393_s2] sm:$0xff] }
 0x182   : > { %v5430_v24 = vpop.f32.mrb[61].mxu0 }
 0x183   : > { %8400 = vst [vmem:[#allocation2_spill] sm:$0xff] %v7972_v21  ;;  %v7974_v12 = vadd.f32 %v5999_v28, %v5540_v25  ;;  %v7976_v50 = vadd.f32 %v5430_v24, %v5429_v47  ;;  %v5432_v45 = vpop.f32.mrb[62].mxu0  ;;  %v213_v28 = vld [vmem:[%s8393_s2 + $0x18] sm:$0xff]  ;;  %v5995_v25 = vadd.f32 %v7922_v51, %v233_v41  ;;  %v234_v51 = vld [vmem:[%s8393_s2 + $0xc0] sm:$0xff] }
 0x184   : > { %v5433_v16 = vpop.f32.mrb[63].mxu0  ;;  %v5901_v21 = vadd.f32 %v7583_v32, %v213_v28 }
 0x185   : > { %8401 = vst [vmem:[#allocation3_spill] sm:$0xff] %v7974_v12  ;;  %v5541_v53 = vpop.f32.mrb[60].mxu1  ;;  %v7981_v15 = vadd.f32 %v5433_v16, %v5432_v45  ;;  %v5891_v45 = vadd.f32 %v7581_v54, %v212_v48  ;;  %v5896_v16 = vadd.f32 %v7538_v2, %v210_v39  ;;  %v5906_v54 = vadd.f32 %v7545_v57, %v211_v56  ;;  %v235_v39 = vld [vmem:[%s8393_s2 + $0xc8] sm:$0xff]  ;;  %v217_v56 = vld [vmem:[%s8393_s2 + $0x38] sm:$0xff] }
 0x186   : > { %v5542_v30 = vpop.f32.mrb[61].mxu1  ;;  %v6007_v57 = vadd.f32 %v7931_v0, %v234_v51 }
 0x187   : > { %v5543_v26 = vadd.f32 %v5542_v30, %v5541_v53  ;;  %v5544_v34 = vpop.f32.mrb[62].mxu1 }
 0x188   : > { %v5545_v49 = vpop.f32.mrb[63].mxu1 }
 0x189   : > { %v7997_v47 = vadd.f32 %v5987_v17, %v5543_v26  ;;  %v5546_v24 = vadd.f32 %v5545_v49, %v5544_v34 }
 0x18a   : > { %v5749_v46 = vpop.f32.mrb[64].mxu0 }
 0x18b   : > { %v8004_v53 = vadd.f32 %v5995_v25, %v5546_v24  ;;  %v5892_v30 = vadd.f32 %v5891_v45, %v5749_v46  ;;  %v1451_v12 = vpop.f32.mrb[65].mxu0  ;;  %v214_v24 = vld [vmem:[%s8393_s2 + $0x20] sm:$0xff]  ;;  %v6015_v46 = vadd.f32 %v7936_v52, %v235_v39  ;;  %v236_v52 = vld [vmem:[%s8393_s2 + $0xd0] sm:$0xff] }
 0x18c   : > { %v5897_v41 = vadd.f32 %v5896_v16, %v1451_v12  ;;  %v5750_v17 = vpop.f32.mrb[66].mxu0  ;;  %v216_v12 = vld [vmem:[%s8393_s2 + $0x30] sm:$0xff] }
 0x18d   : > { %v8012_v48 = vadd.f32 %v5892_v30, %v7760_v14  ;;  %v5547_v26 = vpop.f32.mrb[64].mxu1  ;;  %v5902_v34 = vadd.f32 %v5901_v21, %v5750_v17  ;;  %v1454_v2 = vpop.f32.mrb[67].mxu0  ;;  %v215_v30 = vld [vmem:[%s8393_s2 + $0x28] sm:$0xff] }
 0x18e   : > { %v8018_v32 = vadd.f32 %v5897_v41, %v7715_v4  ;;  %v5548_v49 = vpop.f32.mrb[65].mxu1  ;;  %v5907_v28 = vadd.f32 %v5906_v54, %v1454_v2 }
 0x18f   : > { %v5549_v14 = vadd.f32 %v5548_v49, %v5547_v26  ;;  %v8025_v25 = vadd.f32 %v5902_v34, %v7767_v58  ;;  %v5550_v21 = vpop.f32.mrb[66].mxu1  ;;  %v5911_v58 = vadd.f32 %v7653_v1, %v216_v12  ;;  %v5921_v26 = vadd.f32 %v7660_v5, %v217_v56  ;;  %v237_v12 = vld [vmem:[%s8393_s2 + $0xd8] sm:$0xff]  ;;  %v218_v56 = vld [vmem:[%s8393_s2 + $0x40] sm:$0xff] }
 0x190   : > { %v8031_v4 = vadd.f32 %v5907_v28, %v7720_v6  ;;  %v5551_v45 = vpop.f32.mrb[67].mxu1  ;;  %v5916_v6 = vadd.f32 %v7611_v37, %v214_v24  ;;  %v5926_v1 = vadd.f32 %v7618_v35, %v215_v30  ;;  %v6003_v35 = vadd.f32 %v7944_v20, %v236_v52 }
 0x191   : > { %v8037_v0 = vadd.f32 %v6007_v57, %v5549_v14  ;;  %v5552_v16 = vadd.f32 %v5551_v45, %v5550_v21  ;;  %v220_v21 = vld [vmem:[%s8393_s2 + $0x50] sm:$0xff] }
 0x192   : > { %v5753_v51 = vpop.f32.mrb[68].mxu0 }
 0x193   : > { %v8044_v41 = vadd.f32 %v6015_v46, %v5552_v16  ;;  %v5912_v17 = vadd.f32 %v5911_v58, %v5753_v51  ;;  %v1467_v54 = vpop.f32.mrb[69].mxu0  ;;  %v221_v16 = vld [vmem:[%s8393_s2 + $0x58] sm:$0xff]  ;;  %v6011_v58 = vadd.f32 %v7949_v61, %v237_v12  ;;  %v219_v51 = vld [vmem:[%s8393_s2 + $0x48] sm:$0xff]  ;;  %v238_v61 = vld [vmem:[%s8393_s2 + $0xe0] sm:$0xff] }
 0x194   : > { %v5917_v34 = vadd.f32 %v5916_v6, %v1467_v54  ;;  %v5754_v2 = vpop.f32.mrb[70].mxu0  ;;  %v5941_v52 = vadd.f32 %v7748_v13, %v221_v16 }
 0x195   : > { %v8052_v39 = vadd.f32 %v5912_v17, %v7844_v27  ;;  %v5553_v49 = vpop.f32.mrb[68].mxu1  ;;  %v5922_v28 = vadd.f32 %v5921_v26, %v5754_v2  ;;  %v1470_v37 = vpop.f32.mrb[71].mxu0 }
 0x196   : > { %v8058_v5 = vadd.f32 %v5917_v34, %v7799_v62  ;;  %v5554_v57 = vpop.f32.mrb[69].mxu1  ;;  %v5927_v14 = vadd.f32 %v5926_v1, %v1470_v37  ;;  %v239_v37 = vld [vmem:[%s8393_s2 + $0xe8] sm:$0xff] }
 0x197   : > { %v5555_v27 = vadd.f32 %v5554_v57, %v5553_v49  ;;  %v8065_v24 = vadd.f32 %v5922_v28, %v7851_v18  ;;  %v5556_v45 = vpop.f32.mrb[70].mxu1  ;;  %v5931_v18 = vadd.f32 %v7733_v55, %v220_v21  ;;  %v5946_v55 = vadd.f32 %v7703_v19, %v219_v51 }
 0x198   : > { %v8071_v62 = vadd.f32 %v5927_v14, %v7804_v8  ;;  %v5557_v46 = vpop.f32.mrb[71].mxu1  ;;  %v5936_v8 = vadd.f32 %v7691_v36, %v218_v56  ;;  %v224_v14 = vld [vmem:[%s8393_s2 + $0x70] sm:$0xff]  ;;  %v6023_v19 = vadd.f32 %v7960_v42, %v238_v61  ;;  %v225_v56 = vld [vmem:[%s8393_s2 + $0x78] sm:$0xff] }
 0x199   : > { %v8077_v20 = vadd.f32 %v6003_v35, %v5555_v27  ;;  %v5558_v30 = vadd.f32 %v5557_v46, %v5556_v45  ;;  %v222_v27 = vld [vmem:[%s8393_s2 + $0x60] sm:$0xff]  ;;  %v6031_v46 = vadd.f32 %v7965_v63, %v239_v37  ;;  %v240_v63 = vld [vmem:[%s8393_s2 + $0xf0] sm:$0xff] }
 0x19a   : > { %v5757_v6 = vpop.f32.mrb[72].mxu0 }
 0x19b   : > { %v8084_v17 = vadd.f32 %v6011_v58, %v5558_v30  ;;  %v5932_v54 = vadd.f32 %v5931_v18, %v5757_v6  ;;  %v1483_v26 = vpop.f32.mrb[73].mxu0  ;;  %v223_v58 = vld [vmem:[%s8393_s2 + $0x68] sm:$0xff] }
 0x19c   : > { %v5937_v34 = vadd.f32 %v5936_v8, %v1483_v26  ;;  %v5758_v2 = vpop.f32.mrb[74].mxu0  ;;  %v5961_v8 = vadd.f32 %v7832_v10, %v225_v56 }
 0x19d   : > { %v8092_v1 = vadd.f32 %v5932_v54, %v7902_v33  ;;  %v5559_v49 = vpop.f32.mrb[72].mxu1  ;;  %v5942_v28 = vadd.f32 %v5941_v52, %v5758_v2  ;;  %v1486_v36 = vpop.f32.mrb[75].mxu0  ;;  %v241_v2 = vld [vmem:[%s8393_s2 + $0xf8] sm:$0xff] }
 0x19e   : > { %v8098_v13 = vadd.f32 %v5937_v34, %v7880_v44  ;;  %v5560_v12 = vpop.f32.mrb[73].mxu1  ;;  %v5947_v57 = vadd.f32 %v5946_v55, %v1486_v36 }
 0x19f   : > { %v5561_v33 = vadd.f32 %v5560_v12, %v5559_v49  ;;  %v8105_v21 = vadd.f32 %v5942_v28, %v7910_v59  ;;  %v5562_v35 = vpop.f32.mrb[74].mxu1  ;;  %v5951_v59 = vadd.f32 %v7817_v7, %v224_v14  ;;  %v5966_v7 = vadd.f32 %v7787_v60, %v223_v58 }
 0x1a0   : > { %v8111_v44 = vadd.f32 %v5947_v57, %v7885_v3  ;;  %v5563_v45 = vpop.f32.mrb[75].mxu1  ;;  %v5956_v3 = vadd.f32 %v7775_v29, %v222_v27  ;;  %v6019_v28 = vadd.f32 %v7976_v50, %v240_v63  ;;  %v6027_v57 = vadd.f32 %v7981_v15, %v241_v2 }
 0x1a1   : > { %v8117_v42 = vadd.f32 %v6023_v19, %v5561_v33  ;;  %v5564_v16 = vadd.f32 %v5563_v45, %v5562_v35 }
 0x1a2   : > { %v5761_v30 = vpop.f32.mrb[76].mxu0 }
 0x1a3   : > { %v8124_v18 = vadd.f32 %v6031_v46, %v5564_v16  ;;  %v5952_v51 = vadd.f32 %v5951_v59, %v5761_v30  ;;  %v1499_v6 = vpop.f32.mrb[77].mxu0 }
 0x1a4   : > { %v5957_v54 = vadd.f32 %v5956_v3, %v1499_v6  ;;  %v5762_v26 = vpop.f32.mrb[78].mxu0 }
 0x1a5   : > { %v8132_v52 = vadd.f32 %v5952_v51, %v7924_v11  ;;  %v5565_v61 = vpop.f32.mrb[76].mxu1  ;;  %v5962_v34 = vadd.f32 %v5961_v8, %v5762_v26  ;;  %v1502_v29 = vpop.f32.mrb[79].mxu0 }
 0x1a6   : > { %v8138_v10 = vadd.f32 %v5957_v54, %v7916_v22  ;;  %v5566_v55 = vpop.f32.mrb[77].mxu1  ;;  %v5967_v49 = vadd.f32 %v5966_v7, %v1502_v29 }
 0x1a7   : > { %v5567_v36 = vadd.f32 %v5566_v55, %v5565_v61  ;;  %v8142_v60 = vadd.f32 %v5962_v34, %v7926_v40  ;;  %v5568_v11 = vpop.f32.mrb[78].mxu1 }
 0x1a8   : > { %v5968_v37 = vadd.f32 %v5967_v49, %v7918_v31  ;;  %v5569_v12 = vpop.f32.mrb[79].mxu1 }
 0x1a9   : > { %v8146_v14 = vadd.f32 %v6019_v28, %v5567_v36  ;;  %v5570_v19 = vadd.f32 %v5569_v12, %v5568_v11 }
 0x1ab   : > { %v8148_v33 = vadd.f32 %v6027_v57, %v5570_v19 }
 0x1ad   : > { %v5611_v22 = vpop.f32.mrb[80].mxu0 }
 0x1ae   : > { %v5612_v35 = vpop.f32.mrb[81].mxu0 }
 0x1af   : > { %v5613_v27 = vadd.f32 %v5612_v35, %v5611_v22  ;;  %v5614_v45 = vpop.f32.mrb[82].mxu0 }
 0x1b0   : > { %v5615_v50 = vpop.f32.mrb[83].mxu0 }
 0x1b1   : > { %v5616_v56 = vadd.f32 %v5615_v50, %v5614_v45  ;;  %v8151_v40 = vadd.f32 %v8018_v32, %v5613_v27 }
 0x1b3   : > { %v8154_v46 = vadd.f32 %v8031_v4, %v5616_v56 }
 0x1b5   : > { %v5617_v31 = vpop.f32.mrb[84].mxu0 }
 0x1b6   : > { %v5618_v16 = vpop.f32.mrb[85].mxu0 }
 0x1b7   : > { %v5619_v15 = vadd.f32 %v5618_v16, %v5617_v31  ;;  %v5620_v59 = vpop.f32.mrb[86].mxu0 }
 0x1b8   : > { %v5621_v58 = vpop.f32.mrb[87].mxu0 }
 0x1b9   : > { %v5622_v30 = vadd.f32 %v5621_v58, %v5620_v59  ;;  %v5894_v3 = vadd.f32 %v8012_v48, %v5619_v15 }
 0x1bb   : > { %v8158_v51 = vadd.f32 %v8025_v25, %v5622_v30 }
 0x1bd   : > { %v5623_v6 = vpop.f32.mrb[88].mxu0 }
 0x1be   : > { %v5624_v8 = vpop.f32.mrb[89].mxu0 }
 0x1bf   : > { %v5625_v63 = vadd.f32 %v5624_v8, %v5623_v6  ;;  %v5626_v54 = vpop.f32.mrb[90].mxu0 }
 0x1c0   : > { %v5627_v32 = vpop.f32.mrb[91].mxu0 }
 0x1c1   : > { %v5628_v26 = vadd.f32 %v5627_v32, %v5626_v54  ;;  %v8161_v4 = vadd.f32 %v8058_v5, %v5625_v63 }
 0x1c3   : > { %v8164_v7 = vadd.f32 %v8071_v62, %v5628_v26 }
 0x1c5   : > { %v5629_v61 = vpop.f32.mrb[92].mxu0 }
 0x1c6   : > { %v5630_v34 = vpop.f32.mrb[93].mxu0 }
 0x1c7   : > { %v5631_v29 = vadd.f32 %v5630_v34, %v5629_v61  ;;  %v5632_v2 = vpop.f32.mrb[94].mxu0 }
 0x1c8   : > { %v5633_v48 = vpop.f32.mrb[95].mxu0 }
 0x1c9   : > { %v5634_v55 = vadd.f32 %v5633_v48, %v5632_v2  ;;  %v8167_v25 = vadd.f32 %v8052_v39, %v5631_v29 }
 0x1cb   : > { %v8170_v49 = vadd.f32 %v8065_v24, %v5634_v55 }
 0x1cd   : > { %v5635_v28 = vpop.f32.mrb[96].mxu0 }
 0x1ce   : > { %v5636_v36 = vpop.f32.mrb[97].mxu0 }
 0x1cf   : > { %v5637_v11 = vadd.f32 %v5636_v36, %v5635_v28  ;;  %v5638_v5 = vpop.f32.mrb[98].mxu0 }
 0x1d0   : > { %v5639_v12 = vpop.f32.mrb[99].mxu0 }
 0x1d1   : > { %v5640_v57 = vadd.f32 %v5639_v12, %v5638_v5  ;;  %v8173_v62 = vadd.f32 %v8098_v13, %v5637_v11 }
 0x1d3   : > { %v8176_v19 = vadd.f32 %v8111_v44, %v5640_v57 }
 0x1d5   : > { %v5641_v22 = vpop.f32.mrb[100].mxu0 }
 0x1d6   : > { %v5642_v35 = vpop.f32.mrb[101].mxu0 }
 0x1d7   : > { %v5643_v27 = vadd.f32 %v5642_v35, %v5641_v22  ;;  %v5644_v39 = vpop.f32.mrb[102].mxu0 }
 0x1d8   : > { %v5645_v45 = vpop.f32.mrb[103].mxu0 }
 0x1d9   : > { %v5646_v50 = vadd.f32 %v5645_v45, %v5644_v39  ;;  %v8179_v24 = vadd.f32 %v8092_v1, %v5643_v27 }
 0x1db   : > { %v8182_v56 = vadd.f32 %v8105_v21, %v5646_v50 }
 0x1dd   : > { %v5647_v31 = vpop.f32.mrb[104].mxu0 }
 0x1de   : > { %v5648_v16 = vpop.f32.mrb[105].mxu0 }
 0x1df   : > { %v5649_v13 = vadd.f32 %v5648_v16, %v5647_v31  ;;  %v5650_v15 = vpop.f32.mrb[106].mxu0 }
 0x1e0   : > { %v5651_v59 = vpop.f32.mrb[107].mxu0 }
 0x1e1   : > { %v5652_v44 = vadd.f32 %v5651_v59, %v5650_v15  ;;  %v8185_v58 = vadd.f32 %v8138_v10, %v5649_v13 }
 0x1e3   : > { %v8187_v30 = vadd.f32 %v5968_v37, %v5652_v44 }
 0x1e5   : > { %v5653_v6 = vpop.f32.mrb[108].mxu0 }
 0x1e6   : > { %v5654_v8 = vpop.f32.mrb[109].mxu0 }
 0x1e7   : > { %v5655_v63 = vadd.f32 %v5654_v8, %v5653_v6  ;;  %v5656_v1 = vpop.f32.mrb[110].mxu0 }
 0x1e8   : > { %v5657_v54 = vpop.f32.mrb[111].mxu0 }
 0x1e9   : > { %v5658_v32 = vadd.f32 %v5657_v54, %v5656_v1  ;;  %v8190_v21 = vadd.f32 %v8132_v52, %v5655_v63 }
 0x1eb   : > { %v8193_v26 = vadd.f32 %v8142_v60, %v5658_v32 }
 0x1ed   : > { %v5659_v61 = vpop.f32.mrb[112].mxu0  ;;  %v5845_v34 = vpop.f32.mrb[80].mxu1 }
 0x1ee   : > { %v5660_v29 = vpop.f32.mrb[113].mxu0  ;;  %v5895_v10 = vadd.f32 %v5894_v3, %v5845_v34  ;;  %v4179_v37 = vpop.f32.mrb[81].mxu1 }
 0x1ef   : > { %v5661_v2 = vadd.f32 %v5660_v29, %v5659_v61  ;;  %v5662_v48 = vpop.f32.mrb[114].mxu0  ;;  %v5900_v52 = vadd.f32 %v8151_v40, %v4179_v37  ;;  %v5846_v60 = vpop.f32.mrb[82].mxu1 }
 0x1f0   : > { %v5663_v55 = vpop.f32.mrb[115].mxu0  ;;  %v5293_v28 = vpack.c.bf16 %v5895_v10, %v5895_v10  ;;  %v5905_v36 = vadd.f32 %v8158_v51, %v5846_v60  ;;  %v4182_v3 = vpop.f32.mrb[83].mxu1  ;;  %v4412_v27 = vmul.f32 %v5895_v10, %v5895_v10 }
 0x1f1   : > { %v5291_v11 = vpack.c.bf16 %v5900_v52, %v5900_v52  ;;  %v5664_v5 = vadd.f32 %v5663_v55, %v5662_v48  ;;  %v4410_v57 = vmul.f32 %v5900_v52, %v5900_v52  ;;  %v5910_v22 = vadd.f32 %v8154_v46, %v4182_v3 }
 0x1f2   : > { %4643 = vst.msk [vmem:[%s8199_s22 + $0x8] sm:$0xf] %vm4640_vm6, %v5293_v28  ;;  %v5294_v12 = vpack.c.bf16 %v5905_v36, %v5905_v36  ;;  %v8209_v40 = vadd.f32 %v7940_v23, %v5661_v2  ;;  %v4339_v51 = vsel %vm4338_vm7, %v5900_v52, 0.0  ;;  %v4342_v46 = vsel %vm4338_vm7, %v5895_v10, 0.0 }
 0x1f3   : > { %4641 = vst.msk [vmem:[%s8199_s22] sm:$0xf] %vm4640_vm6, %v5291_v11  ;;  %v8212_v35 = vadd.f32 %v7942_v38, %v5664_v5  ;;  %v4340_v39 = vsel %vm4338_vm7, %v5910_v22, 0.0  ;;  %v4411_v45 = vmul.f32 %v5910_v22, %v5910_v22  ;;  %v5292_v50 = vpack.c.bf16 %v5910_v22, %v5910_v22 }
 0x1f4   : > { %4644 = vst.msk [vmem:[%s8199_s22 + $0xc] sm:$0xf] %vm4640_vm6, %v5294_v12  ;;  %v4413_v13 = vmul.f32 %v5905_v36, %v5905_v36  ;;  %v4341_v23 = vadd.f32 %v4340_v39, %v4339_v51  ;;  %v4442_v44 = vsel %vm4338_vm7, %v4410_v57, 0.0  ;;  %v4445_v32 = vsel %vm4338_vm7, %v4412_v27, 0.0 }
 0x1f5   : > { %v5665_v31 = vpop.f32.mrb[116].mxu0  ;;  %v5849_v16 = vpop.f32.mrb[84].mxu1  ;;  %v4443_v6 = vsel %vm4338_vm7, %v4411_v45, 0.0  ;;  %4642 = vst.msk [vmem:[%s8199_s22 + $0x4] sm:$0xf] %vm4640_vm6, %v5292_v50  ;;  %v4344_v61 = vsel %vm4338_vm7, %v5905_v36, 0.0 }
 0x1f6   : > { %v5915_v15 = vadd.f32 %v8167_v25, %v5849_v16  ;;  %v5666_v38 = vpop.f32.mrb[117].mxu0  ;;  %v4195_v59 = vpop.f32.mrb[85].mxu1  ;;  %v4343_v25 = vadd.f32 %v4342_v46, %v4341_v23  ;;  %v4444_v34 = vadd.f32 %v4443_v6, %v4442_v44  ;;  %v4447_v60 = vsel %vm4338_vm7, %v4413_v13, 0.0 }
 0x1f7   : > { %v5667_v8 = vadd.f32 %v5666_v38, %v5665_v31  ;;  %v5920_v63 = vadd.f32 %v8161_v4, %v4195_v59  ;;  %v5668_v1 = vpop.f32.mrb[118].mxu0  ;;  %v5850_v54 = vpop.f32.mrb[86].mxu1 }
 0x1f8   : > { %v5669_v29 = vpop.f32.mrb[119].mxu0  ;;  %v4198_v10 = vpop.f32.mrb[87].mxu1  ;;  %v5297_v2 = vpack.c.bf16 %v5915_v15, %v5915_v15  ;;  %v4446_v4 = vadd.f32 %v4445_v32, %v4444_v34  ;;  %v4345_v55 = vadd.f32 %v4344_v61, %v4343_v25  ;;  %v5925_v28 = vadd.f32 %v8170_v49, %v5850_v54 }
 0x1f9   : > { %v4346_v37 = vsel %vm4338_vm7, %v5920_v63, 0.0  ;;  %v4414_v48 = vmul.f32 %v5920_v63, %v5920_v63  ;;  %v5295_v52 = vpack.c.bf16 %v5920_v63, %v5920_v63  ;;  %v5670_v36 = vadd.f32 %v5669_v29, %v5668_v1 }
 0x1fa   : > { %4647 = vst.msk [vmem:[%s8199_s22 + $0x18] sm:$0xf] %vm4640_vm6, %v5297_v2  ;;  %v5930_v11 = vadd.f32 %v8164_v7, %v4198_v10  ;;  %v8237_v5 = vadd.f32 %v7956_v9, %v5667_v8  ;;  %v4350_v12 = vsel %vm4338_vm7, %v5915_v15, 0.0  ;;  %v4416_v57 = vmul.f32 %v5915_v15, %v5915_v15 }
 0x1fb   : > { %v4449_v3 = vsel %vm4338_vm7, %v4414_v48, 0.0  ;;  %4645 = vst.msk [vmem:[%s8199_s22 + $0x10] sm:$0xf] %vm4640_vm6, %v5295_v52  ;;  %v4347_v22 = vadd.f32 %v4346_v37, %v4345_v55  ;;  %v4448_v27 = vadd.f32 %v4447_v60, %v4446_v4  ;;  %v5298_v49 = vpack.c.bf16 %v5925_v28, %v5925_v28  ;;  %v8402_v4 = vld [vmem:[#allocation2_spill] sm:$0xff] }
 0x1fc   : > { %v4348_v51 = vsel %vm4338_vm7, %v5930_v11, 0.0  ;;  %v4415_v39 = vmul.f32 %v5930_v11, %v5930_v11  ;;  %v5296_v45 = vpack.c.bf16 %v5930_v11, %v5930_v11  ;;  %v4417_v46 = vmul.f32 %v5925_v28, %v5925_v28 }
 0x1fd   : > { %v5671_v50 = vpop.f32.mrb[120].mxu0  ;;  %v5853_v31 = vpop.f32.mrb[88].mxu1  ;;  %v4450_v16 = vadd.f32 %v4449_v3, %v4448_v27  ;;  %v4349_v7 = vadd.f32 %v4348_v51, %v4347_v22  ;;  %4648 = vst.msk [vmem:[%s8199_s22 + $0x1c] sm:$0xf] %vm4640_vm6, %v5298_v49  ;;  %v8249_v8 = vadd.f32 %v7958_v43, %v5670_v36  ;;  %v4453_v63 = vsel %vm4338_vm7, %v4416_v57, 0.0 }
 0x1fe   : > { %v5935_v9 = vadd.f32 %v8179_v24, %v5853_v31  ;;  %v5672_v13 = vpop.f32.mrb[121].mxu0  ;;  %v4211_v23 = vpop.f32.mrb[89].mxu1  ;;  %v4451_v15 = vsel %vm4338_vm7, %v4415_v39, 0.0  ;;  %4646 = vst.msk [vmem:[%s8199_s22 + $0x14] sm:$0xf] %vm4640_vm6, %v5296_v45  ;;  %v4352_v24 = vsel %vm4338_vm7, %v5925_v28, 0.0 }
 0x1ff   : > { %v5673_v38 = vadd.f32 %v5672_v13, %v5671_v50  ;;  %v5940_v59 = vadd.f32 %v8173_v62, %v4211_v23  ;;  %v5674_v44 = vpop.f32.mrb[122].mxu0  ;;  %v5854_v6 = vpop.f32.mrb[90].mxu1  ;;  %v4351_v1 = vadd.f32 %v4350_v12, %v4349_v7  ;;  %v4452_v54 = vadd.f32 %v4451_v15, %v4450_v16  ;;  %v8403_v23 = vld [vmem:[#allocation3_spill] sm:$0xff] }
 0x200   : > { %v5675_v32 = vpop.f32.mrb[123].mxu0  ;;  %v4214_v61 = vpop.f32.mrb[91].mxu1  ;;  %v5301_v25 = vpack.c.bf16 %v5935_v9, %v5935_v9  ;;  %v4455_v10 = vsel %vm4338_vm7, %v4417_v46, 0.0  ;;  %v5945_v43 = vadd.f32 %v8182_v56, %v5854_v6  ;;  %v4358_v28 = vsel %vm4338_vm7, %v5935_v9, 0.0 }
 0x201   : > { %v4354_v34 = vsel %vm4338_vm7, %v5940_v59, 0.0  ;;  %v4418_v29 = vmul.f32 %v5940_v59, %v5940_v59  ;;  %v5299_v62 = vpack.c.bf16 %v5940_v59, %v5940_v59  ;;  %v4454_v2 = vadd.f32 %v4453_v63, %v4452_v54 }
 0x202   : > { %v4353_v37 = vadd.f32 %v4352_v24, %v4351_v1  ;;  %4651 = vst.msk [vmem:[%s8199_s22 + $0x28] sm:$0xf] %vm4640_vm6, %v5301_v25  ;;  %v5676_v52 = vadd.f32 %v5675_v32, %v5674_v44  ;;  %v5950_v60 = vadd.f32 %v8176_v19, %v4214_v61  ;;  %v8263_v55 = vadd.f32 %v8402_v4, %v5673_v38 }
 0x203   : > { %v4457_v48 = vsel %vm4338_vm7, %v4418_v29, 0.0  ;;  %4649 = vst.msk [vmem:[%s8199_s22 + $0x20] sm:$0xf] %vm4640_vm6, %v5299_v62  ;;  %v4420_v3 = vmul.f32 %v5935_v9, %v5935_v9  ;;  %v4456_v11 = vadd.f32 %v4455_v10, %v4454_v2  ;;  %v5302_v56 = vpack.c.bf16 %v5945_v43, %v5945_v43 }
 0x204   : > { %v4355_v36 = vadd.f32 %v4354_v34, %v4353_v37  ;;  %v4356_v12 = vsel %vm4338_vm7, %v5950_v60, 0.0  ;;  %v4419_v57 = vmul.f32 %v5950_v60, %v5950_v60  ;;  %v5300_v22 = vpack.c.bf16 %v5950_v60, %v5950_v60 }
 0x205   : > { %v5677_v27 = vpop.f32.mrb[124].mxu0  ;;  %v5857_v49 = vpop.f32.mrb[92].mxu1  ;;  %v4458_v51 = vadd.f32 %v4457_v48, %v4456_v11  ;;  %v4421_v39 = vmul.f32 %v5945_v43, %v5945_v43  ;;  %4652 = vst.msk [vmem:[%s8199_s22 + $0x2c] sm:$0xf] %vm4640_vm6, %v5302_v56  ;;  %v8275_v15 = vadd.f32 %v8403_v23, %v5676_v52  ;;  %v4461_v38 = vsel %vm4338_vm7, %v4420_v3, 0.0 }
 0x206   : > { %v4357_v19 = vadd.f32 %v4356_v12, %v4355_v36  ;;  %v5955_v45 = vadd.f32 %v8190_v21, %v5857_v49  ;;  %v5678_v50 = vpop.f32.mrb[125].mxu0  ;;  %v4227_v31 = vpop.f32.mrb[93].mxu1  ;;  %v4459_v16 = vsel %vm4338_vm7, %v4419_v57, 0.0  ;;  %4650 = vst.msk [vmem:[%s8199_s22 + $0x24] sm:$0xf] %vm4640_vm6, %v5300_v22  ;;  %v4360_v21 = vsel %vm4338_vm7, %v5945_v43, 0.0 }
 0x207   : > { %v5679_v46 = vadd.f32 %v5678_v50, %v5677_v27  ;;  %v5960_v7 = vadd.f32 %v8185_v58, %v4227_v31  ;;  %v5680_v9 = vpop.f32.mrb[126].mxu0  ;;  %v5858_v13 = vpop.f32.mrb[94].mxu1  ;;  %v4460_v44 = vadd.f32 %v4459_v16, %v4458_v51  ;;  %v4463_v32 = vsel %vm4338_vm7, %v4421_v39, 0.0 }
 0x208   : > { %v4359_v59 = vadd.f32 %v4358_v28, %v4357_v19  ;;  %v5681_v6 = vpop.f32.mrb[127].mxu0  ;;  %v4230_v63 = vpop.f32.mrb[95].mxu1  ;;  %v5305_v24 = vpack.c.bf16 %v5955_v45, %v5955_v45  ;;  %v5965_v34 = vadd.f32 %v8193_v26, %v5858_v13  ;;  %v4424_v37 = vmul.f32 %v5955_v45, %v5955_v45 }
 0x209   : > { %v4362_v1 = vsel %vm4338_vm7, %v5960_v7, 0.0  ;;  %v4422_v54 = vmul.f32 %v5960_v7, %v5960_v7  ;;  %v5303_v58 = vpack.c.bf16 %v5960_v7, %v5960_v7  ;;  %v4462_v61 = vadd.f32 %v4461_v38, %v4460_v44 }
 0x20a   : > { %v4361_v25 = vadd.f32 %v4360_v21, %v4359_v59  ;;  %4655 = vst.msk [vmem:[%s8199_s22 + $0x38] sm:$0xf] %vm4640_vm6, %v5305_v24  ;;  %v5682_v62 = vadd.f32 %v5681_v6, %v5680_v9  ;;  %v5970_v10 = vadd.f32 %v8187_v30, %v4230_v63  ;;  %v5989_v2 = vadd.f32 %v7997_v47, %v5679_v46 }
 0x20b   : > { %v4465_v29 = vsel %vm4338_vm7, %v4422_v54, 0.0  ;;  %4653 = vst.msk [vmem:[%s8199_s22 + $0x30] sm:$0xf] %vm4640_vm6, %v5303_v58  ;;  %v4464_v48 = vadd.f32 %v4463_v32, %v4462_v61  ;;  %v5306_v52 = vpack.c.bf16 %v5965_v34, %v5965_v34  ;;  %v4425_v36 = vmul.f32 %v5965_v34, %v5965_v34 }
 0x20c   : > { %v4363_v43 = vadd.f32 %v4362_v1, %v4361_v25  ;;  %v4364_v60 = vsel %vm4338_vm7, %v5970_v10, 0.0  ;;  %v4423_v26 = vmul.f32 %v5970_v10, %v5970_v10  ;;  %v5304_v4 = vpack.c.bf16 %v5970_v10, %v5970_v10 }
 0x20d   : > { %v4466_v3 = vadd.f32 %v4465_v29, %v4464_v48  ;;  %v4366_v47 = vsel %vm4338_vm7, %v5955_v45, 0.0  ;;  %4656 = vst.msk [vmem:[%s8199_s22 + $0x3c] sm:$0xf] %vm4640_vm6, %v5306_v52  ;;  %v5997_v51 = vadd.f32 %v8004_v53, %v5682_v62  ;;  %v4469_v39 = vsel %vm4338_vm7, %v4424_v37, 0.0 }
 0x20e   : > { %v5861_v28 = vpop.f32.mrb[0].mxu1  ;;  %v4365_v11 = vadd.f32 %v4364_v60, %v4363_v43  ;;  %v5683_v56 = vpop.f32.mrb[128].mxu0  ;;  %v4467_v57 = vsel %vm4338_vm7, %v4423_v26, 0.0  ;;  %4654 = vst.msk [vmem:[%s8199_s22 + $0x34] sm:$0xf] %vm4640_vm6, %v5304_v4 }
 0x20f   : > { %v5974_v12 = vadd.f32 %v8237_v5, %v5861_v28  ;;  %v4243_v30 = vpop.f32.mrb[1].mxu1  ;;  %v5684_v22 = vpop.f32.mrb[129].mxu0  ;;  %v4368_v5 = vsel %vm4338_vm7, %v5965_v34, 0.0  ;;  %v4468_v50 = vadd.f32 %v4467_v57, %v4466_v3 }
 0x210   : > { %v5978_v27 = vadd.f32 %v8209_v40, %v4243_v30  ;;  %v5862_v49 = vpop.f32.mrb[2].mxu1  ;;  %v4367_v19 = vadd.f32 %v4366_v47, %v4365_v11  ;;  %v5686_v45 = vpop.f32.mrb[130].mxu0  ;;  %v5685_v46 = vadd.f32 %v5684_v22, %v5683_v56  ;;  %v4471_v40 = vsel %vm4338_vm7, %v4425_v36, 0.0 }
 0x211   : > { %v4246_v31 = vpop.f32.mrb[3].mxu1  ;;  %v5309_v16 = vpack.c.bf16 %v5974_v12, %v5974_v12  ;;  %v5687_v13 = vpop.f32.mrb[131].mxu0  ;;  %v4470_v23 = vadd.f32 %v4469_v39, %v4468_v50  ;;  %v5982_v59 = vadd.f32 %v8249_v8, %v5862_v49  ;;  %v4428_v54 = vmul.f32 %v5974_v12, %v5974_v12 }
 0x212   : > { %v4370_v7 = vsel %vm4338_vm7, %v5978_v27, 0.0  ;;  %v4426_v9 = vmul.f32 %v5978_v27, %v5978_v27  ;;  %v4369_v53 = vadd.f32 %v4368_v5, %v4367_v19  ;;  %v5307_v38 = vpack.c.bf16 %v5978_v27, %v5978_v27 }
 0x213   : > { %4659 = vst.msk [vmem:[%s8199_s22 + $0x48] sm:$0xf] %vm4640_vm6, %v5309_v16  ;;  %v5688_v44 = vadd.f32 %v5687_v13, %v5686_v45  ;;  %v5986_v6 = vadd.f32 %v8212_v35, %v4246_v31  ;;  %v4472_v24 = vadd.f32 %v4471_v40, %v4470_v23  ;;  %v8311_v1 = vadd.f32 %v8037_v0, %v5685_v46 }
 0x214   : > { %v4473_v21 = vsel %vm4338_vm7, %v4426_v9, 0.0  ;;  %v4371_v63 = vadd.f32 %v4370_v7, %v4369_v53  ;;  %4657 = vst.msk [vmem:[%s8199_s22 + $0x40] sm:$0xf] %vm4640_vm6, %v5307_v38  ;;  %v5310_v58 = vpack.c.bf16 %v5982_v59, %v5982_v59  ;;  %v4374_v62 = vsel %vm4338_vm7, %v5974_v12, 0.0 }
 0x215   : > { %v4372_v32 = vsel %vm4338_vm7, %v5986_v6, 0.0  ;;  %v4474_v61 = vadd.f32 %v4473_v21, %v4472_v24  ;;  %v4427_v34 = vmul.f32 %v5986_v6, %v5986_v6  ;;  %v5308_v8 = vpack.c.bf16 %v5986_v6, %v5986_v6 }
 0x216   : > { %v4373_v25 = vadd.f32 %v4372_v32, %v4371_v63  ;;  %v4429_v35 = vmul.f32 %v5982_v59, %v5982_v59  ;;  %4660 = vst.msk [vmem:[%s8199_s22 + $0x4c] sm:$0xf] %vm4640_vm6, %v5310_v58  ;;  %v8318_v0 = vadd.f32 %v8044_v41, %v5688_v44  ;;  %v4477_v28 = vsel %vm4338_vm7, %v4428_v54, 0.0 }
 0x217   : > { %v5865_v29 = vpop.f32.mrb[4].mxu1  ;;  %v5689_v10 = vpop.f32.mrb[132].mxu0  ;;  %v4475_v52 = vsel %vm4338_vm7, %v4427_v34, 0.0  ;;  %4658 = vst.msk [vmem:[%s8199_s22 + $0x44] sm:$0xf] %vm4640_vm6, %v5308_v8  ;;  %v4376_v3 = vsel %vm4338_vm7, %v5982_v59, 0.0 }
 0x218   : > { %v5990_v37 = vadd.f32 %v5989_v2, %v5865_v29  ;;  %v4259_v43 = vpop.f32.mrb[5].mxu1  ;;  %v4375_v48 = vadd.f32 %v4374_v62, %v4373_v25  ;;  %v5690_v60 = vpop.f32.mrb[133].mxu0  ;;  %v4476_v36 = vadd.f32 %v4475_v52, %v4474_v61  ;;  %v4479_v22 = vsel %vm4338_vm7, %v4429_v35, 0.0 }
 0x219   : > { %v5994_v26 = vadd.f32 %v8263_v55, %v4259_v43  ;;  %v5866_v4 = vpop.f32.mrb[6].mxu1  ;;  %v5692_v11 = vpop.f32.mrb[134].mxu0  ;;  %v5691_v41 = vadd.f32 %v5690_v60, %v5689_v10 }
 0x21a   : > { %v5313_v2 = vpack.c.bf16 %v5990_v37, %v5990_v37  ;;  %v4262_v56 = vpop.f32.mrb[7].mxu1  ;;  %v4377_v12 = vadd.f32 %v4376_v3, %v4375_v48  ;;  %v5693_v57 = vpop.f32.mrb[135].mxu0  ;;  %v4478_v27 = vadd.f32 %v4477_v28, %v4476_v36  ;;  %v5998_v49 = vadd.f32 %v5997_v51, %v5866_v4 }
 0x21b   : > { %v4378_v30 = vsel %vm4338_vm7, %v5994_v26, 0.0  ;;  %v4430_v47 = vmul.f32 %v5994_v26, %v5994_v26  ;;  %v5311_v55 = vpack.c.bf16 %v5994_v26, %v5994_v26  ;;  %v5694_v19 = vadd.f32 %v5693_v57, %v5692_v11 }
 0x21c   : > { %4663 = vst.msk [vmem:[%s8199_s22 + $0x58] sm:$0xf] %vm4640_vm6, %v5313_v2  ;;  %v4379_v39 = vadd.f32 %v4378_v30, %v4377_v12  ;;  %v6002_v50 = vadd.f32 %v8275_v15, %v4262_v56  ;;  %v4432_v45 = vmul.f32 %v5990_v37, %v5990_v37  ;;  %v4480_v31 = vadd.f32 %v4479_v22, %v4478_v27 }
 0x21d   : > { %v4481_v5 = vsel %vm4338_vm7, %v4430_v47, 0.0  ;;  %4661 = vst.msk [vmem:[%s8199_s22 + $0x50] sm:$0xf] %vm4640_vm6, %v5311_v55  ;;  %v5314_v16 = vpack.c.bf16 %v5998_v49, %v5998_v49  ;;  %v6005_v13 = vadd.f32 %v8077_v20, %v5691_v41  ;;  %v6013_v53 = vadd.f32 %v8084_v17, %v5694_v19 }
 0x21e   : > { %v4380_v46 = vsel %vm4338_vm7, %v6002_v50, 0.0  ;;  %v4431_v7 = vmul.f32 %v6002_v50, %v6002_v50  ;;  %v5312_v9 = vpack.c.bf16 %v6002_v50, %v6002_v50  ;;  %v4482_v40 = vadd.f32 %v4481_v5, %v4480_v31 }
 0x21f   : > { %4664 = vst.msk [vmem:[%s8199_s22 + $0x5c] sm:$0xf] %vm4640_vm6, %v5314_v16  ;;  %v4381_v51 = vadd.f32 %v4380_v46, %v4379_v39  ;;  %v5869_v23 = vpop.f32.mrb[8].mxu1  ;;  %v4382_v15 = vsel %vm4338_vm7, %v5990_v37, 0.0  ;;  %v4433_v38 = vmul.f32 %v5998_v49, %v5998_v49  ;;  %v4485_v32 = vsel %vm4338_vm7, %v4432_v45, 0.0 }
 0x220   : > { %v4483_v21 = vsel %vm4338_vm7, %v4431_v7, 0.0  ;;  %4662 = vst.msk [vmem:[%s8199_s22 + $0x54] sm:$0xf] %vm4640_vm6, %v5312_v9  ;;  %v5695_v59 = vpop.f32.mrb[136].mxu0  ;;  %v6006_v44 = vadd.f32 %v6005_v13, %v5869_v23  ;;  %v4275_v6 = vpop.f32.mrb[9].mxu1  ;;  %v4384_v17 = vsel %vm4338_vm7, %v5998_v49, 0.0 }
 0x221   : > { %v4383_v63 = vadd.f32 %v4382_v15, %v4381_v51  ;;  %v4484_v24 = vadd.f32 %v4483_v21, %v4482_v40  ;;  %v5696_v20 = vpop.f32.mrb[137].mxu0  ;;  %v6010_v54 = vadd.f32 %v8311_v1, %v4275_v6  ;;  %v5870_v58 = vpop.f32.mrb[10].mxu1  ;;  %v4487_v43 = vsel %vm4338_vm7, %v4433_v38, 0.0 }
 0x222   : > { %v5317_v61 = vpack.c.bf16 %v6006_v44, %v6006_v44  ;;  %v5697_v25 = vadd.f32 %v5696_v20, %v5695_v59  ;;  %v5698_v34 = vpop.f32.mrb[138].mxu0  ;;  %v4278_v8 = vpop.f32.mrb[11].mxu1  ;;  %v6014_v48 = vadd.f32 %v6013_v53, %v5870_v58  ;;  %v4436_v3 = vmul.f32 %v6006_v44, %v6006_v44 }
 0x223   : > { %v4486_v29 = vadd.f32 %v4485_v32, %v4484_v24  ;;  %v4385_v62 = vadd.f32 %v4384_v17, %v4383_v63  ;;  %v4386_v35 = vsel %vm4338_vm7, %v6010_v54, 0.0  ;;  %v4434_v10 = vmul.f32 %v6010_v54, %v6010_v54  ;;  %v5699_v37 = vpop.f32.mrb[139].mxu0 }
 0x224   : > { %4667 = vst.msk [vmem:[%s8199_s22 + $0x68] sm:$0xf] %vm4640_vm6, %v5317_v61  ;;  %v5315_v1 = vpack.c.bf16 %v6010_v54, %v6010_v54  ;;  %v5700_v52 = vadd.f32 %v5699_v37, %v5698_v34  ;;  %v6018_v28 = vadd.f32 %v8318_v0, %v4278_v8  ;;  %v5318_v36 = vpack.c.bf16 %v6014_v48, %v6014_v48 }
 0x225   : > { %v4387_v60 = vadd.f32 %v4386_v35, %v4385_v62  ;;  %v4488_v26 = vadd.f32 %v4487_v43, %v4486_v29  ;;  %v4489_v4 = vsel %vm4338_vm7, %v4434_v10, 0.0  ;;  %v6025_v2 = vadd.f32 %v8117_v42, %v5697_v25 }
 0x226   : > { %4665 = vst.msk [vmem:[%s8199_s22 + $0x60] sm:$0xf] %vm4640_vm6, %v5315_v1  ;;  %v4388_v56 = vsel %vm4338_vm7, %v6018_v28, 0.0  ;;  %v4435_v41 = vmul.f32 %v6018_v28, %v6018_v28  ;;  %v5316_v12 = vpack.c.bf16 %v6018_v28, %v6018_v28  ;;  %4668 = vst.msk [vmem:[%s8199_s22 + $0x6c] sm:$0xf] %vm4640_vm6, %v5318_v36  ;;  %v6033_v47 = vadd.f32 %v8124_v18, %v5700_v52 }
 0x227   : > { %v4490_v11 = vadd.f32 %v4489_v4, %v4488_v26  ;;  %v4389_v30 = vadd.f32 %v4388_v56, %v4387_v60  ;;  %v4390_v57 = vsel %vm4338_vm7, %v6006_v44, 0.0  ;;  %v4437_v22 = vmul.f32 %v6014_v48, %v6014_v48 }
 0x228   : > { %v4491_v0 = vsel %vm4338_vm7, %v4435_v41, 0.0  ;;  %4666 = vst.msk [vmem:[%s8199_s22 + $0x64] sm:$0xf] %vm4640_vm6, %v5316_v12  ;;  %v5873_v49 = vpop.f32.mrb[12].mxu1  ;;  %v4493_v39 = vsel %vm4338_vm7, %v4436_v3, 0.0  ;;  %v4392_v5 = vsel %vm4338_vm7, %v6014_v48, 0.0 }
 0x229   : > { %v4391_v27 = vadd.f32 %v4390_v57, %v4389_v30  ;;  %v4492_v55 = vadd.f32 %v4491_v0, %v4490_v11  ;;  %v4291_v50 = vpop.f32.mrb[13].mxu1  ;;  %v4495_v9 = vsel %vm4338_vm7, %v4437_v22, 0.0 }
 0x22a   : > { %v5701_v42 = vpop.f32.mrb[140].mxu0  ;;  %v6026_v18 = vadd.f32 %v6025_v2, %v4291_v50  ;;  %v5874_v7 = vpop.f32.mrb[14].mxu1 }
 0x22b   : > { %v5702_v19 = vpop.f32.mrb[141].mxu0  ;;  %v4494_v45 = vadd.f32 %v4493_v39, %v4492_v55  ;;  %v4393_v16 = vadd.f32 %v4392_v5, %v4391_v27  ;;  %v4294_v40 = vpop.f32.mrb[15].mxu1 }
 0x22c   : > { %v5703_v31 = vadd.f32 %v5702_v19, %v5701_v42  ;;  %v5704_v46 = vpop.f32.mrb[142].mxu0  ;;  %v4394_v23 = vsel %vm4338_vm7, %v6026_v18, 0.0  ;;  %v4438_v53 = vmul.f32 %v6026_v18, %v6026_v18  ;;  %v5319_v21 = vpack.c.bf16 %v6026_v18, %v6026_v18 }
 0x22d   : > { %v5705_v13 = vpop.f32.mrb[143].mxu0  ;;  %v4496_v15 = vadd.f32 %v4495_v9, %v4494_v45  ;;  %v4395_v38 = vadd.f32 %v4394_v23, %v4393_v16  ;;  %v6034_v44 = vadd.f32 %v6033_v47, %v4294_v40 }
 0x22e   : > { %v6021_v51 = vadd.f32 %v8146_v14, %v5703_v31  ;;  %v5706_v59 = vadd.f32 %v5705_v13, %v5704_v46  ;;  %v4497_v63 = vsel %vm4338_vm7, %v4438_v53, 0.0  ;;  %4669 = vst.msk [vmem:[%s8199_s22 + $0x70] sm:$0xf] %vm4640_vm6, %v5319_v21 }
 0x22f   : > { %v4498_v24 = vadd.f32 %v4497_v63, %v4496_v15  ;;  %v4396_v54 = vsel %vm4338_vm7, %v6034_v44, 0.0  ;;  %v4439_v14 = vmul.f32 %v6034_v44, %v6034_v44  ;;  %v5320_v8 = vpack.c.bf16 %v6034_v44, %v6034_v44 }
 0x230   : > { %v6022_v6 = vadd.f32 %v6021_v51, %v5873_v49  ;;  %v6029_v20 = vadd.f32 %v8148_v33, %v5706_v59  ;;  %v4397_v17 = vadd.f32 %v4396_v54, %v4395_v38 }
 0x231   : > { %v4499_v34 = vsel %vm4338_vm7, %v4439_v14, 0.0  ;;  %4670 = vst.msk [vmem:[%s8199_s22 + $0x74] sm:$0xf] %vm4640_vm6, %v5320_v8 }
 0x232   : > { %v4440_v58 = vmul.f32 %v6022_v6, %v6022_v6  ;;  %v5321_v32 = vpack.c.bf16 %v6022_v6, %v6022_v6  ;;  %v4398_v61 = vsel %vm4338_vm7, %v6022_v6, 0.0  ;;  %v6030_v25 = vadd.f32 %v6029_v20, %v5874_v7 }
 0x233   : > { %v4399_v29 = vadd.f32 %v4398_v61, %v4397_v17  ;;  %v4500_v62 = vadd.f32 %v4499_v34, %v4498_v24 }
 0x234   : > { %4671 = vst.msk [vmem:[%s8199_s22 + $0x78] sm:$0xf] %vm4640_vm6, %v5321_v32  ;;  %v4501_v33 = vsel %vm4338_vm7, %v4440_v58, 0.0  ;;  %v4400_v35 = vsel %vm4338_vm7, %v6030_v25, 0.0  ;;  %v4441_v10 = vmul.f32 %v6030_v25, %v6030_v25  ;;  %v5322_v37 = vpack.c.bf16 %v6030_v25, %v6030_v25 }
 0x235   : > { %v4401_v43 = vadd.f32 %v4400_v35, %v4399_v29  ;;  %v4502_v1 = vadd.f32 %v4501_v33, %v4500_v62 }
 0x236   : > { %v4503_v48 = vsel %vm4338_vm7, %v4441_v10, 0.0  ;;  %4672 = vst.msk [vmem:[%s8199_s22 + $0x7c] sm:$0xf] %vm4640_vm6, %v5322_v37 }
 0x237   : > { %v4402_v52 = vrot.slane %v4401_v43, 4  ;;  %v4504_v60 = vadd.f32 %v4503_v48, %v4502_v1 }
 0x239   : > { %v4403_v26 = vadd.f32 %v4402_v52, %v4401_v43  ;;  %v4505_v4 = vrot.slane %v4504_v60, 4 }
 0x23b   : > { %v4404_v28 = vrot.slane %v4403_v26, 2  ;;  %v4506_v3 = vadd.f32 %v4505_v4, %v4504_v60 }
 0x23d   : > { %v4405_v36 = vadd.f32 %v4404_v28, %v4403_v26  ;;  %v4507_v2 = vrot.slane %v4506_v3, 2 }
 0x23f   : > { %v4406_v11 = vrot.slane %v4405_v36, 1  ;;  %v4508_v56 = vadd.f32 %v4507_v2, %v4506_v3 }
 0x241   : > { %v4407_v41 = vadd.f32 %v4406_v11, %v4405_v36  ;;  %v4509_v12 = vrot.slane %v4508_v56, 1 }
 0x243   : > { %4409 = vst.msk [vmem:[%s208_s26] sm:$0x1] %vm4408_vm8, %v4407_v41  ;;  %v4510_v30 = vadd.f32 %v4509_v12, %v4508_v56 }
 0x245   : > { %4511 = vst.msk [vmem:[%s208_s26 + $0x1] sm:$0x1] %vm4408_vm8, %v4510_v30 }
 0x246 PF: > { %s15_s15 = sadd.s32 1, %s6265_s15  }
 0x247   : > { %p12_p4 = scmp.ge.s32.totalorder %s15_s15, 4  }
 0x249   :  { %14 = sbr.rel (!%p12_p4) target bundleno = 1 (0x1), region = 78 }

// kernel: mcam_forward.3
= control target key start
LH: loop header
LB: loop body
LE: loop exit
PB: predicated region body
PF: predicated region fallthrough
CT: control target
= control target key end

     0   :  { %s4859_s12 = smov 0   ;;  %s6833_s0 = inlined_call_operand.vmem [shape: bf16[2,18,18,4], index: 0, kind: input, shape index: {}]   ;;  %s6834_s1 = inlined_call_operand.vmem [shape: bf16[48,128], index: 1, kind: input, shape index: {}]   ;;  %s6835_s2 = inlined_call_operand.vmem [shape: bf16[2,18,18,128], index: 2, kind: output, shape index: {0}]   ;;  %s6836_s3 = inlined_call_operand.vmem [shape: f32[2,2,128], index: 3, kind: output, shape index: {1}]  }
   0x1 LB: > { %s4102_s13 = sadd.s32 4294967295, %s4828_s12   ;;  %p4106_p0 = scmp.ge.s32.totalorder %s4828_s12, 1  ;;  %s4828_s12 = sphi %s4859_s12, %s14_s12  }
   0x2   : > { %p140_p1 = scmp.lt.s32.totalorder %s4828_s12, 3 }
   0x4   : > { %p141_p2 = pnand %p4106_p0, %p140_p1 }
   0x5   : > { %p168_p3 = scmp.lt.s32.totalorder (!%p141_p2), %s4102_s13, 1  ;;  %vm682_vm0 = vcmask (!%p141_p2), 1042432   ;;  %vm683_vm1 = vcmask (!%p141_p2), 1046532   ;;  %s4830_s18 = smov (!%p141_p2), 12   ;;  %vm231_vm3 = vsmask.f32 (!%p141_p2), 3328 }
   0x6   : > { %144 = sbr.rel (%p141_p2) target bundleno = 695 (0x2b7), region = 28  ;;  %vm4899_vm2 = vmor (!%p141_p2), %vm682_vm0, %vm683_vm1  ;;  %vm232_vm4 = vsmask.f32 (!%p141_p2), 7440  ;;  %s4831_s19 = smov (!%p141_p2), 20   ;;  %vm2751_vm6 = vcmask (!%p141_p2), 31744   ;;  %vm2800_vm7 = vcmask (!%p141_p2), 64512  }
   0x7   : > { %s4832_s20 = smov (!%p141_p2), 8   ;;  %vm4943_vm5 = vmor (!%p141_p2), %vm231_vm3, %vm232_vm4  ;;  %s4833_s21 = smov (!%p141_p2), 4   ;;  %vm2833_vm8 = vcmask (!%p141_p2), 97280   ;;  %vm2866_vm9 = vcmask (!%p141_p2), 130048   ;;  %vm2899_vm10 = vcmask (!%p141_p2), 162816   ;;  %vm6837_vm11 = vcmask (!%p141_p2), 195584  }
   0x8   : > { %s4834_s22 = smov (!%p141_p2), 16   ;;  %s4835_s23 = smov (!%p141_p2), 24   ;;  %vm2965_vm12 = vcmask (!%p141_p2), 228352   ;;  %vm2998_vm13 = vcmask (!%p141_p2), 261120   ;;  %vm3031_vm14 = vcmask (!%p141_p2), 293888   ;;  %vm3073_vm15 = vcmask (!%p141_p2), 392192  }
   0x9   : > { %s4836_s24 = smov (!%p141_p2), 28   ;;  %s4837_s25 = smov (!%p141_p2), 32   ;;  %vm3399_vm0 = vcmask (!%p141_p2), 1040384   ;;  %vm3400_vm1 = vsmask.f32 (!%p141_p2), 256 }
   0xa   : > { %vm6415_vm3 = vmand (!%p141_p2), %vm3399_vm0, %vm3400_vm1 }
   0xd   : > { %s6853_s13 = smov (!%p168_p3, %s4102_s13), 1 }
   0xe   : > { %s4725_s14 = smul.u32 216, %s6853_s13  ;;  %s4109_s8 = sshll.u32 %s6853_s13, 1 }
   0xf   : > { %s181_s11 = scalar_lea.vmem %s6836_s3, %s4109_s8 }
  0x10   : > { %s4875_s17 = scalar_lea.vmem %s6833_s0, %s4725_s14  ;;  %s6376_s7 = scalar_lea.vmem %s6835_s2, %s4725_s14 }
  0x11   : > { %v4128_v0 = vld [vmem:[%s4875_s17 + $0x18] sm:$0xf]  ;;  %v4879_v1 = vld [vmem:[%s4875_s17 + $0x1c] sm:$0xf]  ;;  %v4126_v2 = vld [vmem:[%s4875_s17 + $0xc] sm:$0xf] }
  0x12   : > { %v880_v3 = vshll.u32 %v4879_v1, 16  ;;  %v884_v4 = vshrl.u32 %v4879_v1, 16  ;;  %v4335_v5 = vcombine.low %v4128_v0, %v4879_v1  ;;  %v871_v6 = vshrl.u32 %v4128_v0, 16  ;;  %v4886_v7 = vld [vmem:[%s4875_s17 + $0x10] sm:$0xf] }
  0x13   : > { %v874_v8 = vshll.u32 %v4128_v0, 16  ;;  %v856_v9 = vshll.u32 %v4886_v7, 16  ;;  %v860_v10 = vshrl.u32 %v4886_v7, 16  ;;  %v4334_v11 = vcombine.low %v4126_v2, %v4886_v7  ;;  %v4892_v12 = vld [vmem:[%s4875_s17 + $0x14] sm:$0x1] }
  0x14   : > { %v4894_v13 = vrot.slane %v884_v4, 4  ;;  %2305 = vrot.lane.b32.xlu1 %v4335_v5, %s4830_s18  ;;  %v873_v14 = vrot.slane %v871_v6, 4  ;;  %v847_v15 = vshrl.u32 %v4126_v2, 16  ;;  %v850_v16 = vshll.u32 %v4126_v2, 16  ;;  %v4174_v18 = vld [vmem:[%s4875_s17 + $0xc] sm:$0xe] }
  0x15   : > { %v876_v19 = vrot.slane %v874_v8, 5  ;;  %v4904_v20 = vrot.slane %v860_v10, 4  ;;  %2303 = vrot.lane.b32.xlu0 %v4334_v11, %s4830_s18  ;;  %v4190_v21 = vrot.slane %v4174_v18, 9  ;;  %v1296_v22 = vrot.slane %v4886_v7, 5  ;;  %v184_v23 = vld [vmem:[%s4875_s17 + $0x4] sm:$0xf] }
  0x16   : > { %v849_v24 = vrot.slane %v847_v15, 4  ;;  %v852_v25 = vrot.slane %v850_v16, 5  ;;  %v1299_v26 = vrot.slane %v4892_v12, 5  ;;  %v215_v27 = vld [vmem:[%s4875_s17 + $0x8] sm:$0x1]  ;;  %v687_v28 = vrot.slane %v184_v23, 5 }
  0x17   : > { %v877_v29 = vor.u32 %v876_v19, %v873_v14  ;;  %v1297_v30 = vsel %vm4899_vm2, %v4190_v21, %v1296_v22  ;;  %v1298_v31 = vrot.slane %v1296_v22, 4  ;;  %v618_v32 = vld [vmem:[%s4875_s17] sm:$0xe]  ;;  %v690_v33 = vrot.slane %v215_v27, 5  ;;  %v186_v34 = vld [vmem:[%s4875_s17 + $0x10] sm:$0xf] }
  0x18   : > { %v853_v35 = vor.u32 %v852_v25, %v849_v24  ;;  %v4110_v36 = vrot.slane %v618_v32, 9  ;;  %v689_v37 = vrot.slane %v687_v28, 4  ;;  %v216_v38 = vld [vmem:[%s4875_s17 + $0x14] sm:$0x1]  ;;  %v619_v39 = vld [vmem:[%s4875_s17 + $0xc] sm:$0xe] }
  0x19   : > { %v4917_v40 = vrot.slane %v877_v29, 4  ;;  %v1300_v41 = vsel %vm4899_vm2, %v1298_v31, %v1299_v26  ;;  %v4111_v42 = vrot.slane %v619_v39, 9  ;;  %v694_v43 = vrot.slane %v186_v34, 5  ;;  %v183_v44 = vld [vmem:[%s4875_s17] sm:$0xf] }
  0x1a   : > { %v4922_v45 = vrot.slane %v853_v35, 4  ;;  %v4366_v46 = vcombine.low %v1297_v30, %v1300_v41  ;;  %v688_v47 = vsel %vm4899_vm2, %v4110_v36, %v687_v28  ;;  %v691_v48 = vsel %vm4899_vm2, %v689_v37, %v690_v33  ;;  %v4175_v49 = vld [vmem:[%s4875_s17 + $0x18] sm:$0xe]  ;;  %v4159_v58 = vld [vmem:[%s4875_s17 + $0x20] sm:$0x1] }
  0x1b   : > { %v4318_v50 = vcombine.low %v688_v47, %v691_v48  ;;  %v695_v51 = vsel %vm4899_vm2, %v4111_v42, %v694_v43  ;;  %v696_v52 = vrot.slane %v694_v43, 4  ;;  %v697_v53 = vrot.slane %v216_v38, 5  ;;  %v185_v63 = vld [vmem:[%s4875_s17 + $0xc] sm:$0xf]  ;;  %v4208_v42 = vld [vmem:[%s4875_s17 + $0x24] sm:$0xf] }
  0x1c   : > { %2463 = vrot.lane.b32.xlu0 %v4366_v46, %s4831_s19  ;;  %v235_v54 = vshrl.u32 %v183_v44, 16  ;;  %v238_v55 = vshll.u32 %v183_v44, 16  ;;  %v244_v56 = vshll.u32 %v184_v23, 16  ;;  %v248_v57 = vshrl.u32 %v184_v23, 16 }
  0x1d   : > { %2207 = vrot.lane.b32.xlu1 %v4318_v50, %s4832_s20  ;;  %v698_v59 = vsel %vm4899_vm2, %v696_v52, %v697_v53  ;;  %v254_v60 = vshll.u32 %v215_v27, 16  ;;  %v4191_v61 = vrot.slane %v4175_v49, 9  ;;  %v1303_v62 = vrot.slane %v4879_v1, 5 }
  0x1e   : > { %v4319_v0 = vcombine.low %v695_v51, %v698_v59  ;;  %v237_v2 = vrot.slane %v235_v54, 4  ;;  %v240_v4 = vrot.slane %v238_v55, 5  ;;  %v246_v5 = vrot.slane %v244_v56, 5  ;;  %v4206_v51 = vld [vmem:[%s4875_s17 + $0x18] sm:$0xf] }
  0x1f   : > { %v250_v6 = vrot.slane %v248_v57, 4  ;;  %v256_v8 = vrot.slane %v254_v60, 5  ;;  %v1304_v10 = vsel %vm4899_vm2, %v4191_v61, %v1303_v62  ;;  %v1305_v11 = vrot.slane %v1303_v62, 4  ;;  %v4985_v62 = vld [vmem:[%s4875_s17 + $0x2c] sm:$0x1] }
  0x20   : > { %v241_v14 = vor.u32 %v240_v4, %v237_v2  ;;  %v1306_v15 = vrot.slane %v4159_v58, 5  ;;  %v259_v16 = vshrl.u32 %v185_v63, 16  ;;  %v262_v18 = vshll.u32 %v185_v63, 16 }
  0x21   : > { %2209 = vrot.lane.b32.xlu1 %v4319_v0, %s4832_s20  ;;  %v251_v21 = vor.u32 %v250_v6, %v246_v5  ;;  %v268_v22 = vshll.u32 %v186_v34, 16  ;;  %v272_v23 = vshrl.u32 %v186_v34, 16  ;;  %v278_v24 = vshll.u32 %v216_v38, 16 }
  0x22   : > { %v242_v25 = vrot.slane %v241_v14, 4  ;;  %v1307_v26 = vsel %vm4899_vm2, %v1305_v11, %v1306_v15  ;;  %v261_v27 = vrot.slane %v259_v16, 4  ;;  %v264_v28 = vrot.slane %v262_v18, 5  ;;  %v187_v14 = vld [vmem:[%s4875_s17 + $0x18] sm:$0xf] }
  0x23   : > { %v252_v29 = vrot.slane %v251_v21, 4  ;;  %v4367_v30 = vcombine.low %v1304_v10, %v1307_v26  ;;  %v270_v31 = vrot.slane %v268_v22, 5  ;;  %v274_v32 = vrot.slane %v272_v23, 4  ;;  %v5002_v26 = vld [vmem:[%s4875_s17 + $0x1c] sm:$0xf] }
  0x24   : > { %v247_v33 = vsel %vm4943_vm5, %v242_v25, %v246_v5  ;;  %v265_v35 = vor.u32 %v264_v28, %v261_v27  ;;  %v280_v36 = vrot.slane %v278_v24, 5  ;;  %v882_v34 = vrot.slane %v880_v3, 5  ;;  %v4964_v3 = vld [vmem:[%s4875_s17 + $0x28] sm:$0xf]  ;;  %v4993_v5 = vld [vmem:[%s4875_s17 + $0x20] sm:$0x1] }
  0x25   : > { %v257_v37 = vsel %vm4943_vm5, %v252_v29, %v256_v8  ;;  %2465 = vrot.lane.b32.xlu1 %v4367_v30, %s4831_s19  ;;  %v275_v38 = vor.u32 %v274_v32, %v270_v31  ;;  %v890_v39 = vshll.u32 %v4159_v58, 16  ;;  %v858_v41 = vrot.slane %v856_v9, 5  ;;  %v5006_v30 = vld [vmem:[%s4875_s17 + $0x20] sm:$0x1] }
  0x26   : > { %v4302_v43 = vcombine.low %v247_v33, %v257_v37  ;;  %v266_v44 = vrot.slane %v265_v35, 4  ;;  %v883_v46 = vsel %vm4943_vm5, %v4917_v40, %v882_v34  ;;  %v887_v1 = vor.u32 %v4894_v13, %v882_v34  ;;  %v4254_v34 = vld [vmem:[%s4875_s17 + $0x18] sm:$0xe] }
  0x27   : > { %v276_v47 = vrot.slane %v275_v38, 4  ;;  %v892_v48 = vrot.slane %v890_v39, 5  ;;  %v859_v7 = vsel %vm4943_vm5, %v4922_v45, %v858_v41  ;;  %v863_v9 = vor.u32 %v4904_v20, %v858_v41  ;;  %v4979_v20 = vld [vmem:[%s4875_s17 + $0x1c] sm:$0xf] }
  0x28   : > { %2127 = vrot.lane.b32.xlu0 %v4302_v43, %s4833_s21  ;;  %v271_v49 = vsel %vm4943_vm5, %v266_v44, %v270_v31  ;;  %v888_v40 = vrot.slane %v887_v1, 4  ;;  %v866_v13 = vshll.u32 %v4892_v12, 16  ;;  %v1480_v50 = vshrl.u32 %v4208_v42, 16 }
  0x29   : > { %v281_v52 = vsel %vm4943_vm5, %v276_v47, %v280_v36  ;;  %v864_v53 = vrot.slane %v863_v9, 4  ;;  %v1483_v54 = vshll.u32 %v4208_v42, 16  ;;  %v1493_v45 = vshrl.u32 %v4964_v3, 16  ;;  %v189_v9 = vld [vmem:[%s4875_s17 + $0x24] sm:$0xf] }
  0x2a   : > { %v4303_v55 = vcombine.low %v271_v49, %v281_v52  ;;  %v893_v56 = vsel %vm4943_vm5, %v888_v40, %v892_v48  ;;  %v868_v57 = vrot.slane %v866_v13, 5  ;;  %v1482_v58 = vrot.slane %v1480_v50, 4 }
  0x2b   : > { %v4351_v12 = vcombine.low %v883_v46, %v893_v56  ;;  %v1485_v59 = vrot.slane %v1483_v54, 5  ;;  %v4383_v60 = vcombine.low %v4208_v42, %v4964_v3  ;;  %v1456_v61 = vshrl.u32 %v4206_v51, 16 }
  0x2c   : > { %2129 = vrot.lane.b32.xlu0 %v4303_v55, %s4833_s21  ;;  %v869_v63 = vsel %vm4943_vm5, %v864_v53, %v868_v57  ;;  %v1459_v0 = vshll.u32 %v4206_v51, 16  ;;  %v1469_v2 = vshrl.u32 %v4979_v20, 16  ;;  %v4382_v4 = vcombine.low %v4206_v51, %v4979_v20  ;;  %v190_v51 = vld [vmem:[%s4875_s17 + $0x28] sm:$0xf] }
  0x2d   : > { %2385 = vrot.lane.b32.xlu1 %v4351_v12, %s4834_s22  ;;  %v4350_v6 = vcombine.low %v859_v7, %v869_v63  ;;  %v1458_v8 = vrot.slane %v1456_v61, 4  ;;  %v1486_v10 = vor.u32 %v1485_v59, %v1482_v58  ;;  %v1489_v11 = vshll.u32 %v4964_v3, 16  ;;  %v218_v58 = vld [vmem:[%s4875_s17 + $0x2c] sm:$0x1] }
  0x2e   : > { %v1461_v15 = vrot.slane %v1459_v0, 5  ;;  %v1495_v16 = vrot.slane %v1493_v45, 4  ;;  %v1499_v18 = vshll.u32 %v4985_v62, 16  ;;  %v1465_v21 = vshll.u32 %v4979_v20, 16  ;;  %v4255_v0 = vld [vmem:[%s4875_s17 + $0x24] sm:$0xe] }
  0x2f   : > { %v1487_v22 = vrot.slane %v1486_v10, 4  ;;  %v1491_v23 = vrot.slane %v1489_v11, 5  ;;  %v1471_v24 = vrot.slane %v1469_v2, 4  ;;  %v1475_v25 = vshll.u32 %v4993_v5, 16 }
  0x30   : > { %2383 = vrot.lane.b32.xlu0 %v4350_v6, %s4834_s22  ;;  %v1501_v27 = vrot.slane %v1499_v18, 5  ;;  %v1462_v28 = vor.u32 %v1461_v15, %v1458_v8  ;;  %v1467_v29 = vrot.slane %v1465_v21, 5  ;;  %v283_v31 = vshrl.u32 %v187_v14, 16 }
  0x31   : > { %2561 = vrot.lane.b32.xlu1 %v4383_v60, %s4835_s23  ;;  %v1492_v32 = vsel %vm4943_vm5, %v1487_v22, %v1491_v23  ;;  %v1496_v33 = vor.u32 %v1495_v16, %v1491_v23  ;;  %v1477_v35 = vrot.slane %v1475_v25, 5  ;;  %v286_v36 = vshll.u32 %v187_v14, 16  ;;  %v621_v14 = vld [vmem:[%s4875_s17 + $0x24] sm:$0xe] }
  0x32   : > { %v1463_v37 = vrot.slane %v1462_v28, 4  ;;  %v1472_v38 = vor.u32 %v1471_v24, %v1467_v29  ;;  %v285_v39 = vrot.slane %v283_v31, 4  ;;  %v292_v41 = vshll.u32 %v5002_v26, 16 }
  0x33   : > { %v1497_v42 = vrot.slane %v1496_v33, 4  ;;  %v288_v43 = vrot.slane %v286_v36, 5  ;;  %v296_v44 = vshrl.u32 %v5002_v26, 16  ;;  %v302_v46 = vshll.u32 %v5006_v30, 16 }
  0x34   : > { %2559 = vrot.lane.b32.xlu0 %v4382_v4, %s4835_s23  ;;  %v1468_v1 = vsel %vm4943_vm5, %v1463_v37, %v1467_v29  ;;  %v1473_v47 = vrot.slane %v1472_v38, 4  ;;  %v294_v48 = vrot.slane %v292_v41, 5  ;;  %v4270_v7 = vrot.slane %v4254_v34, 9  ;;  %v5047_v37 = vld [vmem:[%s4875_s17 + $0x30] sm:$0xf] }
  0x35   : > { %v1502_v49 = vsel %vm4943_vm5, %v1497_v42, %v1501_v27  ;;  %v289_v40 = vor.u32 %v288_v43, %v285_v39  ;;  %v298_v13 = vrot.slane %v296_v44, 4  ;;  %v304_v50 = vrot.slane %v302_v46, 5  ;;  %v620_v27 = vld [vmem:[%s4875_s17 + $0x18] sm:$0xe] }
  0x36   : > { %v4399_v52 = vcombine.low %v1492_v32, %v1502_v49  ;;  %v1478_v53 = vsel %vm4943_vm5, %v1473_v47, %v1477_v35  ;;  %v1905_v54 = vrot.slane %v4979_v20, 5  ;;  %v1908_v45 = vrot.slane %v4993_v5, 5  ;;  %v4130_v49 = vld [vmem:[%s4875_s17 + $0x24] sm:$0xf] }
  0x37   : > { %v4398_v55 = vcombine.low %v1468_v1, %v1478_v53  ;;  %v290_v56 = vrot.slane %v289_v40, 4  ;;  %v299_v57 = vor.u32 %v298_v13, %v294_v48  ;;  %v307_v12 = vshrl.u32 %v189_v9, 16  ;;  %v5061_v1 = vld [vmem:[%s4875_s17 + $0x34] sm:$0xf]  ;;  %v5070_v40 = vld [vmem:[%s4875_s17 + $0x28] sm:$0xf] }
  0x38   : > { %2641 = vrot.lane.b32.xlu1 %v4399_v52, %s4836_s24  ;;  %v1906_v59 = vsel %vm4899_vm2, %v4270_v7, %v1905_v54  ;;  %v1907_v60 = vrot.slane %v1905_v54, 4  ;;  %v310_v61 = vshll.u32 %v189_v9, 16  ;;  %v316_v63 = vshll.u32 %v190_v51, 16 }
  0x39   : > { %2639 = vrot.lane.b32.xlu0 %v4398_v55, %s4836_s24  ;;  %v295_v20 = vsel %vm4943_vm5, %v290_v56, %v294_v48  ;;  %v300_v2 = vrot.slane %v299_v57, 4  ;;  %v309_v4 = vrot.slane %v307_v12, 4  ;;  %v320_v5 = vshrl.u32 %v190_v51, 16 }
  0x3a   : > { %v1909_v6 = vsel %vm4899_vm2, %v1907_v60, %v1908_v45  ;;  %v312_v8 = vrot.slane %v310_v61, 5  ;;  %v318_v10 = vrot.slane %v316_v63, 5  ;;  %v326_v11 = vshll.u32 %v218_v58, 16  ;;  %v4161_v45 = vld [vmem:[%s4875_s17 + $0x38] sm:$0x1] }
  0x3b   : > { %v305_v15 = vsel %vm4943_vm5, %v300_v2, %v304_v50  ;;  %v4414_v16 = vcombine.low %v1906_v59, %v1909_v6  ;;  %v322_v18 = vrot.slane %v320_v5, 4  ;;  %v4271_v21 = vrot.slane %v4255_v0, 9  ;;  %v5087_v63 = vld [vmem:[%s4875_s17 + $0x2c] sm:$0x1]  ;;  %v4177_v0 = vld [vmem:[%s4875_s17 + $0x30] sm:$0xe] }
  0x3c   : > { %v4304_v22 = vcombine.low %v295_v20, %v305_v15  ;;  %v313_v23 = vor.u32 %v312_v8, %v309_v4  ;;  %v328_v24 = vrot.slane %v326_v11, 5  ;;  %v1912_v25 = vrot.slane %v4964_v3, 5  ;;  %v4763_v3 = vld [vmem:[%s6834_s1] sm:$0xff]   ;;  %v4764_v15 = vld [vmem:[%s6834_s1 + $0x8] sm:$0xff]  }
  0x3d   : > { %2719 = vrot.lane.b32.xlu0 %v4414_v16, %s4837_s25  ;;  %v323_v28 = vor.u32 %v322_v18, %v318_v10  ;;  %v1915_v29 = vrot.slane %v4985_v62, 5  ;;  %v4113_v31 = vrot.slane %v621_v14, 9  ;;  %v708_v32 = vrot.slane %v190_v51, 5  ;;  %4681 = vmatprep.subr.bf16.mxu0 %v4763_v3  ;;  %v4176_v14 = vld [vmem:[%s4875_s17 + $0x24] sm:$0xe] }
  0x3e   : > { %2131 = vrot.lane.b32.xlu1 %v4304_v22, %s4833_s21  ;;  %v314_v33 = vrot.slane %v313_v23, 4  ;;  %v1913_v35 = vsel %vm4899_vm2, %v4271_v21, %v1912_v25  ;;  %v1914_v36 = vrot.slane %v1912_v25, 4  ;;  %v711_v34 = vrot.slane %v218_v58, 5  ;;  %4719 = vmatprep.subr.bf16.mxu1 %v4763_v3 }
  0x3f   : > { %v324_v38 = vrot.slane %v323_v28, 4  ;;  %v709_v62 = vsel %vm4899_vm2, %v4113_v31, %v708_v32  ;;  %v710_v39 = vrot.slane %v708_v32, 4  ;;  %v4112_v41 = vrot.slane %v620_v27, 9  ;;  %4682 = vmatpush3.bf16.msra.mxu0 %v4763_v3  ;;  %4722 = vmatpush3.bf16.msra.mxu1 %v4763_v3  ;;  %v4766_v3 = vld [vmem:[%s6834_s1 + $0x10] sm:$0xff]  }
  0x40   : > { %v319_v42 = vsel %vm4943_vm5, %v314_v33, %v318_v10  ;;  %v1916_v43 = vsel %vm4899_vm2, %v1914_v36, %v1915_v29  ;;  %v701_v44 = vrot.slane %v5002_v26, 5  ;;  %v704_v46 = vrot.slane %v5006_v30, 5  ;;  %4683 = vmatprep.subr.bf16.mxu0 %v4764_v15  ;;  %4720 = vmatprep.subr.bf16.mxu1 %v4764_v15  ;;  %v5100_v33 = vld [vmem:[%s4875_s17 + $0x3c] sm:$0xf] }
  0x41   : > { %v329_v47 = vsel %vm4943_vm5, %v324_v38, %v328_v24  ;;  %v4415_v48 = vcombine.low %v1913_v35, %v1916_v43  ;;  %v712_v7 = vsel %vm4899_vm2, %v710_v39, %v711_v34  ;;  %v919_v9 = vshrl.u32 %v5047_v37, 16 }
  0x42   : > { %v4305_v26 = vcombine.low %v319_v42, %v329_v47  ;;  %v4321_v30 = vcombine.low %v709_v62, %v712_v7  ;;  %v702_v13 = vsel %vm4899_vm2, %v4112_v41, %v701_v44  ;;  %v703_v50 = vrot.slane %v701_v44, 4  ;;  %v5118_v44 = vld [vmem:[%s4875_s17 + $0x40] sm:$0xf] }
  0x43   : > { %2721 = vrot.lane.b32.xlu0 %v4415_v48, %s4837_s25  ;;  %v921_v51 = vrot.slane %v919_v9, 4  ;;  %v922_v52 = vshll.u32 %v5047_v37, 16  ;;  %v932_v53 = vshrl.u32 %v5061_v1, 16  ;;  %v4337_v54 = vcombine.low %v5047_v37, %v5061_v1  ;;  %4684 = vmatpush3.bf16.msra.mxu0 %v4764_v15 }
  0x44   : > { %2133 = vrot.lane.b32.xlu1 %v4305_v26, %s4833_s21  ;;  %v705_v55 = vsel %vm4899_vm2, %v703_v50, %v704_v46  ;;  %v895_v56 = vshrl.u32 %v4130_v49, 16  ;;  %v898_v57 = vshll.u32 %v4130_v49, 16  ;;  %v908_v58 = vshrl.u32 %v5070_v40, 16  ;;  %4723 = vmatpush3.bf16.msra.mxu1 %v4764_v15 }
  0x45   : > { %v4320_v12 = vcombine.low %v702_v13, %v705_v55  ;;  %v924_v59 = vrot.slane %v922_v52, 5  ;;  %v4336_v60 = vcombine.low %v4130_v49, %v5070_v40  ;;  %v928_v61 = vshll.u32 %v5061_v1, 16  ;;  %4685 = vmatprep.subr.bf16.mxu0 %v4766_v3  ;;  %4721 = vmatprep.subr.bf16.mxu1 %v4766_v3  ;;  %v4210_v49 = vld [vmem:[%s4875_s17 + $0x30] sm:$0xf] }
  0x46   : > { %v897_v20 = vrot.slane %v895_v56, 4  ;;  %v900_v2 = vrot.slane %v898_v57, 5  ;;  %v934_v4 = vrot.slane %v932_v53, 4  ;;  %v938_v5 = vshll.u32 %v4161_v45, 16 }
  0x47   : > { %2211 = vrot.lane.b32.xlu0 %v4320_v12, %s4832_s20  ;;  %v925_v6 = vor.u32 %v924_v59, %v921_v51  ;;  %v930_v8 = vrot.slane %v928_v61, 5  ;;  %v904_v10 = vshll.u32 %v5070_v40, 16  ;;  %v910_v11 = vrot.slane %v908_v58, 4  ;;  %4686 = vmatpush3.bf16.msra.mxu0 %v4766_v3  ;;  %v5143_v12 = vld [vmem:[%s4875_s17 + $0x38] sm:$0x1] }
  0x48   : > { %2213 = vrot.lane.b32.xlu1 %v4321_v30, %s4832_s20  ;;  %v940_v16 = vrot.slane %v938_v5, 5  ;;  %v901_v18 = vor.u32 %v900_v2, %v897_v20  ;;  %v914_v21 = vshll.u32 %v5087_v63, 16  ;;  %v4193_v22 = vrot.slane %v4177_v0, 9  ;;  %4724 = vmatpush3.bf16.msra.mxu1 %v4766_v3  ;;  %v191_v0 = vld [vmem:[%s4875_s17 + $0x30] sm:$0xf] }
  0x49   : > { %v926_v23 = vrot.slane %v925_v6, 4  ;;  %v935_v24 = vor.u32 %v934_v4, %v930_v8  ;;  %v906_v25 = vrot.slane %v904_v10, 5  ;;  %v1317_v27 = vrot.slane %v5061_v1, 5 }
  0x4a   : > { %v902_v28 = vrot.slane %v901_v18, 4  ;;  %v916_v29 = vrot.slane %v914_v21, 5  ;;  %v1320_v31 = vrot.slane %v4161_v45, 5  ;;  %v4192_v32 = vrot.slane %v4176_v14, 9  ;;  %v5139_v45 = vld [vmem:[%s4875_s17 + $0x44] sm:$0x1] }
  0x4b   : > { %2307 = vrot.lane.b32.xlu0 %v4336_v60, %s4830_s18  ;;  %v931_v35 = vsel %vm4943_vm5, %v926_v23, %v930_v8  ;;  %v936_v36 = vrot.slane %v935_v24, 4  ;;  %v911_v34 = vor.u32 %v910_v11, %v906_v25  ;;  %v1318_v37 = vsel %vm4899_vm2, %v4193_v22, %v1317_v27  ;;  %v5154_v14 = vld [vmem:[%s4875_s17 + $0x34] sm:$0xf]  ;;  %v5157_v21 = vld [vmem:[%s4875_s17 + $0x38] sm:$0x1] }
  0x4c   : > { %2309 = vrot.lane.b32.xlu1 %v4337_v54, %s4830_s18  ;;  %v907_v38 = vsel %vm4943_vm5, %v902_v28, %v906_v25  ;;  %v1319_v62 = vrot.slane %v1317_v27, 4  ;;  %v1310_v39 = vrot.slane %v5070_v40, 5  ;;  %v1313_v41 = vrot.slane %v5087_v63, 5  ;;  %v5128_v40 = vld [vmem:[%s4875_s17 + $0x34] sm:$0xf] }
  0x4d   : > { %v941_v42 = vsel %vm4943_vm5, %v936_v36, %v940_v16  ;;  %v912_v43 = vrot.slane %v911_v34, 4  ;;  %v1528_v46 = vshrl.u32 %v5100_v33, 16  ;;  %v1531_v1 = vshll.u32 %v5100_v33, 16  ;;  %v4256_v28 = vld [vmem:[%s4875_s17 + $0x30] sm:$0xe] }
  0x4e   : > { %v4353_v47 = vcombine.low %v931_v35, %v941_v42  ;;  %v1321_v48 = vsel %vm4899_vm2, %v1319_v62, %v1320_v31  ;;  %v1311_v7 = vsel %vm4899_vm2, %v4192_v32, %v1310_v39  ;;  %v1312_v9 = vrot.slane %v1310_v39, 4 }
  0x4f   : > { %v917_v26 = vsel %vm4943_vm5, %v912_v43, %v916_v29  ;;  %v4369_v30 = vcombine.low %v1318_v37, %v1321_v48  ;;  %v1530_v13 = vrot.slane %v1528_v46, 4  ;;  %v1533_v50 = vrot.slane %v1531_v1, 5 }
  0x50   : > { %2389 = vrot.lane.b32.xlu1 %v4353_v47, %s4834_s22  ;;  %v4352_v51 = vcombine.low %v907_v38, %v917_v26  ;;  %v1314_v52 = vsel %vm4899_vm2, %v1312_v9, %v1313_v41  ;;  %v1541_v53 = vshrl.u32 %v5118_v44, 16  ;;  %v4385_v54 = vcombine.low %v5100_v33, %v5118_v44  ;;  %v193_v41 = vld [vmem:[%s4875_s17 + $0x3c] sm:$0xf]  ;;  %v194_v47 = vld [vmem:[%s4875_s17 + $0x40] sm:$0xf] }
  0x51   : > { %v4368_v55 = vcombine.low %v1311_v7, %v1314_v52  ;;  %v1504_v56 = vshrl.u32 %v4210_v49, 16  ;;  %v1507_v57 = vshll.u32 %v4210_v49, 16  ;;  %v1517_v58 = vshrl.u32 %v5128_v40, 16 }
  0x52   : > { %2387 = vrot.lane.b32.xlu0 %v4352_v51, %s4834_s22  ;;  %v4384_v59 = vcombine.low %v4210_v49, %v5128_v40  ;;  %v1534_v60 = vor.u32 %v1533_v50, %v1530_v13  ;;  %v1537_v61 = vshll.u32 %v5118_v44, 16  ;;  %v1543_v63 = vrot.slane %v1541_v53, 4  ;;  %v220_v50 = vld [vmem:[%s4875_s17 + $0x44] sm:$0x1] }
  0x53   : > { %v1506_v20 = vrot.slane %v1504_v56, 4  ;;  %v1509_v2 = vrot.slane %v1507_v57, 5  ;;  %v1547_v4 = vshll.u32 %v5139_v45, 16  ;;  %v1513_v5 = vshll.u32 %v5128_v40, 16  ;;  %v4257_v56 = vld [vmem:[%s4875_s17 + $0x3c] sm:$0xe] }
  0x54   : > { %2469 = vrot.lane.b32.xlu1 %v4369_v30, %s4831_s19  ;;  %v1535_v6 = vrot.slane %v1534_v60, 4  ;;  %v1539_v8 = vrot.slane %v1537_v61, 5  ;;  %v1519_v10 = vrot.slane %v1517_v58, 4  ;;  %v1523_v11 = vshll.u32 %v5143_v12, 16 }
  0x55   : > { %v1549_v15 = vrot.slane %v1547_v4, 5  ;;  %v1510_v16 = vor.u32 %v1509_v2, %v1506_v20  ;;  %v1515_v18 = vrot.slane %v1513_v5, 5  ;;  %v331_v22 = vshrl.u32 %v191_v0, 16 }
  0x56   : > { %2467 = vrot.lane.b32.xlu0 %v4368_v55, %s4831_s19  ;;  %v1540_v23 = vsel %vm4943_vm5, %v1535_v6, %v1539_v8  ;;  %v1544_v24 = vor.u32 %v1543_v63, %v1539_v8  ;;  %v1525_v25 = vrot.slane %v1523_v11, 5  ;;  %v334_v27 = vshll.u32 %v191_v0, 16  ;;  %v623_v0 = vld [vmem:[%s4875_s17 + $0x3c] sm:$0xe] }
  0x57   : > { %v1511_v29 = vrot.slane %v1510_v16, 4  ;;  %v1520_v31 = vor.u32 %v1519_v10, %v1515_v18  ;;  %v333_v32 = vrot.slane %v331_v22, 4  ;;  %v340_v33 = vshll.u32 %v5154_v14, 16 }
  0x58   : > { %2565 = vrot.lane.b32.xlu1 %v4385_v54, %s4835_s23  ;;  %v1545_v35 = vrot.slane %v1544_v24, 4  ;;  %v336_v36 = vrot.slane %v334_v27, 5  ;;  %v344_v34 = vshrl.u32 %v5154_v14, 16  ;;  %v350_v37 = vshll.u32 %v5157_v21, 16 }
  0x59   : > { %v1516_v3 = vsel %vm4943_vm5, %v1511_v29, %v1515_v18  ;;  %v1521_v38 = vrot.slane %v1520_v31, 4  ;;  %v342_v62 = vrot.slane %v340_v33, 5  ;;  %v4272_v39 = vrot.slane %v4256_v28, 9 }
  0x5a   : > { %2563 = vrot.lane.b32.xlu0 %v4384_v59, %s4835_s23  ;;  %v1550_v42 = vsel %vm4943_vm5, %v1545_v35, %v1549_v15  ;;  %v337_v43 = vor.u32 %v336_v36, %v333_v32  ;;  %v346_v46 = vrot.slane %v344_v34, 4  ;;  %v352_v1 = vrot.slane %v350_v37, 5  ;;  %v622_v15 = vld [vmem:[%s4875_s17 + $0x30] sm:$0xe]  ;;  %v4137_v37 = vld [vmem:[%s4875_s17 + $0x4c] sm:$0xf] }
  0x5b   : > { %v4401_v48 = vcombine.low %v1540_v23, %v1550_v42  ;;  %v1526_v7 = vsel %vm4943_vm5, %v1521_v38, %v1525_v25  ;;  %v1919_v9 = vrot.slane %v5128_v40, 5  ;;  %v1922_v49 = vrot.slane %v5143_v12, 5  ;;  %v5217_v42 = vld [vmem:[%s4875_s17 + $0x40] sm:$0xf] }
  0x5c   : > { %v4400_v26 = vcombine.low %v1516_v3, %v1526_v7  ;;  %v338_v30 = vrot.slane %v337_v43, 4  ;;  %v347_v13 = vor.u32 %v346_v46, %v342_v62  ;;  %v355_v51 = vshrl.u32 %v193_v41, 16 }
  0x5d   : > { %2645 = vrot.lane.b32.xlu1 %v4401_v48, %s4836_s24  ;;  %v1920_v52 = vsel %vm4899_vm2, %v4272_v39, %v1919_v9  ;;  %v1921_v53 = vrot.slane %v1919_v9, 4  ;;  %v358_v54 = vshll.u32 %v193_v41, 16  ;;  %v364_v55 = vshll.u32 %v194_v47, 16  ;;  %v4134_v41 = vld [vmem:[%s4875_s17 + $0x3c] sm:$0xf] }
  0x5e   : > { %2643 = vrot.lane.b32.xlu0 %v4400_v26, %s4836_s24  ;;  %v343_v40 = vsel %vm4943_vm5, %v338_v30, %v342_v62  ;;  %v348_v57 = vrot.slane %v347_v13, 4  ;;  %v357_v58 = vrot.slane %v355_v51, 4  ;;  %v368_v12 = vshrl.u32 %v194_v47, 16  ;;  %v4163_v9 = vld [vmem:[%s4875_s17 + $0x50] sm:$0x1] }
  0x5f   : > { %v1923_v59 = vsel %vm4899_vm2, %v1921_v53, %v1922_v49  ;;  %v360_v60 = vrot.slane %v358_v54, 5  ;;  %v366_v61 = vrot.slane %v364_v55, 5  ;;  %v374_v63 = vshll.u32 %v220_v50, 16  ;;  %v4162_v54 = vld [vmem:[%s4875_s17 + $0x44] sm:$0x1] }
  0x60   : > { %v353_v20 = vsel %vm4943_vm5, %v348_v57, %v352_v1  ;;  %v4416_v2 = vcombine.low %v1920_v52, %v1923_v59  ;;  %v370_v4 = vrot.slane %v368_v12, 4  ;;  %v4273_v5 = vrot.slane %v4257_v56, 9  ;;  %v4179_v55 = vld [vmem:[%s4875_s17 + $0x48] sm:$0xe] }
  0x61   : > { %v4306_v6 = vcombine.low %v343_v40, %v353_v20  ;;  %v361_v8 = vor.u32 %v360_v60, %v357_v58  ;;  %v376_v10 = vrot.slane %v374_v63, 5  ;;  %v1926_v11 = vrot.slane %v5118_v44, 5  ;;  %v5199_v44 = vld [vmem:[%s4875_s17 + $0x48] sm:$0xf]  ;;  %v4178_v63 = vld [vmem:[%s4875_s17 + $0x3c] sm:$0xe] }
  0x62   : > { %2723 = vrot.lane.b32.xlu0 %v4416_v2, %s4837_s25  ;;  %v371_v16 = vor.u32 %v370_v4, %v366_v61  ;;  %v1929_v18 = vrot.slane %v5139_v45, 5  ;;  %v4115_v22 = vrot.slane %v623_v0, 9  ;;  %v722_v23 = vrot.slane %v194_v47, 5 }
  0x63   : > { %2135 = vrot.lane.b32.xlu1 %v4306_v6, %s4833_s21  ;;  %v362_v24 = vrot.slane %v361_v8, 4  ;;  %v1927_v25 = vsel %vm4899_vm2, %v4273_v5, %v1926_v11  ;;  %v1928_v27 = vrot.slane %v1926_v11, 4  ;;  %v725_v28 = vrot.slane %v220_v50, 5 }
  0x64   : > { %v372_v29 = vrot.slane %v371_v16, 4  ;;  %v723_v31 = vsel %vm4899_vm2, %v4115_v22, %v722_v23  ;;  %v724_v45 = vrot.slane %v722_v23, 4  ;;  %v4114_v32 = vrot.slane %v622_v15, 9  ;;  %v5237_v22 = vld [vmem:[%s4875_s17 + $0x54] sm:$0xf] }
  0x65   : > { %v367_v33 = vsel %vm4943_vm5, %v362_v24, %v366_v61  ;;  %v1930_v35 = vsel %vm4899_vm2, %v1928_v27, %v1929_v18  ;;  %v715_v36 = vrot.slane %v5154_v14, 5  ;;  %v718_v34 = vrot.slane %v5157_v21, 5 }
  0x66   : > { %v377_v3 = vsel %vm4943_vm5, %v372_v29, %v376_v10  ;;  %v4417_v38 = vcombine.low %v1927_v25, %v1930_v35  ;;  %v726_v62 = vsel %vm4899_vm2, %v724_v45, %v725_v28  ;;  %v967_v39 = vshrl.u32 %v5199_v44, 16 }
  0x67   : > { %v4307_v43 = vcombine.low %v367_v33, %v377_v3  ;;  %v4323_v46 = vcombine.low %v723_v31, %v726_v62  ;;  %v716_v14 = vsel %vm4899_vm2, %v4114_v32, %v715_v36  ;;  %v717_v21 = vrot.slane %v715_v36, 4  ;;  %v5251_v33 = vld [vmem:[%s4875_s17 + $0x58] sm:$0xf]  ;;  %v4214_v62 = vld [vmem:[%s4875_s17 + $0x48] sm:$0xf] }
  0x68   : > { %2725 = vrot.lane.b32.xlu0 %v4417_v38, %s4837_s25  ;;  %v969_v1 = vrot.slane %v967_v39, 4  ;;  %v970_v47 = vshll.u32 %v5199_v44, 16  ;;  %v980_v48 = vshrl.u32 %v4137_v37, 16  ;;  %v4339_v7 = vcombine.low %v5199_v44, %v4137_v37  ;;  %v5261_v39 = vld [vmem:[%s4875_s17 + $0x4c] sm:$0xf] }
  0x69   : > { %2137 = vrot.lane.b32.xlu1 %v4307_v43, %s4833_s21  ;;  %v719_v49 = vsel %vm4899_vm2, %v717_v21, %v718_v34  ;;  %v943_v26 = vshrl.u32 %v4134_v41, 16  ;;  %v946_v30 = vshll.u32 %v4134_v41, 16  ;;  %v956_v13 = vshrl.u32 %v5217_v42, 16 }
  0x6a   : > { %v4322_v50 = vcombine.low %v716_v14, %v719_v49  ;;  %v972_v51 = vrot.slane %v970_v47, 5  ;;  %v4338_v52 = vcombine.low %v4134_v41, %v5217_v42  ;;  %v976_v53 = vshll.u32 %v4137_v37, 16 }
  0x6b   : > { %v945_v56 = vrot.slane %v943_v26, 4  ;;  %v948_v40 = vrot.slane %v946_v30, 5  ;;  %v982_v57 = vrot.slane %v980_v48, 4  ;;  %v986_v58 = vshll.u32 %v4163_v9, 16  ;;  %v5272_v48 = vld [vmem:[%s4875_s17 + $0x5c] sm:$0x1] }
  0x6c   : > { %2215 = vrot.lane.b32.xlu0 %v4322_v50, %s4832_s20  ;;  %v973_v12 = vor.u32 %v972_v51, %v969_v1  ;;  %v978_v59 = vrot.slane %v976_v53, 5  ;;  %v952_v60 = vshll.u32 %v5217_v42, 16  ;;  %v958_v61 = vrot.slane %v956_v13, 4  ;;  %v5276_v30 = vld [vmem:[%s4875_s17 + $0x50] sm:$0x1] }
  0x6d   : > { %2217 = vrot.lane.b32.xlu1 %v4323_v46, %s4832_s20  ;;  %v988_v0 = vrot.slane %v986_v58, 5  ;;  %v949_v20 = vor.u32 %v948_v40, %v945_v56  ;;  %v962_v2 = vshll.u32 %v4162_v54, 16  ;;  %v4195_v4 = vrot.slane %v4179_v55, 9  ;;  %v195_v53 = vld [vmem:[%s4875_s17 + $0x48] sm:$0xf] }
  0x6e   : > { %v974_v5 = vrot.slane %v973_v12, 4  ;;  %v983_v6 = vor.u32 %v982_v57, %v978_v59  ;;  %v954_v8 = vrot.slane %v952_v60, 5  ;;  %v1331_v10 = vrot.slane %v4137_v37, 5  ;;  %v5287_v60 = vld [vmem:[%s4875_s17 + $0x4c] sm:$0xf] }
  0x6f   : > { %v950_v11 = vrot.slane %v949_v20, 4  ;;  %v964_v15 = vrot.slane %v962_v2, 5  ;;  %v1334_v16 = vrot.slane %v4163_v9, 5  ;;  %v4194_v18 = vrot.slane %v4178_v63, 9  ;;  %v5290_v20 = vld [vmem:[%s4875_s17 + $0x50] sm:$0x1] }
  0x70   : > { %2311 = vrot.lane.b32.xlu0 %v4338_v52, %s4830_s18  ;;  %v979_v23 = vsel %vm4943_vm5, %v974_v5, %v978_v59  ;;  %v984_v24 = vrot.slane %v983_v6, 4  ;;  %v959_v25 = vor.u32 %v958_v61, %v954_v8  ;;  %v1332_v27 = vsel %vm4899_vm2, %v4195_v4, %v1331_v10 }
  0x71   : > { %2313 = vrot.lane.b32.xlu1 %v4339_v7, %s4830_s18  ;;  %v955_v28 = vsel %vm4943_vm5, %v950_v11, %v954_v8  ;;  %v1333_v44 = vrot.slane %v1331_v10, 4  ;;  %v1324_v29 = vrot.slane %v5217_v42, 5  ;;  %v1327_v31 = vrot.slane %v4162_v54, 5  ;;  %v4258_v10 = vld [vmem:[%s4875_s17 + $0x48] sm:$0xe] }
  0x72   : > { %v989_v45 = vsel %vm4943_vm5, %v984_v24, %v988_v0  ;;  %v960_v32 = vrot.slane %v959_v25, 4  ;;  %v1576_v35 = vshrl.u32 %v5237_v22, 16  ;;  %v1579_v36 = vshll.u32 %v5237_v22, 16 }
  0x73   : > { %v4355_v34 = vcombine.low %v979_v23, %v989_v45  ;;  %v1335_v37 = vsel %vm4899_vm2, %v1333_v44, %v1334_v16  ;;  %v1325_v3 = vsel %vm4899_vm2, %v4194_v18, %v1324_v29  ;;  %v1326_v38 = vrot.slane %v1324_v29, 4 }
  0x74   : > { %v965_v41 = vsel %vm4943_vm5, %v960_v32, %v964_v15  ;;  %v4371_v42 = vcombine.low %v1332_v27, %v1335_v37  ;;  %v1578_v43 = vrot.slane %v1576_v35, 4  ;;  %v1581_v46 = vrot.slane %v1579_v36, 5 }
  0x75   : > { %2393 = vrot.lane.b32.xlu1 %v4355_v34, %s4834_s22  ;;  %v4354_v14 = vcombine.low %v955_v28, %v965_v41  ;;  %v1328_v21 = vsel %vm4899_vm2, %v1326_v38, %v1327_v31  ;;  %v1589_v1 = vshrl.u32 %v5251_v33, 16  ;;  %v4387_v47 = vcombine.low %v5237_v22, %v5251_v33  ;;  %v197_v31 = vld [vmem:[%s4875_s17 + $0x54] sm:$0xf]  ;;  %v198_v34 = vld [vmem:[%s4875_s17 + $0x58] sm:$0xf] }
  0x76   : > { %v4370_v7 = vcombine.low %v1325_v3, %v1328_v21  ;;  %v1552_v9 = vshrl.u32 %v4214_v62, 16  ;;  %v1555_v49 = vshll.u32 %v4214_v62, 16  ;;  %v1565_v26 = vshrl.u32 %v5261_v39, 16 }
  0x77   : > { %2391 = vrot.lane.b32.xlu0 %v4354_v14, %s4834_s22  ;;  %v4386_v13 = vcombine.low %v4214_v62, %v5261_v39  ;;  %v1582_v50 = vor.u32 %v1581_v46, %v1578_v43  ;;  %v1585_v51 = vshll.u32 %v5251_v33, 16  ;;  %v1591_v52 = vrot.slane %v1589_v1, 4  ;;  %v222_v46 = vld [vmem:[%s4875_s17 + $0x5c] sm:$0x1] }
  0x78   : > { %v1554_v54 = vrot.slane %v1552_v9, 4  ;;  %v1557_v55 = vrot.slane %v1555_v49, 5  ;;  %v1595_v56 = vshll.u32 %v5272_v48, 16  ;;  %v1561_v40 = vshll.u32 %v5261_v39, 16  ;;  %v4259_v9 = vld [vmem:[%s4875_s17 + $0x54] sm:$0xe] }
  0x79   : > { %2473 = vrot.lane.b32.xlu1 %v4371_v42, %s4831_s19  ;;  %v1583_v57 = vrot.slane %v1582_v50, 4  ;;  %v1587_v58 = vrot.slane %v1585_v51, 5  ;;  %v1567_v12 = vrot.slane %v1565_v26, 4  ;;  %v1571_v59 = vshll.u32 %v5276_v30, 16 }
  0x7a   : > { %v1597_v61 = vrot.slane %v1595_v56, 5  ;;  %v1558_v63 = vor.u32 %v1557_v55, %v1554_v54  ;;  %v1563_v0 = vrot.slane %v1561_v40, 5  ;;  %v379_v2 = vshrl.u32 %v195_v53, 16 }
  0x7b   : > { %2471 = vrot.lane.b32.xlu0 %v4370_v7, %s4831_s19  ;;  %v1588_v4 = vsel %vm4943_vm5, %v1583_v57, %v1587_v58  ;;  %v1592_v5 = vor.u32 %v1591_v52, %v1587_v58  ;;  %v1573_v6 = vrot.slane %v1571_v59, 5  ;;  %v382_v8 = vshll.u32 %v195_v53, 16  ;;  %v625_v53 = vld [vmem:[%s4875_s17 + $0x54] sm:$0xe] }
  0x7c   : > { %v1559_v11 = vrot.slane %v1558_v63, 4  ;;  %v1568_v15 = vor.u32 %v1567_v12, %v1563_v0  ;;  %v381_v16 = vrot.slane %v379_v2, 4  ;;  %v388_v18 = vshll.u32 %v5287_v60, 16 }
  0x7d   : > { %2569 = vrot.lane.b32.xlu1 %v4387_v47, %s4835_s23  ;;  %v1593_v22 = vrot.slane %v1592_v5, 4  ;;  %v384_v23 = vrot.slane %v382_v8, 5  ;;  %v392_v24 = vshrl.u32 %v5287_v60, 16  ;;  %v398_v25 = vshll.u32 %v5290_v20, 16 }
  0x7e   : > { %v1564_v27 = vsel %vm4943_vm5, %v1559_v11, %v1563_v0  ;;  %v1569_v28 = vrot.slane %v1568_v15, 4  ;;  %v390_v44 = vrot.slane %v388_v18, 5  ;;  %v4274_v29 = vrot.slane %v4258_v10, 9  ;;  %v5332_v11 = vld [vmem:[%s4875_s17 + $0x60] sm:$0xf] }
  0x7f   : > { %2567 = vrot.lane.b32.xlu0 %v4386_v13, %s4835_s23  ;;  %v1598_v45 = vsel %vm4943_vm5, %v1593_v22, %v1597_v61  ;;  %v385_v32 = vor.u32 %v384_v23, %v381_v16  ;;  %v394_v35 = vrot.slane %v392_v24, 4  ;;  %v400_v36 = vrot.slane %v398_v25, 5  ;;  %v624_v61 = vld [vmem:[%s4875_s17 + $0x48] sm:$0xe] }
  0x80   : > { %v4403_v37 = vcombine.low %v1588_v4, %v1598_v45  ;;  %v1574_v3 = vsel %vm4943_vm5, %v1569_v28, %v1573_v6  ;;  %v1933_v38 = vrot.slane %v5261_v39, 5  ;;  %v1936_v62 = vrot.slane %v5276_v30, 5  ;;  %v4138_v45 = vld [vmem:[%s4875_s17 + $0x54] sm:$0xf] }
  0x81   : > { %v4402_v41 = vcombine.low %v1564_v27, %v1574_v3  ;;  %v386_v42 = vrot.slane %v385_v32, 4  ;;  %v395_v43 = vor.u32 %v394_v35, %v390_v44  ;;  %v403_v14 = vshrl.u32 %v197_v31, 16  ;;  %v5345_v27 = vld [vmem:[%s4875_s17 + $0x64] sm:$0xf]  ;;  %v5354_v32 = vld [vmem:[%s4875_s17 + $0x58] sm:$0xf] }
  0x82   : > { %2649 = vrot.lane.b32.xlu1 %v4403_v37, %s4836_s24  ;;  %v1934_v21 = vsel %vm4899_vm2, %v4274_v29, %v1933_v38  ;;  %v1935_v1 = vrot.slane %v1933_v38, 4  ;;  %v406_v47 = vshll.u32 %v197_v31, 16  ;;  %v412_v7 = vshll.u32 %v198_v34, 16 }
  0x83   : > { %2647 = vrot.lane.b32.xlu0 %v4402_v41, %s4836_s24  ;;  %v391_v39 = vsel %vm4943_vm5, %v386_v42, %v390_v44  ;;  %v396_v49 = vrot.slane %v395_v43, 4  ;;  %v405_v26 = vrot.slane %v403_v14, 4  ;;  %v416_v30 = vshrl.u32 %v198_v34, 16 }
  0x84   : > { %v1937_v13 = vsel %vm4899_vm2, %v1935_v1, %v1936_v62  ;;  %v408_v50 = vrot.slane %v406_v47, 5  ;;  %v414_v51 = vrot.slane %v412_v7, 5  ;;  %v422_v52 = vshll.u32 %v222_v46, 16  ;;  %v4165_v62 = vld [vmem:[%s4875_s17 + $0x68] sm:$0x1] }
  0x85   : > { %v401_v54 = vsel %vm4943_vm5, %v396_v49, %v400_v36  ;;  %v4418_v55 = vcombine.low %v1934_v21, %v1937_v13  ;;  %v418_v56 = vrot.slane %v416_v30, 4  ;;  %v4275_v40 = vrot.slane %v4259_v9, 9  ;;  %v4164_v9 = vld [vmem:[%s4875_s17 + $0x5c] sm:$0x1] }
  0x86   : > { %v4308_v57 = vcombine.low %v391_v39, %v401_v54  ;;  %v409_v58 = vor.u32 %v408_v50, %v405_v26  ;;  %v424_v12 = vrot.slane %v422_v52, 5  ;;  %v1940_v59 = vrot.slane %v5251_v33, 5  ;;  %v5336_v18 = vpop.permute.xlu1 %2305  ;;  %v4181_v39 = vld [vmem:[%s4875_s17 + $0x60] sm:$0xe] }
  0x87   : > { %2727 = vrot.lane.b32.xlu0 %v4418_v55, %s4837_s25  ;;  %v419_v63 = vor.u32 %v418_v56, %v414_v51  ;;  %v1943_v0 = vrot.slane %v5272_v48, 5  ;;  %v4117_v2 = vrot.slane %v625_v53, 9  ;;  %v736_v4 = vrot.slane %v198_v34, 5  ;;  %v5368_v14 = vpop.permute.xlu0 %2303  ;;  %v4180_v55 = vld [vmem:[%s4875_s17 + $0x54] sm:$0xe] }
  0x88   : > { %2139 = vrot.lane.b32.xlu1 %v4308_v57, %s4833_s21  ;;  %v410_v5 = vrot.slane %v409_v58, 4  ;;  %v1941_v6 = vsel %vm4899_vm2, %v4275_v40, %v1940_v59  ;;  %v1942_v8 = vrot.slane %v1940_v59, 4  ;;  %v739_v10 = vrot.slane %v222_v46, 5 }
  0x89   : > { %v420_v33 = vrot.slane %v419_v63, 4  ;;  %v737_v15 = vsel %vm4899_vm2, %v4117_v2, %v736_v4  ;;  %v738_v48 = vrot.slane %v736_v4, 4  ;;  %v4116_v16 = vrot.slane %v624_v61, 9 }
  0x8a   : > { %v415_v22 = vsel %vm4943_vm5, %v410_v5, %v414_v51  ;;  %v1944_v23 = vsel %vm4899_vm2, %v1942_v8, %v1943_v0  ;;  %v729_v24 = vrot.slane %v5287_v60, 5  ;;  %v732_v25 = vrot.slane %v5290_v20, 5  ;;  %v5384_v8 = vld [vmem:[%s4875_s17 + $0x6c] sm:$0xf] }
  0x8b   : > { %v425_v28 = vsel %vm4943_vm5, %v420_v33, %v424_v12  ;;  %v4419_v44 = vcombine.low %v1941_v6, %v1944_v23  ;;  %v740_v29 = vsel %vm4899_vm2, %v738_v48, %v739_v10  ;;  %v1015_v31 = vshrl.u32 %v5332_v11, 16 }
  0x8c   : > { %v4309_v35 = vcombine.low %v415_v22, %v425_v28  ;;  %v4325_v36 = vcombine.low %v737_v15, %v740_v29  ;;  %v730_v60 = vsel %vm4899_vm2, %v4116_v16, %v729_v24  ;;  %v731_v20 = vrot.slane %v729_v24, 4  ;;  %v5400_v28 = vld [vmem:[%s4875_s17 + $0x70] sm:$0xf] }
  0x8d   : > { %2729 = vrot.lane.b32.xlu0 %v4419_v44, %s4837_s25  ;;  %v1017_v34 = vrot.slane %v1015_v31, 4  ;;  %v1018_v37 = vshll.u32 %v5332_v11, 16  ;;  %v1028_v3 = vshrl.u32 %v5345_v27, 16  ;;  %v4341_v38 = vcombine.low %v5332_v11, %v5345_v27 }
  0x8e   : > { %2141 = vrot.lane.b32.xlu1 %v4309_v35, %s4833_s21  ;;  %v733_v41 = vsel %vm4899_vm2, %v731_v20, %v732_v25  ;;  %v991_v42 = vshrl.u32 %v4138_v45, 16  ;;  %v994_v43 = vshll.u32 %v4138_v45, 16  ;;  %v1004_v46 = vshrl.u32 %v5354_v32, 16  ;;  %v5386_v10 = vpop.permute.xlu0 %2463 }
  0x8f   : > { %v4324_v21 = vcombine.low %v730_v60, %v733_v41  ;;  %v1020_v1 = vrot.slane %v1018_v37, 5  ;;  %v4340_v47 = vcombine.low %v4138_v45, %v5354_v32  ;;  %v1024_v7 = vshll.u32 %v5345_v27, 16  ;;  %v5374_v49 = vpop.permute.xlu1 %2207  ;;  %v5412_v60 = vld [vmem:[%s4875_s17 + $0x64] sm:$0xf] }
  0x90   : > { %v993_v26 = vrot.slane %v991_v42, 4  ;;  %v996_v30 = vrot.slane %v994_v43, 5  ;;  %v1030_v13 = vrot.slane %v1028_v3, 4  ;;  %v1034_v50 = vshll.u32 %v4165_v62, 16 }
  0x91   : > { %2219 = vrot.lane.b32.xlu0 %v4324_v21, %s4832_s20  ;;  %v1021_v51 = vor.u32 %v1020_v1, %v1017_v34  ;;  %v1026_v52 = vrot.slane %v1024_v7, 5  ;;  %v1000_v53 = vshll.u32 %v5354_v32, 16  ;;  %v1006_v54 = vrot.slane %v1004_v46, 4  ;;  %v5425_v46 = vld [vmem:[%s4875_s17 + $0x74] sm:$0x1] }
  0x92   : > { %2221 = vrot.lane.b32.xlu1 %v4325_v36, %s4832_s20  ;;  %v1036_v56 = vrot.slane %v1034_v50, 5  ;;  %v997_v40 = vor.u32 %v996_v30, %v993_v26  ;;  %v1010_v57 = vshll.u32 %v4164_v9, 16  ;;  %v4197_v58 = vrot.slane %v4181_v39, 9  ;;  %v5409_v36 = vld [vmem:[%s4875_s17 + $0x60] sm:$0xf] }
  0x93   : > { %v1022_v12 = vrot.slane %v1021_v51, 4  ;;  %v1031_v59 = vor.u32 %v1030_v13, %v1026_v52  ;;  %v1002_v61 = vrot.slane %v1000_v53, 5  ;;  %v1345_v63 = vrot.slane %v5345_v27, 5  ;;  %v5381_v0 = vpop.permute.xlu1 %2209  ;;  %v5431_v39 = vld [vmem:[%s4875_s17 + $0x68] sm:$0x1] }
  0x94   : > { %v998_v2 = vrot.slane %v997_v40, 4  ;;  %v1012_v4 = vrot.slane %v1010_v57, 5  ;;  %v1348_v5 = vrot.slane %v4165_v62, 5  ;;  %v4196_v6 = vrot.slane %v4180_v55, 9 }
  0x95   : > { %2315 = vrot.lane.b32.xlu0 %v4340_v47, %s4830_s18  ;;  %v1027_v11 = vsel %vm4943_vm5, %v1022_v12, %v1026_v52  ;;  %v1032_v33 = vrot.slane %v1031_v59, 4  ;;  %v1007_v15 = vor.u32 %v1006_v54, %v1002_v61  ;;  %v1346_v48 = vsel %vm4899_vm2, %v4197_v58, %v1345_v63 }
  0x96   : > { %2317 = vrot.lane.b32.xlu1 %v4341_v38, %s4830_s18  ;;  %v1003_v16 = vsel %vm4943_vm5, %v998_v2, %v1002_v61  ;;  %v1347_v22 = vrot.slane %v1345_v63, 4  ;;  %v1338_v23 = vrot.slane %v5354_v32, 5  ;;  %v1341_v24 = vrot.slane %v4164_v9, 5  ;;  %v4794_v63 = vld [vmem:[%s4875_s17 + $0x4] sm:$0xf] }
  0x97   : > { %v1037_v25 = vsel %vm4943_vm5, %v1032_v33, %v1036_v56  ;;  %v1008_v27 = vrot.slane %v1007_v15, 4  ;;  %v1624_v44 = vshrl.u32 %v5384_v8, 16  ;;  %v1627_v29 = vshll.u32 %v5384_v8, 16  ;;  %v5416_v38 = vpop.permute.xlu1 %2465  ;;  %v4795_v2 = vld [vmem:[%s4875_s17] sm:$0xf] }
  0x98   : > { %v4357_v31 = vcombine.low %v1027_v11, %v1037_v25  ;;  %v1349_v45 = vsel %vm4899_vm2, %v1347_v22, %v1348_v5  ;;  %v1339_v35 = vsel %vm4899_vm2, %v4196_v6, %v1338_v23  ;;  %v1340_v32 = vrot.slane %v1338_v23, 4  ;;  %v199_v5 = vld [vmem:[%s4875_s17 + $0x60] sm:$0xf]  ;;  %v5452_v15 = vld [vmem:[%s4875_s17 + $0x64] sm:$0xf] }
  0x99   : > { %v1013_v20 = vsel %vm4943_vm5, %v1008_v27, %v1012_v4  ;;  %v4373_v34 = vcombine.low %v1346_v48, %v1349_v45  ;;  %v1626_v37 = vrot.slane %v1624_v44, 4  ;;  %v1629_v3 = vrot.slane %v1627_v29, 5  ;;  %v5456_v23 = vld [vmem:[%s4875_s17 + $0x68] sm:$0x1] }
  0x9a   : > { %2397 = vrot.lane.b32.xlu1 %v4357_v31, %s4834_s22  ;;  %v4356_v62 = vcombine.low %v1003_v16, %v1013_v20  ;;  %v1342_v41 = vsel %vm4899_vm2, %v1340_v32, %v1341_v24  ;;  %v1637_v42 = vshrl.u32 %v5400_v28, 16  ;;  %v4389_v43 = vcombine.low %v5384_v8, %v5400_v28  ;;  %v2128_v21 = vpop.permute.xlu0 %2127 }
  0x9b   : > { %v4372_v1 = vcombine.low %v1339_v35, %v1342_v41  ;;  %v1600_v47 = vshrl.u32 %v5409_v36, 16  ;;  %v1603_v7 = vshll.u32 %v5409_v36, 16  ;;  %v1613_v9 = vshrl.u32 %v5412_v60, 16 }
  0x9c   : > { %2395 = vrot.lane.b32.xlu0 %v4356_v62, %s4834_s22  ;;  %v4388_v26 = vcombine.low %v5409_v36, %v5412_v60  ;;  %v1630_v30 = vor.u32 %v1629_v3, %v1626_v37  ;;  %v1633_v13 = vshll.u32 %v5400_v28, 16  ;;  %v1639_v50 = vrot.slane %v1637_v42, 4  ;;  %v4260_v36 = vld [vmem:[%s4875_s17 + $0x60] sm:$0xe] }
  0x9d   : > { %v1602_v51 = vrot.slane %v1600_v47, 4  ;;  %v1605_v52 = vrot.slane %v1603_v7, 5  ;;  %v1643_v53 = vshll.u32 %v5425_v46, 16  ;;  %v1609_v54 = vshll.u32 %v5412_v60, 16 }
  0x9e   : > { %2477 = vrot.lane.b32.xlu1 %v4373_v34, %s4831_s19  ;;  %v1631_v55 = vrot.slane %v1630_v30, 4  ;;  %v1635_v56 = vrot.slane %v1633_v13, 5  ;;  %v1615_v40 = vrot.slane %v1613_v9, 4  ;;  %v1619_v57 = vshll.u32 %v5431_v39, 16  ;;  %v5441_v58 = vpop.permute.xlu0 %2129 }
  0x9f   : > { %v1645_v12 = vrot.slane %v1643_v53, 5  ;;  %v1606_v59 = vor.u32 %v1605_v52, %v1602_v51  ;;  %v1611_v61 = vrot.slane %v1609_v54, 5  ;;  %v4286_v4 = vcombine.low %v4795_v2, %v4794_v63  ;;  %v5446_v6 = vpop.permute.xlu1 %2385  ;;  %v4796_v52 = vld [vmem:[%s4875_s17 + $0x10] sm:$0xf]  ;;  %v4797_v53 = vld [vmem:[%s4875_s17 + $0xc] sm:$0xf] }
  0xa0   : > { %2475 = vrot.lane.b32.xlu0 %v4372_v1, %s4831_s19  ;;  %v1636_v8 = vsel %vm4943_vm5, %v1631_v55, %v1635_v56  ;;  %v1640_v11 = vor.u32 %v1639_v50, %v1635_v56  ;;  %v1621_v33 = vrot.slane %v1619_v57, 5  ;;  %v427_v27 = vshrl.u32 %v199_v5, 16  ;;  %v5480_v1 = vld [vmem:[%s4875_s17 + $0x70] sm:$0xf] }
  0xa1   : > { %v1607_v48 = vrot.slane %v1606_v59, 4  ;;  %v1616_v16 = vor.u32 %v1615_v40, %v1611_v61  ;;  %v2754_v22 = vsel %vm2751_vm6, %v4286_v4, %v2128_v21  ;;  %v430_v44 = vshll.u32 %v199_v5, 16  ;;  %v201_v21 = vld [vmem:[%s4875_s17 + $0x6c] sm:$0xf] }
  0xa2   : > { %2573 = vrot.lane.b32.xlu1 %v4389_v43, %s4835_s23  ;;  %v1641_v24 = vrot.slane %v1640_v11, 4  ;;  %v5461_v25 = vsel %vm2800_vm7, %v2754_v22, %v5374_v49  ;;  %v5463_v29 = vpop.permute.xlu0 %2383  ;;  %v436_v35 = vshll.u32 %v5452_v15, 16  ;;  %v440_v32 = vshrl.u32 %v5452_v15, 16 }
  0xa3   : > { %v1612_v31 = vsel %vm4943_vm5, %v1607_v48, %v1611_v61  ;;  %v1617_v45 = vrot.slane %v1616_v16, 4  ;;  %v429_v20 = vrot.slane %v427_v27, 4  ;;  %v432_v34 = vrot.slane %v430_v44, 5  ;;  %v5474_v3 = vpop.permute.xlu1 %2561 }
  0xa4   : > { %2571 = vrot.lane.b32.xlu0 %v4388_v26, %s4835_s23  ;;  %v1646_v49 = vsel %vm4943_vm5, %v1641_v24, %v1645_v12  ;;  %v446_v37 = vshll.u32 %v5456_v23, 16  ;;  %v438_v42 = vrot.slane %v436_v35, 5  ;;  %v442_v43 = vrot.slane %v440_v32, 4 }
  0xa5   : > { %v4405_v62 = vcombine.low %v1636_v8, %v1646_v49  ;;  %v1622_v41 = vsel %vm4943_vm5, %v1617_v45, %v1621_v33  ;;  %v433_v7 = vor.u32 %v432_v34, %v429_v20  ;;  %v4276_v26 = vrot.slane %v4260_v36, 9  ;;  %v4261_v8 = vld [vmem:[%s4875_s17 + $0x6c] sm:$0xe] }
  0xa6   : > { %v4404_v47 = vcombine.low %v1612_v31, %v1622_v41  ;;  %v448_v9 = vrot.slane %v446_v37, 5  ;;  %v5482_v30 = vpop.permute.xlu0 %2559  ;;  %v443_v13 = vor.u32 %v442_v43, %v438_v42  ;;  %v1947_v50 = vrot.slane %v5412_v60, 5  ;;  %v627_v36 = vld [vmem:[%s4875_s17 + $0x6c] sm:$0xe] }
  0xa7   : > { %2653 = vrot.lane.b32.xlu1 %v4405_v62, %s4836_s24  ;;  %v1950_v51 = vrot.slane %v5431_v39, 5  ;;  %v4287_v54 = vcombine.low %v4797_v53, %v4796_v52  ;;  %v434_v55 = vrot.slane %v433_v7, 4  ;;  %v451_v56 = vshrl.u32 %v201_v21, 16  ;;  %v224_v39 = vld [vmem:[%s4875_s17 + $0x74] sm:$0x1] }
  0xa8   : > { %2651 = vrot.lane.b32.xlu0 %v4404_v47, %s4836_s24  ;;  %v454_v40 = vshll.u32 %v201_v21, 16  ;;  %v460_v57 = vshll.u32 %v5480_v1, 16  ;;  %v444_v12 = vrot.slane %v443_v13, 4  ;;  %v1948_v59 = vsel %vm4899_vm2, %v4276_v26, %v1947_v50 }
  0xa9   : > { %v1949_v61 = vrot.slane %v1947_v50, 4  ;;  %v2757_v60 = vsel %vm2751_vm6, %v4287_v54, %v5441_v58  ;;  %v439_v63 = vsel %vm4943_vm5, %v434_v55, %v438_v42  ;;  %v453_v4 = vrot.slane %v451_v56, 4  ;;  %v4144_v56 = vld [vmem:[%s4875_s17 + $0x78] sm:$0xf] }
  0xaa   : > { %v2804_v2 = vsel %vm2800_vm7, %v2757_v60, %v5381_v0  ;;  %v456_v5 = vrot.slane %v454_v40, 5  ;;  %v5501_v11 = vpop.permute.xlu1 %2641  ;;  %v449_v33 = vsel %vm4943_vm5, %v444_v12, %v448_v9  ;;  %v462_v58 = vrot.slane %v460_v57, 5  ;;  %v4142_v12 = vld [vmem:[%s4875_s17 + $0x6c] sm:$0xf] }
  0xab   : > { %v1951_v48 = vsel %vm4899_vm2, %v1949_v61, %v1950_v51  ;;  %v464_v16 = vshrl.u32 %v5480_v1, 16  ;;  %v5508_v22 = vpop.permute.xlu0 %2639  ;;  %v4310_v24 = vcombine.low %v439_v63, %v449_v33  ;;  %v470_v44 = vshll.u32 %v224_v39, 16 }
  0xac   : > { %v4420_v27 = vcombine.low %v1948_v59, %v1951_v48  ;;  %v457_v0 = vor.u32 %v456_v5, %v453_v4  ;;  %v4277_v45 = vrot.slane %v4261_v8, 9  ;;  %v1954_v35 = vrot.slane %v5400_v28, 5  ;;  %v626_v28 = vld [vmem:[%s4875_s17 + $0x60] sm:$0xe] }
  0xad   : > { %v466_v31 = vrot.slane %v464_v16, 4  ;;  %v1957_v32 = vrot.slane %v5425_v46, 5  ;;  %2143 = vrot.lane.b32.xlu1 %v4310_v24, %s4833_s21  ;;  %v472_v20 = vrot.slane %v470_v44, 5  ;;  %v2837_v41 = vsel %vm2833_vm8, %v2804_v2, %v5336_v18  ;;  %v4167_v24 = vld [vmem:[%s4875_s17 + $0x80] sm:$0x1] }
  0xae   : > { %2731 = vrot.lane.b32.xlu0 %v4420_v27, %s4837_s25  ;;  %v458_v49 = vrot.slane %v457_v0, 4  ;;  %v1955_v37 = vsel %vm4899_vm2, %v4277_v45, %v1954_v35  ;;  %v1956_v62 = vrot.slane %v1954_v35, 4  ;;  %v2870_v43 = vsel %vm2866_vm9, %v2837_v41, %v5446_v6  ;;  %v5576_v0 = vld [vmem:[%s4875_s17 + $0x74] sm:$0x1] }
  0xaf   : > { %v467_v34 = vor.u32 %v466_v31, %v462_v58  ;;  %v5520_v42 = vpop.permute.xlu0 %2719  ;;  %v2835_v21 = vsel %vm2833_vm8, %v5461_v25, %v5368_v14  ;;  %v4119_v47 = vrot.slane %v627_v36, 9  ;;  %v750_v13 = vrot.slane %v5480_v1, 5 }
  0xb0   : > { %v463_v46 = vsel %vm4943_vm5, %v458_v49, %v462_v58  ;;  %v5529_v7 = vpop.permute.xlu1 %2131  ;;  %v1958_v18 = vsel %vm4899_vm2, %v1956_v62, %v1957_v32  ;;  %v2868_v26 = vsel %vm2866_vm9, %v2835_v21, %v5463_v29  ;;  %v753_v6 = vrot.slane %v224_v39, 5 }
  0xb1   : > { %v468_v9 = vrot.slane %v467_v34, 4  ;;  %v4421_v50 = vcombine.low %v1955_v37, %v1958_v18  ;;  %v4118_v51 = vrot.slane %v626_v28, 9  ;;  %v743_v14 = vrot.slane %v5452_v15, 5  ;;  %v5547_v15 = vld [vmem:[%s4875_s17 + $0x7c] sm:$0xf] }
  0xb2   : > { %v751_v52 = vsel %vm4899_vm2, %v4119_v47, %v750_v13  ;;  %v752_v53 = vrot.slane %v750_v13, 4  ;;  %v746_v54 = vrot.slane %v5456_v23, 5  ;;  %v2903_v57 = vsel %vm2899_vm10, %v2870_v43, %v5416_v38  ;;  %v5555_v23 = vld [vmem:[%s4875_s17 + $0x70] sm:$0xf]  ;;  %v4798_v47 = vld [vmem:[%s4875_s17 + $0x18] sm:$0xf] }
  0xb3   : > { %v473_v25 = vsel %vm4943_vm5, %v468_v9, %v472_v20  ;;  %2733 = vrot.lane.b32.xlu0 %v4421_v50, %s4837_s25  ;;  %v744_v1 = vsel %vm4899_vm2, %v4118_v51, %v743_v14  ;;  %v745_v55 = vrot.slane %v743_v14, 4  ;;  %v2936_v39 = vsel %vm6837_vm11, %v2903_v57, %v5474_v3  ;;  %v4799_v9 = vld [vmem:[%s4875_s17 + $0x1c] sm:$0xf] }
  0xb4   : > { %v4311_v29 = vcombine.low %v463_v46, %v473_v25  ;;  %v754_v40 = vsel %vm4899_vm2, %v752_v53, %v753_v6  ;;  %v2901_v63 = vsel %vm2899_vm10, %v2868_v26, %v5386_v10  ;;  %v1063_v4 = vshrl.u32 %v4144_v56, 16  ;;  %v4183_v46 = vld [vmem:[%s4875_s17 + $0x78] sm:$0xe]  ;;  %v4182_v26 = vld [vmem:[%s4875_s17 + $0x6c] sm:$0xe] }
  0xb5   : > { %v5557_v59 = vpop.permute.xlu0 %2721  ;;  %v4327_v61 = vcombine.low %v751_v52, %v754_v40  ;;  %v747_v60 = vsel %vm4899_vm2, %v745_v55, %v746_v54  ;;  %v1066_v5 = vshll.u32 %v4144_v56, 16  ;;  %v1076_v8 = vshrl.u32 %v5547_v15, 16 }
  0xb6   : > { %2145 = vrot.lane.b32.xlu1 %v4311_v29, %s4833_s21  ;;  %v5566_v38 = vpop.permute.xlu1 %2133  ;;  %v4326_v2 = vcombine.low %v744_v1, %v747_v60  ;;  %v2934_v33 = vsel %vm6837_vm11, %v2901_v63, %v5482_v30  ;;  %v1039_v48 = vshrl.u32 %v4142_v12, 16  ;;  %v1042_v58 = vshll.u32 %v4142_v12, 16 }
  0xb7   : > { %v1052_v16 = vshrl.u32 %v5555_v23, 16  ;;  %v1065_v3 = vrot.slane %v1063_v4, 4  ;;  %v1068_v10 = vrot.slane %v1066_v5, 5  ;;  %v4342_v27 = vcombine.low %v4142_v12, %v5555_v23 }
  0xb8   : > { %2223 = vrot.lane.b32.xlu0 %v4326_v2, %s4832_s20  ;;  %v4343_v30 = vcombine.low %v4144_v56, %v5547_v15  ;;  %v1041_v31 = vrot.slane %v1039_v48, 4  ;;  %v1044_v45 = vrot.slane %v1042_v58, 5  ;;  %v5584_v35 = vsel %vm2965_vm12, %v2936_v39, %v5501_v11  ;;  %v5630_v58 = vld [vmem:[%s4875_s17 + $0x88] sm:$0xf] }
  0xb9   : > { %v5578_v44 = vpop.permute.xlu0 %2211  ;;  %v1069_v36 = vor.u32 %v1068_v10, %v1065_v3  ;;  %v1072_v49 = vshll.u32 %v5547_v15, 16  ;;  %v1078_v20 = vrot.slane %v1076_v8, 4  ;;  %v1082_v34 = vshll.u32 %v4167_v24, 16 }
  0xba   : > { %2225 = vrot.lane.b32.xlu1 %v4327_v61, %s4832_s20  ;;  %v5586_v32 = vpop.permute.xlu1 %2213  ;;  %v1045_v37 = vor.u32 %v1044_v45, %v1041_v31  ;;  %v1048_v62 = vshll.u32 %v5555_v23, 16  ;;  %v1054_v41 = vrot.slane %v1052_v16, 4  ;;  %v1058_v28 = vshll.u32 %v5576_v0, 16 }
  0xbb   : > { %v2967_v11 = vsel %vm2965_vm12, %v2934_v33, %v5508_v22  ;;  %v1070_v43 = vrot.slane %v1069_v36, 4  ;;  %v1074_v21 = vrot.slane %v1072_v49, 5  ;;  %v4288_v18 = vcombine.low %v4798_v47, %v4799_v9  ;;  %v5646_v49 = vld [vmem:[%s4875_s17 + $0x7c] sm:$0xf] }
  0xbc   : > { %2319 = vrot.lane.b32.xlu0 %v4342_v27, %s4830_s18  ;;  %v1084_v13 = vrot.slane %v1082_v34, 5  ;;  %v1046_v50 = vrot.slane %v1045_v37, 4  ;;  %v1050_v6 = vrot.slane %v1048_v62, 5  ;;  %v1060_v51 = vrot.slane %v1058_v28, 5  ;;  %v4222_v27 = vld [vmem:[%s4875_s17 + $0x78] sm:$0xf] }
  0xbd   : > { %v5601_v25 = vpop.permute.xlu0 %2307  ;;  %v1075_v52 = vsel %vm4943_vm5, %v1070_v43, %v1074_v21  ;;  %v1079_v22 = vor.u32 %v1078_v20, %v1074_v21  ;;  %v4199_v53 = vrot.slane %v4183_v46, 9  ;;  %v1359_v54 = vrot.slane %v5547_v15, 5 }
  0xbe   : > { %2321 = vrot.lane.b32.xlu1 %v4343_v30, %s4830_s18  ;;  %v5599_v14 = vpop.permute.xlu1 %2309  ;;  %v1055_v29 = vor.u32 %v1054_v41, %v1050_v6  ;;  %v5608_v1 = vsel %vm2751_vm6, %v4288_v18, %v5529_v7  ;;  %v1362_v55 = vrot.slane %v4167_v24, 5  ;;  %v4198_v56 = vrot.slane %v4182_v26, 9  ;;  %v4800_v30 = vld [vmem:[%s4875_s17 + $0x24] sm:$0xf]  ;;  %v5665_v26 = vld [vmem:[%s4875_s17 + $0x80] sm:$0x1] }
  0xbf   : > { %v1080_v40 = vrot.slane %v1079_v22, 4  ;;  %v1051_v57 = vsel %vm4943_vm5, %v1046_v50, %v1050_v6  ;;  %v1361_v12 = vrot.slane %v1359_v54, 4  ;;  %v1352_v61 = vrot.slane %v5555_v23, 5  ;;  %v4224_v23 = vld [vmem:[%s4875_s17 + $0x84] sm:$0xf] }
  0xc0   : > { %v1056_v60 = vrot.slane %v1055_v29, 4  ;;  %v1355_v39 = vrot.slane %v5576_v0, 5  ;;  %v1360_v63 = vsel %vm4899_vm2, %v4199_v53, %v1359_v54  ;;  %v3000_v48 = vsel %vm2998_vm13, %v2967_v11, %v5520_v42  ;;  %v4801_v42 = vld [vmem:[%s4875_s17 + $0x28] sm:$0xf] }
  0xc1   : > { %v1085_v7 = vsel %vm4943_vm5, %v1080_v40, %v1084_v13  ;;  %v1363_v2 = vsel %vm4899_vm2, %v1361_v12, %v1362_v55  ;;  %v1354_v4 = vrot.slane %v1352_v61, 4  ;;  %v1353_v33 = vsel %vm4899_vm2, %v4198_v56, %v1352_v61 }
  0xc2   : > { %v5614_v15 = vpop.permute.xlu1 %2389  ;;  %v4359_v5 = vcombine.low %v1075_v52, %v1085_v7  ;;  %v1061_v8 = vsel %vm4943_vm5, %v1056_v60, %v1060_v51  ;;  %v3033_v10 = vsel %vm3031_vm14, %v3000_v48, 0  ;;  %v4375_v0 = vcombine.low %v1360_v63, %v1363_v2  ;;  %v5684_v7 = vld [vmem:[%s4875_s17 + $0x7c] sm:$0xf]  ;;  %v4262_v48 = vld [vmem:[%s4875_s17 + $0x78] sm:$0xe] }
  0xc3   : > { %v4358_v24 = vcombine.low %v1051_v57, %v1061_v8  ;;  %v1356_v3 = vsel %vm4899_vm2, %v1354_v4, %v1355_v39  ;;  %4687 = vmatprep.mubr.msk.bf16.mxu0 %vm3073_vm15, %v3033_v10  ;;  %v4289_v31 = vcombine.low %v4800_v30, %v4801_v42  ;;  %v3002_v45 = vsel %vm2998_vm13, %v5584_v35, %v5557_v59  ;;  %v5656_v59 = vld [vmem:[%s4875_s17 + $0x8c] sm:$0x1] }
  0xc4   : > { %v5632_v16 = vpop.permute.xlu0 %2387  ;;  %2401 = vrot.lane.b32.xlu1 %v4359_v5, %s4834_s22  ;;  %v1672_v36 = vshrl.u32 %v4224_v23, 16  ;;  %v4374_v34 = vcombine.low %v1353_v33, %v1356_v3  ;;  %v3034_v37 = vsel %vm3031_vm14, %v3002_v45, 0  ;;  %v1675_v62 = vshll.u32 %v4224_v23, 16  ;;  %v5690_v5 = vld [vmem:[%s4875_s17 + $0x80] sm:$0x1] }
  0xc5   : > { %2399 = vrot.lane.b32.xlu0 %v4358_v24, %s4834_s22  ;;  %v1685_v41 = vshrl.u32 %v5630_v58, 16  ;;  %v4391_v46 = vcombine.low %v4224_v23, %v5630_v58  ;;  %v1648_v11 = vshrl.u32 %v4222_v27, 16  ;;  %v1651_v43 = vshll.u32 %v4222_v27, 16  ;;  %4688 = vmatmul.mubr.msk.bf16.vlgmr.msra.gmra.mrb[0].mxu0 %vm3073_vm15, %v3034_v37 }
  0xc6   : > { %v5648_v20 = vpop.permute.xlu1 %2469  ;;  %v1674_v28 = vrot.slane %v1672_v36, 4  ;;  %v2763_v21 = vsel %vm2751_vm6, %v4289_v31, %v5566_v38  ;;  %v1677_v47 = vrot.slane %v1675_v62, 5  ;;  %v1661_v9 = vshrl.u32 %v5646_v49, 16 }
  0xc7   : > { %v4390_v18 = vcombine.low %v4222_v27, %v5646_v49  ;;  %v1650_v13 = vrot.slane %v1648_v11, 4  ;;  %v1653_v50 = vrot.slane %v1651_v43, 5  ;;  %v2808_v6 = vsel %vm2800_vm7, %v2763_v21, %v5586_v32  ;;  %v203_v32 = vld [vmem:[%s4875_s17 + $0x78] sm:$0xf] }
  0xc8   : > { %v5658_v35 = vpop.permute.xlu0 %2467  ;;  %2481 = vrot.lane.b32.xlu1 %v4375_v0, %s4831_s19  ;;  %v1681_v51 = vshll.u32 %v5630_v58, 16  ;;  %v1678_v38 = vor.u32 %v1677_v47, %v1674_v28  ;;  %v1687_v22 = vrot.slane %v1685_v41, 4  ;;  %v1691_v53 = vshll.u32 %v5656_v59, 16  ;;  %v205_v41 = vld [vmem:[%s4875_s17 + $0x84] sm:$0xf] }
  0xc9   : > { %2479 = vrot.lane.b32.xlu0 %v4374_v34, %s4831_s19  ;;  %v1657_v54 = vshll.u32 %v5646_v49, 16  ;;  %v1654_v55 = vor.u32 %v1653_v50, %v1650_v13  ;;  %v1663_v56 = vrot.slane %v1661_v9, 4  ;;  %v1667_v40 = vshll.u32 %v5665_v26, 16  ;;  %v206_v13 = vld [vmem:[%s4875_s17 + $0x88] sm:$0xf] }
  0xca   : > { %v5671_v52 = vpop.permute.xlu1 %2565  ;;  %v1683_v29 = vrot.slane %v1681_v51, 5  ;;  %v2806_v12 = vsel %vm2800_vm7, %v5608_v1, %v5578_v44  ;;  %v1679_v61 = vrot.slane %v1678_v38, 4  ;;  %v1693_v60 = vrot.slane %v1691_v53, 5 }
  0xcb   : > { %v1659_v39 = vrot.slane %v1657_v54, 5  ;;  %v1655_v2 = vrot.slane %v1654_v55, 4  ;;  %v1669_v4 = vrot.slane %v1667_v40, 5  ;;  %v2841_v23 = vsel %vm2833_vm8, %v2808_v6, %v5599_v14 }
  0xcc   : > { %v5678_v57 = vpop.permute.xlu0 %2563  ;;  %2577 = vrot.lane.b32.xlu1 %v4391_v46, %s4835_s23  ;;  %v1688_v63 = vor.u32 %v1687_v22, %v1683_v29  ;;  %v1684_v44 = vsel %vm4943_vm5, %v1679_v61, %v1683_v29  ;;  %v475_v8 = vshrl.u32 %v203_v32, 16  ;;  %v478_v33 = vshll.u32 %v203_v32, 16  ;;  %v5721_v22 = vld [vmem:[%s4875_s17 + $0x8c] sm:$0x1]  ;;  %v4263_v32 = vld [vmem:[%s4875_s17 + $0x84] sm:$0xe] }
  0xcd   : > { %2575 = vrot.lane.b32.xlu0 %v4390_v18, %s4835_s23  ;;  %v1664_v1 = vor.u32 %v1663_v56, %v1659_v39  ;;  %v1660_v10 = vsel %vm4943_vm5, %v1655_v2, %v1659_v39  ;;  %v484_v14 = vshll.u32 %v5684_v7, 16  ;;  %v488_v27 = vshrl.u32 %v5684_v7, 16 }
  0xce   : > { %v1689_v3 = vrot.slane %v1688_v63, 4  ;;  %v477_v42 = vrot.slane %v475_v8, 4  ;;  %v480_v31 = vrot.slane %v478_v33, 5  ;;  %v494_v45 = vshll.u32 %v5690_v5, 16 }
  0xcf   : > { %v5696_v24 = vpop.permute.xlu1 %2645  ;;  %v1665_v30 = vrot.slane %v1664_v1, 4  ;;  %v486_v34 = vrot.slane %v484_v14, 5  ;;  %v490_v37 = vrot.slane %v488_v27, 4  ;;  %v4278_v62 = vrot.slane %v4262_v48, 9 }
  0xd0   : > { %v5702_v0 = vpop.permute.xlu0 %2643  ;;  %v1694_v36 = vsel %vm4943_vm5, %v1689_v3, %v1693_v60  ;;  %v481_v11 = vor.u32 %v480_v31, %v477_v42  ;;  %v496_v43 = vrot.slane %v494_v45, 5  ;;  %v1961_v9 = vrot.slane %v5646_v49, 5  ;;  %v628_v3 = vld [vmem:[%s4875_s17 + $0x78] sm:$0xe] }
  0xd1   : > { %v4407_v28 = vcombine.low %v1684_v44, %v1694_v36  ;;  %v1670_v46 = vsel %vm4943_vm5, %v1665_v30, %v1669_v4  ;;  %v491_v47 = vor.u32 %v490_v37, %v486_v34  ;;  %v1964_v18 = vrot.slane %v5665_v26, 5  ;;  %v629_v44 = vld [vmem:[%s4875_s17 + $0x84] sm:$0xe] }
  0xd2   : > { %v4406_v21 = vcombine.low %v1660_v10, %v1670_v46  ;;  %v2839_v6 = vsel %vm2833_vm8, %v2806_v12, %v5601_v25  ;;  %v482_v51 = vrot.slane %v481_v11, 4  ;;  %v2874_v38 = vsel %vm2866_vm9, %v2841_v23, %v5614_v15  ;;  %v5760_v11 = vld [vmem:[%s4875_s17 + $0x90] sm:$0xf] }
  0xd3   : > { %2657 = vrot.lane.b32.xlu1 %v4407_v28, %s4836_s24  ;;  %v499_v53 = vshrl.u32 %v205_v41, 16  ;;  %v492_v49 = vrot.slane %v491_v47, 4  ;;  %v1962_v26 = vsel %vm4899_vm2, %v4278_v62, %v1961_v9  ;;  %v1963_v29 = vrot.slane %v1961_v9, 4 }
  0xd4   : > { %v5713_v50 = vpop.permute.xlu0 %2723  ;;  %2655 = vrot.lane.b32.xlu0 %v4406_v21, %s4836_s24  ;;  %v502_v55 = vshll.u32 %v205_v41, 16  ;;  %v487_v25 = vsel %vm4943_vm5, %v482_v51, %v486_v34  ;;  %v508_v40 = vshll.u32 %v206_v13, 16  ;;  %v512_v15 = vshrl.u32 %v206_v13, 16 }
  0xd5   : > { %v5723_v54 = vpop.permute.xlu1 %2135  ;;  %v501_v56 = vrot.slane %v499_v53, 4  ;;  %v497_v12 = vsel %vm4943_vm5, %v492_v49, %v496_v43  ;;  %v1965_v61 = vsel %vm4899_vm2, %v1963_v29, %v1964_v18  ;;  %v518_v39 = vshll.u32 %v5721_v22, 16 }
  0xd6   : > { %v504_v60 = vrot.slane %v502_v55, 5  ;;  %v4312_v63 = vcombine.low %v487_v25, %v497_v12  ;;  %v4422_v2 = vcombine.low %v1962_v26, %v1965_v61  ;;  %v510_v4 = vrot.slane %v508_v40, 5  ;;  %v5786_v55 = vld [vmem:[%s4875_s17 + $0x88] sm:$0xf]  ;;  %v5795_v61 = vld [vmem:[%s4875_s17 + $0x98] sm:$0x1] }
  0xd7   : > { %v514_v23 = vrot.slane %v512_v15, 4  ;;  %v2872_v1 = vsel %vm2866_vm9, %v2839_v6, %v5632_v16  ;;  %v4279_v33 = vrot.slane %v4263_v32, 9  ;;  %v1968_v48 = vrot.slane %v5630_v58, 5 }
  0xd8   : > { %v505_v8 = vor.u32 %v504_v60, %v501_v56  ;;  %2147 = vrot.lane.b32.xlu1 %v4312_v63, %s4833_s21  ;;  %2735 = vrot.lane.b32.xlu0 %v4422_v2, %s4837_s25  ;;  %v520_v27 = vrot.slane %v518_v39, 5  ;;  %v1971_v30 = vrot.slane %v5656_v59, 5  ;;  %v2907_v42 = vsel %vm2899_vm10, %v2874_v38, %v5648_v20 }
  0xd9   : > { %v515_v14 = vor.u32 %v514_v23, %v510_v4  ;;  %v1969_v58 = vsel %vm4899_vm2, %v4279_v33, %v1968_v48  ;;  %v1970_v45 = vrot.slane %v1968_v48, 4  ;;  %v4121_v36 = vrot.slane %v629_v44, 9  ;;  %v5806_v23 = vld [vmem:[%s4875_s17 + $0x8c] sm:$0x1] }
  0xda   : > { %v5741_v10 = vpop.permute.xlu0 %2725  ;;  %v506_v31 = vrot.slane %v505_v8, 4  ;;  %v764_v37 = vrot.slane %v206_v13, 5  ;;  %v767_v62 = vrot.slane %v5721_v22, 5  ;;  %v4120_v41 = vrot.slane %v628_v3, 9  ;;  %v5769_v13 = vld [vmem:[%s4875_s17 + $0x94] sm:$0xf] }
  0xdb   : > { %v5748_v16 = vpop.permute.xlu1 %2137  ;;  %v516_v34 = vrot.slane %v515_v14, 4  ;;  %v1972_v20 = vsel %vm4899_vm2, %v1970_v45, %v1971_v30  ;;  %v757_v28 = vrot.slane %v5684_v7, 5  ;;  %v760_v46 = vrot.slane %v5690_v5, 5  ;;  %v4146_v22 = vld [vmem:[%s4875_s17 + $0x84] sm:$0xf] }
  0xdc   : > { %v511_v59 = vsel %vm4943_vm5, %v506_v31, %v510_v4  ;;  %v4423_v47 = vcombine.low %v1969_v58, %v1972_v20  ;;  %v765_v9 = vsel %vm4899_vm2, %v4121_v36, %v764_v37  ;;  %v766_v18 = vrot.slane %v764_v37, 4  ;;  %v4802_v20 = vld [vmem:[%s4875_s17 + $0x30] sm:$0xf] }
  0xdd   : > { %v521_v21 = vsel %vm4943_vm5, %v516_v34, %v520_v27  ;;  %v2905_v5 = vsel %vm2899_vm10, %v2872_v1, %v5658_v35  ;;  %v758_v51 = vsel %vm4899_vm2, %v4120_v41, %v757_v28  ;;  %v759_v38 = vrot.slane %v757_v28, 4  ;;  %v4803_v28 = vld [vmem:[%s4875_s17 + $0x34] sm:$0xf] }
  0xde   : > { %v5762_v43 = vpop.permute.xlu0 %2215  ;;  %v4313_v7 = vcombine.low %v511_v59, %v521_v21  ;;  %2737 = vrot.lane.b32.xlu0 %v4423_v47, %s4837_s25  ;;  %v768_v53 = vsel %vm4899_vm2, %v766_v18, %v767_v62  ;;  %v2940_v49 = vsel %vm6837_vm11, %v2907_v42, %v5671_v52  ;;  %v1111_v26 = vshrl.u32 %v5760_v11, 16  ;;  %v4185_v62 = vld [vmem:[%s4875_s17 + $0x90] sm:$0xe]  ;;  %v4184_v21 = vld [vmem:[%s4875_s17 + $0x84] sm:$0xe] }
  0xdf   : > { %v5771_v6 = vpop.permute.xlu1 %2217  ;;  %v1114_v29 = vshll.u32 %v5760_v11, 16  ;;  %v4329_v35 = vcombine.low %v765_v9, %v768_v53  ;;  %v761_v25 = vsel %vm4899_vm2, %v759_v38, %v760_v46  ;;  %v2938_v56 = vsel %vm6837_vm11, %v2905_v5, %v5678_v57 }
  0xe0   : > { %2149 = vrot.lane.b32.xlu1 %v4313_v7, %s4833_s21  ;;  %v1124_v40 = vshrl.u32 %v5769_v13, 16  ;;  %v4328_v15 = vcombine.low %v758_v51, %v761_v25  ;;  %v1113_v52 = vrot.slane %v1111_v26, 4  ;;  %v1087_v12 = vshrl.u32 %v4146_v22, 16 }
  0xe1   : > { %v1116_v32 = vrot.slane %v1114_v29, 5  ;;  %v4345_v63 = vcombine.low %v5760_v11, %v5769_v13  ;;  %v1090_v2 = vshll.u32 %v4146_v22, 16  ;;  %v1100_v4 = vshrl.u32 %v5786_v55, 16 }
  0xe2   : > { %v5799_v39 = vpop.permute.xlu0 %2311  ;;  %v4344_v57 = vcombine.low %v4146_v22, %v5786_v55  ;;  %2227 = vrot.lane.b32.xlu0 %v4328_v15, %s4832_s20  ;;  %v1089_v44 = vrot.slane %v1087_v12, 4  ;;  %v2973_v1 = vsel %vm2965_vm12, %v2940_v49, %v5696_v24  ;;  %v1120_v33 = vshll.u32 %v5769_v13, 16 }
  0xe3   : > { %v5797_v60 = vpop.permute.xlu1 %2313  ;;  %v1117_v8 = vor.u32 %v1116_v32, %v1113_v52  ;;  %v1092_v48 = vrot.slane %v1090_v2, 5  ;;  %v1126_v3 = vrot.slane %v1124_v40, 4  ;;  %v1130_v14 = vshll.u32 %v5795_v61, 16  ;;  %v4228_v40 = vld [vmem:[%s4875_s17 + $0x9c] sm:$0xf] }
  0xe4   : > { %2229 = vrot.lane.b32.xlu1 %v4329_v35, %s4832_s20  ;;  %v1096_v27 = vshll.u32 %v5786_v55, 16  ;;  %v1122_v42 = vrot.slane %v1120_v33, 5  ;;  %v1102_v31 = vrot.slane %v1100_v4, 4  ;;  %v1106_v24 = vshll.u32 %v5806_v23, 16  ;;  %v4804_v4 = vld [vmem:[%s4875_s17 + $0x3c] sm:$0xf] }
  0xe5   : > { %v1118_v30 = vrot.slane %v1117_v8, 4  ;;  %v2971_v45 = vsel %vm2965_vm12, %v2938_v56, %v5702_v0  ;;  %v1132_v36 = vrot.slane %v1130_v14, 5  ;;  %v1093_v34 = vor.u32 %v1092_v48, %v1089_v44  ;;  %v4226_v8 = vld [vmem:[%s4875_s17 + $0x90] sm:$0xf] }
  0xe6   : > { %v1098_v37 = vrot.slane %v1096_v27, 5  ;;  %2323 = vrot.lane.b32.xlu0 %v4344_v57, %s4830_s18  ;;  %v1127_v59 = vor.u32 %v1126_v3, %v1122_v42  ;;  %v4290_v46 = vcombine.low %v4802_v20, %v4803_v28  ;;  %v3004_v11 = vsel %vm2998_vm13, %v2971_v45, %v5713_v50  ;;  %v4805_v57 = vld [vmem:[%s4875_s17 + $0x40] sm:$0xf]  ;;  %v5888_v28 = vld [vmem:[%s4875_s17 + $0x98] sm:$0x1] }
  0xe7   : > { %v5816_v58 = vpop.permute.xlu1 %2393  ;;  %v1123_v41 = vsel %vm4943_vm5, %v1118_v30, %v1122_v42  ;;  %v1094_v0 = vrot.slane %v1093_v34, 4  ;;  %v1108_v18 = vrot.slane %v1106_v24, 5  ;;  %v3035_v7 = vsel %vm3031_vm14, %v3004_v11, 0  ;;  %v5870_v30 = vld [vmem:[%s4875_s17 + $0x94] sm:$0xf] }
  0xe8   : > { %2325 = vrot.lane.b32.xlu1 %v4345_v63, %s4830_s18  ;;  %v1103_v9 = vor.u32 %v1102_v31, %v1098_v37  ;;  %v1128_v5 = vrot.slane %v1127_v59, 4  ;;  %v4201_v51 = vrot.slane %v4185_v62, 9  ;;  %v1373_v38 = vrot.slane %v5769_v13, 5  ;;  %4691 = vmatprep.mubr.msk.bf16.mxu0 %vm3073_vm15, %v3035_v7  ;;  %v5882_v62 = vld [vmem:[%s4875_s17 + $0xa4] sm:$0x1] }
  0xe9   : > { %v5829_v47 = vpop.permute.xlu0 %2391  ;;  %v1376_v22 = vrot.slane %v5795_v61, 5  ;;  %v1099_v53 = vsel %vm4943_vm5, %v1094_v0, %v1098_v37  ;;  %v4200_v26 = vrot.slane %v4184_v21, 9  ;;  %v1366_v29 = vrot.slane %v5786_v55, 5  ;;  %v5854_v61 = vld [vmem:[%s4875_s17 + $0xa0] sm:$0xf] }
  0xea   : > { %v1104_v49 = vrot.slane %v1103_v9, 4  ;;  %v1133_v35 = vsel %vm4943_vm5, %v1128_v5, %v1132_v36  ;;  %v1374_v13 = vsel %vm4899_vm2, %v4201_v51, %v1373_v38  ;;  %v1375_v25 = vrot.slane %v1373_v38, 4 }
  0xeb   : > { %v5836_v50 = vpop.permute.xlu1 %2473  ;;  %v1369_v56 = vrot.slane %v5806_v23, 5  ;;  %v4361_v52 = vcombine.low %v1123_v41, %v1133_v35  ;;  %v1367_v55 = vsel %vm4899_vm2, %v4200_v26, %v1366_v29  ;;  %v1368_v12 = vrot.slane %v1366_v29, 4 }
  0xec   : > { %v1109_v32 = vsel %vm4943_vm5, %v1104_v49, %v1108_v18  ;;  %v1377_v2 = vsel %vm4899_vm2, %v1375_v25, %v1376_v22  ;;  %v4291_v23 = vcombine.low %v4804_v4, %v4805_v57  ;;  %v3006_v44 = vsel %vm2998_vm13, %v2973_v1, %v5741_v10  ;;  %v207_v49 = vld [vmem:[%s4875_s17 + $0x90] sm:$0xf]  ;;  %v5906_v25 = vld [vmem:[%s4875_s17 + $0x94] sm:$0xf] }
  0xed   : > { %v5847_v15 = vpop.permute.xlu0 %2471  ;;  %v4360_v63 = vcombine.low %v1099_v53, %v1109_v32  ;;  %2405 = vrot.lane.b32.xlu1 %v4361_v52, %s4834_s22  ;;  %v4377_v48 = vcombine.low %v1374_v13, %v1377_v2  ;;  %v1370_v3 = vsel %vm4899_vm2, %v1368_v12, %v1369_v56  ;;  %v3036_v14 = vsel %vm3031_vm14, %v3006_v44, 0 }
  0xee   : > { %v1720_v27 = vshrl.u32 %v4228_v40, 16  ;;  %v2766_v10 = vsel %vm2751_vm6, %v4290_v46, %v5723_v54  ;;  %v4376_v1 = vcombine.low %v1367_v55, %v1370_v3  ;;  %v1723_v42 = vshll.u32 %v4228_v40, 16  ;;  %4692 = vmatmul.mubr.msk.bf16.gmra.mrb[4].mxu0 %vm3073_vm15, %v3036_v14  ;;  %v5912_v55 = vld [vmem:[%s4875_s17 + $0x98] sm:$0x1] }
  0xef   : > { %v5863_v33 = vpop.permute.xlu1 %2569  ;;  %2403 = vrot.lane.b32.xlu0 %v4360_v63, %s4834_s22  ;;  %v1733_v31 = vshrl.u32 %v5854_v61, 16  ;;  %v2769_v45 = vsel %vm2751_vm6, %v4291_v23, %v5748_v16  ;;  %v1696_v34 = vshrl.u32 %v4226_v8, 16  ;;  %v1699_v37 = vshll.u32 %v4226_v8, 16 }
  0xf0   : > { %v1722_v36 = vrot.slane %v1720_v27, 4  ;;  %v1725_v41 = vrot.slane %v1723_v42, 5  ;;  %v4393_v59 = vcombine.low %v4228_v40, %v5854_v61  ;;  %v1709_v54 = vshrl.u32 %v5870_v30, 16 }
  0xf1   : > { %v5877_v24 = vpop.permute.xlu0 %2567  ;;  %v4392_v20 = vcombine.low %v4226_v8, %v5870_v30  ;;  %2485 = vrot.lane.b32.xlu1 %v4377_v48, %s4831_s19  ;;  %v1698_v46 = vrot.slane %v1696_v34, 4  ;;  %v1701_v11 = vrot.slane %v1699_v37, 5  ;;  %v2812_v16 = vsel %vm2800_vm7, %v2769_v45, %v5771_v6 }
  0xf2   : > { %v1729_v21 = vshll.u32 %v5854_v61, 16  ;;  %v1726_v9 = vor.u32 %v1725_v41, %v1722_v36  ;;  %v1735_v18 = vrot.slane %v1733_v31, 4  ;;  %v1739_v7 = vshll.u32 %v5882_v62, 16 }
  0xf3   : > { %2483 = vrot.lane.b32.xlu0 %v4376_v1, %s4831_s19  ;;  %v1705_v5 = vshll.u32 %v5870_v30, 16  ;;  %v1702_v22 = vor.u32 %v1701_v11, %v1698_v46  ;;  %v1711_v53 = vrot.slane %v1709_v54, 4  ;;  %v1715_v6 = vshll.u32 %v5888_v28, 16 }
  0xf4   : > { %v5894_v0 = vpop.permute.xlu1 %2649  ;;  %v1731_v38 = vrot.slane %v1729_v21, 5  ;;  %v2810_v26 = vsel %vm2800_vm7, %v2766_v10, %v5762_v43  ;;  %v1727_v29 = vrot.slane %v1726_v9, 4  ;;  %v1741_v35 = vrot.slane %v1739_v7, 5  ;;  %v4264_v10 = vld [vmem:[%s4875_s17 + $0x90] sm:$0xe] }
  0xf5   : > { %v5899_v51 = vpop.permute.xlu0 %2647  ;;  %v1707_v13 = vrot.slane %v1705_v5, 5  ;;  %2581 = vrot.lane.b32.xlu1 %v4393_v59, %s4835_s23  ;;  %v1703_v40 = vrot.slane %v1702_v22, 4  ;;  %v1717_v52 = vrot.slane %v1715_v6, 5  ;;  %v2845_v32 = vsel %vm2833_vm8, %v2812_v16, %v5797_v60  ;;  %v209_v59 = vld [vmem:[%s4875_s17 + $0x9c] sm:$0xf] }
  0xf6   : > { %v1736_v56 = vor.u32 %v1735_v18, %v1731_v38  ;;  %v1732_v43 = vsel %vm4943_vm5, %v1727_v29, %v1731_v38  ;;  %v523_v63 = vshrl.u32 %v207_v49, 16  ;;  %v526_v2 = vshll.u32 %v207_v49, 16  ;;  %v210_v16 = vld [vmem:[%s4875_s17 + $0xa0] sm:$0xf]  ;;  %v228_v7 = vld [vmem:[%s4875_s17 + $0xa4] sm:$0x1] }
  0xf7   : > { %2579 = vrot.lane.b32.xlu0 %v4392_v20, %s4835_s23  ;;  %v1712_v12 = vor.u32 %v1711_v53, %v1707_v13  ;;  %v1708_v23 = vsel %vm4943_vm5, %v1703_v40, %v1707_v13  ;;  %v532_v44 = vshll.u32 %v5906_v25, 16  ;;  %v536_v60 = vshrl.u32 %v5906_v25, 16  ;;  %v4265_v29 = vld [vmem:[%s4875_s17 + $0x9c] sm:$0xe] }
  0xf8   : > { %v1737_v57 = vrot.slane %v1736_v56, 4  ;;  %v525_v3 = vrot.slane %v523_v63, 4  ;;  %v528_v14 = vrot.slane %v526_v2, 5  ;;  %v542_v27 = vshll.u32 %v5912_v55, 16  ;;  %v631_v63 = vld [vmem:[%s4875_s17 + $0x9c] sm:$0xe] }
  0xf9   : > { %v5917_v4 = vpop.permute.xlu0 %2727  ;;  %v1713_v48 = vrot.slane %v1712_v12, 4  ;;  %v2843_v42 = vsel %vm2833_vm8, %v2810_v26, %v5799_v39  ;;  %v534_v31 = vrot.slane %v532_v44, 5  ;;  %v538_v45 = vrot.slane %v536_v60, 4 }
  0xfa   : > { %v5923_v8 = vpop.permute.xlu1 %2139  ;;  %v1742_v1 = vsel %vm4943_vm5, %v1737_v57, %v1741_v35  ;;  %v529_v37 = vor.u32 %v528_v14, %v525_v3  ;;  %v544_v41 = vrot.slane %v542_v27, 5  ;;  %v4280_v46 = vrot.slane %v4264_v10, 9 }
  0xfb   : > { %v4409_v36 = vcombine.low %v1732_v43, %v1742_v1  ;;  %v1718_v34 = vsel %vm4943_vm5, %v1713_v48, %v1717_v52  ;;  %v539_v20 = vor.u32 %v538_v45, %v534_v31  ;;  %v1975_v11 = vrot.slane %v5870_v30, 5  ;;  %v630_v48 = vld [vmem:[%s4875_s17 + $0x90] sm:$0xe] }
  0xfc   : > { %v4408_v54 = vcombine.low %v1708_v23, %v1718_v34  ;;  %v530_v21 = vrot.slane %v529_v37, 4  ;;  %v774_v39 = vrot.slane %v5912_v55, 5  ;;  %v1978_v9 = vrot.slane %v5888_v28, 5 }
  0xfd   : > { %2661 = vrot.lane.b32.xlu1 %v4409_v36, %s4836_s24  ;;  %v2878_v18 = vsel %vm2866_vm9, %v2845_v32, %v5816_v58  ;;  %v540_v38 = vrot.slane %v539_v20, 4  ;;  %v1976_v30 = vsel %vm4899_vm2, %v4280_v46, %v1975_v11  ;;  %v1977_v22 = vrot.slane %v1975_v11, 4  ;;  %v5976_v20 = vld [vmem:[%s4875_s17 + $0xa8] sm:$0xf] }
  0xfe   : > { %2659 = vrot.lane.b32.xlu0 %v4408_v54, %s4836_s24  ;;  %v547_v53 = vshrl.u32 %v209_v59, 16  ;;  %v535_v28 = vsel %vm4943_vm5, %v530_v21, %v534_v31  ;;  %v550_v49 = vshll.u32 %v209_v59, 16  ;;  %v556_v26 = vshll.u32 %v210_v16, 16 }
  0xff   : > { %v5942_v5 = vpop.permute.xlu0 %2729  ;;  %v560_v58 = vshrl.u32 %v210_v16, 16  ;;  %v545_v35 = vsel %vm4943_vm5, %v540_v38, %v544_v41  ;;  %v1979_v13 = vsel %vm4899_vm2, %v1977_v22, %v1978_v9  ;;  %v566_v40 = vshll.u32 %v228_v7, 16  ;;  %v5991_v9 = vld [vmem:[%s4875_s17 + $0xac] sm:$0xf]  ;;  %v6001_v22 = vld [vmem:[%s4875_s17 + $0xa0] sm:$0xf] }
 0x100   : > { %v5947_v6 = vpop.permute.xlu1 %2141  ;;  %v549_v56 = vrot.slane %v547_v53, 4  ;;  %v4314_v52 = vcombine.low %v535_v28, %v545_v35  ;;  %v4424_v32 = vcombine.low %v1976_v30, %v1979_v13  ;;  %v552_v43 = vrot.slane %v550_v49, 5 }
 0x101   : > { %v558_v12 = vrot.slane %v556_v26, 5  ;;  %v2876_v57 = vsel %vm2866_vm9, %v2843_v42, %v5829_v47  ;;  %v562_v23 = vrot.slane %v560_v58, 4  ;;  %v568_v44 = vrot.slane %v566_v40, 5 }
 0x102   : > { %v4281_v60 = vrot.slane %v4265_v29, 9  ;;  %2151 = vrot.lane.b32.xlu1 %v4314_v52, %s4833_s21  ;;  %2739 = vrot.lane.b32.xlu0 %v4424_v32, %s4837_s25  ;;  %v553_v14 = vor.u32 %v552_v43, %v549_v56  ;;  %v781_v27 = vrot.slane %v228_v7, 5  ;;  %v1982_v10 = vrot.slane %v5854_v61, 5  ;;  %v6018_v32 = vld [vmem:[%s4875_s17 + $0xb0] sm:$0x1] }
 0x103   : > { %v5957_v2 = vpop.permute.xlu0 %2219  ;;  %v1985_v1 = vrot.slane %v5882_v62, 5  ;;  %v563_v31 = vor.u32 %v562_v23, %v558_v12  ;;  %v2911_v47 = vsel %vm2899_vm10, %v2878_v18, %v5836_v50  ;;  %v4123_v42 = vrot.slane %v631_v63, 9  ;;  %v6023_v23 = vld [vmem:[%s4875_s17 + $0xa4] sm:$0x1] }
 0x104   : > { %v5962_v3 = vpop.permute.xlu1 %2221  ;;  %v778_v45 = vrot.slane %v210_v16, 5  ;;  %v554_v36 = vrot.slane %v553_v14, 4  ;;  %v1983_v34 = vsel %vm4899_vm2, %v4281_v60, %v1982_v10  ;;  %v1984_v37 = vrot.slane %v1982_v10, 4 }
 0x105   : > { %v4122_v41 = vrot.slane %v630_v48, 9  ;;  %v564_v59 = vrot.slane %v563_v31, 4  ;;  %v2909_v61 = vsel %vm2899_vm10, %v2876_v57, %v5847_v15  ;;  %v771_v54 = vrot.slane %v5906_v25, 5  ;;  %v4150_v25 = vld [vmem:[%s4875_s17 + $0x9c] sm:$0xf] }
 0x106   : > { %v780_v62 = vrot.slane %v778_v45, 4  ;;  %v559_v11 = vsel %vm4943_vm5, %v554_v36, %v558_v12  ;;  %v1986_v16 = vsel %vm4899_vm2, %v1984_v37, %v1985_v1  ;;  %v779_v21 = vsel %vm4899_vm2, %v4123_v42, %v778_v45 }
 0x107   : > { %v5980_v46 = vpop.permute.xlu0 %2315  ;;  %v2944_v15 = vsel %vm6837_vm11, %v2911_v47, %v5863_v33  ;;  %v569_v18 = vsel %vm4943_vm5, %v564_v59, %v568_v44  ;;  %v4425_v7 = vcombine.low %v1983_v34, %v1986_v16  ;;  %v2942_v30 = vsel %vm6837_vm11, %v2909_v61, %v5877_v24  ;;  %v4187_v59 = vld [vmem:[%s4875_s17 + $0xa8] sm:$0xe] }
 0x108   : > { %v5978_v50 = vpop.permute.xlu1 %2317  ;;  %v782_v38 = vsel %vm4899_vm2, %v780_v62, %v781_v27  ;;  %v4315_v53 = vcombine.low %v559_v11, %v569_v18  ;;  %v772_v33 = vsel %vm4899_vm2, %v4122_v41, %v771_v54  ;;  %v773_v28 = vrot.slane %v771_v54, 4  ;;  %v4807_v11 = vld [vmem:[%s4875_s17 + $0x4c] sm:$0xf] }
 0x109   : > { %v1159_v49 = vshrl.u32 %v5976_v20, 16  ;;  %2741 = vrot.lane.b32.xlu0 %v4425_v7, %s4837_s25  ;;  %v4331_v26 = vcombine.low %v779_v21, %v782_v38  ;;  %v1162_v58 = vshll.u32 %v5976_v20, 16  ;;  %v1172_v29 = vshrl.u32 %v5991_v9, 16 }
 0x10a   : > { %v1135_v35 = vshrl.u32 %v4150_v25, 16  ;;  %2153 = vrot.lane.b32.xlu1 %v4315_v53, %s4833_s21  ;;  %v775_v13 = vsel %vm4899_vm2, %v773_v28, %v774_v39  ;;  %v1138_v40 = vshll.u32 %v4150_v25, 16  ;;  %v1148_v52 = vshrl.u32 %v6001_v22, 16 }
 0x10b   : > { %v1161_v56 = vrot.slane %v1159_v49, 4  ;;  %v4330_v43 = vcombine.low %v772_v33, %v775_v13  ;;  %v1164_v12 = vrot.slane %v1162_v58, 5  ;;  %v4347_v63 = vcombine.low %v5976_v20, %v5991_v9  ;;  %v4806_v20 = vld [vmem:[%s4875_s17 + $0x48] sm:$0xf] }
 0x10c   : > { %v6009_v24 = vpop.permute.xlu1 %2397  ;;  %v1137_v57 = vrot.slane %v1135_v35, 4  ;;  %v1140_v55 = vrot.slane %v1138_v40, 5  ;;  %v4346_v60 = vcombine.low %v4150_v25, %v6001_v22  ;;  %v2977_v39 = vsel %vm2965_vm12, %v2944_v15, %v5894_v0  ;;  %v4186_v15 = vld [vmem:[%s4875_s17 + $0x9c] sm:$0xe]  ;;  %v4232_v40 = vld [vmem:[%s4875_s17 + $0xb4] sm:$0xf] }
 0x10d   : > { %v1168_v48 = vshll.u32 %v5991_v9, 16  ;;  %2231 = vrot.lane.b32.xlu0 %v4330_v43, %s4832_s20  ;;  %v1165_v14 = vor.u32 %v1164_v12, %v1161_v56  ;;  %v1174_v27 = vrot.slane %v1172_v29, 4  ;;  %v1178_v10 = vshll.u32 %v6018_v32, 16  ;;  %v6074_v12 = vld [vmem:[%s4875_s17 + $0xb8] sm:$0xf] }
 0x10e   : > { %v6025_v44 = vpop.permute.xlu0 %2395  ;;  %v1144_v1 = vshll.u32 %v6001_v22, 16  ;;  %2233 = vrot.lane.b32.xlu1 %v4331_v26, %s4832_s20  ;;  %v1141_v0 = vor.u32 %v1140_v55, %v1137_v57  ;;  %v1150_v42 = vrot.slane %v1148_v52, 4  ;;  %v1154_v45 = vshll.u32 %v6023_v23, 16  ;;  %v4808_v55 = vld [vmem:[%s4875_s17 + $0x54] sm:$0xf] }
 0x10f   : > { %v1170_v47 = vrot.slane %v1168_v48, 5  ;;  %v2975_v36 = vsel %vm2965_vm12, %v2942_v30, %v5899_v51  ;;  %v1166_v34 = vrot.slane %v1165_v14, 4  ;;  %v1180_v37 = vrot.slane %v1178_v10, 5  ;;  %v4230_v14 = vld [vmem:[%s4875_s17 + $0xa8] sm:$0xf] }
 0x110   : > { %v6034_v31 = vpop.permute.xlu1 %2477  ;;  %v1146_v41 = vrot.slane %v1144_v1, 5  ;;  %v1142_v54 = vrot.slane %v1141_v0, 4  ;;  %v4292_v16 = vcombine.low %v4806_v20, %v4807_v11  ;;  %v3008_v21 = vsel %vm2998_vm13, %v2975_v36, %v5917_v4  ;;  %v6088_v0 = vld [vmem:[%s4875_s17 + $0xac] sm:$0xf] }
 0x111   : > { %v1175_v62 = vor.u32 %v1174_v27, %v1170_v47  ;;  %2327 = vrot.lane.b32.xlu0 %v4346_v60, %s4830_s18  ;;  %v1171_v51 = vsel %vm4943_vm5, %v1166_v34, %v1170_v47  ;;  %v1156_v18 = vrot.slane %v1154_v45, 5  ;;  %v3037_v7 = vsel %vm3031_vm14, %v3008_v21, 0  ;;  %v4809_v60 = vld [vmem:[%s4875_s17 + $0x58] sm:$0xf]  ;;  %v6108_v21 = vld [vmem:[%s4875_s17 + $0xb0] sm:$0x1] }
 0x112   : > { %v6041_v61 = vpop.permute.xlu0 %2475  ;;  %v1151_v25 = vor.u32 %v1150_v42, %v1146_v41  ;;  %2329 = vrot.lane.b32.xlu1 %v4347_v63, %s4830_s18  ;;  %v1147_v30 = vsel %vm4943_vm5, %v1142_v54, %v1146_v41  ;;  %v4203_v53 = vrot.slane %v4187_v59, 9  ;;  %v1387_v4 = vrot.slane %v5991_v9, 5  ;;  %4695 = vmatprep.mubr.msk.bf16.mxu0 %vm3073_vm15, %v3037_v7 }
 0x113   : > { %v1176_v38 = vrot.slane %v1175_v62, 4  ;;  %v1390_v28 = vrot.slane %v6018_v32, 5  ;;  %v4202_v49 = vrot.slane %v4186_v15, 9  ;;  %v1380_v26 = vrot.slane %v6001_v22, 5  ;;  %v6100_v62 = vld [vmem:[%s4875_s17 + $0xbc] sm:$0x1] }
 0x114   : > { %v1152_v33 = vrot.slane %v1151_v25, 4  ;;  %v6059_v58 = vpop.permute.xlu1 %2573  ;;  %v1388_v9 = vsel %vm4899_vm2, %v4203_v53, %v1387_v4  ;;  %v1389_v13 = vrot.slane %v1387_v4, 4  ;;  %v1383_v56 = vrot.slane %v6023_v23, 5 }
 0x115   : > { %v1181_v35 = vsel %vm4943_vm5, %v1176_v38, %v1180_v37  ;;  %v1381_v32 = vsel %vm4899_vm2, %v4202_v49, %v1380_v26  ;;  %v1382_v43 = vrot.slane %v1380_v26, 4  ;;  %v4293_v48 = vcombine.low %v4808_v55, %v4809_v60  ;;  %v6119_v49 = vld [vmem:[%s4875_s17 + $0xa8] sm:$0xf] }
 0x116   : > { %v6061_v29 = vpop.permute.xlu0 %2571  ;;  %v4363_v52 = vcombine.low %v1171_v51, %v1181_v35  ;;  %v1157_v22 = vsel %vm4943_vm5, %v1152_v33, %v1156_v18  ;;  %v1391_v57 = vsel %vm4899_vm2, %v1389_v13, %v1390_v28  ;;  %v3010_v23 = vsel %vm2998_vm13, %v2977_v39, %v5942_v5  ;;  %v6124_v13 = vld [vmem:[%s4875_s17 + $0xac] sm:$0xf] }
 0x117   : > { %v4362_v63 = vcombine.low %v1147_v30, %v1157_v22  ;;  %v4379_v27 = vcombine.low %v1388_v9, %v1391_v57  ;;  %v1384_v10 = vsel %vm4899_vm2, %v1382_v43, %v1383_v56  ;;  %v3038_v1 = vsel %vm3031_vm14, %v3010_v23, 0  ;;  %v6132_v43 = vld [vmem:[%s4875_s17 + $0xb0] sm:$0x1] }
 0x118   : > { %2409 = vrot.lane.b32.xlu1 %v4363_v52, %s4834_s22  ;;  %v1768_v47 = vshrl.u32 %v4232_v40, 16  ;;  %v2772_v42 = vsel %vm2751_vm6, %v4292_v16, %v5923_v8  ;;  %v4378_v5 = vcombine.low %v1381_v32, %v1384_v10  ;;  %v1771_v39 = vshll.u32 %v4232_v40, 16  ;;  %4696 = vmatmul.mubr.msk.bf16.gmra.mrb[8].mxu0 %vm3073_vm15, %v3038_v1 }
 0x119   : > { %2407 = vrot.lane.b32.xlu0 %v4362_v63, %s4834_s22  ;;  %v1781_v45 = vshrl.u32 %v6074_v12, 16  ;;  %v2775_v34 = vsel %vm2751_vm6, %v4293_v48, %v5947_v6  ;;  %v1744_v41 = vshrl.u32 %v4230_v14, 16  ;;  %v1747_v59 = vshll.u32 %v4230_v14, 16  ;;  %v6102_v54 = vpop.permute.xlu1 %2653  ;;  %v4266_v48 = vld [vmem:[%s4875_s17 + $0xa8] sm:$0xe] }
 0x11a   : > { %v6095_v36 = vpop.permute.xlu0 %2651  ;;  %v1770_v37 = vrot.slane %v1768_v47, 4  ;;  %v1773_v8 = vrot.slane %v1771_v39, 5  ;;  %v4395_v20 = vcombine.low %v4232_v40, %v6074_v12  ;;  %v1757_v11 = vshrl.u32 %v6088_v0, 16 }
 0x11b   : > { %v4394_v16 = vcombine.low %v4230_v14, %v6088_v0  ;;  %v1746_v6 = vrot.slane %v1744_v41, 4  ;;  %v1749_v15 = vrot.slane %v1747_v59, 5  ;;  %v2816_v51 = vsel %vm2800_vm7, %v2775_v34, %v5962_v3 }
 0x11c   : > { %2489 = vrot.lane.b32.xlu1 %v4379_v27, %s4831_s19  ;;  %v1777_v25 = vshll.u32 %v6074_v12, 16  ;;  %v1774_v18 = vor.u32 %v1773_v8, %v1770_v37  ;;  %v1783_v7 = vrot.slane %v1781_v45, 4  ;;  %v1787_v38 = vshll.u32 %v6100_v62, 16  ;;  %v6150_v37 = vld [vmem:[%s4875_s17 + $0xb4] sm:$0xf] }
 0x11d   : > { %2487 = vrot.lane.b32.xlu0 %v4378_v5, %s4831_s19  ;;  %v1753_v30 = vshll.u32 %v6088_v0, 16  ;;  %v1750_v4 = vor.u32 %v1749_v15, %v1746_v6  ;;  %v1759_v33 = vrot.slane %v1757_v11, 4  ;;  %v1763_v28 = vshll.u32 %v6108_v21, 16 }
 0x11e   : > { %v1779_v53 = vrot.slane %v1777_v25, 5  ;;  %v2814_v3 = vsel %vm2800_vm7, %v2772_v42, %v5957_v2  ;;  %v1775_v26 = vrot.slane %v1774_v18, 4  ;;  %v1789_v35 = vrot.slane %v1787_v38, 5  ;;  %v6159_v25 = vld [vmem:[%s4875_s17 + $0xb8] sm:$0xf] }
 0x11f   : > { %v1755_v9 = vrot.slane %v1753_v30, 5  ;;  %v1751_v52 = vrot.slane %v1750_v4, 4  ;;  %v1765_v22 = vrot.slane %v1763_v28, 5  ;;  %v2849_v32 = vsel %vm2833_vm8, %v2816_v51, %v5978_v50  ;;  %v6134_v63 = vpop.permute.xlu1 %2143 }
 0x120   : > { %v6126_v56 = vpop.permute.xlu0 %2731  ;;  %2585 = vrot.lane.b32.xlu1 %v4395_v20, %s4835_s23  ;;  %v1784_v40 = vor.u32 %v1783_v7, %v1779_v53  ;;  %v1780_v2 = vsel %vm4943_vm5, %v1775_v26, %v1779_v53  ;;  %v571_v55 = vshrl.u32 %v6119_v49, 16  ;;  %v574_v60 = vshll.u32 %v6119_v49, 16  ;;  %v230_v53 = vld [vmem:[%s4875_s17 + $0xbc] sm:$0x1] }
 0x121   : > { %2583 = vrot.lane.b32.xlu0 %v4394_v16, %s4835_s23  ;;  %v1760_v57 = vor.u32 %v1759_v33, %v1755_v9  ;;  %v1756_v50 = vsel %vm4943_vm5, %v1751_v52, %v1755_v9  ;;  %v580_v14 = vshll.u32 %v6124_v13, 16  ;;  %v584_v27 = vshrl.u32 %v6124_v13, 16 }
 0x122   : > { %v1785_v23 = vrot.slane %v1784_v40, 4  ;;  %v573_v1 = vrot.slane %v571_v55, 4  ;;  %v576_v47 = vrot.slane %v574_v60, 5  ;;  %v590_v42 = vshll.u32 %v6132_v43, 16 }
 0x123   : > { %v1761_v10 = vrot.slane %v1760_v57, 4  ;;  %v582_v39 = vrot.slane %v580_v14, 5  ;;  %v586_v45 = vrot.slane %v584_v27, 4  ;;  %v4282_v34 = vrot.slane %v4266_v48, 9  ;;  %v633_v48 = vld [vmem:[%s4875_s17 + $0xb4] sm:$0xe] }
 0x124   : > { %v1790_v5 = vsel %vm4943_vm5, %v1785_v23, %v1789_v35  ;;  %v577_v8 = vor.u32 %v576_v47, %v573_v1  ;;  %v592_v20 = vrot.slane %v590_v42, 5  ;;  %v1989_v15 = vrot.slane %v6088_v0, 5  ;;  %v4267_v35 = vld [vmem:[%s4875_s17 + $0xb4] sm:$0xe]  ;;  %v632_v1 = vld [vmem:[%s4875_s17 + $0xa8] sm:$0xe] }
 0x125   : > { %v4411_v41 = vcombine.low %v1780_v2, %v1790_v5  ;;  %v1766_v59 = vsel %vm4943_vm5, %v1761_v10, %v1765_v22  ;;  %v6154_v11 = vpop.permute.xlu0 %2733  ;;  %v587_v6 = vor.u32 %v586_v45, %v582_v39  ;;  %v1992_v51 = vrot.slane %v6108_v21, 5 }
 0x126   : > { %v4410_v16 = vcombine.low %v1756_v50, %v1766_v59  ;;  %v2847_v7 = vsel %vm2833_vm8, %v2814_v3, %v5980_v46  ;;  %v578_v38 = vrot.slane %v577_v8, 4  ;;  %v2882_v30 = vsel %vm2866_vm9, %v2849_v32, %v6009_v24 }
 0x127   : > { %2665 = vrot.lane.b32.xlu1 %v4411_v41, %s4836_s24  ;;  %v595_v4 = vshrl.u32 %v6150_v37, 16  ;;  %v588_v0 = vrot.slane %v587_v6, 4  ;;  %v1990_v21 = vsel %vm4899_vm2, %v4282_v34, %v1989_v15  ;;  %v1991_v33 = vrot.slane %v1989_v15, 4  ;;  %v6207_v15 = vld [vmem:[%s4875_s17 + $0xc0] sm:$0xf] }
 0x128   : > { %v6161_v18 = vpop.permute.xlu1 %2145  ;;  %2663 = vrot.lane.b32.xlu0 %v4410_v16, %s4836_s24  ;;  %v598_v28 = vshll.u32 %v6150_v37, 16  ;;  %v583_v46 = vsel %vm4943_vm5, %v578_v38, %v582_v39  ;;  %v604_v26 = vshll.u32 %v6159_v25, 16  ;;  %v608_v24 = vshrl.u32 %v6159_v25, 16 }
 0x129   : > { %v597_v3 = vrot.slane %v595_v4, 4  ;;  %v593_v9 = vsel %vm4943_vm5, %v588_v0, %v592_v20  ;;  %v1993_v40 = vsel %vm4899_vm2, %v1991_v33, %v1992_v51  ;;  %v614_v22 = vshll.u32 %v230_v53, 16  ;;  %v6216_v4 = vld [vmem:[%s4875_s17 + $0xc4] sm:$0xf] }
 0x12a   : > { %v600_v52 = vrot.slane %v598_v28, 5  ;;  %v4316_v2 = vcombine.low %v583_v46, %v593_v9  ;;  %v4426_v57 = vcombine.low %v1990_v21, %v1993_v40  ;;  %v606_v55 = vrot.slane %v604_v26, 5  ;;  %v6186_v23 = vpop.permute.xlu0 %2223  ;;  %v4154_v46 = vld [vmem:[%s4875_s17 + $0xb4] sm:$0xf] }
 0x12b   : > { %v610_v60 = vrot.slane %v608_v24, 4  ;;  %v2880_v50 = vsel %vm2866_vm9, %v2847_v7, %v6025_v44  ;;  %v4283_v27 = vrot.slane %v4267_v35, 9  ;;  %v1996_v10 = vrot.slane %v6074_v12, 5 }
 0x12c   : > { %v6183_v32 = vpop.permute.xlu1 %2225  ;;  %v601_v14 = vor.u32 %v600_v52, %v597_v3  ;;  %2155 = vrot.lane.b32.xlu1 %v4316_v2, %s4833_s21  ;;  %2743 = vrot.lane.b32.xlu0 %v4426_v57, %s4837_s25  ;;  %v616_v42 = vrot.slane %v614_v22, 5  ;;  %v1999_v5 = vrot.slane %v6100_v62, 5  ;;  %v2915_v39 = vsel %vm2899_vm10, %v2882_v30, %v6034_v31 }
 0x12d   : > { %v611_v47 = vor.u32 %v610_v60, %v606_v55  ;;  %v1997_v44 = vsel %vm4899_vm2, %v4283_v27, %v1996_v10  ;;  %v1998_v34 = vrot.slane %v1996_v10, 4  ;;  %v4125_v12 = vrot.slane %v633_v48, 9  ;;  %v6242_v60 = vld [vmem:[%s4875_s17 + $0xc8] sm:$0x1]  ;;  %v6249_v10 = vld [vmem:[%s4875_s17 + $0xbc] sm:$0x1] }
 0x12e   : > { %v602_v45 = vrot.slane %v601_v14, 4  ;;  %v792_v59 = vrot.slane %v6159_v25, 5  ;;  %v795_v8 = vrot.slane %v230_v53, 5  ;;  %v4124_v20 = vrot.slane %v632_v1, 9  ;;  %v6218_v0 = vpop.permute.xlu0 %2319 }
 0x12f   : > { %v612_v41 = vrot.slane %v611_v47, 4  ;;  %v2000_v62 = vsel %vm4899_vm2, %v1998_v34, %v1999_v5  ;;  %v785_v31 = vrot.slane %v6124_v13, 5  ;;  %v788_v6 = vrot.slane %v6132_v43, 5 }
 0x130   : > { %v607_v16 = vsel %vm4943_vm5, %v602_v45, %v606_v55  ;;  %v6209_v51 = vpop.permute.xlu1 %2321  ;;  %v4427_v38 = vcombine.low %v1997_v44, %v2000_v62  ;;  %v793_v30 = vsel %vm4899_vm2, %v4125_v12, %v792_v59  ;;  %v794_v53 = vrot.slane %v792_v59, 4 }
 0x131   : > { %v617_v7 = vsel %vm4943_vm5, %v612_v41, %v616_v42  ;;  %v2913_v43 = vsel %vm2899_vm10, %v2880_v50, %v6041_v61  ;;  %v786_v33 = vsel %vm4899_vm2, %v4124_v20, %v785_v31  ;;  %v787_v28 = vrot.slane %v785_v31, 4  ;;  %v6233_v61 = vld [vmem:[%s4875_s17 + $0xb8] sm:$0xf] }
 0x132   : > { %v4317_v21 = vcombine.low %v607_v16, %v617_v7  ;;  %2745 = vrot.lane.b32.xlu0 %v4427_v38, %s4837_s25  ;;  %v796_v3 = vsel %vm4899_vm2, %v794_v53, %v795_v8  ;;  %v2948_v26 = vsel %vm6837_vm11, %v2915_v39, %v6059_v58  ;;  %v1207_v24 = vshrl.u32 %v6207_v15, 16  ;;  %v4811_v53 = vld [vmem:[%s4875_s17 + $0x64] sm:$0xf] }
 0x133   : > { %v1210_v35 = vshll.u32 %v6207_v15, 16  ;;  %v4333_v9 = vcombine.low %v793_v30, %v796_v3  ;;  %v789_v40 = vsel %vm4899_vm2, %v787_v28, %v788_v6  ;;  %v2946_v52 = vsel %vm6837_vm11, %v2913_v43, %v6061_v29  ;;  %v4189_v6 = vld [vmem:[%s4875_s17 + $0xc0] sm:$0xe] }
 0x134   : > { %2157 = vrot.lane.b32.xlu1 %v4317_v21, %s4833_s21  ;;  %v1220_v22 = vshrl.u32 %v6216_v4, 16  ;;  %v4332_v2 = vcombine.low %v786_v33, %v789_v40  ;;  %v1209_v58 = vrot.slane %v1207_v24, 4  ;;  %v1183_v55 = vshrl.u32 %v4154_v46, 16  ;;  %v4810_v30 = vld [vmem:[%s4875_s17 + $0x60] sm:$0xf] }
 0x135   : > { %v1212_v57 = vrot.slane %v1210_v35, 5  ;;  %v4349_v48 = vcombine.low %v6207_v15, %v6216_v4  ;;  %v1186_v50 = vshll.u32 %v4154_v46, 16  ;;  %v1196_v14 = vshrl.u32 %v6233_v61, 16  ;;  %v4188_v33 = vld [vmem:[%s4875_s17 + $0xb4] sm:$0xe] }
 0x136   : > { %v4348_v27 = vcombine.low %v4154_v46, %v6233_v61  ;;  %v6251_v1 = vpop.permute.xlu1 %2401  ;;  %2235 = vrot.lane.b32.xlu0 %v4332_v2, %s4832_s20  ;;  %v1185_v29 = vrot.slane %v1183_v55, 4  ;;  %v2981_v47 = vsel %vm2965_vm12, %v2948_v26, %v6102_v54  ;;  %v1216_v5 = vshll.u32 %v6216_v4, 16 }
 0x137   : > { %v1213_v42 = vor.u32 %v1212_v57, %v1209_v58  ;;  %v6257_v39 = vpop.permute.xlu0 %2399  ;;  %v1188_v45 = vrot.slane %v1186_v50, 5  ;;  %v1222_v44 = vrot.slane %v1220_v22, 4  ;;  %v1226_v34 = vshll.u32 %v6242_v60, 16 }
 0x138   : > { %2237 = vrot.lane.b32.xlu1 %v4333_v9, %s4832_s20  ;;  %v1192_v12 = vshll.u32 %v6233_v61, 16  ;;  %v1218_v59 = vrot.slane %v1216_v5, 5  ;;  %v1198_v54 = vrot.slane %v1196_v14, 4  ;;  %v1202_v8 = vshll.u32 %v6249_v10, 16 }
 0x139   : > { %v1214_v41 = vrot.slane %v1213_v42, 4  ;;  %v2979_v20 = vsel %vm2965_vm12, %v2946_v52, %v6095_v36  ;;  %v1228_v16 = vrot.slane %v1226_v34, 5  ;;  %v1189_v62 = vor.u32 %v1188_v45, %v1185_v29  ;;  %v4812_v45 = vld [vmem:[%s4875_s17 + $0x6c] sm:$0xf] }
 0x13a   : > { %v1194_v31 = vrot.slane %v1192_v12, 5  ;;  %v6266_v15 = vpop.permute.xlu1 %2481  ;;  %2331 = vrot.lane.b32.xlu0 %v4348_v27, %s4830_s18  ;;  %v1223_v38 = vor.u32 %v1222_v44, %v1218_v59  ;;  %v4294_v21 = vcombine.low %v4810_v30, %v4811_v53  ;;  %v3012_v43 = vsel %vm2998_vm13, %v2979_v20, %v6126_v56  ;;  %v6297_v27 = vld [vmem:[%s4875_s17 + $0xd0] sm:$0xf]  ;;  %v4253_v30 = vld [vmem:[%s4875_s17 + $0xd4] sm:$0x1] }
 0x13b   : > { %v1219_v7 = vsel %vm4943_vm5, %v1214_v41, %v1218_v59  ;;  %v6276_v36 = vpop.permute.xlu0 %2479  ;;  %v1190_v28 = vrot.slane %v1189_v62, 4  ;;  %v1204_v3 = vrot.slane %v1202_v8, 5  ;;  %v3039_v26 = vsel %vm3031_vm14, %v3012_v43, 0  ;;  %v4813_v44 = vld [vmem:[%s4875_s17 + $0x70] sm:$0xf] }
 0x13c   : > { %2333 = vrot.lane.b32.xlu1 %v4349_v48, %s4830_s18  ;;  %v1199_v46 = vor.u32 %v1198_v54, %v1194_v31  ;;  %v1224_v24 = vrot.slane %v1223_v38, 4  ;;  %v4205_v35 = vrot.slane %v4189_v6, 9  ;;  %v1401_v9 = vrot.slane %v6216_v4, 5  ;;  %4699 = vmatprep.mubr.msk.bf16.mxu0 %vm3073_vm15, %v3039_v26  ;;  %v4234_v41 = vld [vmem:[%s4875_s17 + $0xc0] sm:$0xf] }
 0x13d   : > { %v1404_v40 = vrot.slane %v6242_v60, 5  ;;  %v1195_v56 = vsel %vm4943_vm5, %v1190_v28, %v1194_v31  ;;  %v4204_v22 = vrot.slane %v4188_v33, 9  ;;  %v1394_v2 = vrot.slane %v6233_v61, 5  ;;  %v4236_v60 = vld [vmem:[%s4875_s17 + $0xcc] sm:$0xf] }
 0x13e   : > { %v1200_v52 = vrot.slane %v1199_v46, 4  ;;  %v1229_v58 = vsel %vm4943_vm5, %v1224_v24, %v1228_v16  ;;  %v1402_v4 = vsel %vm4899_vm2, %v4205_v35, %v1401_v9  ;;  %v1403_v57 = vrot.slane %v1401_v9, 4  ;;  %v6299_v29 = vpop.permute.xlu1 %2577  ;;  %v6315_v16 = vld [vmem:[%s4875_s17 + $0xc4] sm:$0xf]  ;;  %v6328_v46 = vld [vmem:[%s4875_s17 + $0xc8] sm:$0x1] }
 0x13f   : > { %v1397_v55 = vrot.slane %v6249_v10, 5  ;;  %v4365_v48 = vcombine.low %v1219_v7, %v1229_v58  ;;  %v1395_v14 = vsel %vm4899_vm2, %v4204_v22, %v1394_v2  ;;  %v1396_v61 = vrot.slane %v1394_v2, 4  ;;  %v6301_v42 = vpop.permute.xlu0 %2575 }
 0x140   : > { %v1205_v50 = vsel %vm4943_vm5, %v1200_v52, %v1204_v3  ;;  %v1405_v10 = vsel %vm4899_vm2, %v1403_v57, %v1404_v40  ;;  %v4295_v34 = vcombine.low %v4812_v45, %v4813_v44  ;;  %v3014_v12 = vsel %vm2998_vm13, %v2981_v47, %v6154_v11 }
 0x141   : > { %v4364_v5 = vcombine.low %v1195_v56, %v1205_v50  ;;  %2413 = vrot.lane.b32.xlu1 %v4365_v48, %s4834_s22  ;;  %v4381_v59 = vcombine.low %v1402_v4, %v1405_v10  ;;  %v1398_v54 = vsel %vm4899_vm2, %v1396_v61, %v1397_v55  ;;  %v3040_v8 = vsel %vm3031_vm14, %v3014_v12, 0  ;;  %v4269_v4 = vld [vmem:[%s4875_s17 + $0xcc] sm:$0xe]  ;;  %v4268_v50 = vld [vmem:[%s4875_s17 + $0xc0] sm:$0xe] }
 0x142   : > { %v1816_v20 = vshrl.u32 %v4236_v60, 16  ;;  %v4380_v62 = vcombine.low %v1395_v14, %v1398_v54  ;;  %v1819_v31 = vshll.u32 %v4236_v60, 16  ;;  %v1829_v11 = vshrl.u32 %v6297_v27, 16  ;;  %4700 = vmatmul.mubr.msk.bf16.gmra.mrb[12].mxu0 %vm3073_vm15, %v3040_v8 }
 0x143   : > { %2411 = vrot.lane.b32.xlu0 %v4364_v5, %s4834_s22  ;;  %v2778_v47 = vsel %vm2751_vm6, %v4294_v21, %v6134_v63  ;;  %v1792_v7 = vshrl.u32 %v4234_v41, 16  ;;  %v1795_v38 = vshll.u32 %v4234_v41, 16  ;;  %v2781_v53 = vsel %vm2751_vm6, %v4295_v34, %v6161_v18 }
 0x144   : > { %v1818_v6 = vrot.slane %v1816_v20, 4  ;;  %v1821_v43 = vrot.slane %v1819_v31, 5  ;;  %v4397_v33 = vcombine.low %v4236_v60, %v6297_v27  ;;  %v1805_v28 = vshrl.u32 %v6315_v16, 16 }
 0x145   : > { %2493 = vrot.lane.b32.xlu1 %v4381_v59, %s4831_s19  ;;  %v1794_v3 = vrot.slane %v1792_v7, 4  ;;  %v1797_v26 = vrot.slane %v1795_v38, 5  ;;  %v4396_v63 = vcombine.low %v4234_v41, %v6315_v16  ;;  %v1825_v21 = vshll.u32 %v6297_v27, 16  ;;  %v2658_v24 = vpop.permute.xlu1 %2657 }
 0x146   : > { %v2656_v35 = vpop.permute.xlu0 %2655  ;;  %v1822_v18 = vor.u32 %v1821_v43, %v1818_v6  ;;  %v1831_v9 = vrot.slane %v1829_v11, 4  ;;  %v1835_v40 = vshll.u32 %v4253_v30, 16  ;;  %v1801_v56 = vshll.u32 %v6315_v16, 16 }
 0x147   : > { %2491 = vrot.lane.b32.xlu0 %v4380_v62, %s4831_s19  ;;  %v1827_v52 = vrot.slane %v1825_v21, 5  ;;  %v1798_v22 = vor.u32 %v1797_v26, %v1794_v3  ;;  %v1807_v2 = vrot.slane %v1805_v28, 4  ;;  %v1811_v58 = vshll.u32 %v6328_v46, 16 }
 0x148   : > { %v2820_v57 = vsel %vm2800_vm7, %v2781_v53, %v6183_v32  ;;  %v2818_v55 = vsel %vm2800_vm7, %v2778_v47, %v6186_v23  ;;  %v1823_v60 = vrot.slane %v1822_v18, 4  ;;  %v1803_v48 = vrot.slane %v1801_v56, 5  ;;  %v4454_v18 = vld [vmem:[%s6376_s7 + $0x18] sm:$0x1]  ;;  %v4486_v56 = vld [vmem:[%s6376_s7 + $0x20] sm:$0x1] }
 0x149   : > { %2589 = vrot.lane.b32.xlu1 %v4397_v33, %s4835_s23  ;;  %v1832_v14 = vor.u32 %v1831_v9, %v1827_v52  ;;  %v1837_v61 = vrot.slane %v1835_v40, 5  ;;  %v1799_v5 = vrot.slane %v1798_v22, 4  ;;  %v2853_v10 = vsel %vm2833_vm8, %v2820_v57, %v6209_v51  ;;  %v4452_v9 = vld [vmem:[%s6376_s7 + $0xc] sm:$0x1]  ;;  %v4456_v22 = vld [vmem:[%s6376_s7 + $0x24] sm:$0x1] }
 0x14a   : > { %v1808_v45 = vor.u32 %v1807_v2, %v1803_v48  ;;  %v1813_v44 = vrot.slane %v1811_v58, 5  ;;  %v4285_v34 = vrot.slane %v4269_v4, 9  ;;  %v2010_v32 = vrot.slane %v6297_v27, 5  ;;  %v2736_v12 = vpop.permute.xlu0 %2735  ;;  %v6349_v8 = vpop.permute.xlu1 %2147  ;;  %v4490_v4 = vld [vmem:[%s6376_s7 + $0x38] sm:$0x1] }
 0x14b   : > { %2587 = vrot.lane.b32.xlu0 %v4396_v63, %s4835_s23  ;;  %v1828_v23 = vsel %vm4943_vm5, %v1823_v60, %v1827_v52  ;;  %v1833_v41 = vrot.slane %v1832_v14, 4  ;;  %v2013_v59 = vrot.slane %v4253_v30, 5  ;;  %v4284_v54 = vrot.slane %v4268_v50, 9  ;;  %v4458_v52 = vld [vmem:[%s6376_s7 + $0x30] sm:$0x1] }
 0x14c   : > { %v1804_v20 = vsel %vm4943_vm5, %v1799_v5, %v1803_v48  ;;  %v1809_v51 = vrot.slane %v1808_v45, 4  ;;  %v2012_v62 = vrot.slane %v2010_v32, 4  ;;  %v2003_v31 = vrot.slane %v6315_v16, 5 }
 0x14d   : > { %v1838_v27 = vsel %vm4943_vm5, %v1833_v41, %v1837_v61  ;;  %v2851_v11 = vsel %vm2833_vm8, %v2818_v55, %v6218_v0  ;;  %v2011_v47 = vsel %vm4899_vm2, %v4285_v34, %v2010_v32  ;;  %v2006_v6 = vrot.slane %v6328_v46, 5  ;;  %v4488_v55 = vld [vmem:[%s6376_s7 + $0x2c] sm:$0x1] }
 0x14e   : > { %v4413_v7 = vcombine.low %v1828_v23, %v1838_v27  ;;  %v1814_v38 = vsel %vm4943_vm5, %v1809_v51, %v1813_v44  ;;  %v2014_v30 = vsel %vm4899_vm2, %v2012_v62, %v2013_v59  ;;  %v2886_v16 = vsel %vm2866_vm9, %v2853_v10, %v6251_v1  ;;  %v4814_v51 = vld [vmem:[%s4875_s17 + $0x78] sm:$0xf]  ;;  %v4815_v62 = vld [vmem:[%s4875_s17 + $0x7c] sm:$0xf] }
 0x14f   : > { %v4412_v53 = vcombine.low %v1804_v20, %v1814_v38  ;;  %v2004_v43 = vsel %vm4899_vm2, %v4284_v54, %v2003_v31  ;;  %v2005_v0 = vrot.slane %v2003_v31, 4  ;;  %v2884_v33 = vsel %vm2866_vm9, %v2851_v11, %v6257_v39  ;;  %v4462_v11 = vld [vmem:[%s6376_s7 + $0x48] sm:$0x1] }
 0x150   : > { %2669 = vrot.lane.b32.xlu1 %v4413_v7, %s4836_s24  ;;  %v4429_v19 = vcombine.low %v2011_v47, %v2014_v30  ;;  %v2919_v1 = vsel %vm2899_vm10, %v2886_v16, %v6266_v15  ;;  %v2917_v28 = vsel %vm2899_vm10, %v2884_v33, %v6276_v36  ;;  %v2738_v39 = vpop.permute.xlu0 %2737  ;;  %v4301_v58 = vcombine.low %v6150_v37, %v6159_v25 }
 0x151   : > { %2667 = vrot.lane.b32.xlu0 %v4412_v53, %s4836_s24  ;;  %v2007_v46 = vsel %vm4899_vm2, %v2005_v0, %v2006_v6  ;;  %v2952_v3 = vsel %vm6837_vm11, %v2919_v1, %v6299_v29  ;;  %v2950_v26 = vsel %vm6837_vm11, %v2917_v28, %v6301_v42  ;;  %v4300_v29 = vcombine.low %v6119_v49, %v6124_v13  ;;  %v4484_v42 = vld [vmem:[%s6376_s7 + $0x14] sm:$0x1]  ;;  %v4816_v53 = vld [vmem:[%s4875_s17 + $0x84] sm:$0xf] }
 0x152   : > { %v6390_v15 = vpop.permute.xlu1 %2149  ;;  %v4428_v63 = vcombine.low %v2004_v43, %v2007_v46  ;;  %v2985_v36 = vsel %vm2965_vm12, %v2952_v3, %v2658_v24  ;;  %v2983_v21 = vsel %vm2965_vm12, %v2950_v26, %v2656_v35  ;;  %vm3450_vm2 = vsmask.f32 7938  ;;  %v4817_v43 = vld [vmem:[%s4875_s17 + $0x88] sm:$0xf]  ;;  %v4460_v3 = vld [vmem:[%s6376_s7 + $0x3c] sm:$0x1] }
 0x153   : > { %v3016_v17 = vsel %vm2998_vm13, %v2983_v21, %v2736_v12  ;;  %v3018_v40 = vsel %vm2998_vm13, %v2985_v36, %v2738_v39  ;;  %v3406_v48 = vsel %vm6415_vm3, 0, %v4454_v18  ;;  %vm6422_vm4 = vmand %vm3399_vm0, %vm3450_vm2  ;;  %v3403_v14 = vsel %vm6415_vm3, 0, %v4452_v9  ;;  %v4494_v18 = vld [vmem:[%s6376_s7 + $0x50] sm:$0x1] }
 0x154   : > { %2749 = vrot.lane.b32.xlu1 %v4429_v19, %s4837_s25  ;;  %v3041_v24 = vsel %vm3031_vm14, %v3016_v17, 0  ;;  %v3042_v35 = vsel %vm3031_vm14, %v3018_v40, 0  ;;  %v2228_v2 = vpop.permute.xlu0 %2227  ;;  %v3412_v61 = vsel %vm6415_vm3, 0, %v4458_v52  ;;  %v3409_v5 = vsel %vm6415_vm3, 0, %v4456_v22  ;;  %4455 = vst [vmem:[%s6376_s7 + $0x18] sm:$0x1] %v3406_v48 }
 0x155   : > { %2747 = vrot.lane.b32.xlu0 %v4428_v63, %s4837_s25  ;;  %4703 = vmatprep.mubr.msk.bf16.mxu1 %vm3073_vm15, %v3041_v24  ;;  %4453 = vst [vmem:[%s6376_s7 + $0xc] sm:$0x1] %v3403_v14  ;;  %v3456_v10 = vsel %vm6422_vm4, 0, %v4486_v56  ;;  %v3453_v45 = vsel %vm6422_vm4, 0, %v4484_v42  ;;  %4459 = vst [vmem:[%s6376_s7 + $0x30] sm:$0x1] %v3412_v61  ;;  %v4296_v31 = vcombine.low %v4814_v51, %v4815_v62 }
 0x156   : > { %v2230_v57 = vpop.permute.xlu1 %2229  ;;  %4704 = vmatmul.mubr.msk.bf16.vlgmr.msra.gmra.mrb[0].mxu1 %vm3073_vm15, %v3042_v35  ;;  %4457 = vst [vmem:[%s6376_s7 + $0x24] sm:$0x1] %v3409_v5  ;;  %v3462_v44 = vsel %vm6422_vm4, 0, %v4490_v4  ;;  %v3459_v34 = vsel %vm6422_vm4, 0, %v4488_v55  ;;  %4487 = vst [vmem:[%s6376_s7 + $0x20] sm:$0x1] %v3456_v10  ;;  %v4297_v0 = vcombine.low %v4816_v53, %v4817_v43 }
 0x157   : > { %4485 = vst [vmem:[%s6376_s7 + $0x14] sm:$0x1] %v3453_v45  ;;  %4491 = vst [vmem:[%s6376_s7 + $0x38] sm:$0x1] %v3462_v44  ;;  %v3418_v47 = vsel %vm6415_vm3, 0, %v4462_v11  ;;  %v2784_v6 = vsel %vm2751_vm6, %v4296_v31, %v6349_v8  ;;  %v3415_v21 = vsel %vm6415_vm3, 0, %v4460_v3 }
 0x158   : > { %4489 = vst [vmem:[%s6376_s7 + $0x2c] sm:$0x1] %v3459_v34  ;;  %v2324_v12 = vpop.permute.xlu0 %2323  ;;  %4463 = vst [vmem:[%s6376_s7 + $0x48] sm:$0x1] %v3418_v47  ;;  %v2822_v7 = vsel %vm2800_vm7, %v2784_v6, %v2228_v2  ;;  %v2787_v39 = vsel %vm2751_vm6, %v4297_v0, %v6390_v15  ;;  %v3468_v15 = vsel %vm6422_vm4, 0, %v4494_v18  ;;  %vm3902_vm5 = vcmask 1043456  }
 0x159   : > { %v2855_v30 = vsel %vm2833_vm8, %v2822_v7, %v2324_v12  ;;  %v2824_v26 = vsel %vm2800_vm7, %v2787_v39, %v2230_v57  ;;  %4461 = vst [vmem:[%s6376_s7 + $0x3c] sm:$0x1] %v3415_v21  ;;  %v4492_v17 = vld [vmem:[%s6376_s7 + $0x44] sm:$0x1]  ;;  %4495 = vst [vmem:[%s6376_s7 + $0x50] sm:$0x1] %v3468_v15 }
 0x15a   : > { %v2326_v32 = vpop.permute.xlu1 %2325  ;;  %v3465_v56 = vsel %vm6422_vm4, 0, %v4492_v17  ;;  %v4818_v44 = vld [vmem:[%s4875_s17 + $0x90] sm:$0xf]  ;;  %v4819_v34 = vld [vmem:[%s4875_s17 + $0x94] sm:$0xf] }
 0x15b   : > { %v2857_v9 = vsel %vm2833_vm8, %v2824_v26, %v2326_v32  ;;  %4493 = vst [vmem:[%s6376_s7 + $0x44] sm:$0x1] %v3465_v56  ;;  %v4298_v32 = vcombine.low %v4818_v44, %v4819_v34  ;;  %v4820_v12 = vld [vmem:[%s4875_s17 + $0x9c] sm:$0xf]  ;;  %vm3580_vm0 = vsmask.f32 4368 }
 0x15f   : > { %v2406_v23 = vpop.permute.xlu1 %2405 }
 0x160   : > { %v2890_v40 = vsel %vm2866_vm9, %v2857_v9, %v2406_v23  ;;  %v4821_v23 = vld [vmem:[%s4875_s17 + $0xa0] sm:$0xf] }
 0x161   : > { %v2404_v41 = vpop.permute.xlu0 %2403 }
 0x162   : > { %v2888_v33 = vsel %vm2866_vm9, %v2855_v30, %v2404_v41  ;;  %v4299_v41 = vcombine.low %v4820_v12, %v4821_v23  ;;  %v4464_v12 = vld [vmem:[%s6376_s7 + $0x54] sm:$0x1]  ;;  %v4498_v23 = vld [vmem:[%s6376_s7 + $0x68] sm:$0x1] }
 0x163   : > { %v2486_v59 = vpop.permute.xlu1 %2485 }
 0x164   : > { %v2923_v42 = vsel %vm2899_vm10, %v2890_v40, %v2486_v59 }
 0x165   : > { %v2484_v54 = vpop.permute.xlu0 %2483 }
 0x166   : > { %v2921_v19 = vsel %vm2899_vm10, %v2888_v33, %v2484_v54 }
 0x167   : > { %v2582_v27 = vpop.permute.xlu1 %2581 }
 0x168   : > { %v2956_v52 = vsel %vm6837_vm11, %v2923_v42, %v2582_v27  ;;  %v4466_v27 = vld [vmem:[%s6376_s7 + $0x60] sm:$0x1] }
 0x169   : > { %v2580_v20 = vpop.permute.xlu0 %2579  ;;  %v3424_v6 = vsel %vm6415_vm3, 0, %v4466_v27 }
 0x16a   : > { %v2954_v8 = vsel %vm6837_vm11, %v2921_v19, %v2580_v20  ;;  %4467 = vst [vmem:[%s6376_s7 + $0x60] sm:$0x1] %v3424_v6 }
 0x16f   : > { %v2662_v16 = vpop.permute.xlu1 %2661 }
 0x170   : > { %v2660_v38 = vpop.permute.xlu0 %2659  ;;  %v2989_v22 = vsel %vm2965_vm12, %v2956_v52, %v2662_v16 }
 0x171   : > { %v2987_v1 = vsel %vm2965_vm12, %v2954_v8, %v2660_v38 }
 0x174   : > { %v2740_v28 = vpop.permute.xlu0 %2739  ;;  %v2152_v63 = vpop.permute.xlu1 %2151 }
 0x175   : > { %v3020_v46 = vsel %vm2998_vm13, %v2987_v1, %v2740_v28  ;;  %v2790_v20 = vsel %vm2751_vm6, %v4298_v32, %v2152_v63 }
 0x176   : > { %v3043_v36 = vsel %vm3031_vm14, %v3020_v46, 0 }
 0x177   : > { %4707 = vmatprep.mubr.msk.bf16.mxu1 %vm3073_vm15, %v3043_v36 }
 0x17b   : > { %v2742_v24 = vpop.permute.xlu0 %2741 }
 0x17c   : > { %v2154_v35 = vpop.permute.xlu1 %2153  ;;  %v3022_v2 = vsel %vm2998_vm13, %v2989_v22, %v2742_v24  ;;  %v4553_v24 = vld [vmem:[%s6376_s7 + $0x18] sm:$0xf] }
 0x17d   : > { %v3044_v4 = vsel %vm3031_vm14, %v3022_v2, 0  ;;  %v2793_v51 = vsel %vm2751_vm6, %v4299_v41, %v2154_v35 }
 0x17e   : > { %4708 = vmatmul.mubr.msk.bf16.gmra.mrb[4].mxu1 %vm3073_vm15, %v3044_v4 }
 0x17f   : > { %v2232_v57 = vpop.permute.xlu0 %2231 }
 0x180   : > { %v2234_v55 = vpop.permute.xlu1 %2233  ;;  %v2826_v31 = vsel %vm2800_vm7, %v2790_v20, %v2232_v57 }
 0x181   : > { %v2828_v62 = vsel %vm2800_vm7, %v2793_v51, %v2234_v55 }
 0x183   : > { %v2328_v14 = vpop.permute.xlu0 %2327 }
 0x184   : > { %v2330_v48 = vpop.permute.xlu1 %2329  ;;  %v2859_v47 = vsel %vm2833_vm8, %v2826_v31, %v2328_v14  ;;  %v4496_v31 = vld [vmem:[%s6376_s7 + $0x5c] sm:$0x1] }
 0x185   : > { %v2861_v11 = vsel %vm2833_vm8, %v2828_v62, %v2330_v48 }
 0x18a   : > { %v2410_v61 = vpop.permute.xlu1 %2409 }
 0x18b   : > { %v2408_v5 = vpop.permute.xlu0 %2407  ;;  %v2894_v7 = vsel %vm2866_vm9, %v2861_v11, %v2410_v61 }
 0x18c   : > { %v2892_v38 = vsel %vm2866_vm9, %v2859_v47, %v2408_v5  ;;  %v4548_v5 = vld [vmem:[%s6376_s7 + $0xc] sm:$0xf] }
 0x18e   : > { %v2490_v10 = vpop.permute.xlu1 %2489 }
 0x18f   : > { %v2488_v45 = vpop.permute.xlu0 %2487  ;;  %v2927_v53 = vsel %vm2899_vm10, %v2894_v7, %v2490_v10 }
 0x190   : > { %v2925_v43 = vsel %vm2899_vm10, %v2892_v38, %v2488_v45 }
 0x192   : > { %v2586_v59 = vpop.permute.xlu1 %2585 }
 0x193   : > { %v2584_v54 = vpop.permute.xlu0 %2583  ;;  %v2960_v8 = vsel %vm6837_vm11, %v2927_v53, %v2586_v59  ;;  %v3474_v53 = vsel %vm6422_vm4, 0, %v4498_v23 }
 0x194   : > { %v2958_v1 = vsel %vm6837_vm11, %v2925_v43, %v2584_v54  ;;  %vm6515_vm11 = vmand %vm3902_vm5, %vm3450_vm2  ;;  %v4556_v54 = vld [vmem:[%s6376_s7 + $0x20] sm:$0x1]  ;;  %4499 = vst [vmem:[%s6376_s7 + $0x68] sm:$0x1] %v3474_v53 }
 0x195   : > { %vm6532_vm2 = vmor %vm3400_vm1, %vm3580_vm0  ;;  %vm6850_vm1 = vcmask 195584  }
 0x198   : > { %v4689_v16 = vpop.f32.mrb[0].mxu0 }
 0x199   : > { %v6505_v30 = vpop.permute.xlu1 %2665  ;;  %v4632_v33 = vpack.c.bf16 %v4689_v16, %v4689_v16  ;;  %v3140_v19 = vpop.f32.mrb[1].mxu0  ;;  %v3307_v3 = vmul.f32 %v4689_v16, %v4689_v16 }
 0x19a   : > { %v2664_v0 = vpop.permute.xlu0 %2663  ;;  %v4630_v28 = vpack.c.bf16 %v3140_v19, %v3140_v19  ;;  %v4690_v39 = vpop.f32.mrb[2].mxu0  ;;  %v3305_v21 = vmul.f32 %v3140_v19, %v3140_v19  ;;  %v2993_v43 = vsel %vm2965_vm12, %v2960_v8, %v6505_v30 }
 0x19b   : > { %v2991_v46 = vsel %vm2965_vm12, %v2958_v1, %v2664_v0  ;;  %v3600_v26 = vshrl.u32 %v4632_v33, 16  ;;  %v4633_v63 = vpack.c.bf16 %v4690_v39, %v4690_v39  ;;  %v3143_v36 = vpop.f32.mrb[3].mxu0  ;;  %v3603_v40 = vshll.u32 %v4632_v33, 16  ;;  %v4551_v1 = vld [vmem:[%s6376_s7 + $0x14] sm:$0x1] }
 0x19c   : > { %v3583_v18 = vshrl.u32 %v4630_v28, 16  ;;  %v3267_v9 = vadd.f32 %v3143_v36, %v3140_v19  ;;  %v3306_v15 = vmul.f32 %v3143_v36, %v3143_v36  ;;  %v4631_v42 = vpack.c.bf16 %v3143_v36, %v3143_v36 }
 0x19d   : > { %v3602_v17 = vrot.slane %v3600_v26, 7  ;;  %v3608_v56 = vshrl.u32 %v4633_v63, 16  ;;  %v3586_v2 = vshll.u32 %v4630_v28, 16  ;;  %v3611_v10 = vshll.u32 %v4633_v63, 16 }
 0x19e   : > { %v2744_v52 = vpop.permute.xlu0 %2743  ;;  %v3585_v35 = vrot.slane %v3583_v18, 7  ;;  %v3268_v4 = vadd.f32 %v4689_v16, %v3267_v9  ;;  %v3337_v57 = vadd.f32 %v3306_v15, %v3305_v21  ;;  %v6520_v55 = vpop.permute.xlu1 %2155  ;;  %v3308_v34 = vmul.f32 %v4690_v39, %v4690_v39  ;;  %v4470_v9 = vld [vmem:[%s6376_s7 + $0x78] sm:$0x1] }
 0x19f   : > { %v3024_v48 = vsel %vm2998_vm13, %v2991_v46, %v2744_v52  ;;  %v3605_v14 = vor.u32 %v3603_v40, %v3602_v17  ;;  %v3606_v61 = vrot.slane %v3602_v17, 4  ;;  %v3610_v32 = vrot.slane %v3608_v56, 7 }
 0x1a0   : > { %v3045_v45 = vsel %vm3031_vm14, %v3024_v48, 0  ;;  %v3588_v44 = vor.u32 %v3586_v2, %v3585_v35  ;;  %v3338_v20 = vadd.f32 %v3337_v57, %v3307_v3  ;;  %v3591_v51 = vshrl.u32 %v4631_v42, 16 }
 0x1a1   : > { %4711 = vmatprep.mubr.msk.bf16.mxu1 %vm3073_vm15, %v3045_v45  ;;  %v3912_v41 = vsel %vm6515_vm11, %v3605_v14, %v4553_v24  ;;  %v3594_v62 = vshll.u32 %v4631_v42, 16  ;;  %v3613_v11 = vor.u32 %v3611_v10, %v3610_v32  ;;  %v3615_v47 = vrot.slane %v3610_v32, 4  ;;  %v4468_v42 = vld [vmem:[%s6376_s7 + $0x6c] sm:$0x1] }
 0x1a2   : > { %4554 = vst [vmem:[%s6376_s7 + $0x18] sm:$0xf] %v3912_v41  ;;  %v3905_v27 = vsel %vm6515_vm11, %v3588_v44, %v4548_v5  ;;  %v6541_v6 = vadd.f32 %v4690_v39, %v3268_v4  ;;  %v3593_v7 = vrot.slane %v3591_v51, 7  ;;  %v6544_v38 = vadd.f32 %v3338_v20, %v3308_v34  ;;  %v4500_v4 = vld [vmem:[%s6376_s7 + $0x74] sm:$0x1] }
 0x1a3   : > { %4549 = vst [vmem:[%s6376_s7 + $0xc] sm:$0xf] %v3905_v27  ;;  %v3421_v16 = vsel %vm6415_vm3, 0, %v4464_v12  ;;  %v3614_v33 = vsel %vm6532_vm2, %v3606_v61, %v3613_v11  ;;  %v3916_v19 = vsel %vm6415_vm3, %v3615_v47, %v4556_v54  ;;  %v3471_v28 = vsel %vm6422_vm4, 0, %v4496_v31 }
 0x1a4   : > { %v2746_v0 = vpop.permute.xlu0 %2745  ;;  %4465 = vst [vmem:[%s6376_s7 + $0x54] sm:$0x1] %v3421_v16  ;;  %v3589_v30 = vrot.slane %v3585_v35, 4  ;;  %4555 = vst [vmem:[%s6376_s7 + $0x1c] sm:$0xf] %v3614_v33  ;;  %v3596_v8 = vor.u32 %v3594_v62, %v3593_v7  ;;  %v3598_v3 = vrot.slane %v3593_v7, 4  ;;  %v2796_v45 = vsel %vm2751_vm6, %v4300_v29, %v6520_v55 }
 0x1a5   : > { %v3026_v46 = vsel %vm2998_vm13, %v2993_v43, %v2746_v0  ;;  %4557 = vst [vmem:[%s6376_s7 + $0x20] sm:$0x1] %v3916_v19  ;;  %4497 = vst [vmem:[%s6376_s7 + $0x5c] sm:$0x1] %v3471_v28  ;;  %v3430_v15 = vsel %vm6415_vm3, 0, %v4470_v9  ;;  %v3427_v24 = vsel %vm6415_vm3, 0, %v4468_v42 }
 0x1a6   : > { %v2158_v39 = vpop.permute.xlu1 %2157  ;;  %v3046_v26 = vsel %vm3031_vm14, %v3026_v46, 0  ;;  %v3597_v63 = vsel %vm6532_vm2, %v3589_v30, %v3596_v8  ;;  %v3909_v36 = vsel %vm6415_vm3, %v3598_v3, %v4551_v1  ;;  %4471 = vst [vmem:[%s6376_s7 + $0x78] sm:$0x1] %v3430_v15  ;;  %v4502_v35 = vld [vmem:[%s6376_s7 + $0x80] sm:$0x1]  ;;  %v3477_v57 = vsel %vm6422_vm4, 0, %v4500_v4 }
 0x1a7   : > { %4712 = vmatmul.mubr.msk.bf16.gmra.mrb[8].mxu1 %vm3073_vm15, %v3046_v26  ;;  %4550 = vst [vmem:[%s6376_s7 + $0x10] sm:$0xf] %v3597_v63  ;;  %4552 = vst [vmem:[%s6376_s7 + $0x14] sm:$0x1] %v3909_v36  ;;  %v3480_v2 = vsel %vm6422_vm4, 0, %v4502_v35  ;;  %v2799_v5 = vsel %vm2751_vm6, %v4301_v58, %v2158_v39 }
 0x1a8   : > { %v2236_v21 = vpop.permute.xlu0 %2235  ;;  %4469 = vst [vmem:[%s6376_s7 + $0x6c] sm:$0x1] %v3427_v24  ;;  %4503 = vst [vmem:[%s6376_s7 + $0x80] sm:$0x1] %v3480_v2  ;;  %v4563_v3 = vld [vmem:[%s6376_s7 + $0x30] sm:$0xf] }
 0x1a9   : > { %4501 = vst [vmem:[%s6376_s7 + $0x74] sm:$0x1] %v3477_v57  ;;  %v2830_v34 = vsel %vm2800_vm7, %v2796_v45, %v2236_v21  ;;  %vm6851_vm6 = vmmov %vm6850_vm1  ;;  %v4558_v9 = vld [vmem:[%s6376_s7 + $0x24] sm:$0xf]  ;;  %v4566_v24 = vld [vmem:[%s6376_s7 + $0x38] sm:$0x1] }
 0x1aa   : > { %v2238_v18 = vpop.permute.xlu1 %2237 }
 0x1ab   : > { %v2832_v44 = vsel %vm2800_vm7, %v2799_v5, %v2238_v18 }
 0x1ac   : > { %v2332_v40 = vpop.permute.xlu0 %2331 }
 0x1ad   : > { %v2863_v12 = vsel %vm2833_vm8, %v2830_v34, %v2332_v40 }
 0x1ae   : > { %v2334_v17 = vpop.permute.xlu1 %2333 }
 0x1af   : > { %v2865_v32 = vsel %vm2833_vm8, %v2832_v44, %v2334_v17 }
 0x1b3   : > { %v2414_v56 = vpop.permute.xlu1 %2413 }
 0x1b4   : > { %v2898_v23 = vsel %vm2866_vm9, %v2865_v32, %v2414_v56 }
 0x1b5   : > { %v2412_v52 = vpop.permute.xlu0 %2411 }
 0x1b6   : > { %v2896_v37 = vsel %vm2866_vm9, %v2863_v12, %v2412_v52  ;;  %v4561_v12 = vld [vmem:[%s6376_s7 + $0x2c] sm:$0x1] }
 0x1b7   : > { %v2494_v48 = vpop.permute.xlu1 %2493 }
 0x1b8   : > { %v2931_v25 = vsel %vm2899_vm10, %v2898_v23, %v2494_v48 }
 0x1b9   : > { %v2492_v14 = vpop.permute.xlu0 %2491 }
 0x1ba   : > { %v2929_v41 = vsel %vm2899_vm10, %v2896_v37, %v2492_v14 }
 0x1bb   : > { %v2590_v61 = vpop.permute.xlu1 %2589 }
 0x1bc   : > { %v2964_v49 = vsel %vm6850_vm1, %v2931_v25, %v2590_v61 }
 0x1bd   : > { %v2588_v10 = vpop.permute.xlu0 %2587 }
 0x1be   : > { %v2962_v54 = vsel %vm6851_vm6, %v2929_v41, %v2588_v10 }
 0x1c1   : > { %v4693_v58 = vpop.f32.mrb[4].mxu0 }
 0x1c2   : > { %v2670_v13 = vpop.permute.xlu1 %2669  ;;  %v4636_v29 = vpack.c.bf16 %v4693_v58, %v4693_v58  ;;  %v3156_v55 = vpop.f32.mrb[5].mxu0  ;;  %v3311_v7 = vmul.f32 %v4693_v58, %v4693_v58 }
 0x1c3   : > { %v2668_v20 = vpop.permute.xlu0 %2667  ;;  %v3270_v51 = vadd.f32 %v6541_v6, %v3156_v55  ;;  %v3309_v62 = vmul.f32 %v3156_v55, %v3156_v55  ;;  %v4634_v31 = vpack.c.bf16 %v3156_v55, %v3156_v55  ;;  %v4694_v27 = vpop.f32.mrb[6].mxu0  ;;  %v2997_v11 = vsel %vm2965_vm12, %v2964_v49, %v2670_v13  ;;  %v4474_v13 = vld [vmem:[%s6376_s7 + $0x90] sm:$0x1]  ;;  %v4472_v55 = vld [vmem:[%s6376_s7 + $0x84] sm:$0x1] }
 0x1c4   : > { %v2995_v47 = vsel %vm2965_vm12, %v2962_v54, %v2668_v20  ;;  %v3634_v16 = vshrl.u32 %v4636_v29, 16  ;;  %v3159_v53 = vpop.f32.mrb[7].mxu0  ;;  %v3637_v43 = vshll.u32 %v4636_v29, 16  ;;  %v4637_v19 = vpack.c.bf16 %v4694_v27, %v4694_v27  ;;  %v4506_v20 = vld [vmem:[%s6376_s7 + $0x98] sm:$0x1] }
 0x1c5   : > { %v3340_v0 = vadd.f32 %v6544_v38, %v3309_v62  ;;  %v3617_v33 = vshrl.u32 %v4634_v31, 16  ;;  %v3271_v6 = vadd.f32 %v3270_v51, %v3159_v53  ;;  %v3310_v39 = vmul.f32 %v3159_v53, %v3159_v53  ;;  %v4504_v62 = vld [vmem:[%s6376_s7 + $0x8c] sm:$0x1] }
 0x1c6   : > { %v2750_v1 = vpop.permute.xlu1 %2749  ;;  %v3636_v28 = vrot.slane %v3634_v16, 7  ;;  %v4635_v46 = vpack.c.bf16 %v3159_v53, %v3159_v53  ;;  %v3620_v63 = vshll.u32 %v4634_v31, 16  ;;  %v3642_v36 = vshrl.u32 %v4637_v19, 16 }
 0x1c7   : > { %v3030_v30 = vsel %vm2998_vm13, %v2997_v11, %v2750_v1  ;;  %v2748_v8 = vpop.permute.xlu0 %2747  ;;  %v3619_v26 = vrot.slane %v3617_v33, 7  ;;  %v3312_v15 = vmul.f32 %v4694_v27, %v4694_v27  ;;  %v3645_v42 = vshll.u32 %v4637_v19, 16 }
 0x1c8   : > { %v3048_v21 = vsel %vm3031_vm14, %v3030_v30, 0  ;;  %v3028_v38 = vsel %vm2998_vm13, %v2995_v47, %v2748_v8  ;;  %v3639_v18 = vor.u32 %v3637_v43, %v3636_v28  ;;  %v3644_v56 = vrot.slane %v3642_v36, 7 }
 0x1c9   : > { %v3047_v17 = vsel %vm3031_vm14, %v3028_v38, 0  ;;  %v3622_v40 = vor.u32 %v3620_v63, %v3619_v26  ;;  %v3272_v35 = vadd.f32 %v4693_v58, %v3271_v6  ;;  %v3341_v2 = vadd.f32 %v3340_v0, %v3310_v39 }
 0x1ca   : > { %4715 = vmatprep.mubr.msk.bf16.mxu1 %vm3073_vm15, %v3047_v17  ;;  %v3926_v52 = vsel %vm6515_vm11, %v3639_v18, %v4563_v3  ;;  %v3625_v4 = vshrl.u32 %v4635_v46, 16  ;;  %v3640_v57 = vrot.slane %v3636_v28, 4  ;;  %v3647_v14 = vor.u32 %v3645_v42, %v3644_v56 }
 0x1cb   : > { %4716 = vmatmul.mubr.msk.bf16.gmra.mrb[12].mxu1 %vm3073_vm15, %v3048_v21  ;;  %4564 = vst [vmem:[%s6376_s7 + $0x30] sm:$0xf] %v3926_v52  ;;  %v3919_v48 = vsel %vm6515_vm11, %v3622_v40, %v4558_v9  ;;  %v3649_v61 = vrot.slane %v3644_v56, 4  ;;  %v3342_v5 = vadd.f32 %v3341_v2, %v3311_v7  ;;  %v3628_v45 = vshll.u32 %v4635_v46, 16  ;;  %v4568_v9 = vld [vmem:[%s6376_s7 + $0x3c] sm:$0xf] }
 0x1cc   : > { %4559 = vst [vmem:[%s6376_s7 + $0x24] sm:$0xf] %v3919_v48  ;;  %v3627_v10 = vrot.slane %v3625_v4, 7  ;;  %v3273_v44 = vadd.f32 %v4694_v27, %v3272_v35  ;;  %v3648_v34 = vsel %vm6532_vm2, %v3640_v57, %v3647_v14  ;;  %v3623_v23 = vrot.slane %v3619_v26, 4  ;;  %v4573_v26 = vld [vmem:[%s6376_s7 + $0x48] sm:$0xf] }
 0x1cd   : > { %v3930_v32 = vsel %vm6415_vm3, %v3649_v61, %v4566_v24  ;;  %4565 = vst [vmem:[%s6376_s7 + $0x34] sm:$0xf] %v3648_v34  ;;  %v3343_v58 = vadd.f32 %v3342_v5, %v3312_v15  ;;  %v3436_v29 = vsel %vm6415_vm3, 0, %v4474_v13  ;;  %v3433_v54 = vsel %vm6415_vm3, 0, %v4472_v55  ;;  %v4576_v24 = vld [vmem:[%s6376_s7 + $0x50] sm:$0x1] }
 0x1ce   : > { %4567 = vst [vmem:[%s6376_s7 + $0x38] sm:$0x1] %v3930_v32  ;;  %v3630_v37 = vor.u32 %v3628_v45, %v3627_v10  ;;  %v3632_v25 = vrot.slane %v3627_v10, 4  ;;  %4475 = vst [vmem:[%s6376_s7 + $0x90] sm:$0x1] %v3436_v29  ;;  %v3486_v51 = vsel %vm6422_vm4, 0, %v4506_v20 }
 0x1cf   : > { %4473 = vst [vmem:[%s6376_s7 + $0x84] sm:$0x1] %v3433_v54  ;;  %4507 = vst [vmem:[%s6376_s7 + $0x98] sm:$0x1] %v3486_v51  ;;  %v3483_v31 = vsel %vm6422_vm4, 0, %v4504_v62 }
 0x1d0   : > { %v3631_v41 = vsel %vm6532_vm2, %v3623_v23, %v3630_v37  ;;  %v3923_v49 = vsel %vm6415_vm3, %v3632_v25, %v4561_v12  ;;  %4505 = vst [vmem:[%s6376_s7 + $0x8c] sm:$0x1] %v3483_v31  ;;  %v4571_v34 = vld [vmem:[%s6376_s7 + $0x44] sm:$0x1]  ;;  %v4476_v13 = vld [vmem:[%s6376_s7 + $0x9c] sm:$0x1] }
 0x1d1   : > { %4560 = vst [vmem:[%s6376_s7 + $0x28] sm:$0xf] %v3631_v41  ;;  %4562 = vst [vmem:[%s6376_s7 + $0x2c] sm:$0x1] %v3923_v49  ;;  %v4478_v41 = vld [vmem:[%s6376_s7 + $0xa8] sm:$0x1] }
 0x1d2   : > { %v3442_v49 = vsel %vm6415_vm3, 0, %v4478_v41  ;;  %v3439_v29 = vsel %vm6415_vm3, 0, %v4476_v13  ;;  %v4510_v55 = vld [vmem:[%s6376_s7 + $0xb0] sm:$0x1]  ;;  %v4508_v20 = vld [vmem:[%s6376_s7 + $0xa4] sm:$0x1] }
 0x1d3   : > { %4479 = vst [vmem:[%s6376_s7 + $0xa8] sm:$0x1] %v3442_v49  ;;  %4477 = vst [vmem:[%s6376_s7 + $0x9c] sm:$0x1] %v3439_v29  ;;  %v3492_v54 = vsel %vm6422_vm4, 0, %v4510_v55  ;;  %v3489_v51 = vsel %vm6422_vm4, 0, %v4508_v20 }
 0x1d4   : > { %4511 = vst [vmem:[%s6376_s7 + $0xb0] sm:$0x1] %v3492_v54  ;;  %4509 = vst [vmem:[%s6376_s7 + $0xa4] sm:$0x1] %v3489_v51  ;;  %v4512_v13 = vld [vmem:[%s6376_s7 + $0xbc] sm:$0x1] }
 0x1d5   : > { %v3495_v29 = vsel %vm6422_vm4, 0, %v4512_v13 }
 0x1d6   : > { %4513 = vst [vmem:[%s6376_s7 + $0xbc] sm:$0x1] %v3495_v29 }
 0x1eb   : > { %v4697_v27 = vpop.f32.mrb[8].mxu0 }
 0x1ec   : > { %v4640_v11 = vpack.c.bf16 %v4697_v27, %v4697_v27  ;;  %v3172_v47 = vpop.f32.mrb[9].mxu0  ;;  %v3315_v1 = vmul.f32 %v4697_v27, %v4697_v27 }
 0x1ed   : > { %v3274_v7 = vadd.f32 %v3273_v44, %v3172_v47  ;;  %v3313_v16 = vmul.f32 %v3172_v47, %v3172_v47  ;;  %v4638_v53 = vpack.c.bf16 %v3172_v47, %v3172_v47  ;;  %v4698_v43 = vpop.f32.mrb[10].mxu0 }
 0x1ee   : > { %v3668_v0 = vshrl.u32 %v4640_v11, 16  ;;  %v4641_v33 = vpack.c.bf16 %v4698_v43, %v4698_v43  ;;  %v3175_v19 = vpop.f32.mrb[11].mxu0  ;;  %v3671_v30 = vshll.u32 %v4640_v11, 16  ;;  %v3316_v52 = vmul.f32 %v4698_v43, %v4698_v43 }
 0x1ef   : > { %v3344_v28 = vadd.f32 %v3343_v58, %v3313_v16  ;;  %v3651_v6 = vshrl.u32 %v4638_v53, 16  ;;  %v3275_v39 = vadd.f32 %v3274_v7, %v3175_v19  ;;  %v3314_v3 = vmul.f32 %v3175_v19, %v3175_v19 }
 0x1f0   : > { %v3670_v46 = vrot.slane %v3668_v0, 7  ;;  %v3676_v8 = vshrl.u32 %v4641_v33, 16  ;;  %v3654_v36 = vshll.u32 %v4638_v53, 16  ;;  %v4639_v38 = vpack.c.bf16 %v3175_v19, %v3175_v19 }
 0x1f1   : > { %v3653_v63 = vrot.slane %v3651_v6, 7  ;;  %v3276_v21 = vadd.f32 %v4697_v27, %v3275_v39  ;;  %v3679_v17 = vshll.u32 %v4641_v33, 16  ;;  %v3345_v40 = vadd.f32 %v3344_v28, %v3314_v3  ;;  %v4583_v3 = vld [vmem:[%s6376_s7 + $0x60] sm:$0xf] }
 0x1f2   : > { %v3673_v18 = vor.u32 %v3671_v30, %v3670_v46  ;;  %v3678_v15 = vrot.slane %v3676_v8, 7  ;;  %v3674_v56 = vrot.slane %v3670_v46, 4  ;;  %v3659_v35 = vshrl.u32 %v4639_v38, 16 }
 0x1f3   : > { %v3656_v42 = vor.u32 %v3654_v36, %v3653_v63  ;;  %v3346_v48 = vadd.f32 %v3345_v40, %v3315_v1  ;;  %v3662_v5 = vshll.u32 %v4639_v38, 16  ;;  %v3277_v10 = vadd.f32 %v4698_v43, %v3276_v21 }
 0x1f4   : > { %v3940_v2 = vsel %vm6515_vm11, %v3673_v18, %v4573_v26  ;;  %v3681_v4 = vor.u32 %v3679_v17, %v3678_v15  ;;  %v3683_v57 = vrot.slane %v3678_v15, 4  ;;  %v3661_v61 = vrot.slane %v3659_v35, 7  ;;  %v4578_v18 = vld [vmem:[%s6376_s7 + $0x54] sm:$0xf]  ;;  %v4586_v17 = vld [vmem:[%s6376_s7 + $0x68] sm:$0x1] }
 0x1f5   : > { %4574 = vst [vmem:[%s6376_s7 + $0x48] sm:$0xf] %v3940_v2  ;;  %v3933_v14 = vsel %vm6515_vm11, %v3656_v42, %v4568_v9  ;;  %v3347_v32 = vadd.f32 %v3346_v48, %v3316_v52  ;;  %v3657_v12 = vrot.slane %v3653_v63, 4  ;;  %v4482_v35 = vld [vmem:[%s6376_s7 + $0xc0] sm:$0x1] }
 0x1f6   : > { %4569 = vst [vmem:[%s6376_s7 + $0x3c] sm:$0xf] %v3933_v14  ;;  %v3682_v45 = vsel %vm6532_vm2, %v3674_v56, %v3681_v4  ;;  %v3944_v44 = vsel %vm6415_vm3, %v3683_v57, %v4576_v24  ;;  %v3664_v23 = vor.u32 %v3662_v5, %v3661_v61  ;;  %v3666_v37 = vrot.slane %v3661_v61, 4  ;;  %v4480_v14 = vld [vmem:[%s6376_s7 + $0xb4] sm:$0x1] }
 0x1f7   : > { %4575 = vst [vmem:[%s6376_s7 + $0x4c] sm:$0xf] %v3682_v45  ;;  %4577 = vst [vmem:[%s6376_s7 + $0x50] sm:$0x1] %v3944_v44  ;;  %v3448_v45 = vsel %vm6415_vm3, 0, %v4482_v35 }
 0x1f8   : > { %v3665_v25 = vsel %vm6532_vm2, %v3657_v12, %v3664_v23  ;;  %v3937_v58 = vsel %vm6415_vm3, %v3666_v37, %v4571_v34  ;;  %v4514_v44 = vld [vmem:[%s6376_s7 + $0xc8] sm:$0x1]  ;;  %v4581_v12 = vld [vmem:[%s6376_s7 + $0x5c] sm:$0x1]  ;;  %4483 = vst [vmem:[%s6376_s7 + $0xc0] sm:$0x1] %v3448_v45 }
 0x1f9   : > { %4570 = vst [vmem:[%s6376_s7 + $0x40] sm:$0xf] %v3665_v25  ;;  %4572 = vst [vmem:[%s6376_s7 + $0x44] sm:$0x1] %v3937_v58  ;;  %v3445_v37 = vsel %vm6415_vm3, 0, %v4480_v14  ;;  %v3498_v49 = vsel %vm6422_vm4, 0, %v4514_v44 }
 0x1fa   : > { %4481 = vst [vmem:[%s6376_s7 + $0xb4] sm:$0x1] %v3445_v37  ;;  %4515 = vst [vmem:[%s6376_s7 + $0xc8] sm:$0x1] %v3498_v49 }
 0x215   : > { %v4701_v62 = vpop.f32.mrb[12].mxu0 }
 0x216   : > { %v4644_v31 = vpack.c.bf16 %v4701_v62, %v4701_v62  ;;  %v3188_v27 = vpop.f32.mrb[13].mxu0  ;;  %v3319_v53 = vmul.f32 %v4701_v62, %v4701_v62 }
 0x217   : > { %v3278_v11 = vadd.f32 %v3277_v10, %v3188_v27  ;;  %v3317_v47 = vmul.f32 %v3188_v27, %v3188_v27  ;;  %v4642_v7 = vpack.c.bf16 %v3188_v27, %v3188_v27  ;;  %v4702_v16 = vpop.f32.mrb[14].mxu0 }
 0x218   : > { %v3702_v43 = vshrl.u32 %v4644_v31, 16  ;;  %v4645_v0 = vpack.c.bf16 %v4702_v16, %v4702_v16  ;;  %v3191_v33 = vpop.f32.mrb[15].mxu0  ;;  %v3705_v19 = vshll.u32 %v4644_v31, 16  ;;  %v3320_v46 = vmul.f32 %v4702_v16, %v4702_v16 }
 0x219   : > { %v3348_v1 = vadd.f32 %v3347_v32, %v3317_v47  ;;  %v3685_v28 = vshrl.u32 %v4642_v7, 16  ;;  %v3279_v6 = vadd.f32 %v3278_v11, %v3191_v33  ;;  %v3318_v8 = vmul.f32 %v3191_v33, %v3191_v33 }
 0x21a   : > { %v3704_v39 = vrot.slane %v3702_v43, 7  ;;  %v3710_v30 = vshrl.u32 %v4645_v0, 16  ;;  %v3688_v63 = vshll.u32 %v4642_v7, 16  ;;  %v4643_v21 = vpack.c.bf16 %v3191_v33, %v3191_v33 }
 0x21b   : > { %v3687_v26 = vrot.slane %v3685_v28, 7  ;;  %v3280_v36 = vadd.f32 %v4701_v62, %v3279_v6  ;;  %v3713_v15 = vshll.u32 %v4645_v0, 16  ;;  %v3349_v40 = vadd.f32 %v3348_v1, %v3318_v8 }
 0x21c   : > { %v3707_v38 = vor.u32 %v3705_v19, %v3704_v39  ;;  %v3712_v9 = vrot.slane %v3710_v30, 7  ;;  %v3708_v56 = vrot.slane %v3704_v39, 4  ;;  %v3693_v52 = vshrl.u32 %v4643_v21, 16  ;;  %v4593_v39 = vld [vmem:[%s6376_s7 + $0x78] sm:$0xf] }
 0x21d   : > { %v3690_v42 = vor.u32 %v3688_v63, %v3687_v26  ;;  %v3696_v24 = vshll.u32 %v4643_v21, 16  ;;  %v3350_v48 = vadd.f32 %v3349_v40, %v3319_v53  ;;  %v3281_v10 = vadd.f32 %v4702_v16, %v3280_v36  ;;  %v4588_v63 = vld [vmem:[%s6376_s7 + $0x6c] sm:$0xf] }
 0x21e   : > { %v3954_v2 = vsel %vm6515_vm11, %v3707_v38, %v4583_v3  ;;  %v3715_v4 = vor.u32 %v3713_v15, %v3712_v9  ;;  %v3717_v57 = vrot.slane %v3712_v9, 4  ;;  %v3695_v5 = vrot.slane %v3693_v52, 7 }
 0x21f   : > { %4584 = vst [vmem:[%s6376_s7 + $0x60] sm:$0xf] %v3954_v2  ;;  %v3947_v61 = vsel %vm6515_vm11, %v3690_v42, %v4578_v18  ;;  %v3351_v23 = vadd.f32 %v3350_v48, %v3320_v46  ;;  %v3691_v25 = vrot.slane %v3687_v26, 4 }
 0x220   : > { %4579 = vst [vmem:[%s6376_s7 + $0x54] sm:$0xf] %v3947_v61  ;;  %v3716_v34 = vsel %vm6532_vm2, %v3708_v56, %v3715_v4  ;;  %v3958_v32 = vsel %vm6415_vm3, %v3717_v57, %v4586_v17  ;;  %v3698_v58 = vor.u32 %v3696_v24, %v3695_v5  ;;  %v3700_v41 = vrot.slane %v3695_v5, 4  ;;  %v4596_v17 = vld [vmem:[%s6376_s7 + $0x80] sm:$0x1] }
 0x221   : > { %4585 = vst [vmem:[%s6376_s7 + $0x64] sm:$0xf] %v3716_v34  ;;  %4587 = vst [vmem:[%s6376_s7 + $0x68] sm:$0x1] %v3958_v32  ;;  %v4591_v61 = vld [vmem:[%s6376_s7 + $0x74] sm:$0x1] }
 0x222   : > { %v3699_v55 = vsel %vm6532_vm2, %v3691_v25, %v3698_v58  ;;  %v3951_v54 = vsel %vm6415_vm3, %v3700_v41, %v4581_v12  ;;  %v4838_v12 = vmov 0  }
 0x223   : > { %4580 = vst [vmem:[%s6376_s7 + $0x58] sm:$0xf] %v3699_v55  ;;  %4582 = vst [vmem:[%s6376_s7 + $0x5c] sm:$0x1] %v3951_v54 }
 0x224   : > { %3391 = vst [vmem:[%s6376_s7] sm:$0xf] %v4838_v12  ;;  %3392 = vst [vmem:[%s6376_s7 + $0x4] sm:$0xf] %v4838_v12 }
 0x225   : > { %3393 = vst [vmem:[%s6376_s7 + $0x8] sm:$0x1] %v4838_v12  ;;  %4449 = vst [vmem:[%s6376_s7 + $0xcc] sm:$0xf] %v4838_v12 }
 0x226   : > { %4450 = vst [vmem:[%s6376_s7 + $0xd0] sm:$0xf] %v4838_v12  ;;  %4451 = vst [vmem:[%s6376_s7 + $0xd4] sm:$0x1] %v4838_v12 }
 0x229   : > { %v4705_v20 = vpop.f32.mrb[0].mxu1 }
 0x22a   : > { %v4648_v51 = vpack.c.bf16 %v4705_v20, %v4705_v20  ;;  %v3204_v62 = vpop.f32.mrb[1].mxu1  ;;  %v3323_v53 = vmul.f32 %v4705_v20, %v4705_v20 }
 0x22b   : > { %v3282_v31 = vadd.f32 %v3281_v10, %v3204_v62  ;;  %v3321_v27 = vmul.f32 %v3204_v62, %v3204_v62  ;;  %v4646_v11 = vpack.c.bf16 %v3204_v62, %v3204_v62  ;;  %v4706_v47 = vpop.f32.mrb[2].mxu1 }
 0x22c   : > { %v3736_v7 = vshrl.u32 %v4648_v51, 16  ;;  %v4649_v50 = vpack.c.bf16 %v4706_v47, %v4706_v47  ;;  %v3207_v16 = vpop.f32.mrb[3].mxu1  ;;  %v3739_v1 = vshll.u32 %v4648_v51, 16  ;;  %v3324_v15 = vmul.f32 %v4706_v47, %v4706_v47 }
 0x22d   : > { %v3352_v43 = vadd.f32 %v3351_v23, %v3321_v27  ;;  %v3719_v0 = vshrl.u32 %v4646_v11, 16  ;;  %v3283_v33 = vadd.f32 %v3282_v31, %v3207_v16  ;;  %v3322_v6 = vmul.f32 %v3207_v16, %v3207_v16 }
 0x22e   : > { %v3738_v19 = vrot.slane %v3736_v7, 7  ;;  %v3744_v28 = vshrl.u32 %v4649_v50, 16  ;;  %v3722_v30 = vshll.u32 %v4646_v11, 16  ;;  %v4647_v3 = vpack.c.bf16 %v3207_v16, %v3207_v16 }
 0x22f   : > { %v3721_v46 = vrot.slane %v3719_v0, 7  ;;  %v3284_v8 = vadd.f32 %v4705_v20, %v3283_v33  ;;  %v3747_v21 = vshll.u32 %v4649_v50, 16  ;;  %v3353_v38 = vadd.f32 %v3352_v43, %v3322_v6  ;;  %v4603_v50 = vld [vmem:[%s6376_s7 + $0x90] sm:$0xf] }
 0x230   : > { %v3741_v26 = vor.u32 %v3739_v1, %v3738_v19  ;;  %v3746_v36 = vrot.slane %v3744_v28, 7  ;;  %v3742_v18 = vrot.slane %v3738_v19, 4  ;;  %v3727_v40 = vshrl.u32 %v4647_v3, 16  ;;  %v4598_v19 = vld [vmem:[%s6376_s7 + $0x84] sm:$0xf] }
 0x231   : > { %v3724_v9 = vor.u32 %v3722_v30, %v3721_v46  ;;  %v3354_v24 = vadd.f32 %v3353_v38, %v3323_v53  ;;  %v3730_v4 = vshll.u32 %v4647_v3, 16  ;;  %v3285_v57 = vadd.f32 %v4706_v47, %v3284_v8  ;;  %v4606_v8 = vld [vmem:[%s6376_s7 + $0x98] sm:$0x1] }
 0x232   : > { %v3968_v56 = vsel %vm6515_vm11, %v3741_v26, %v4593_v39  ;;  %v3749_v42 = vor.u32 %v3747_v21, %v3746_v36  ;;  %v3751_v52 = vrot.slane %v3746_v36, 4  ;;  %v3729_v2 = vrot.slane %v3727_v40, 7 }
 0x233   : > { %4594 = vst [vmem:[%s6376_s7 + $0x78] sm:$0xf] %v3968_v56  ;;  %v3961_v35 = vsel %vm6515_vm11, %v3724_v9, %v4588_v63  ;;  %v3355_v5 = vadd.f32 %v3354_v24, %v3324_v15  ;;  %v3725_v10 = vrot.slane %v3721_v46, 4  ;;  %v4601_v56 = vld [vmem:[%s6376_s7 + $0x8c] sm:$0x1] }
 0x234   : > { %4589 = vst [vmem:[%s6376_s7 + $0x6c] sm:$0xf] %v3961_v35  ;;  %v3750_v48 = vsel %vm6532_vm2, %v3742_v18, %v3749_v42  ;;  %v3972_v14 = vsel %vm6415_vm3, %v3751_v52, %v4596_v17  ;;  %v3732_v45 = vor.u32 %v3730_v4, %v3729_v2  ;;  %v3734_v44 = vrot.slane %v3729_v2, 4 }
 0x235   : > { %4595 = vst [vmem:[%s6376_s7 + $0x7c] sm:$0xf] %v3750_v48  ;;  %4597 = vst [vmem:[%s6376_s7 + $0x80] sm:$0x1] %v3972_v14 }
 0x236   : > { %v3733_v34 = vsel %vm6532_vm2, %v3725_v10, %v3732_v45  ;;  %v3965_v32 = vsel %vm6415_vm3, %v3734_v44, %v4591_v61 }
 0x237   : > { %4590 = vst [vmem:[%s6376_s7 + $0x70] sm:$0xf] %v3733_v34  ;;  %4592 = vst [vmem:[%s6376_s7 + $0x74] sm:$0x1] %v3965_v32 }
 0x251   : > { %v4709_v23 = vpop.f32.mrb[4].mxu1 }
 0x252   : > { %v4652_v37 = vpack.c.bf16 %v4709_v23, %v4709_v23  ;;  %v3220_v25 = vpop.f32.mrb[5].mxu1  ;;  %v3327_v20 = vmul.f32 %v4709_v23, %v4709_v23 }
 0x253   : > { %v3286_v58 = vadd.f32 %v3285_v57, %v3220_v25  ;;  %v3325_v41 = vmul.f32 %v3220_v25, %v3220_v25  ;;  %v4650_v49 = vpack.c.bf16 %v3220_v25, %v3220_v25  ;;  %v4710_v13 = vpop.f32.mrb[6].mxu1 }
 0x254   : > { %v3770_v29 = vshrl.u32 %v4652_v37, 16  ;;  %v4653_v55 = vpack.c.bf16 %v4710_v13, %v4710_v13  ;;  %v3223_v54 = vpop.f32.mrb[7].mxu1  ;;  %v3773_v11 = vshll.u32 %v4652_v37, 16  ;;  %v3328_v30 = vmul.f32 %v4710_v13, %v4710_v13 }
 0x255   : > { %v3356_v51 = vadd.f32 %v3355_v5, %v3325_v41  ;;  %v3753_v62 = vshrl.u32 %v4650_v49, 16  ;;  %v3287_v31 = vadd.f32 %v3286_v58, %v3223_v54  ;;  %v3326_v7 = vmul.f32 %v3223_v54, %v3223_v54 }
 0x256   : > { %v3772_v27 = vrot.slane %v3770_v29, 7  ;;  %v3778_v47 = vshrl.u32 %v4653_v55, 16  ;;  %v3756_v53 = vshll.u32 %v4650_v49, 16  ;;  %v4651_v0 = vpack.c.bf16 %v3223_v54, %v3223_v54  ;;  %v4613_v29 = vld [vmem:[%s6376_s7 + $0xa8] sm:$0xf] }
 0x257   : > { %v3755_v16 = vrot.slane %v3753_v62, 7  ;;  %v3288_v43 = vadd.f32 %v4709_v23, %v3287_v31  ;;  %v3781_v28 = vshll.u32 %v4653_v55, 16  ;;  %v3357_v6 = vadd.f32 %v3356_v51, %v3326_v7  ;;  %v4608_v31 = vld [vmem:[%s6376_s7 + $0x9c] sm:$0xf] }
 0x258   : > { %v3775_v33 = vor.u32 %v3773_v11, %v3772_v27  ;;  %v3780_v1 = vrot.slane %v3778_v47, 7  ;;  %v3776_v39 = vrot.slane %v3772_v27, 4  ;;  %v3761_v3 = vshrl.u32 %v4651_v0, 16 }
 0x259   : > { %v3758_v46 = vor.u32 %v3756_v53, %v3755_v16  ;;  %v3358_v21 = vadd.f32 %v3357_v6, %v3327_v20  ;;  %v3764_v9 = vshll.u32 %v4651_v0, 16  ;;  %v3289_v15 = vadd.f32 %v4710_v13, %v3288_v43  ;;  %v4616_v53 = vld [vmem:[%s6376_s7 + $0xb0] sm:$0x1] }
 0x25a   : > { %v3982_v26 = vsel %vm6515_vm11, %v3775_v33, %v4603_v50  ;;  %v3783_v63 = vor.u32 %v3781_v28, %v3780_v1  ;;  %v3785_v36 = vrot.slane %v3780_v1, 4  ;;  %v3763_v18 = vrot.slane %v3761_v3, 7  ;;  %v4611_v3 = vld [vmem:[%s6376_s7 + $0xa4] sm:$0x1] }
 0x25b   : > { %4604 = vst [vmem:[%s6376_s7 + $0x90] sm:$0xf] %v3982_v26  ;;  %v3975_v38 = vsel %vm6515_vm11, %v3758_v46, %v4598_v19  ;;  %v3359_v42 = vadd.f32 %v3358_v21, %v3328_v30  ;;  %v3759_v52 = vrot.slane %v3755_v16, 4 }
 0x25c   : > { %4599 = vst [vmem:[%s6376_s7 + $0x84] sm:$0xf] %v3975_v38  ;;  %v3784_v17 = vsel %vm6532_vm2, %v3776_v39, %v3783_v63  ;;  %v3986_v40 = vsel %vm6415_vm3, %v3785_v36, %v4606_v8  ;;  %v3766_v24 = vor.u32 %v3764_v9, %v3763_v18  ;;  %v3768_v35 = vrot.slane %v3763_v18, 4 }
 0x25d   : > { %4605 = vst [vmem:[%s6376_s7 + $0x94] sm:$0xf] %v3784_v17  ;;  %4607 = vst [vmem:[%s6376_s7 + $0x98] sm:$0x1] %v3986_v40 }
 0x25e   : > { %v3767_v2 = vsel %vm6532_vm2, %v3759_v52, %v3766_v24  ;;  %v3979_v4 = vsel %vm6415_vm3, %v3768_v35, %v4601_v56 }
 0x25f   : > { %4600 = vst [vmem:[%s6376_s7 + $0x88] sm:$0xf] %v3767_v2  ;;  %4602 = vst [vmem:[%s6376_s7 + $0x8c] sm:$0x1] %v3979_v4 }
 0x27a   : > { %v4713_v57 = vpop.f32.mrb[8].mxu1 }
 0x27b   : > { %v4656_v48 = vpack.c.bf16 %v4713_v57, %v4713_v57  ;;  %v3236_v14 = vpop.f32.mrb[9].mxu1  ;;  %v3331_v12 = vmul.f32 %v4713_v57, %v4713_v57 }
 0x27c   : > { %v3290_v61 = vadd.f32 %v3289_v15, %v3236_v14  ;;  %v3329_v5 = vmul.f32 %v3236_v14, %v3236_v14  ;;  %v4654_v10 = vpack.c.bf16 %v3236_v14, %v3236_v14  ;;  %v4714_v45 = vpop.f32.mrb[10].mxu1 }
 0x27d   : > { %v3804_v44 = vshrl.u32 %v4656_v48, 16  ;;  %v4657_v34 = vpack.c.bf16 %v4714_v45, %v4714_v45  ;;  %v3239_v32 = vpop.f32.mrb[11].mxu1  ;;  %v3807_v41 = vshll.u32 %v4656_v48, 16  ;;  %v3332_v16 = vmul.f32 %v4714_v45, %v4714_v45 }
 0x27e   : > { %v3360_v23 = vadd.f32 %v3359_v42, %v3329_v5  ;;  %v3787_v37 = vshrl.u32 %v4654_v10, 16  ;;  %v3291_v25 = vadd.f32 %v3290_v61, %v3239_v32  ;;  %v3330_v13 = vmul.f32 %v3239_v32, %v3239_v32 }
 0x27f   : > { %v3806_v58 = vrot.slane %v3804_v44, 7  ;;  %v3812_v49 = vshrl.u32 %v4657_v34, 16  ;;  %v3790_v54 = vshll.u32 %v4654_v10, 16  ;;  %v4655_v51 = vpack.c.bf16 %v3239_v32, %v3239_v32 }
 0x280   : > { %v3789_v55 = vrot.slane %v3787_v37, 7  ;;  %v3292_v20 = vadd.f32 %v4713_v57, %v3291_v25  ;;  %v3815_v11 = vshll.u32 %v4657_v34, 16  ;;  %v3361_v47 = vadd.f32 %v3360_v23, %v3330_v13  ;;  %v4623_v34 = vld [vmem:[%s6376_s7 + $0xc0] sm:$0xf] }
 0x281   : > { %v3809_v62 = vor.u32 %v3807_v41, %v3806_v58  ;;  %v3814_v27 = vrot.slane %v3812_v49, 7  ;;  %v3810_v7 = vrot.slane %v3806_v58, 4  ;;  %v3795_v43 = vshrl.u32 %v4655_v51, 16  ;;  %v4618_v58 = vld [vmem:[%s6376_s7 + $0xb4] sm:$0xf] }
 0x282   : > { %v3792_v50 = vor.u32 %v3790_v54, %v3789_v55  ;;  %v3362_v1 = vadd.f32 %v3361_v47, %v3331_v12  ;;  %v3798_v39 = vshll.u32 %v4655_v51, 16  ;;  %v3293_v46 = vadd.f32 %v4714_v45, %v3292_v20  ;;  %v4626_v54 = vld [vmem:[%s6376_s7 + $0xc8] sm:$0x1] }
 0x283   : > { %v3996_v0 = vsel %vm6515_vm11, %v3809_v62, %v4613_v29  ;;  %v3817_v33 = vor.u32 %v3815_v11, %v3814_v27  ;;  %v3819_v19 = vrot.slane %v3814_v27, 4  ;;  %v3797_v6 = vrot.slane %v3795_v43, 7 }
 0x284   : > { %4614 = vst [vmem:[%s6376_s7 + $0xa8] sm:$0xf] %v3996_v0  ;;  %v3989_v28 = vsel %vm6515_vm11, %v3792_v50, %v4608_v31  ;;  %v3363_v26 = vadd.f32 %v3362_v1, %v3332_v16  ;;  %v3793_v63 = vrot.slane %v3789_v55, 4 }
 0x285   : > { %4609 = vst [vmem:[%s6376_s7 + $0x9c] sm:$0xf] %v3989_v28  ;;  %v3818_v30 = vsel %vm6532_vm2, %v3810_v7, %v3817_v33  ;;  %v4000_v8 = vsel %vm6415_vm3, %v3819_v19, %v4616_v53  ;;  %v3800_v36 = vor.u32 %v3798_v39, %v3797_v6  ;;  %v3802_v21 = vrot.slane %v3797_v6, 4  ;;  %v4621_v33 = vld [vmem:[%s6376_s7 + $0xbc] sm:$0x1] }
 0x286   : > { %4615 = vst [vmem:[%s6376_s7 + $0xac] sm:$0xf] %v3818_v30  ;;  %4617 = vst [vmem:[%s6376_s7 + $0xb0] sm:$0x1] %v4000_v8 }
 0x287   : > { %v3801_v38 = vsel %vm6532_vm2, %v3793_v63, %v3800_v36  ;;  %v3993_v18 = vsel %vm6415_vm3, %v3802_v21, %v4611_v3 }
 0x288   : > { %4610 = vst [vmem:[%s6376_s7 + $0xa0] sm:$0xf] %v3801_v38  ;;  %4612 = vst [vmem:[%s6376_s7 + $0xa4] sm:$0x1] %v3993_v18 }
 0x29e   : > { %v4717_v9 = vpop.f32.mrb[12].mxu1 }
 0x29f   : > { %v4660_v15 = vpack.c.bf16 %v4717_v9, %v4717_v9  ;;  %v3252_v17 = vpop.f32.mrb[13].mxu1  ;;  %v3335_v24 = vmul.f32 %v4717_v9, %v4717_v9 }
 0x2a0   : > { %v3294_v40 = vadd.f32 %v3293_v46, %v3252_v17  ;;  %v3333_v56 = vmul.f32 %v3252_v17, %v3252_v17  ;;  %v4658_v42 = vpack.c.bf16 %v3252_v17, %v3252_v17  ;;  %v4718_v52 = vpop.f32.mrb[14].mxu1 }
 0x2a1   : > { %v3838_v35 = vshrl.u32 %v4660_v15, 16  ;;  %v4661_v2 = vpack.c.bf16 %v4718_v52, %v4718_v52  ;;  %v3255_v4 = vpop.f32.mrb[15].mxu1  ;;  %v3841_v57 = vshll.u32 %v4660_v15, 16  ;;  %v3336_v10 = vmul.f32 %v4718_v52, %v4718_v52 }
 0x2a2   : > { %v3364_v48 = vadd.f32 %v3363_v26, %v3333_v56  ;;  %v3821_v14 = vshrl.u32 %v4658_v42, 16  ;;  %v3295_v61 = vadd.f32 %v3294_v40, %v3255_v4  ;;  %v3334_v44 = vmul.f32 %v3255_v4, %v3255_v4 }
 0x2a3   : > { %v3840_v5 = vrot.slane %v3838_v35, 7  ;;  %v3846_v45 = vshrl.u32 %v4661_v2, 16  ;;  %v3824_v12 = vshll.u32 %v4658_v42, 16  ;;  %v4659_v37 = vpack.c.bf16 %v3255_v4, %v3255_v4 }
 0x2a4   : > { %v3823_v32 = vrot.slane %v3821_v14, 7  ;;  %v3296_v23 = vadd.f32 %v4717_v9, %v3295_v61  ;;  %v3849_v49 = vshll.u32 %v4661_v2, 16  ;;  %v3365_v13 = vadd.f32 %v3364_v48, %v3334_v44 }
 0x2a5   : > { %v3843_v25 = vor.u32 %v3841_v57, %v3840_v5  ;;  %v3848_v41 = vrot.slane %v3846_v45, 7  ;;  %v3844_v29 = vrot.slane %v3840_v5, 4  ;;  %v3829_v51 = vshrl.u32 %v4659_v37, 16 }
 0x2a6   : > { %v3826_v55 = vor.u32 %v3824_v12, %v3823_v32  ;;  %v3297_v20 = vadd.f32 %v4718_v52, %v3296_v23  ;;  %v3366_v11 = vadd.f32 %v3365_v13, %v3335_v24  ;;  %v3832_v16 = vshll.u32 %v4659_v37, 16 }
 0x2a7   : > { %v4010_v62 = vsel %vm6515_vm11, %v3843_v25, %v4623_v34  ;;  %v3851_v31 = vor.u32 %v3849_v49, %v3848_v41  ;;  %v3853_v27 = vrot.slane %v3848_v41, 4  ;;  %v3831_v50 = vrot.slane %v3829_v51, 7 }
 0x2a8   : > { %4624 = vst [vmem:[%s6376_s7 + $0xc0] sm:$0xf] %v4010_v62  ;;  %v4003_v47 = vsel %vm6515_vm11, %v3826_v55, %v4618_v58  ;;  %v3298_v7 = vrot.slane %v3297_v20, 4  ;;  %v3367_v0 = vadd.f32 %v3366_v11, %v3336_v10  ;;  %v3827_v19 = vrot.slane %v3823_v32, 4 }
 0x2a9   : > { %4619 = vst [vmem:[%s6376_s7 + $0xb4] sm:$0xf] %v4003_v47  ;;  %v3852_v53 = vsel %vm6532_vm2, %v3844_v29, %v3851_v31  ;;  %v4014_v43 = vsel %vm6415_vm3, %v3853_v27, %v4626_v54  ;;  %v3834_v1 = vor.u32 %v3832_v16, %v3831_v50  ;;  %v3836_v28 = vrot.slane %v3831_v50, 4 }
 0x2aa   : > { %4625 = vst [vmem:[%s6376_s7 + $0xc4] sm:$0xf] %v3852_v53  ;;  %4627 = vst [vmem:[%s6376_s7 + $0xc8] sm:$0x1] %v4014_v43  ;;  %v3299_v22 = vadd.f32 %v3298_v7, %v3297_v20  ;;  %v3368_v6 = vrot.slane %v3367_v0, 4 }
 0x2ab   : > { %v3835_v46 = vsel %vm6532_vm2, %v3827_v19, %v3834_v1  ;;  %v4007_v30 = vsel %vm6415_vm3, %v3836_v28, %v4621_v33 }
 0x2ac   : > { %v3300_v39 = vrot.slane %v3299_v22, 2  ;;  %v3369_v8 = vadd.f32 %v3368_v6, %v3367_v0  ;;  %4620 = vst [vmem:[%s6376_s7 + $0xb8] sm:$0xf] %v3835_v46  ;;  %4622 = vst [vmem:[%s6376_s7 + $0xbc] sm:$0x1] %v4007_v30 }
 0x2ae   : > { %v3301_v3 = vadd.f32 %v3300_v39, %v3299_v22  ;;  %v3370_v26 = vrot.slane %v3369_v8, 2 }
 0x2b0   : > { %v3302_v63 = vrot.slane %v3301_v3, 1  ;;  %v3371_v36 = vadd.f32 %v3370_v26, %v3369_v8 }
 0x2b2   : > { %v3303_v21 = vadd.f32 %v3302_v63, %v3301_v3  ;;  %v3372_v38 = vrot.slane %v3371_v36, 1 }
 0x2b4   : > { %3304 = vst [vmem:[%s181_s11] sm:$0x1] %v3303_v21  ;;  %v3373_v59 = vadd.f32 %v3372_v38, %v3371_v36 }
 0x2b6   : > { %3374 = vst [vmem:[%s181_s11 + $0x1] sm:$0x1] %v3373_v59 }
 0x2b7 PF: > { %s14_s12 = sadd.s32 1, %s4828_s12  }
 0x2b8   : > { %p11_p4 = scmp.ge.s32.totalorder %s14_s12, 4  }
 0x2ba   :  { %13 = sbr.rel (!%p11_p4) target bundleno = 1 (0x1), region = 74 }

</bundles_post_ra>
